<compile_context>
chip_gen: v7x
topology: tpu7x:2x2x1
jax: 0.10.0
libtpu: 0.0.40
codegen_flags: <defaults>
</compile_context>

<pallas_src>
import functools

import jax
import jax.numpy as jnp
from jax.experimental import pallas as pl
from jax.experimental.pallas import tpu as pltpu

LRELU_SLOPE = 0.1
_T_TILE_MAX = 512                    # output lanes per tile once T grows (x128)
_VMEM_LIMIT = 48 * 1024 * 1024       # > all default scoped limits, < v7x 64MiB


def get_padding(kernel_size, dilation=1):
    return (kernel_size * dilation - dilation) // 2


def _leaky(x, slope):
    return jnp.where(x >= 0, x, slope * x)


def _pick_tiles(T):
    t_tile = T if T <= _T_TILE_MAX else _T_TILE_MAX
    n_t = -(-T // t_tile)
    return t_tile, n_t


def _compiler_params():
    return pltpu.CompilerParams(
        dimension_semantics=("parallel", "parallel"),
        vmem_limit_bytes=_VMEM_LIMIT)


# --------------------------------------------------------------------------
# Kernel 1: single stride-1 dilated conv, channels-major (used by conv_pre).
# --------------------------------------------------------------------------
def _conv_kernel(x_ref, w_ref, b_ref, o_ref, *, K, dil, T_tile, single_tile,
                 in_slope):
    # x_ref: (1, Cin, Tp)   w_ref: (K, Cout, Cin)   b_ref: (Cout, 1)
    # o_ref: (1, Cout, T_tile)
    if single_tile:
        base = 0
    else:
        base = pl.multiple_of(pl.program_id(1) * T_tile, 128)
    win = T_tile + (K - 1) * dil
    xw = x_ref[0, :, pl.ds(base, win)]
    if in_slope is not None:                 # leaky(0)==0 so pad-then-leaky OK
        xw = _leaky(xw.astype(jnp.float32), in_slope)
    xw = xw.astype(w_ref.dtype)
    Cout = o_ref.shape[1]
    acc = jnp.zeros((Cout, T_tile), jnp.float32)
    for k in range(K):                       # K static & small
        acc = acc + jnp.dot(w_ref[k], xw[:, k * dil:k * dil + T_tile],
                            preferred_element_type=jnp.float32)
    acc = acc + b_ref[...]
    o_ref[0] = acc.astype(o_ref.dtype)


# --------------------------------------------------------------------------
# Kernel 2: fused conv pair: leaky -> conv1(dil) -> leaky -> conv2(dil=1)
#           [+ residual] [+ running accumulator] [* scale] [tanh].
# Used for every resblock branch and for the whole conv_post stack.
# --------------------------------------------------------------------------
def _conv_pair_kernel(*refs, K1, d1, K2, T_tile, T_valid, single_tile,
                      in_slope, mid_slope, residual, has_acc, out_scale,
                      tanh_out):
    if has_acc:
        x_ref, w1_ref, b1_ref, w2_ref, b2_ref, acc_ref, o_ref = refs
    else:
        x_ref, w1_ref, b1_ref, w2_ref, b2_ref, o_ref = refs
        acc_ref = None
    P1 = (K1 - 1) * d1 // 2
    P2 = (K2 - 1) // 2
    if single_tile:
        base = 0
    else:
        base = pl.multiple_of(pl.program_id(1) * T_tile, 128)

    Text = T_tile + 2 * P2               # conv1 evaluated with conv2's halo
    win = Text + 2 * P1
    xw = x_ref[0, :, pl.ds(base, win)]
    if in_slope is not None:
        xw = _leaky(xw.astype(jnp.float32), in_slope)
    xw = xw.astype(w1_ref.dtype)

    Cmid = w1_ref.shape[1]
    xt = jnp.zeros((Cmid, Text), jnp.float32)
    for k in range(K1):
        xt = xt + jnp.dot(w1_ref[k], xw[:, k * d1:k * d1 + Text],
                          preferred_element_type=jnp.float32)
    xt = xt + b1_ref[...]
    if mid_slope is not None:
        xt = _leaky(xt, mid_slope)
    # conv2's zero padding lives at the GLOBAL sequence edges: mask halo values
    # that fall outside [0, T_valid) to zero (matches torch's implicit pad).
    gpos = (base - P2) + jax.lax.broadcasted_iota(jnp.int32, (Cmid, Text), 1)
    xt = jnp.where((gpos >= 0) & (gpos < T_valid), xt, 0.0)
    xt = xt.astype(w2_ref.dtype)

    Cout = o_ref.shape[1]
    acc = jnp.zeros((Cout, T_tile), jnp.float32)
    for k in range(K2):
        acc = acc + jnp.dot(w2_ref[k], xt[:, k:k + T_tile],
                            preferred_element_type=jnp.float32)
    acc = acc + b2_ref[...]
    if residual:      # residual = raw branch input (before the input leaky)
        acc = acc + x_ref[0, :, pl.ds(base + P1 + P2, T_tile)].astype(jnp.float32)
    if acc_ref is not None:
        acc = acc + acc_ref[0].astype(jnp.float32)
    if out_scale is not None:
        acc = acc * out_scale
    if tanh_out:
        acc = jnp.tanh(acc)
    o_ref[0] = acc.astype(o_ref.dtype)


# --------------------------------------------------------------------------
# Kernel 3: polyphase transposed conv (input leaky fused).  Outputs the u
# phases separately (B, u, Cout, T); the wrapper interleaves them.
# --------------------------------------------------------------------------
def _tconv_kernel(x_ref, w_ref, b_ref, o_ref, *, u, ntaps, conv_pad, T_tile,
                  PL, PR, single_tile, in_slope):
    # x_ref: (1, Cin, Tp)   w_ref: (K=u*ntaps, Cout, Cin)   b_ref: (Cout, 1)
    # o_ref: (1, u, Cout, T_tile)
    if single_tile:
        base = 0
    else:
        base = pl.multiple_of(pl.program_id(1) * T_tile, 128)
    win = T_tile + PL + PR
    xw = x_ref[0, :, pl.ds(base, win)]
    if in_slope is not None:
        xw = _leaky(xw.astype(jnp.float32), in_slope)
    xw = xw.astype(w_ref.dtype)
    Cout = o_ref.shape[2]
    for r in range(u):                          # u small & static
        s_r = (r + conv_pad) // u
        k_min = (r + conv_pad) % u
        acc = jnp.zeros((Cout, T_tile), jnp.float32)
        for j in range(ntaps):
            start = s_r - j + PL
            acc = acc + jnp.dot(w_ref[k_min + j * u],
                                xw[:, start:start + T_tile],
                                preferred_element_type=jnp.float32)
        acc = acc + b_ref[...]
        o_ref[0, r] = acc.astype(o_ref.dtype)


# --------------------------------------------------------------------------
# Wrappers (padding, tile selection, weight relayout, pallas_call plumbing).
# --------------------------------------------------------------------------
def conv1d(x, w_t, b, *, dilation=1, in_slope=None, out_dtype=jnp.bfloat16):
    """x: (B, Cin, T).  w_t: torch layout (Cout, Cin, K).  b: (Cout,)."""
    B, Cin, T = x.shape
    Cout, _, K = w_t.shape
    P = (K - 1) * dilation // 2
    T_tile, n_t = _pick_tiles(T)
    T_ceil = T_tile * n_t
    x_pad = jnp.pad(x, ((0, 0), (0, 0), (P, P + T_ceil - T)))
    Tp = T_ceil + 2 * P
    w = jnp.transpose(w_t, (2, 0, 1)).astype(jnp.bfloat16)      # (K, Cout, Cin)
    br = b.reshape(Cout, 1).astype(jnp.float32)
    out = pl.pallas_call(
        functools.partial(_conv_kernel, K=K, dil=dilation, T_tile=T_tile,
                          single_tile=(n_t == 1), in_slope=in_slope),
        out_shape=jax.ShapeDtypeStruct((B, Cout, T_ceil), out_dtype),
        grid=(B, n_t),
        in_specs=[pl.BlockSpec((1, Cin, Tp), lambda bb, tt: (bb, 0, 0)),
                  pl.BlockSpec((K, Cout, Cin), lambda bb, tt: (0, 0, 0)),
                  pl.BlockSpec((Cout, 1), lambda bb, tt: (0, 0))],
        out_specs=pl.BlockSpec((1, Cout, T_tile), lambda bb, tt: (bb, 0, tt)),
        compiler_params=_compiler_params(),
    )(x_pad, w, br)
    return out if T_ceil == T else out[:, :, :T]


def conv_pair(x, w1_t, b1, w2_t, b2, *, d1, in_slope, mid_slope, residual,
              acc=None, out_scale=None, tanh_out=False,
              out_dtype=jnp.bfloat16):
    """Fused pair.  w1_t: (Cmid, Cin, K1) torch; w2_t: (Cout, Cmid, K2) torch."""
    B, Cin, T = x.shape
    Cmid, _, K1 = w1_t.shape
    Cout, _, K2 = w2_t.shape
    P1 = (K1 - 1) * d1 // 2
    P2 = (K2 - 1) // 2
    T_tile, n_t = _pick_tiles(T)
    T_ceil = T_tile * n_t
    pad_l = P1 + P2
    x_pad = jnp.pad(x, ((0, 0), (0, 0), (pad_l, pad_l + T_ceil - T)))
    Tp = T_ceil + 2 * pad_l
    w1 = jnp.transpose(w1_t, (2, 0, 1)).astype(jnp.bfloat16)    # (K1, Cmid, Cin)
    w2 = jnp.transpose(w2_t, (2, 0, 1)).astype(jnp.bfloat16)    # (K2, Cout, Cmid)
    b1r = b1.reshape(Cmid, 1).astype(jnp.float32)
    b2r = b2.reshape(Cout, 1).astype(jnp.float32)

    in_specs = [pl.BlockSpec((1, Cin, Tp), lambda bb, tt: (bb, 0, 0)),
                pl.BlockSpec((K1, Cmid, Cin), lambda bb, tt: (0, 0, 0)),
                pl.BlockSpec((Cmid, 1), lambda bb, tt: (0, 0)),
                pl.BlockSpec((K2, Cout, Cmid), lambda bb, tt: (0, 0, 0)),
                pl.BlockSpec((Cout, 1), lambda bb, tt: (0, 0))]
    args = [x_pad, w1, b1r, w2, b2r]
    if acc is not None:
        acc_p = jnp.pad(acc, ((0, 0), (0, 0), (0, T_ceil - T)))
        in_specs.append(pl.BlockSpec((1, Cout, T_tile),
                                     lambda bb, tt: (bb, 0, tt)))
        args.append(acc_p)

    out = pl.pallas_call(
        functools.partial(_conv_pair_kernel, K1=K1, d1=d1, K2=K2,
                          T_tile=T_tile, T_valid=T, single_tile=(n_t == 1),
                          in_slope=in_slope, mid_slope=mid_slope,
                          residual=residual, has_acc=acc is not None,
                          out_scale=out_scale, tanh_out=tanh_out),
        out_shape=jax.ShapeDtypeStruct((B, Cout, T_ceil), out_dtype),
        grid=(B, n_t),
        in_specs=in_specs,
        out_specs=pl.BlockSpec((1, Cout, T_tile), lambda bb, tt: (bb, 0, tt)),
        compiler_params=_compiler_params(),
    )(*args)
    return out if T_ceil == T else out[:, :, :T]


def tconv1d(x, w_t, b, *, stride, padding, in_slope, out_dtype=jnp.bfloat16):
    """Polyphase transposed conv1d.  x: (B, Cin, T).  w_t: torch (Cin, Cout, K).
    Requires K % stride == 0 and K - 2*padding == stride (HiFi-GAN configs)."""
    B, Cin, T = x.shape
    _, Cout, K = w_t.shape
    u = stride
    assert K % u == 0 and K - 2 * padding == u, (K, u, padding)
    ntaps = K // u
    s_list = [(r + padding) // u for r in range(u)]
    PL = max(0, (ntaps - 1) - min(s_list))
    PR = max(0, max(s_list))
    T_tile, n_t = _pick_tiles(T)
    T_ceil = T_tile * n_t
    x_pad = jnp.pad(x, ((0, 0), (0, 0), (PL, PR + T_ceil - T)))
    Tp = T_ceil + PL + PR
    w = jnp.transpose(w_t, (2, 1, 0)).astype(jnp.bfloat16)      # (K, Cout, Cin)
    br = b.reshape(Cout, 1).astype(jnp.float32)
    out = pl.pallas_call(
        functools.partial(_tconv_kernel, u=u, ntaps=ntaps, conv_pad=padding,
                          T_tile=T_tile, PL=PL, PR=PR,
                          single_tile=(n_t == 1), in_slope=in_slope),
        out_shape=jax.ShapeDtypeStruct((B, u, Cout, T_ceil), out_dtype),
        grid=(B, n_t),
        in_specs=[pl.BlockSpec((1, Cin, Tp), lambda bb, tt: (bb, 0, 0)),
                  pl.BlockSpec((K, Cout, Cin), lambda bb, tt: (0, 0, 0)),
                  pl.BlockSpec((Cout, 1), lambda bb, tt: (0, 0))],
        out_specs=pl.BlockSpec((1, u, Cout, T_tile),
                               lambda bb, tt: (bb, 0, 0, tt)),
        compiler_params=_compiler_params(),
    )(x_pad, w, br)
    out = out[:, :, :, :T]                                      # (B, u, Cout, T)
    # interleave phases: y[:, c, q*u + r] = out[:, r, c, q]
    return jnp.transpose(out, (0, 2, 3, 1)).reshape(B, Cout, T * u)


# --------------------------------------------------------------------------
# Quaternion weight construction (Hamilton product block matrix) + init.
# --------------------------------------------------------------------------
def hamilton_weight(r, i, j, k):
    """Components (A, B, K) -> full weight (4A, 4B, K)."""
    row_r = jnp.concatenate([r, -i, -j, -k], axis=1)
    row_i = jnp.concatenate([i,  r, -k,  j], axis=1)
    row_j = jnp.concatenate([j,  k,  r, -i], axis=1)
    row_k = jnp.concatenate([k, -j,  i,  r], axis=1)
    return jnp.concatenate([row_r, row_i, row_j, row_k], axis=0)


def init_quaternion_conv(key, cin, cout, ksz):
    kr, ki, kj, kk, kb = jax.random.split(key, 5)
    shape = (cout // 4, cin // 4, ksz)
    scale = 1.0 / jnp.sqrt(jnp.float32(cin * ksz))
    comps = [jax.random.normal(s, shape, jnp.float32) * scale
             for s in (kr, ki, kj, kk)]
    w = hamilton_weight(*comps)                           # (cout, cin, K)
    b = jax.random.normal(kb, (cout,), jnp.float32) * 0.01
    return {"w": w, "b": b}


def init_quaternion_tconv(key, cin, cout, ksz):
    kr, ki, kj, kk, kb = jax.random.split(key, 5)
    shape = (cin // 4, cout // 4, ksz)
    scale = 1.0 / jnp.sqrt(jnp.float32(cin * ksz))
    comps = [jax.random.normal(s, shape, jnp.float32) * scale
             for s in (kr, ki, kj, kk)]
    w = hamilton_weight(*comps)                           # (cin, cout, K)
    b = jax.random.normal(kb, (cout,), jnp.float32) * 0.01
    return {"w": w, "b": b}


def init_plain_conv(key, cin, cout, ksz):
    kw, kb = jax.random.split(key)
    w = jax.random.normal(kw, (cout, cin, ksz), jnp.float32) * 0.01
    b = jnp.zeros((cout,), jnp.float32)
    return {"w": w, "b": b}


class HParams:
    resblock = "1"
    upsample_rates = (2, 2)
    upsample_kernel_sizes = (4, 4)
    upsample_initial_channel = 32
    resblock_kernel_sizes = (3, 5)
    resblock_dilation_sizes = ((1, 3, 5), (1, 3, 5))


def init_generator_params(key, h):
    """Params pytree contains ONLY arrays (all static config stays in `h`)."""
    params = {}
    key, k0 = jax.random.split(key)
    params["conv_pre"] = init_quaternion_conv(
        k0, 320, h.upsample_initial_channel, 7)

    params["ups"] = []
    for i, (u, ksz) in enumerate(zip(h.upsample_rates, h.upsample_kernel_sizes)):
        key, ki = jax.random.split(key)
        cin = h.upsample_initial_channel // (2 ** i)
        cout = h.upsample_initial_channel // (2 ** (i + 1))
        params["ups"].append(init_quaternion_tconv(ki, cin, cout, ksz))

    params["resblocks"] = []
    ch = None
    for i in range(len(h.upsample_rates)):
        ch = h.upsample_initial_channel // (2 ** (i + 1))
        for ksz, dil in zip(h.resblock_kernel_sizes, h.resblock_dilation_sizes):
            convs1, convs2 = [], []
            for _d in dil:
                key, ka, kb = jax.random.split(key, 3)
                convs1.append(init_quaternion_conv(ka, ch, ch, ksz))
                convs2.append(init_quaternion_conv(kb, ch, ch, ksz))
            params["resblocks"].append({"convs1": convs1, "convs2": convs2})

    key, kp0, kp1 = jax.random.split(key, 3)
    params["conv_post"] = [init_plain_conv(kp0, ch, ch // 2, 7),
                           init_plain_conv(kp1, ch // 2, 1, 5)]
    return params


# --------------------------------------------------------------------------
# Forward pass (matches QGenerator.forward / QResBlock1.forward).
# --------------------------------------------------------------------------
def qresblock1_forward(bp, dilations, x, acc=None, final_scale=None):
    """One resblock; each branch = one fused pallas_call.  On the last branch
    the caller's running sum `acc` and the 1/num_kernels scale are fused in.
    `dilations` is a STATIC tuple of Python ints (from HParams)."""
    nb = len(dilations)
    for bi, d1 in enumerate(dilations):
        c1 = bp["convs1"][bi]
        c2 = bp["convs2"][bi]
        last = bi == nb - 1
        x = conv_pair(x, c1["w"], c1["b"], c2["w"], c2["b"], d1=d1,
                      in_slope=LRELU_SLOPE, mid_slope=LRELU_SLOPE,
                      residual=True,
                      acc=acc if last else None,
                      out_scale=final_scale if last else None)
    return x


def qgenerator_forward(params, h, x_ncw):
    # NCW is already the channels-major internal layout -> no transposes.
    x = x_ncw.astype(jnp.bfloat16)
    cp = params["conv_pre"]
    x = conv1d(x, cp["w"], cp["b"], dilation=1)                 # K=7, pad 3

    nk = len(h.resblock_kernel_sizes)
    for i, (u, ksz) in enumerate(zip(h.upsample_rates, h.upsample_kernel_sizes)):
        up = params["ups"][i]
        # F.leaky_relu(x, 0.1) fused into the polyphase transposed conv
        x = tconv1d(x, up["w"], up["b"], stride=u, padding=(ksz - u) // 2,
                    in_slope=LRELU_SLOPE)
        xs = None
        for j in range(nk):
            last_rb = j == nk - 1
            xs = qresblock1_forward(
                params["resblocks"][i * nk + j],
                h.resblock_dilation_sizes[j],            # static config
                x,
                acc=xs,
                final_scale=(1.0 / nk) if last_rb else None)
        x = xs          # == (sum of resblock outputs) / num_kernels (in-kernel)

    cp0, cp1 = params["conv_post"]
    # F.leaky_relu(default 0.01) + conv7 + conv5 + tanh: ONE fused kernel
    y = conv_pair(x, cp0["w"], cp0["b"], cp1["w"], cp1["b"], d1=1,
                  in_slope=0.01, mid_slope=None, residual=False,
                  tanh_out=True, out_dtype=jnp.float32)
    return y


if __name__ == "__main__":
    h = HParams()
    key = jax.random.PRNGKey(0)
    key_x, key_p = jax.random.split(key)

    B, C_in, T = 2, 320, 8
    x = jax.random.normal(key_x, (B, C_in, T), jnp.float32)
    params = init_generator_params(key_p, h)

    fwd = jax.jit(lambda p, xx: qgenerator_forward(p, h, xx))
    y = jax.block_until_ready(fwd(params, x))

    total_up = 1
    for u in h.upsample_rates:
        total_up *= u
    expected_shape = (B, 1, T * total_up)
    assert y.shape == expected_shape, (y.shape, expected_shape)
    assert bool(jnp.all(jnp.isfinite(y)))
    assert bool(jnp.all(jnp.abs(y) <= 1.0))  # tanh output range

    print("KERNEL_OK")
</pallas_src>

<mosaic_0001>
module attributes {stable_mosaic.version = 11 : i64} {
  func.func @_conv_kernel(%arg0: i32, %arg1: i32, %arg2: memref<1x320x14xbf16, #tpu.memory_space<vmem>>, %arg3: memref<7x32x320xbf16, #tpu.memory_space<vmem>>, %arg4: memref<32x1xf32, #tpu.memory_space<vmem>>, %arg5: memref<1x32x8xbf16, #tpu.memory_space<vmem>>) attributes {dimension_semantics = [#tpu.dimension_semantics<parallel>, #tpu.dimension_semantics<parallel>], iteration_bounds = array<i64: 2, 1>, scalar_prefetch = 0 : i64, scratch_operands = 0 : i64, tpu.core_type = #tpu.core_type<tc>, window_params = [{transform_indices = @transform_0, window_bounds = array<i64: 1, 320, 14>}, {pipeline_mode = #tpu.pipeline_mode<synchronous>, transform_indices = @transform_1, window_bounds = array<i64: 7, 32, 320>}, {pipeline_mode = #tpu.pipeline_mode<synchronous>, transform_indices = @transform_2, window_bounds = array<i64: 32, 1>}, {transform_indices = @transform_3, window_bounds = array<i64: 1, 32, 8>}]} {
    %c0 = arith.constant 0 : index
    %c0_0 = arith.constant 0 : index
    %c0_1 = arith.constant 0 : index
    %0 = vector.load %arg2[%c0, %c0_0, %c0_1] : memref<1x320x14xbf16, #tpu.memory_space<vmem>>, vector<1x320x14xbf16>
    %1 = vector.shape_cast %0 : vector<1x320x14xbf16> to vector<320x14xbf16>
    %cst = arith.constant 0.000000e+00 : f32
    %2 = vector.broadcast %cst : f32 to vector<32x8xf32>
    %c0_2 = arith.constant 0 : index
    %c0_3 = arith.constant 0 : index
    %c0_4 = arith.constant 0 : index
    %3 = vector.load %arg3[%c0_2, %c0_3, %c0_4] : memref<7x32x320xbf16, #tpu.memory_space<vmem>>, vector<1x32x320xbf16>
    %4 = vector.shape_cast %3 : vector<1x32x320xbf16> to vector<32x320xbf16>
    %5 = vector.extract_strided_slice %1 {offsets = [0, 0], sizes = [320, 8], strides = [1, 1]} : vector<320x14xbf16> to vector<320x8xbf16>
    %cst_5 = arith.constant dense<0.000000e+00> : vector<32x8xf32>
    %6 = tpu.matmul %4, %5, %cst_5 {dimension_numbers = #tpu.dot_dimension_numbers<[1], [0], [0], [1], [0, 0, 1, 1], [], []>} : vector<32x320xbf16>, vector<320x8xbf16>, vector<32x8xf32> -> vector<32x8xf32>
    %7 = arith.addf %2, %6 : vector<32x8xf32>
    %c1 = arith.constant 1 : index
    %c0_6 = arith.constant 0 : index
    %c0_7 = arith.constant 0 : index
    %8 = vector.load %arg3[%c1, %c0_6, %c0_7] : memref<7x32x320xbf16, #tpu.memory_space<vmem>>, vector<1x32x320xbf16>
    %9 = vector.shape_cast %8 : vector<1x32x320xbf16> to vector<32x320xbf16>
    %10 = vector.extract_strided_slice %1 {offsets = [0, 1], sizes = [320, 8], strides = [1, 1]} : vector<320x14xbf16> to vector<320x8xbf16>
    %cst_8 = arith.constant dense<0.000000e+00> : vector<32x8xf32>
    %11 = tpu.matmul %9, %10, %cst_8 {dimension_numbers = #tpu.dot_dimension_numbers<[1], [0], [0], [1], [0, 0, 1, 1], [], []>} : vector<32x320xbf16>, vector<320x8xbf16>, vector<32x8xf32> -> vector<32x8xf32>
    %12 = arith.addf %7, %11 : vector<32x8xf32>
    %c2 = arith.constant 2 : index
    %c0_9 = arith.constant 0 : index
    %c0_10 = arith.constant 0 : index
    %13 = vector.load %arg3[%c2, %c0_9, %c0_10] : memref<7x32x320xbf16, #tpu.memory_space<vmem>>, vector<1x32x320xbf16>
    %14 = vector.shape_cast %13 : vector<1x32x320xbf16> to vector<32x320xbf16>
    %15 = vector.extract_strided_slice %1 {offsets = [0, 2], sizes = [320, 8], strides = [1, 1]} : vector<320x14xbf16> to vector<320x8xbf16>
    %cst_11 = arith.constant dense<0.000000e+00> : vector<32x8xf32>
    %16 = tpu.matmul %14, %15, %cst_11 {dimension_numbers = #tpu.dot_dimension_numbers<[1], [0], [0], [1], [0, 0, 1, 1], [], []>} : vector<32x320xbf16>, vector<320x8xbf16>, vector<32x8xf32> -> vector<32x8xf32>
    %17 = arith.addf %12, %16 : vector<32x8xf32>
    %c3 = arith.constant 3 : index
    %c0_12 = arith.constant 0 : index
    %c0_13 = arith.constant 0 : index
    %18 = vector.load %arg3[%c3, %c0_12, %c0_13] : memref<7x32x320xbf16, #tpu.memory_space<vmem>>, vector<1x32x320xbf16>
    %19 = vector.shape_cast %18 : vector<1x32x320xbf16> to vector<32x320xbf16>
    %20 = vector.extract_strided_slice %1 {offsets = [0, 3], sizes = [320, 8], strides = [1, 1]} : vector<320x14xbf16> to vector<320x8xbf16>
    %cst_14 = arith.constant dense<0.000000e+00> : vector<32x8xf32>
    %21 = tpu.matmul %19, %20, %cst_14 {dimension_numbers = #tpu.dot_dimension_numbers<[1], [0], [0], [1], [0, 0, 1, 1], [], []>} : vector<32x320xbf16>, vector<320x8xbf16>, vector<32x8xf32> -> vector<32x8xf32>
    %22 = arith.addf %17, %21 : vector<32x8xf32>
    %c4 = arith.constant 4 : index
    %c0_15 = arith.constant 0 : index
    %c0_16 = arith.constant 0 : index
    %23 = vector.load %arg3[%c4, %c0_15, %c0_16] : memref<7x32x320xbf16, #tpu.memory_space<vmem>>, vector<1x32x320xbf16>
    %24 = vector.shape_cast %23 : vector<1x32x320xbf16> to vector<32x320xbf16>
    %25 = vector.extract_strided_slice %1 {offsets = [0, 4], sizes = [320, 8], strides = [1, 1]} : vector<320x14xbf16> to vector<320x8xbf16>
    %cst_17 = arith.constant dense<0.000000e+00> : vector<32x8xf32>
    %26 = tpu.matmul %24, %25, %cst_17 {dimension_numbers = #tpu.dot_dimension_numbers<[1], [0], [0], [1], [0, 0, 1, 1], [], []>} : vector<32x320xbf16>, vector<320x8xbf16>, vector<32x8xf32> -> vector<32x8xf32>
    %27 = arith.addf %22, %26 : vector<32x8xf32>
    %c5 = arith.constant 5 : index
    %c0_18 = arith.constant 0 : index
    %c0_19 = arith.constant 0 : index
    %28 = vector.load %arg3[%c5, %c0_18, %c0_19] : memref<7x32x320xbf16, #tpu.memory_space<vmem>>, vector<1x32x320xbf16>
    %29 = vector.shape_cast %28 : vector<1x32x320xbf16> to vector<32x320xbf16>
    %30 = vector.extract_strided_slice %1 {offsets = [0, 5], sizes = [320, 8], strides = [1, 1]} : vector<320x14xbf16> to vector<320x8xbf16>
    %cst_20 = arith.constant dense<0.000000e+00> : vector<32x8xf32>
    %31 = tpu.matmul %29, %30, %cst_20 {dimension_numbers = #tpu.dot_dimension_numbers<[1], [0], [0], [1], [0, 0, 1, 1], [], []>} : vector<32x320xbf16>, vector<320x8xbf16>, vector<32x8xf32> -> vector<32x8xf32>
    %32 = arith.addf %27, %31 : vector<32x8xf32>
    %c6 = arith.constant 6 : index
    %c0_21 = arith.constant 0 : index
    %c0_22 = arith.constant 0 : index
    %33 = vector.load %arg3[%c6, %c0_21, %c0_22] : memref<7x32x320xbf16, #tpu.memory_space<vmem>>, vector<1x32x320xbf16>
    %34 = vector.shape_cast %33 : vector<1x32x320xbf16> to vector<32x320xbf16>
    %35 = vector.extract_strided_slice %1 {offsets = [0, 6], sizes = [320, 8], strides = [1, 1]} : vector<320x14xbf16> to vector<320x8xbf16>
    %cst_23 = arith.constant dense<0.000000e+00> : vector<32x8xf32>
    %36 = tpu.matmul %34, %35, %cst_23 {dimension_numbers = #tpu.dot_dimension_numbers<[1], [0], [0], [1], [0, 0, 1, 1], [], []>} : vector<32x320xbf16>, vector<320x8xbf16>, vector<32x8xf32> -> vector<32x8xf32>
    %37 = arith.addf %32, %36 : vector<32x8xf32>
    %c0_24 = arith.constant 0 : index
    %c0_25 = arith.constant 0 : index
    %38 = vector.load %arg4[%c0_24, %c0_25] : memref<32x1xf32, #tpu.memory_space<vmem>>, vector<32x1xf32>
    %39 = vector.broadcast %38 : vector<32x1xf32> to vector<32x8xf32>
    %40 = arith.addf %37, %39 : vector<32x8xf32>
    %41 = arith.truncf %40 : vector<32x8xf32> to vector<32x8xbf16>
    %c0_26 = arith.constant 0 : index
    %c0_27 = arith.constant 0 : index
    %c0_28 = arith.constant 0 : index
    %42 = vector.load %arg5[%c0_26, %c0_27, %c0_28] : memref<1x32x8xbf16, #tpu.memory_space<vmem>>, vector<1x32x8xbf16>
    %43 = vector.shape_cast %42 : vector<1x32x8xbf16> to vector<32x8xbf16>
    %44 = vector.shape_cast %41 : vector<32x8xbf16> to vector<1x32x8xbf16>
    tpu.vector_store %arg5[%c0_26, %c0_27, %c0_28], %44 {strides = array<i32>} : memref<1x32x8xbf16, #tpu.memory_space<vmem>>, vector<1x32x8xbf16>,
    return
  }
  func.func @transform_0(%arg0: i32, %arg1: i32) -> (i32, i32, i32) {
    %c0_i32 = arith.constant 0 : i32
    %c0_i32_0 = arith.constant 0 : i32
    %c0_i32_1 = arith.constant 0 : i32
    return %arg0, %c0_i32, %c0_i32_0 : i32, i32, i32
  }
  func.func @transform_1(%arg0: i32, %arg1: i32) -> (i32, i32, i32) {
    %c0_i32 = arith.constant 0 : i32
    %c0_i32_0 = arith.constant 0 : i32
    %c0_i32_1 = arith.constant 0 : i32
    %c0_i32_2 = arith.constant 0 : i32
    return %c0_i32, %c0_i32_0, %c0_i32_1 : i32, i32, i32
  }
  func.func @transform_2(%arg0: i32, %arg1: i32) -> (i32, i32) {
    %c0_i32 = arith.constant 0 : i32
    %c0_i32_0 = arith.constant 0 : i32
    %c0_i32_1 = arith.constant 0 : i32
    return %c0_i32, %c0_i32_0 : i32, i32
  }
  func.func @transform_3(%arg0: i32, %arg1: i32) -> (i32, i32, i32) {
    %c0_i32 = arith.constant 0 : i32
    %c0_i32_0 = arith.constant 0 : i32
    return %arg0, %c0_i32, %arg1 : i32, i32, i32
  }
}

module attributes {stable_mosaic.version = 11 : i64} {
  func.func @_tconv_kernel(%arg0: i32, %arg1: i32, %arg2: memref<1x32x10xbf16, #tpu.memory_space<vmem>>, %arg3: memref<4x16x32xbf16, #tpu.memory_space<vmem>>, %arg4: memref<16x1xf32, #tpu.memory_space<vmem>>, %arg5: memref<1x2x16x8xbf16, #tpu.memory_space<vmem>>) attributes {dimension_semantics = [#tpu.dimension_semantics<parallel>, #tpu.dimension_semantics<parallel>], iteration_bounds = array<i64: 2, 1>, scalar_prefetch = 0 : i64, scratch_operands = 0 : i64, tpu.core_type = #tpu.core_type<tc>, window_params = [{transform_indices = @transform_0, window_bounds = array<i64: 1, 32, 10>}, {pipeline_mode = #tpu.pipeline_mode<synchronous>, transform_indices = @transform_1, window_bounds = array<i64: 4, 16, 32>}, {pipeline_mode = #tpu.pipeline_mode<synchronous>, transform_indices = @transform_2, window_bounds = array<i64: 16, 1>}, {transform_indices = @transform_3, window_bounds = array<i64: 1, 2, 16, 8>}]} {
    %c0 = arith.constant 0 : index
    %c0_0 = arith.constant 0 : index
    %c0_1 = arith.constant 0 : index
    %0 = vector.load %arg2[%c0, %c0_0, %c0_1] : memref<1x32x10xbf16, #tpu.memory_space<vmem>>, vector<1x32x10xbf16>
    %1 = vector.shape_cast %0 : vector<1x32x10xbf16> to vector<32x10xbf16>
    %2 = arith.extf %1 : vector<32x10xbf16> to vector<32x10xf32>
    %cst = arith.constant 0.000000e+00 : f32
    %3 = vector.broadcast %cst : f32 to vector<32x10xf32>
    %4 = arith.cmpf oge, %2, %3 : vector<32x10xf32>
    %cst_2 = arith.constant 1.000000e-01 : f32
    %5 = vector.broadcast %cst_2 : f32 to vector<32x10xf32>
    %6 = arith.mulf %5, %2 : vector<32x10xf32>
    %7 = arith.select %4, %2, %6 : vector<32x10xi1>, vector<32x10xf32>
    %8 = arith.truncf %7 : vector<32x10xf32> to vector<32x10xbf16>
    %cst_3 = arith.constant 0.000000e+00 : f32
    %9 = vector.broadcast %cst_3 : f32 to vector<16x8xf32>
    %c1 = arith.constant 1 : index
    %c0_4 = arith.constant 0 : index
    %c0_5 = arith.constant 0 : index
    %10 = vector.load %arg3[%c1, %c0_4, %c0_5] : memref<4x16x32xbf16, #tpu.memory_space<vmem>>, vector<1x16x32xbf16>
    %11 = vector.shape_cast %10 : vector<1x16x32xbf16> to vector<16x32xbf16>
    %12 = vector.extract_strided_slice %8 {offsets = [0, 1], sizes = [32, 8], strides = [1, 1]} : vector<32x10xbf16> to vector<32x8xbf16>
    %cst_6 = arith.constant dense<0.000000e+00> : vector<16x8xf32>
    %13 = tpu.matmul %11, %12, %cst_6 {dimension_numbers = #tpu.dot_dimension_numbers<[1], [0], [0], [1], [0, 0, 1, 1], [], []>} : vector<16x32xbf16>, vector<32x8xbf16>, vector<16x8xf32> -> vector<16x8xf32>
    %14 = arith.addf %9, %13 : vector<16x8xf32>
    %c3 = arith.constant 3 : index
    %c0_7 = arith.constant 0 : index
    %c0_8 = arith.constant 0 : index
    %15 = vector.load %arg3[%c3, %c0_7, %c0_8] : memref<4x16x32xbf16, #tpu.memory_space<vmem>>, vector<1x16x32xbf16>
    %16 = vector.shape_cast %15 : vector<1x16x32xbf16> to vector<16x32xbf16>
    %17 = vector.extract_strided_slice %8 {offsets = [0, 0], sizes = [32, 8], strides = [1, 1]} : vector<32x10xbf16> to vector<32x8xbf16>
    %cst_9 = arith.constant dense<0.000000e+00> : vector<16x8xf32>
    %18 = tpu.matmul %16, %17, %cst_9 {dimension_numbers = #tpu.dot_dimension_numbers<[1], [0], [0], [1], [0, 0, 1, 1], [], []>} : vector<16x32xbf16>, vector<32x8xbf16>, vector<16x8xf32> -> vector<16x8xf32>
    %19 = arith.addf %14, %18 : vector<16x8xf32>
    %c0_10 = arith.constant 0 : index
    %c0_11 = arith.constant 0 : index
    %20 = vector.load %arg4[%c0_10, %c0_11] : memref<16x1xf32, #tpu.memory_space<vmem>>, vector<16x1xf32>
    %21 = vector.broadcast %20 : vector<16x1xf32> to vector<16x8xf32>
    %22 = arith.addf %19, %21 : vector<16x8xf32>
    %23 = arith.truncf %22 : vector<16x8xf32> to vector<16x8xbf16>
    %c0_12 = arith.constant 0 : index
    %c0_13 = arith.constant 0 : index
    %c0_14 = arith.constant 0 : index
    %c0_15 = arith.constant 0 : index
    %24 = vector.load %arg5[%c0_12, %c0_13, %c0_14, %c0_15] : memref<1x2x16x8xbf16, #tpu.memory_space<vmem>>, vector<1x1x16x8xbf16>
    %25 = vector.shape_cast %24 : vector<1x1x16x8xbf16> to vector<16x8xbf16>
    %26 = vector.shape_cast %23 : vector<16x8xbf16> to vector<1x1x16x8xbf16>
    tpu.vector_store %arg5[%c0_12, %c0_13, %c0_14, %c0_15], %26 {strides = array<i32>} : memref<1x2x16x8xbf16, #tpu.memory_space<vmem>>, vector<1x1x16x8xbf16>,
    %cst_16 = arith.constant 0.000000e+00 : f32
    %27 = vector.broadcast %cst_16 : f32 to vector<16x8xf32>
    %c0_17 = arith.constant 0 : index
    %c0_18 = arith.constant 0 : index
    %c0_19 = arith.constant 0 : index
    %28 = vector.load %arg3[%c0_17, %c0_18, %c0_19] : memref<4x16x32xbf16, #tpu.memory_space<vmem>>, vector<1x16x32xbf16>
    %29 = vector.shape_cast %28 : vector<1x16x32xbf16> to vector<16x32xbf16>
    %30 = vector.extract_strided_slice %8 {offsets = [0, 2], sizes = [32, 8], strides = [1, 1]} : vector<32x10xbf16> to vector<32x8xbf16>
    %cst_20 = arith.constant dense<0.000000e+00> : vector<16x8xf32>
    %31 = tpu.matmul %29, %30, %cst_20 {dimension_numbers = #tpu.dot_dimension_numbers<[1], [0], [0], [1], [0, 0, 1, 1], [], []>} : vector<16x32xbf16>, vector<32x8xbf16>, vector<16x8xf32> -> vector<16x8xf32>
    %32 = arith.addf %27, %31 : vector<16x8xf32>
    %c2 = arith.constant 2 : index
    %c0_21 = arith.constant 0 : index
    %c0_22 = arith.constant 0 : index
    %33 = vector.load %arg3[%c2, %c0_21, %c0_22] : memref<4x16x32xbf16, #tpu.memory_space<vmem>>, vector<1x16x32xbf16>
    %34 = vector.shape_cast %33 : vector<1x16x32xbf16> to vector<16x32xbf16>
    %35 = vector.extract_strided_slice %8 {offsets = [0, 1], sizes = [32, 8], strides = [1, 1]} : vector<32x10xbf16> to vector<32x8xbf16>
    %cst_23 = arith.constant dense<0.000000e+00> : vector<16x8xf32>
    %36 = tpu.matmul %34, %35, %cst_23 {dimension_numbers = #tpu.dot_dimension_numbers<[1], [0], [0], [1], [0, 0, 1, 1], [], []>} : vector<16x32xbf16>, vector<32x8xbf16>, vector<16x8xf32> -> vector<16x8xf32>
    %37 = arith.addf %32, %36 : vector<16x8xf32>
    %c0_24 = arith.constant 0 : index
    %c0_25 = arith.constant 0 : index
    %38 = vector.load %arg4[%c0_24, %c0_25] : memref<16x1xf32, #tpu.memory_space<vmem>>, vector<16x1xf32>
    %39 = vector.broadcast %38 : vector<16x1xf32> to vector<16x8xf32>
    %40 = arith.addf %37, %39 : vector<16x8xf32>
    %41 = arith.truncf %40 : vector<16x8xf32> to vector<16x8xbf16>
    %c0_26 = arith.constant 0 : index
    %c1_27 = arith.constant 1 : index
    %c0_28 = arith.constant 0 : index
    %c0_29 = arith.constant 0 : index
    %42 = vector.load %arg5[%c0_26, %c1_27, %c0_28, %c0_29] : memref<1x2x16x8xbf16, #tpu.memory_space<vmem>>, vector<1x1x16x8xbf16>
    %43 = vector.shape_cast %42 : vector<1x1x16x8xbf16> to vector<16x8xbf16>
    %44 = vector.shape_cast %41 : vector<16x8xbf16> to vector<1x1x16x8xbf16>
    tpu.vector_store %arg5[%c0_26, %c1_27, %c0_28, %c0_29], %44 {strides = array<i32>} : memref<1x2x16x8xbf16, #tpu.memory_space<vmem>>, vector<1x1x16x8xbf16>,
    return
  }
  func.func @transform_0(%arg0: i32, %arg1: i32) -> (i32, i32, i32) {
    %c0_i32 = arith.constant 0 : i32
    %c0_i32_0 = arith.constant 0 : i32
    %c0_i32_1 = arith.constant 0 : i32
    return %arg0, %c0_i32, %c0_i32_0 : i32, i32, i32
  }
  func.func @transform_1(%arg0: i32, %arg1: i32) -> (i32, i32, i32) {
    %c0_i32 = arith.constant 0 : i32
    %c0_i32_0 = arith.constant 0 : i32
    %c0_i32_1 = arith.constant 0 : i32
    %c0_i32_2 = arith.constant 0 : i32
    return %c0_i32, %c0_i32_0, %c0_i32_1 : i32, i32, i32
  }
  func.func @transform_2(%arg0: i32, %arg1: i32) -> (i32, i32) {
    %c0_i32 = arith.constant 0 : i32
    %c0_i32_0 = arith.constant 0 : i32
    %c0_i32_1 = arith.constant 0 : i32
    return %c0_i32, %c0_i32_0 : i32, i32
  }
  func.func @transform_3(%arg0: i32, %arg1: i32) -> (i32, i32, i32, i32) {
    %c0_i32 = arith.constant 0 : i32
    %c0_i32_0 = arith.constant 0 : i32
    %c0_i32_1 = arith.constant 0 : i32
    return %arg0, %c0_i32, %c0_i32_0, %arg1 : i32, i32, i32, i32
  }
}

module attributes {stable_mosaic.version = 11 : i64} {
  func.func @_conv_pair_kernel(%arg0: i32, %arg1: i32, %arg2: memref<1x16x20xbf16, #tpu.memory_space<vmem>>, %arg3: memref<3x16x16xbf16, #tpu.memory_space<vmem>>, %arg4: memref<16x1xf32, #tpu.memory_space<vmem>>, %arg5: memref<3x16x16xbf16, #tpu.memory_space<vmem>>, %arg6: memref<16x1xf32, #tpu.memory_space<vmem>>, %arg7: memref<1x16x16xbf16, #tpu.memory_space<vmem>>) attributes {dimension_semantics = [#tpu.dimension_semantics<parallel>, #tpu.dimension_semantics<parallel>], iteration_bounds = array<i64: 2, 1>, scalar_prefetch = 0 : i64, scratch_operands = 0 : i64, tpu.core_type = #tpu.core_type<tc>, window_params = [{transform_indices = @transform_0, window_bounds = array<i64: 1, 16, 20>}, {pipeline_mode = #tpu.pipeline_mode<synchronous>, transform_indices = @transform_1, window_bounds = array<i64: 3, 16, 16>}, {pipeline_mode = #tpu.pipeline_mode<synchronous>, transform_indices = @transform_2, window_bounds = array<i64: 16, 1>}, {pipeline_mode = #tpu.pipeline_mode<synchronous>, transform_indices = @transform_3, window_bounds = array<i64: 3, 16, 16>}, {pipeline_mode = #tpu.pipeline_mode<synchronous>, transform_indices = @transform_4, window_bounds = array<i64: 16, 1>}, {transform_indices = @transform_5, window_bounds = array<i64: 1, 16, 16>}]} {
    %c0 = arith.constant 0 : index
    %c0_0 = arith.constant 0 : index
    %c0_1 = arith.constant 0 : index
    %0 = vector.load %arg2[%c0, %c0_0, %c0_1] : memref<1x16x20xbf16, #tpu.memory_space<vmem>>, vector<1x16x20xbf16>
    %1 = vector.shape_cast %0 : vector<1x16x20xbf16> to vector<16x20xbf16>
    %2 = arith.extf %1 : vector<16x20xbf16> to vector<16x20xf32>
    %cst = arith.constant 0.000000e+00 : f32
    %3 = vector.broadcast %cst : f32 to vector<16x20xf32>
    %4 = arith.cmpf oge, %2, %3 : vector<16x20xf32>
    %cst_2 = arith.constant 1.000000e-01 : f32
    %5 = vector.broadcast %cst_2 : f32 to vector<16x20xf32>
    %6 = arith.mulf %5, %2 : vector<16x20xf32>
    %7 = arith.select %4, %2, %6 : vector<16x20xi1>, vector<16x20xf32>
    %8 = arith.truncf %7 : vector<16x20xf32> to vector<16x20xbf16>
    %cst_3 = arith.constant 0.000000e+00 : f32
    %9 = vector.broadcast %cst_3 : f32 to vector<16x18xf32>
    %c0_4 = arith.constant 0 : index
    %c0_5 = arith.constant 0 : index
    %c0_6 = arith.constant 0 : index
    %10 = vector.load %arg3[%c0_4, %c0_5, %c0_6] : memref<3x16x16xbf16, #tpu.memory_space<vmem>>, vector<1x16x16xbf16>
    %11 = vector.shape_cast %10 : vector<1x16x16xbf16> to vector<16x16xbf16>
    %12 = vector.extract_strided_slice %8 {offsets = [0, 0], sizes = [16, 18], strides = [1, 1]} : vector<16x20xbf16> to vector<16x18xbf16>
    %cst_7 = arith.constant dense<0.000000e+00> : vector<16x18xf32>
    %13 = tpu.matmul %11, %12, %cst_7 {dimension_numbers = #tpu.dot_dimension_numbers<[1], [0], [0], [1], [0, 0, 1, 1], [], []>} : vector<16x16xbf16>, vector<16x18xbf16>, vector<16x18xf32> -> vector<16x18xf32>
    %14 = arith.addf %9, %13 : vector<16x18xf32>
    %c1 = arith.constant 1 : index
    %c0_8 = arith.constant 0 : index
    %c0_9 = arith.constant 0 : index
    %15 = vector.load %arg3[%c1, %c0_8, %c0_9] : memref<3x16x16xbf16, #tpu.memory_space<vmem>>, vector<1x16x16xbf16>
    %16 = vector.shape_cast %15 : vector<1x16x16xbf16> to vector<16x16xbf16>
    %17 = vector.extract_strided_slice %8 {offsets = [0, 1], sizes = [16, 18], strides = [1, 1]} : vector<16x20xbf16> to vector<16x18xbf16>
    %cst_10 = arith.constant dense<0.000000e+00> : vector<16x18xf32>
    %18 = tpu.matmul %16, %17, %cst_10 {dimension_numbers = #tpu.dot_dimension_numbers<[1], [0], [0], [1], [0, 0, 1, 1], [], []>} : vector<16x16xbf16>, vector<16x18xbf16>, vector<16x18xf32> -> vector<16x18xf32>
    %19 = arith.addf %14, %18 : vector<16x18xf32>
    %c2 = arith.constant 2 : index
    %c0_11 = arith.constant 0 : index
    %c0_12 = arith.constant 0 : index
    %20 = vector.load %arg3[%c2, %c0_11, %c0_12] : memref<3x16x16xbf16, #tpu.memory_space<vmem>>, vector<1x16x16xbf16>
    %21 = vector.shape_cast %20 : vector<1x16x16xbf16> to vector<16x16xbf16>
    %22 = vector.extract_strided_slice %8 {offsets = [0, 2], sizes = [16, 18], strides = [1, 1]} : vector<16x20xbf16> to vector<16x18xbf16>
    %cst_13 = arith.constant dense<0.000000e+00> : vector<16x18xf32>
    %23 = tpu.matmul %21, %22, %cst_13 {dimension_numbers = #tpu.dot_dimension_numbers<[1], [0], [0], [1], [0, 0, 1, 1], [], []>} : vector<16x16xbf16>, vector<16x18xbf16>, vector<16x18xf32> -> vector<16x18xf32>
    %24 = arith.addf %19, %23 : vector<16x18xf32>
    %c0_14 = arith.constant 0 : index
    %c0_15 = arith.constant 0 : index
    %25 = vector.load %arg4[%c0_14, %c0_15] : memref<16x1xf32, #tpu.memory_space<vmem>>, vector<16x1xf32>
    %26 = vector.broadcast %25 : vector<16x1xf32> to vector<16x18xf32>
    %27 = arith.addf %24, %26 : vector<16x18xf32>
    %cst_16 = arith.constant 0.000000e+00 : f32
    %28 = vector.broadcast %cst_16 : f32 to vector<16x18xf32>
    %29 = arith.cmpf oge, %27, %28 : vector<16x18xf32>
    %cst_17 = arith.constant 1.000000e-01 : f32
    %30 = vector.broadcast %cst_17 : f32 to vector<16x18xf32>
    %31 = arith.mulf %30, %27 : vector<16x18xf32>
    %32 = arith.select %29, %27, %31 : vector<16x18xi1>, vector<16x18xf32>
    %33 = tpu.iota {dimensions = array<i32: 1>} : vector<16x18xi32>
    %c-1_i32 = arith.constant -1 : i32
    %34 = vector.broadcast %c-1_i32 : i32 to vector<16x18xi32>
    %35 = arith.addi %34, %33 : vector<16x18xi32>
    %c0_i32 = arith.constant 0 : i32
    %36 = vector.broadcast %c0_i32 : i32 to vector<16x18xi32>
    %37 = arith.cmpi sge, %35, %36 : vector<16x18xi32>
    %c16_i32 = arith.constant 16 : i32
    %38 = vector.broadcast %c16_i32 : i32 to vector<16x18xi32>
    %39 = arith.cmpi slt, %35, %38 : vector<16x18xi32>
    %40 = arith.andi %37, %39 : vector<16x18xi1>
    %cst_18 = arith.constant 0.000000e+00 : f32
    %41 = vector.broadcast %cst_18 : f32 to vector<16x18xf32>
    %42 = arith.select %40, %32, %41 : vector<16x18xi1>, vector<16x18xf32>
    %43 = arith.truncf %42 : vector<16x18xf32> to vector<16x18xbf16>
    %cst_19 = arith.constant 0.000000e+00 : f32
    %44 = vector.broadcast %cst_19 : f32 to vector<16x16xf32>
    %c0_20 = arith.constant 0 : index
    %c0_21 = arith.constant 0 : index
    %c0_22 = arith.constant 0 : index
    %45 = vector.load %arg5[%c0_20, %c0_21, %c0_22] : memref<3x16x16xbf16, #tpu.memory_space<vmem>>, vector<1x16x16xbf16>
    %46 = vector.shape_cast %45 : vector<1x16x16xbf16> to vector<16x16xbf16>
    %47 = vector.extract_strided_slice %43 {offsets = [0, 0], sizes = [16, 16], strides = [1, 1]} : vector<16x18xbf16> to vector<16x16xbf16>
    %cst_23 = arith.constant dense<0.000000e+00> : vector<16x16xf32>
    %48 = tpu.matmul %46, %47, %cst_23 {dimension_numbers = #tpu.dot_dimension_numbers<[1], [0], [0], [1], [0, 0, 1, 1], [], []>} : vector<16x16xbf16>, vector<16x16xbf16>, vector<16x16xf32> -> vector<16x16xf32>
    %49 = arith.addf %44, %48 : vector<16x16xf32>
    %c1_24 = arith.constant 1 : index
    %c0_25 = arith.constant 0 : index
    %c0_26 = arith.constant 0 : index
    %50 = vector.load %arg5[%c1_24, %c0_25, %c0_26] : memref<3x16x16xbf16, #tpu.memory_space<vmem>>, vector<1x16x16xbf16>
    %51 = vector.shape_cast %50 : vector<1x16x16xbf16> to vector<16x16xbf16>
    %52 = vector.extract_strided_slice %43 {offsets = [0, 1], sizes = [16, 16], strides = [1, 1]} : vector<16x18xbf16> to vector<16x16xbf16>
    %cst_27 = arith.constant dense<0.000000e+00> : vector<16x16xf32>
    %53 = tpu.matmul %51, %52, %cst_27 {dimension_numbers = #tpu.dot_dimension_numbers<[1], [0], [0], [1], [0, 0, 1, 1], [], []>} : vector<16x16xbf16>, vector<16x16xbf16>, vector<16x16xf32> -> vector<16x16xf32>
    %54 = arith.addf %49, %53 : vector<16x16xf32>
    %c2_28 = arith.constant 2 : index
    %c0_29 = arith.constant 0 : index
    %c0_30 = arith.constant 0 : index
    %55 = vector.load %arg5[%c2_28, %c0_29, %c0_30] : memref<3x16x16xbf16, #tpu.memory_space<vmem>>, vector<1x16x16xbf16>
    %56 = vector.shape_cast %55 : vector<1x16x16xbf16> to vector<16x16xbf16>
    %57 = vector.extract_strided_slice %43 {offsets = [0, 2], sizes = [16, 16], strides = [1, 1]} : vector<16x18xbf16> to vector<16x16xbf16>
    %cst_31 = arith.constant dense<0.000000e+00> : vector<16x16xf32>
    %58 = tpu.matmul %56, %57, %cst_31 {dimension_numbers = #tpu.dot_dimension_numbers<[1], [0], [0], [1], [0, 0, 1, 1], [], []>} : vector<16x16xbf16>, vector<16x16xbf16>, vector<16x16xf32> -> vector<16x16xf32>
    %59 = arith.addf %54, %58 : vector<16x16xf32>
    %c0_32 = arith.constant 0 : index
    %c0_33 = arith.constant 0 : index
    %60 = vector.load %arg6[%c0_32, %c0_33] : memref<16x1xf32, #tpu.memory_space<vmem>>, vector<16x1xf32>
    %61 = vector.broadcast %60 : vector<16x1xf32> to vector<16x16xf32>
    %62 = arith.addf %59, %61 : vector<16x16xf32>
    %c0_34 = arith.constant 0 : index
    %c0_35 = arith.constant 0 : index
    %c2_36 = arith.constant 2 : index
    %63 = vector.load %arg2[%c0_34, %c0_35, %c2_36] : memref<1x16x20xbf16, #tpu.memory_space<vmem>>, vector<1x16x16xbf16>
    %64 = vector.shape_cast %63 : vector<1x16x16xbf16> to vector<16x16xbf16>
    %65 = arith.extf %64 : vector<16x16xbf16> to vector<16x16xf32>
    %66 = arith.addf %62, %65 : vector<16x16xf32>
    %67 = arith.truncf %66 : vector<16x16xf32> to vector<16x16xbf16>
    %c0_37 = arith.constant 0 : index
    %c0_38 = arith.constant 0 : index
    %c0_39 = arith.constant 0 : index
    %68 = vector.load %arg7[%c0_37, %c0_38, %c0_39] : memref<1x16x16xbf16, #tpu.memory_space<vmem>>, vector<1x16x16xbf16>
    %69 = vector.shape_cast %68 : vector<1x16x16xbf16> to vector<16x16xbf16>
    %70 = vector.shape_cast %67 : vector<16x16xbf16> to vector<1x16x16xbf16>
    tpu.vector_store %arg7[%c0_37, %c0_38, %c0_39], %70 {strides = array<i32>} : memref<1x16x16xbf16, #tpu.memory_space<vmem>>, vector<1x16x16xbf16>,
    return
  }
  func.func @transform_0(%arg0: i32, %arg1: i32) -> (i32, i32, i32) {
    %c0_i32 = arith.constant 0 : i32
    %c0_i32_0 = arith.constant 0 : i32
    %c0_i32_1 = arith.constant 0 : i32
    return %arg0, %c0_i32, %c0_i32_0 : i32, i32, i32
  }
  func.func @transform_1(%arg0: i32, %arg1: i32) -> (i32, i32, i32) {
    %c0_i32 = arith.constant 0 : i32
    %c0_i32_0 = arith.constant 0 : i32
    %c0_i32_1 = arith.constant 0 : i32
    %c0_i32_2 = arith.constant 0 : i32
    return %c0_i32, %c0_i32_0, %c0_i32_1 : i32, i32, i32
  }
  func.func @transform_2(%arg0: i32, %arg1: i32) -> (i32, i32) {
    %c0_i32 = arith.constant 0 : i32
    %c0_i32_0 = arith.constant 0 : i32
    %c0_i32_1 = arith.constant 0 : i32
    return %c0_i32, %c0_i32_0 : i32, i32
  }
  func.func @transform_3(%arg0: i32, %arg1: i32) -> (i32, i32, i32) {
    %c0_i32 = arith.constant 0 : i32
    %c0_i32_0 = arith.constant 0 : i32
    %c0_i32_1 = arith.constant 0 : i32
    %c0_i32_2 = arith.constant 0 : i32
    return %c0_i32, %c0_i32_0, %c0_i32_1 : i32, i32, i32
  }
  func.func @transform_4(%arg0: i32, %arg1: i32) -> (i32, i32) {
    %c0_i32 = arith.constant 0 : i32
    %c0_i32_0 = arith.constant 0 : i32
    %c0_i32_1 = arith.constant 0 : i32
    return %c0_i32, %c0_i32_0 : i32, i32
  }
  func.func @transform_5(%arg0: i32, %arg1: i32) -> (i32, i32, i32) {
    %c0_i32 = arith.constant 0 : i32
    %c0_i32_0 = arith.constant 0 : i32
    return %arg0, %c0_i32, %arg1 : i32, i32, i32
  }
}

module attributes {stable_mosaic.version = 11 : i64} {
  func.func @_conv_pair_kernel(%arg0: i32, %arg1: i32, %arg2: memref<1x16x24xbf16, #tpu.memory_space<vmem>>, %arg3: memref<3x16x16xbf16, #tpu.memory_space<vmem>>, %arg4: memref<16x1xf32, #tpu.memory_space<vmem>>, %arg5: memref<3x16x16xbf16, #tpu.memory_space<vmem>>, %arg6: memref<16x1xf32, #tpu.memory_space<vmem>>, %arg7: memref<1x16x16xbf16, #tpu.memory_space<vmem>>) attributes {dimension_semantics = [#tpu.dimension_semantics<parallel>, #tpu.dimension_semantics<parallel>], iteration_bounds = array<i64: 2, 1>, scalar_prefetch = 0 : i64, scratch_operands = 0 : i64, tpu.core_type = #tpu.core_type<tc>, window_params = [{transform_indices = @transform_0, window_bounds = array<i64: 1, 16, 24>}, {pipeline_mode = #tpu.pipeline_mode<synchronous>, transform_indices = @transform_1, window_bounds = array<i64: 3, 16, 16>}, {pipeline_mode = #tpu.pipeline_mode<synchronous>, transform_indices = @transform_2, window_bounds = array<i64: 16, 1>}, {pipeline_mode = #tpu.pipeline_mode<synchronous>, transform_indices = @transform_3, window_bounds = array<i64: 3, 16, 16>}, {pipeline_mode = #tpu.pipeline_mode<synchronous>, transform_indices = @transform_4, window_bounds = array<i64: 16, 1>}, {transform_indices = @transform_5, window_bounds = array<i64: 1, 16, 16>}]} {
    %c0 = arith.constant 0 : index
    %c0_0 = arith.constant 0 : index
    %c0_1 = arith.constant 0 : index
    %0 = vector.load %arg2[%c0, %c0_0, %c0_1] : memref<1x16x24xbf16, #tpu.memory_space<vmem>>, vector<1x16x24xbf16>
    %1 = vector.shape_cast %0 : vector<1x16x24xbf16> to vector<16x24xbf16>
    %2 = arith.extf %1 : vector<16x24xbf16> to vector<16x24xf32>
    %cst = arith.constant 0.000000e+00 : f32
    %3 = vector.broadcast %cst : f32 to vector<16x24xf32>
    %4 = arith.cmpf oge, %2, %3 : vector<16x24xf32>
    %cst_2 = arith.constant 1.000000e-01 : f32
    %5 = vector.broadcast %cst_2 : f32 to vector<16x24xf32>
    %6 = arith.mulf %5, %2 : vector<16x24xf32>
    %7 = arith.select %4, %2, %6 : vector<16x24xi1>, vector<16x24xf32>
    %8 = arith.truncf %7 : vector<16x24xf32> to vector<16x24xbf16>
    %cst_3 = arith.constant 0.000000e+00 : f32
    %9 = vector.broadcast %cst_3 : f32 to vector<16x18xf32>
    %c0_4 = arith.constant 0 : index
    %c0_5 = arith.constant 0 : index
    %c0_6 = arith.constant 0 : index
    %10 = vector.load %arg3[%c0_4, %c0_5, %c0_6] : memref<3x16x16xbf16, #tpu.memory_space<vmem>>, vector<1x16x16xbf16>
    %11 = vector.shape_cast %10 : vector<1x16x16xbf16> to vector<16x16xbf16>
    %12 = vector.extract_strided_slice %8 {offsets = [0, 0], sizes = [16, 18], strides = [1, 1]} : vector<16x24xbf16> to vector<16x18xbf16>
    %cst_7 = arith.constant dense<0.000000e+00> : vector<16x18xf32>
    %13 = tpu.matmul %11, %12, %cst_7 {dimension_numbers = #tpu.dot_dimension_numbers<[1], [0], [0], [1], [0, 0, 1, 1], [], []>} : vector<16x16xbf16>, vector<16x18xbf16>, vector<16x18xf32> -> vector<16x18xf32>
    %14 = arith.addf %9, %13 : vector<16x18xf32>
    %c1 = arith.constant 1 : index
    %c0_8 = arith.constant 0 : index
    %c0_9 = arith.constant 0 : index
    %15 = vector.load %arg3[%c1, %c0_8, %c0_9] : memref<3x16x16xbf16, #tpu.memory_space<vmem>>, vector<1x16x16xbf16>
    %16 = vector.shape_cast %15 : vector<1x16x16xbf16> to vector<16x16xbf16>
    %17 = vector.extract_strided_slice %8 {offsets = [0, 3], sizes = [16, 18], strides = [1, 1]} : vector<16x24xbf16> to vector<16x18xbf16>
    %cst_10 = arith.constant dense<0.000000e+00> : vector<16x18xf32>
    %18 = tpu.matmul %16, %17, %cst_10 {dimension_numbers = #tpu.dot_dimension_numbers<[1], [0], [0], [1], [0, 0, 1, 1], [], []>} : vector<16x16xbf16>, vector<16x18xbf16>, vector<16x18xf32> -> vector<16x18xf32>
    %19 = arith.addf %14, %18 : vector<16x18xf32>
    %c2 = arith.constant 2 : index
    %c0_11 = arith.constant 0 : index
    %c0_12 = arith.constant 0 : index
    %20 = vector.load %arg3[%c2, %c0_11, %c0_12] : memref<3x16x16xbf16, #tpu.memory_space<vmem>>, vector<1x16x16xbf16>
    %21 = vector.shape_cast %20 : vector<1x16x16xbf16> to vector<16x16xbf16>
    %22 = vector.extract_strided_slice %8 {offsets = [0, 6], sizes = [16, 18], strides = [1, 1]} : vector<16x24xbf16> to vector<16x18xbf16>
    %cst_13 = arith.constant dense<0.000000e+00> : vector<16x18xf32>
    %23 = tpu.matmul %21, %22, %cst_13 {dimension_numbers = #tpu.dot_dimension_numbers<[1], [0], [0], [1], [0, 0, 1, 1], [], []>} : vector<16x16xbf16>, vector<16x18xbf16>, vector<16x18xf32> -> vector<16x18xf32>
    %24 = arith.addf %19, %23 : vector<16x18xf32>
    %c0_14 = arith.constant 0 : index
    %c0_15 = arith.constant 0 : index
    %25 = vector.load %arg4[%c0_14, %c0_15] : memref<16x1xf32, #tpu.memory_space<vmem>>, vector<16x1xf32>
    %26 = vector.broadcast %25 : vector<16x1xf32> to vector<16x18xf32>
    %27 = arith.addf %24, %26 : vector<16x18xf32>
    %cst_16 = arith.constant 0.000000e+00 : f32
    %28 = vector.broadcast %cst_16 : f32 to vector<16x18xf32>
    %29 = arith.cmpf oge, %27, %28 : vector<16x18xf32>
    %cst_17 = arith.constant 1.000000e-01 : f32
    %30 = vector.broadcast %cst_17 : f32 to vector<16x18xf32>
    %31 = arith.mulf %30, %27 : vector<16x18xf32>
    %32 = arith.select %29, %27, %31 : vector<16x18xi1>, vector<16x18xf32>
    %33 = tpu.iota {dimensions = array<i32: 1>} : vector<16x18xi32>
    %c-1_i32 = arith.constant -1 : i32
    %34 = vector.broadcast %c-1_i32 : i32 to vector<16x18xi32>
    %35 = arith.addi %34, %33 : vector<16x18xi32>
    %c0_i32 = arith.constant 0 : i32
    %36 = vector.broadcast %c0_i32 : i32 to vector<16x18xi32>
    %37 = arith.cmpi sge, %35, %36 : vector<16x18xi32>
    %c16_i32 = arith.constant 16 : i32
    %38 = vector.broadcast %c16_i32 : i32 to vector<16x18xi32>
    %39 = arith.cmpi slt, %35, %38 : vector<16x18xi32>
    %40 = arith.andi %37, %39 : vector<16x18xi1>
    %cst_18 = arith.constant 0.000000e+00 : f32
    %41 = vector.broadcast %cst_18 : f32 to vector<16x18xf32>
    %42 = arith.select %40, %32, %41 : vector<16x18xi1>, vector<16x18xf32>
    %43 = arith.truncf %42 : vector<16x18xf32> to vector<16x18xbf16>
    %cst_19 = arith.constant 0.000000e+00 : f32
    %44 = vector.broadcast %cst_19 : f32 to vector<16x16xf32>
    %c0_20 = arith.constant 0 : index
    %c0_21 = arith.constant 0 : index
    %c0_22 = arith.constant 0 : index
    %45 = vector.load %arg5[%c0_20, %c0_21, %c0_22] : memref<3x16x16xbf16, #tpu.memory_space<vmem>>, vector<1x16x16xbf16>
    %46 = vector.shape_cast %45 : vector<1x16x16xbf16> to vector<16x16xbf16>
    %47 = vector.extract_strided_slice %43 {offsets = [0, 0], sizes = [16, 16], strides = [1, 1]} : vector<16x18xbf16> to vector<16x16xbf16>
    %cst_23 = arith.constant dense<0.000000e+00> : vector<16x16xf32>
    %48 = tpu.matmul %46, %47, %cst_23 {dimension_numbers = #tpu.dot_dimension_numbers<[1], [0], [0], [1], [0, 0, 1, 1], [], []>} : vector<16x16xbf16>, vector<16x16xbf16>, vector<16x16xf32> -> vector<16x16xf32>
    %49 = arith.addf %44, %48 : vector<16x16xf32>
    %c1_24 = arith.constant 1 : index
    %c0_25 = arith.constant 0 : index
    %c0_26 = arith.constant 0 : index
    %50 = vector.load %arg5[%c1_24, %c0_25, %c0_26] : memref<3x16x16xbf16, #tpu.memory_space<vmem>>, vector<1x16x16xbf16>
    %51 = vector.shape_cast %50 : vector<1x16x16xbf16> to vector<16x16xbf16>
    %52 = vector.extract_strided_slice %43 {offsets = [0, 1], sizes = [16, 16], strides = [1, 1]} : vector<16x18xbf16> to vector<16x16xbf16>
    %cst_27 = arith.constant dense<0.000000e+00> : vector<16x16xf32>
    %53 = tpu.matmul %51, %52, %cst_27 {dimension_numbers = #tpu.dot_dimension_numbers<[1], [0], [0], [1], [0, 0, 1, 1], [], []>} : vector<16x16xbf16>, vector<16x16xbf16>, vector<16x16xf32> -> vector<16x16xf32>
    %54 = arith.addf %49, %53 : vector<16x16xf32>
    %c2_28 = arith.constant 2 : index
    %c0_29 = arith.constant 0 : index
    %c0_30 = arith.constant 0 : index
    %55 = vector.load %arg5[%c2_28, %c0_29, %c0_30] : memref<3x16x16xbf16, #tpu.memory_space<vmem>>, vector<1x16x16xbf16>
    %56 = vector.shape_cast %55 : vector<1x16x16xbf16> to vector<16x16xbf16>
    %57 = vector.extract_strided_slice %43 {offsets = [0, 2], sizes = [16, 16], strides = [1, 1]} : vector<16x18xbf16> to vector<16x16xbf16>
    %cst_31 = arith.constant dense<0.000000e+00> : vector<16x16xf32>
    %58 = tpu.matmul %56, %57, %cst_31 {dimension_numbers = #tpu.dot_dimension_numbers<[1], [0], [0], [1], [0, 0, 1, 1], [], []>} : vector<16x16xbf16>, vector<16x16xbf16>, vector<16x16xf32> -> vector<16x16xf32>
    %59 = arith.addf %54, %58 : vector<16x16xf32>
    %c0_32 = arith.constant 0 : index
    %c0_33 = arith.constant 0 : index
    %60 = vector.load %arg6[%c0_32, %c0_33] : memref<16x1xf32, #tpu.memory_space<vmem>>, vector<16x1xf32>
    %61 = vector.broadcast %60 : vector<16x1xf32> to vector<16x16xf32>
    %62 = arith.addf %59, %61 : vector<16x16xf32>
    %c0_34 = arith.constant 0 : index
    %c0_35 = arith.constant 0 : index
    %c4 = arith.constant 4 : index
    %63 = vector.load %arg2[%c0_34, %c0_35, %c4] : memref<1x16x24xbf16, #tpu.memory_space<vmem>>, vector<1x16x16xbf16>
    %64 = vector.shape_cast %63 : vector<1x16x16xbf16> to vector<16x16xbf16>
    %65 = arith.extf %64 : vector<16x16xbf16> to vector<16x16xf32>
    %66 = arith.addf %62, %65 : vector<16x16xf32>
    %67 = arith.truncf %66 : vector<16x16xf32> to vector<16x16xbf16>
    %c0_36 = arith.constant 0 : index
    %c0_37 = arith.constant 0 : index
    %c0_38 = arith.constant 0 : index
    %68 = vector.load %arg7[%c0_36, %c0_37, %c0_38] : memref<1x16x16xbf16, #tpu.memory_space<vmem>>, vector<1x16x16xbf16>
    %69 = vector.shape_cast %68 : vector<1x16x16xbf16> to vector<16x16xbf16>
    %70 = vector.shape_cast %67 : vector<16x16xbf16> to vector<1x16x16xbf16>
    tpu.vector_store %arg7[%c0_36, %c0_37, %c0_38], %70 {strides = array<i32>} : memref<1x16x16xbf16, #tpu.memory_space<vmem>>, vector<1x16x16xbf16>,
    return
  }
  func.func @transform_0(%arg0: i32, %arg1: i32) -> (i32, i32, i32) {
    %c0_i32 = arith.constant 0 : i32
    %c0_i32_0 = arith.constant 0 : i32
    %c0_i32_1 = arith.constant 0 : i32
    return %arg0, %c0_i32, %c0_i32_0 : i32, i32, i32
  }
  func.func @transform_1(%arg0: i32, %arg1: i32) -> (i32, i32, i32) {
    %c0_i32 = arith.constant 0 : i32
    %c0_i32_0 = arith.constant 0 : i32
    %c0_i32_1 = arith.constant 0 : i32
    %c0_i32_2 = arith.constant 0 : i32
    return %c0_i32, %c0_i32_0, %c0_i32_1 : i32, i32, i32
  }
  func.func @transform_2(%arg0: i32, %arg1: i32) -> (i32, i32) {
    %c0_i32 = arith.constant 0 : i32
    %c0_i32_0 = arith.constant 0 : i32
    %c0_i32_1 = arith.constant 0 : i32
    return %c0_i32, %c0_i32_0 : i32, i32
  }
  func.func @transform_3(%arg0: i32, %arg1: i32) -> (i32, i32, i32) {
    %c0_i32 = arith.constant 0 : i32
    %c0_i32_0 = arith.constant 0 : i32
    %c0_i32_1 = arith.constant 0 : i32
    %c0_i32_2 = arith.constant 0 : i32
    return %c0_i32, %c0_i32_0, %c0_i32_1 : i32, i32, i32
  }
  func.func @transform_4(%arg0: i32, %arg1: i32) -> (i32, i32) {
    %c0_i32 = arith.constant 0 : i32
    %c0_i32_0 = arith.constant 0 : i32
    %c0_i32_1 = arith.constant 0 : i32
    return %c0_i32, %c0_i32_0 : i32, i32
  }
  func.func @transform_5(%arg0: i32, %arg1: i32) -> (i32, i32, i32) {
    %c0_i32 = arith.constant 0 : i32
    %c0_i32_0 = arith.constant 0 : i32
    return %arg0, %c0_i32, %arg1 : i32, i32, i32
  }
}

module attributes {stable_mosaic.version = 11 : i64} {
  func.func @_conv_pair_kernel(%arg0: i32, %arg1: i32, %arg2: memref<1x16x28xbf16, #tpu.memory_space<vmem>>, %arg3: memref<3x16x16xbf16, #tpu.memory_space<vmem>>, %arg4: memref<16x1xf32, #tpu.memory_space<vmem>>, %arg5: memref<3x16x16xbf16, #tpu.memory_space<vmem>>, %arg6: memref<16x1xf32, #tpu.memory_space<vmem>>, %arg7: memref<1x16x16xbf16, #tpu.memory_space<vmem>>) attributes {dimension_semantics = [#tpu.dimension_semantics<parallel>, #tpu.dimension_semantics<parallel>], iteration_bounds = array<i64: 2, 1>, scalar_prefetch = 0 : i64, scratch_operands = 0 : i64, tpu.core_type = #tpu.core_type<tc>, window_params = [{transform_indices = @transform_0, window_bounds = array<i64: 1, 16, 28>}, {pipeline_mode = #tpu.pipeline_mode<synchronous>, transform_indices = @transform_1, window_bounds = array<i64: 3, 16, 16>}, {pipeline_mode = #tpu.pipeline_mode<synchronous>, transform_indices = @transform_2, window_bounds = array<i64: 16, 1>}, {pipeline_mode = #tpu.pipeline_mode<synchronous>, transform_indices = @transform_3, window_bounds = array<i64: 3, 16, 16>}, {pipeline_mode = #tpu.pipeline_mode<synchronous>, transform_indices = @transform_4, window_bounds = array<i64: 16, 1>}, {transform_indices = @transform_5, window_bounds = array<i64: 1, 16, 16>}]} {
    %c0 = arith.constant 0 : index
    %c0_0 = arith.constant 0 : index
    %c0_1 = arith.constant 0 : index
    %0 = vector.load %arg2[%c0, %c0_0, %c0_1] : memref<1x16x28xbf16, #tpu.memory_space<vmem>>, vector<1x16x28xbf16>
    %1 = vector.shape_cast %0 : vector<1x16x28xbf16> to vector<16x28xbf16>
    %2 = arith.extf %1 : vector<16x28xbf16> to vector<16x28xf32>
    %cst = arith.constant 0.000000e+00 : f32
    %3 = vector.broadcast %cst : f32 to vector<16x28xf32>
    %4 = arith.cmpf oge, %2, %3 : vector<16x28xf32>
    %cst_2 = arith.constant 1.000000e-01 : f32
    %5 = vector.broadcast %cst_2 : f32 to vector<16x28xf32>
    %6 = arith.mulf %5, %2 : vector<16x28xf32>
    %7 = arith.select %4, %2, %6 : vector<16x28xi1>, vector<16x28xf32>
    %8 = arith.truncf %7 : vector<16x28xf32> to vector<16x28xbf16>
    %cst_3 = arith.constant 0.000000e+00 : f32
    %9 = vector.broadcast %cst_3 : f32 to vector<16x18xf32>
    %c0_4 = arith.constant 0 : index
    %c0_5 = arith.constant 0 : index
    %c0_6 = arith.constant 0 : index
    %10 = vector.load %arg3[%c0_4, %c0_5, %c0_6] : memref<3x16x16xbf16, #tpu.memory_space<vmem>>, vector<1x16x16xbf16>
    %11 = vector.shape_cast %10 : vector<1x16x16xbf16> to vector<16x16xbf16>
    %12 = vector.extract_strided_slice %8 {offsets = [0, 0], sizes = [16, 18], strides = [1, 1]} : vector<16x28xbf16> to vector<16x18xbf16>
    %cst_7 = arith.constant dense<0.000000e+00> : vector<16x18xf32>
    %13 = tpu.matmul %11, %12, %cst_7 {dimension_numbers = #tpu.dot_dimension_numbers<[1], [0], [0], [1], [0, 0, 1, 1], [], []>} : vector<16x16xbf16>, vector<16x18xbf16>, vector<16x18xf32> -> vector<16x18xf32>
    %14 = arith.addf %9, %13 : vector<16x18xf32>
    %c1 = arith.constant 1 : index
    %c0_8 = arith.constant 0 : index
    %c0_9 = arith.constant 0 : index
    %15 = vector.load %arg3[%c1, %c0_8, %c0_9] : memref<3x16x16xbf16, #tpu.memory_space<vmem>>, vector<1x16x16xbf16>
    %16 = vector.shape_cast %15 : vector<1x16x16xbf16> to vector<16x16xbf16>
    %17 = vector.extract_strided_slice %8 {offsets = [0, 5], sizes = [16, 18], strides = [1, 1]} : vector<16x28xbf16> to vector<16x18xbf16>
    %cst_10 = arith.constant dense<0.000000e+00> : vector<16x18xf32>
    %18 = tpu.matmul %16, %17, %cst_10 {dimension_numbers = #tpu.dot_dimension_numbers<[1], [0], [0], [1], [0, 0, 1, 1], [], []>} : vector<16x16xbf16>, vector<16x18xbf16>, vector<16x18xf32> -> vector<16x18xf32>
    %19 = arith.addf %14, %18 : vector<16x18xf32>
    %c2 = arith.constant 2 : index
    %c0_11 = arith.constant 0 : index
    %c0_12 = arith.constant 0 : index
    %20 = vector.load %arg3[%c2, %c0_11, %c0_12] : memref<3x16x16xbf16, #tpu.memory_space<vmem>>, vector<1x16x16xbf16>
    %21 = vector.shape_cast %20 : vector<1x16x16xbf16> to vector<16x16xbf16>
    %22 = vector.extract_strided_slice %8 {offsets = [0, 10], sizes = [16, 18], strides = [1, 1]} : vector<16x28xbf16> to vector<16x18xbf16>
    %cst_13 = arith.constant dense<0.000000e+00> : vector<16x18xf32>
    %23 = tpu.matmul %21, %22, %cst_13 {dimension_numbers = #tpu.dot_dimension_numbers<[1], [0], [0], [1], [0, 0, 1, 1], [], []>} : vector<16x16xbf16>, vector<16x18xbf16>, vector<16x18xf32> -> vector<16x18xf32>
    %24 = arith.addf %19, %23 : vector<16x18xf32>
    %c0_14 = arith.constant 0 : index
    %c0_15 = arith.constant 0 : index
    %25 = vector.load %arg4[%c0_14, %c0_15] : memref<16x1xf32, #tpu.memory_space<vmem>>, vector<16x1xf32>
    %26 = vector.broadcast %25 : vector<16x1xf32> to vector<16x18xf32>
    %27 = arith.addf %24, %26 : vector<16x18xf32>
    %cst_16 = arith.constant 0.000000e+00 : f32
    %28 = vector.broadcast %cst_16 : f32 to vector<16x18xf32>
    %29 = arith.cmpf oge, %27, %28 : vector<16x18xf32>
    %cst_17 = arith.constant 1.000000e-01 : f32
    %30 = vector.broadcast %cst_17 : f32 to vector<16x18xf32>
    %31 = arith.mulf %30, %27 : vector<16x18xf32>
    %32 = arith.select %29, %27, %31 : vector<16x18xi1>, vector<16x18xf32>
    %33 = tpu.iota {dimensions = array<i32: 1>} : vector<16x18xi32>
    %c-1_i32 = arith.constant -1 : i32
    %34 = vector.broadcast %c-1_i32 : i32 to vector<16x18xi32>
    %35 = arith.addi %34, %33 : vector<16x18xi32>
    %c0_i32 = arith.constant 0 : i32
    %36 = vector.broadcast %c0_i32 : i32 to vector<16x18xi32>
    %37 = arith.cmpi sge, %35, %36 : vector<16x18xi32>
    %c16_i32 = arith.constant 16 : i32
    %38 = vector.broadcast %c16_i32 : i32 to vector<16x18xi32>
    %39 = arith.cmpi slt, %35, %38 : vector<16x18xi32>
    %40 = arith.andi %37, %39 : vector<16x18xi1>
    %cst_18 = arith.constant 0.000000e+00 : f32
    %41 = vector.broadcast %cst_18 : f32 to vector<16x18xf32>
    %42 = arith.select %40, %32, %41 : vector<16x18xi1>, vector<16x18xf32>
    %43 = arith.truncf %42 : vector<16x18xf32> to vector<16x18xbf16>
    %cst_19 = arith.constant 0.000000e+00 : f32
    %44 = vector.broadcast %cst_19 : f32 to vector<16x16xf32>
    %c0_20 = arith.constant 0 : index
    %c0_21 = arith.constant 0 : index
    %c0_22 = arith.constant 0 : index
    %45 = vector.load %arg5[%c0_20, %c0_21, %c0_22] : memref<3x16x16xbf16, #tpu.memory_space<vmem>>, vector<1x16x16xbf16>
    %46 = vector.shape_cast %45 : vector<1x16x16xbf16> to vector<16x16xbf16>
    %47 = vector.extract_strided_slice %43 {offsets = [0, 0], sizes = [16, 16], strides = [1, 1]} : vector<16x18xbf16> to vector<16x16xbf16>
    %cst_23 = arith.constant dense<0.000000e+00> : vector<16x16xf32>
    %48 = tpu.matmul %46, %47, %cst_23 {dimension_numbers = #tpu.dot_dimension_numbers<[1], [0], [0], [1], [0, 0, 1, 1], [], []>} : vector<16x16xbf16>, vector<16x16xbf16>, vector<16x16xf32> -> vector<16x16xf32>
    %49 = arith.addf %44, %48 : vector<16x16xf32>
    %c1_24 = arith.constant 1 : index
    %c0_25 = arith.constant 0 : index
    %c0_26 = arith.constant 0 : index
    %50 = vector.load %arg5[%c1_24, %c0_25, %c0_26] : memref<3x16x16xbf16, #tpu.memory_space<vmem>>, vector<1x16x16xbf16>
    %51 = vector.shape_cast %50 : vector<1x16x16xbf16> to vector<16x16xbf16>
    %52 = vector.extract_strided_slice %43 {offsets = [0, 1], sizes = [16, 16], strides = [1, 1]} : vector<16x18xbf16> to vector<16x16xbf16>
    %cst_27 = arith.constant dense<0.000000e+00> : vector<16x16xf32>
    %53 = tpu.matmul %51, %52, %cst_27 {dimension_numbers = #tpu.dot_dimension_numbers<[1], [0], [0], [1], [0, 0, 1, 1], [], []>} : vector<16x16xbf16>, vector<16x16xbf16>, vector<16x16xf32> -> vector<16x16xf32>
    %54 = arith.addf %49, %53 : vector<16x16xf32>
    %c2_28 = arith.constant 2 : index
    %c0_29 = arith.constant 0 : index
    %c0_30 = arith.constant 0 : index
    %55 = vector.load %arg5[%c2_28, %c0_29, %c0_30] : memref<3x16x16xbf16, #tpu.memory_space<vmem>>, vector<1x16x16xbf16>
    %56 = vector.shape_cast %55 : vector<1x16x16xbf16> to vector<16x16xbf16>
    %57 = vector.extract_strided_slice %43 {offsets = [0, 2], sizes = [16, 16], strides = [1, 1]} : vector<16x18xbf16> to vector<16x16xbf16>
    %cst_31 = arith.constant dense<0.000000e+00> : vector<16x16xf32>
    %58 = tpu.matmul %56, %57, %cst_31 {dimension_numbers = #tpu.dot_dimension_numbers<[1], [0], [0], [1], [0, 0, 1, 1], [], []>} : vector<16x16xbf16>, vector<16x16xbf16>, vector<16x16xf32> -> vector<16x16xf32>
    %59 = arith.addf %54, %58 : vector<16x16xf32>
    %c0_32 = arith.constant 0 : index
    %c0_33 = arith.constant 0 : index
    %60 = vector.load %arg6[%c0_32, %c0_33] : memref<16x1xf32, #tpu.memory_space<vmem>>, vector<16x1xf32>
    %61 = vector.broadcast %60 : vector<16x1xf32> to vector<16x16xf32>
    %62 = arith.addf %59, %61 : vector<16x16xf32>
    %c0_34 = arith.constant 0 : index
    %c0_35 = arith.constant 0 : index
    %c6 = arith.constant 6 : index
    %63 = vector.load %arg2[%c0_34, %c0_35, %c6] : memref<1x16x28xbf16, #tpu.memory_space<vmem>>, vector<1x16x16xbf16>
    %64 = vector.shape_cast %63 : vector<1x16x16xbf16> to vector<16x16xbf16>
    %65 = arith.extf %64 : vector<16x16xbf16> to vector<16x16xf32>
    %66 = arith.addf %62, %65 : vector<16x16xf32>
    %67 = arith.truncf %66 : vector<16x16xf32> to vector<16x16xbf16>
    %c0_36 = arith.constant 0 : index
    %c0_37 = arith.constant 0 : index
    %c0_38 = arith.constant 0 : index
    %68 = vector.load %arg7[%c0_36, %c0_37, %c0_38] : memref<1x16x16xbf16, #tpu.memory_space<vmem>>, vector<1x16x16xbf16>
    %69 = vector.shape_cast %68 : vector<1x16x16xbf16> to vector<16x16xbf16>
    %70 = vector.shape_cast %67 : vector<16x16xbf16> to vector<1x16x16xbf16>
    tpu.vector_store %arg7[%c0_36, %c0_37, %c0_38], %70 {strides = array<i32>} : memref<1x16x16xbf16, #tpu.memory_space<vmem>>, vector<1x16x16xbf16>,
    return
  }
  func.func @transform_0(%arg0: i32, %arg1: i32) -> (i32, i32, i32) {
    %c0_i32 = arith.constant 0 : i32
    %c0_i32_0 = arith.constant 0 : i32
    %c0_i32_1 = arith.constant 0 : i32
    return %arg0, %c0_i32, %c0_i32_0 : i32, i32, i32
  }
  func.func @transform_1(%arg0: i32, %arg1: i32) -> (i32, i32, i32) {
    %c0_i32 = arith.constant 0 : i32
    %c0_i32_0 = arith.constant 0 : i32
    %c0_i32_1 = arith.constant 0 : i32
    %c0_i32_2 = arith.constant 0 : i32
    return %c0_i32, %c0_i32_0, %c0_i32_1 : i32, i32, i32
  }
  func.func @transform_2(%arg0: i32, %arg1: i32) -> (i32, i32) {
    %c0_i32 = arith.constant 0 : i32
    %c0_i32_0 = arith.constant 0 : i32
    %c0_i32_1 = arith.constant 0 : i32
    return %c0_i32, %c0_i32_0 : i32, i32
  }
  func.func @transform_3(%arg0: i32, %arg1: i32) -> (i32, i32, i32) {
    %c0_i32 = arith.constant 0 : i32
    %c0_i32_0 = arith.constant 0 : i32
    %c0_i32_1 = arith.constant 0 : i32
    %c0_i32_2 = arith.constant 0 : i32
    return %c0_i32, %c0_i32_0, %c0_i32_1 : i32, i32, i32
  }
  func.func @transform_4(%arg0: i32, %arg1: i32) -> (i32, i32) {
    %c0_i32 = arith.constant 0 : i32
    %c0_i32_0 = arith.constant 0 : i32
    %c0_i32_1 = arith.constant 0 : i32
    return %c0_i32, %c0_i32_0 : i32, i32
  }
  func.func @transform_5(%arg0: i32, %arg1: i32) -> (i32, i32, i32) {
    %c0_i32 = arith.constant 0 : i32
    %c0_i32_0 = arith.constant 0 : i32
    return %arg0, %c0_i32, %arg1 : i32, i32, i32
  }
}

module attributes {stable_mosaic.version = 11 : i64} {
  func.func @_conv_pair_kernel(%arg0: i32, %arg1: i32, %arg2: memref<1x16x24xbf16, #tpu.memory_space<vmem>>, %arg3: memref<5x16x16xbf16, #tpu.memory_space<vmem>>, %arg4: memref<16x1xf32, #tpu.memory_space<vmem>>, %arg5: memref<5x16x16xbf16, #tpu.memory_space<vmem>>, %arg6: memref<16x1xf32, #tpu.memory_space<vmem>>, %arg7: memref<1x16x16xbf16, #tpu.memory_space<vmem>>) attributes {dimension_semantics = [#tpu.dimension_semantics<parallel>, #tpu.dimension_semantics<parallel>], iteration_bounds = array<i64: 2, 1>, scalar_prefetch = 0 : i64, scratch_operands = 0 : i64, tpu.core_type = #tpu.core_type<tc>, window_params = [{transform_indices = @transform_0, window_bounds = array<i64: 1, 16, 24>}, {pipeline_mode = #tpu.pipeline_mode<synchronous>, transform_indices = @transform_1, window_bounds = array<i64: 5, 16, 16>}, {pipeline_mode = #tpu.pipeline_mode<synchronous>, transform_indices = @transform_2, window_bounds = array<i64: 16, 1>}, {pipeline_mode = #tpu.pipeline_mode<synchronous>, transform_indices = @transform_3, window_bounds = array<i64: 5, 16, 16>}, {pipeline_mode = #tpu.pipeline_mode<synchronous>, transform_indices = @transform_4, window_bounds = array<i64: 16, 1>}, {transform_indices = @transform_5, window_bounds = array<i64: 1, 16, 16>}]} {
    %c0 = arith.constant 0 : index
    %c0_0 = arith.constant 0 : index
    %c0_1 = arith.constant 0 : index
    %0 = vector.load %arg2[%c0, %c0_0, %c0_1] : memref<1x16x24xbf16, #tpu.memory_space<vmem>>, vector<1x16x24xbf16>
    %1 = vector.shape_cast %0 : vector<1x16x24xbf16> to vector<16x24xbf16>
    %2 = arith.extf %1 : vector<16x24xbf16> to vector<16x24xf32>
    %cst = arith.constant 0.000000e+00 : f32
    %3 = vector.broadcast %cst : f32 to vector<16x24xf32>
    %4 = arith.cmpf oge, %2, %3 : vector<16x24xf32>
    %cst_2 = arith.constant 1.000000e-01 : f32
    %5 = vector.broadcast %cst_2 : f32 to vector<16x24xf32>
    %6 = arith.mulf %5, %2 : vector<16x24xf32>
    %7 = arith.select %4, %2, %6 : vector<16x24xi1>, vector<16x24xf32>
    %8 = arith.truncf %7 : vector<16x24xf32> to vector<16x24xbf16>
    %cst_3 = arith.constant 0.000000e+00 : f32
    %9 = vector.broadcast %cst_3 : f32 to vector<16x20xf32>
    %c0_4 = arith.constant 0 : index
    %c0_5 = arith.constant 0 : index
    %c0_6 = arith.constant 0 : index
    %10 = vector.load %arg3[%c0_4, %c0_5, %c0_6] : memref<5x16x16xbf16, #tpu.memory_space<vmem>>, vector<1x16x16xbf16>
    %11 = vector.shape_cast %10 : vector<1x16x16xbf16> to vector<16x16xbf16>
    %12 = vector.extract_strided_slice %8 {offsets = [0, 0], sizes = [16, 20], strides = [1, 1]} : vector<16x24xbf16> to vector<16x20xbf16>
    %cst_7 = arith.constant dense<0.000000e+00> : vector<16x20xf32>
    %13 = tpu.matmul %11, %12, %cst_7 {dimension_numbers = #tpu.dot_dimension_numbers<[1], [0], [0], [1], [0, 0, 1, 1], [], []>} : vector<16x16xbf16>, vector<16x20xbf16>, vector<16x20xf32> -> vector<16x20xf32>
    %14 = arith.addf %9, %13 : vector<16x20xf32>
    %c1 = arith.constant 1 : index
    %c0_8 = arith.constant 0 : index
    %c0_9 = arith.constant 0 : index
    %15 = vector.load %arg3[%c1, %c0_8, %c0_9] : memref<5x16x16xbf16, #tpu.memory_space<vmem>>, vector<1x16x16xbf16>
    %16 = vector.shape_cast %15 : vector<1x16x16xbf16> to vector<16x16xbf16>
    %17 = vector.extract_strided_slice %8 {offsets = [0, 1], sizes = [16, 20], strides = [1, 1]} : vector<16x24xbf16> to vector<16x20xbf16>
    %cst_10 = arith.constant dense<0.000000e+00> : vector<16x20xf32>
    %18 = tpu.matmul %16, %17, %cst_10 {dimension_numbers = #tpu.dot_dimension_numbers<[1], [0], [0], [1], [0, 0, 1, 1], [], []>} : vector<16x16xbf16>, vector<16x20xbf16>, vector<16x20xf32> -> vector<16x20xf32>
    %19 = arith.addf %14, %18 : vector<16x20xf32>
    %c2 = arith.constant 2 : index
    %c0_11 = arith.constant 0 : index
    %c0_12 = arith.constant 0 : index
    %20 = vector.load %arg3[%c2, %c0_11, %c0_12] : memref<5x16x16xbf16, #tpu.memory_space<vmem>>, vector<1x16x16xbf16>
    %21 = vector.shape_cast %20 : vector<1x16x16xbf16> to vector<16x16xbf16>
    %22 = vector.extract_strided_slice %8 {offsets = [0, 2], sizes = [16, 20], strides = [1, 1]} : vector<16x24xbf16> to vector<16x20xbf16>
    %cst_13 = arith.constant dense<0.000000e+00> : vector<16x20xf32>
    %23 = tpu.matmul %21, %22, %cst_13 {dimension_numbers = #tpu.dot_dimension_numbers<[1], [0], [0], [1], [0, 0, 1, 1], [], []>} : vector<16x16xbf16>, vector<16x20xbf16>, vector<16x20xf32> -> vector<16x20xf32>
    %24 = arith.addf %19, %23 : vector<16x20xf32>
    %c3 = arith.constant 3 : index
    %c0_14 = arith.constant 0 : index
    %c0_15 = arith.constant 0 : index
    %25 = vector.load %arg3[%c3, %c0_14, %c0_15] : memref<5x16x16xbf16, #tpu.memory_space<vmem>>, vector<1x16x16xbf16>
    %26 = vector.shape_cast %25 : vector<1x16x16xbf16> to vector<16x16xbf16>
    %27 = vector.extract_strided_slice %8 {offsets = [0, 3], sizes = [16, 20], strides = [1, 1]} : vector<16x24xbf16> to vector<16x20xbf16>
    %cst_16 = arith.constant dense<0.000000e+00> : vector<16x20xf32>
    %28 = tpu.matmul %26, %27, %cst_16 {dimension_numbers = #tpu.dot_dimension_numbers<[1], [0], [0], [1], [0, 0, 1, 1], [], []>} : vector<16x16xbf16>, vector<16x20xbf16>, vector<16x20xf32> -> vector<16x20xf32>
    %29 = arith.addf %24, %28 : vector<16x20xf32>
    %c4 = arith.constant 4 : index
    %c0_17 = arith.constant 0 : index
    %c0_18 = arith.constant 0 : index
    %30 = vector.load %arg3[%c4, %c0_17, %c0_18] : memref<5x16x16xbf16, #tpu.memory_space<vmem>>, vector<1x16x16xbf16>
    %31 = vector.shape_cast %30 : vector<1x16x16xbf16> to vector<16x16xbf16>
    %32 = vector.extract_strided_slice %8 {offsets = [0, 4], sizes = [16, 20], strides = [1, 1]} : vector<16x24xbf16> to vector<16x20xbf16>
    %cst_19 = arith.constant dense<0.000000e+00> : vector<16x20xf32>
    %33 = tpu.matmul %31, %32, %cst_19 {dimension_numbers = #tpu.dot_dimension_numbers<[1], [0], [0], [1], [0, 0, 1, 1], [], []>} : vector<16x16xbf16>, vector<16x20xbf16>, vector<16x20xf32> -> vector<16x20xf32>
    %34 = arith.addf %29, %33 : vector<16x20xf32>
    %c0_20 = arith.constant 0 : index
    %c0_21 = arith.constant 0 : index
    %35 = vector.load %arg4[%c0_20, %c0_21] : memref<16x1xf32, #tpu.memory_space<vmem>>, vector<16x1xf32>
    %36 = vector.broadcast %35 : vector<16x1xf32> to vector<16x20xf32>
    %37 = arith.addf %34, %36 : vector<16x20xf32>
    %cst_22 = arith.constant 0.000000e+00 : f32
    %38 = vector.broadcast %cst_22 : f32 to vector<16x20xf32>
    %39 = arith.cmpf oge, %37, %38 : vector<16x20xf32>
    %cst_23 = arith.constant 1.000000e-01 : f32
    %40 = vector.broadcast %cst_23 : f32 to vector<16x20xf32>
    %41 = arith.mulf %40, %37 : vector<16x20xf32>
    %42 = arith.select %39, %37, %41 : vector<16x20xi1>, vector<16x20xf32>
    %43 = tpu.iota {dimensions = array<i32: 1>} : vector<16x20xi32>
    %c-2_i32 = arith.constant -2 : i32
    %44 = vector.broadcast %c-2_i32 : i32 to vector<16x20xi32>
    %45 = arith.addi %44, %43 : vector<16x20xi32>
    %c0_i32 = arith.constant 0 : i32
    %46 = vector.broadcast %c0_i32 : i32 to vector<16x20xi32>
    %47 = arith.cmpi sge, %45, %46 : vector<16x20xi32>
    %c16_i32 = arith.constant 16 : i32
    %48 = vector.broadcast %c16_i32 : i32 to vector<16x20xi32>
    %49 = arith.cmpi slt, %45, %48 : vector<16x20xi32>
    %50 = arith.andi %47, %49 : vector<16x20xi1>
    %cst_24 = arith.constant 0.000000e+00 : f32
    %51 = vector.broadcast %cst_24 : f32 to vector<16x20xf32>
    %52 = arith.select %50, %42, %51 : vector<16x20xi1>, vector<16x20xf32>
    %53 = arith.truncf %52 : vector<16x20xf32> to vector<16x20xbf16>
    %cst_25 = arith.constant 0.000000e+00 : f32
    %54 = vector.broadcast %cst_25 : f32 to vector<16x16xf32>
    %c0_26 = arith.constant 0 : index
    %c0_27 = arith.constant 0 : index
    %c0_28 = arith.constant 0 : index
    %55 = vector.load %arg5[%c0_26, %c0_27, %c0_28] : memref<5x16x16xbf16, #tpu.memory_space<vmem>>, vector<1x16x16xbf16>
    %56 = vector.shape_cast %55 : vector<1x16x16xbf16> to vector<16x16xbf16>
    %57 = vector.extract_strided_slice %53 {offsets = [0, 0], sizes = [16, 16], strides = [1, 1]} : vector<16x20xbf16> to vector<16x16xbf16>
    %cst_29 = arith.constant dense<0.000000e+00> : vector<16x16xf32>
    %58 = tpu.matmul %56, %57, %cst_29 {dimension_numbers = #tpu.dot_dimension_numbers<[1], [0], [0], [1], [0, 0, 1, 1], [], []>} : vector<16x16xbf16>, vector<16x16xbf16>, vector<16x16xf32> -> vector<16x16xf32>
    %59 = arith.addf %54, %58 : vector<16x16xf32>
    %c1_30 = arith.constant 1 : index
    %c0_31 = arith.constant 0 : index
    %c0_32 = arith.constant 0 : index
    %60 = vector.load %arg5[%c1_30, %c0_31, %c0_32] : memref<5x16x16xbf16, #tpu.memory_space<vmem>>, vector<1x16x16xbf16>
    %61 = vector.shape_cast %60 : vector<1x16x16xbf16> to vector<16x16xbf16>
    %62 = vector.extract_strided_slice %53 {offsets = [0, 1], sizes = [16, 16], strides = [1, 1]} : vector<16x20xbf16> to vector<16x16xbf16>
    %cst_33 = arith.constant dense<0.000000e+00> : vector<16x16xf32>
    %63 = tpu.matmul %61, %62, %cst_33 {dimension_numbers = #tpu.dot_dimension_numbers<[1], [0], [0], [1], [0, 0, 1, 1], [], []>} : vector<16x16xbf16>, vector<16x16xbf16>, vector<16x16xf32> -> vector<16x16xf32>
    %64 = arith.addf %59, %63 : vector<16x16xf32>
    %c2_34 = arith.constant 2 : index
    %c0_35 = arith.constant 0 : index
    %c0_36 = arith.constant 0 : index
    %65 = vector.load %arg5[%c2_34, %c0_35, %c0_36] : memref<5x16x16xbf16, #tpu.memory_space<vmem>>, vector<1x16x16xbf16>
    %66 = vector.shape_cast %65 : vector<1x16x16xbf16> to vector<16x16xbf16>
    %67 = vector.extract_strided_slice %53 {offsets = [0, 2], sizes = [16, 16], strides = [1, 1]} : vector<16x20xbf16> to vector<16x16xbf16>
    %cst_37 = arith.constant dense<0.000000e+00> : vector<16x16xf32>
    %68 = tpu.matmul %66, %67, %cst_37 {dimension_numbers = #tpu.dot_dimension_numbers<[1], [0], [0], [1], [0, 0, 1, 1], [], []>} : vector<16x16xbf16>, vector<16x16xbf16>, vector<16x16xf32> -> vector<16x16xf32>
    %69 = arith.addf %64, %68 : vector<16x16xf32>
    %c3_38 = arith.constant 3 : index
    %c0_39 = arith.constant 0 : index
    %c0_40 = arith.constant 0 : index
    %70 = vector.load %arg5[%c3_38, %c0_39, %c0_40] : memref<5x16x16xbf16, #tpu.memory_space<vmem>>, vector<1x16x16xbf16>
    %71 = vector.shape_cast %70 : vector<1x16x16xbf16> to vector<16x16xbf16>
    %72 = vector.extract_strided_slice %53 {offsets = [0, 3], sizes = [16, 16], strides = [1, 1]} : vector<16x20xbf16> to vector<16x16xbf16>
    %cst_41 = arith.constant dense<0.000000e+00> : vector<16x16xf32>
    %73 = tpu.matmul %71, %72, %cst_41 {dimension_numbers = #tpu.dot_dimension_numbers<[1], [0], [0], [1], [0, 0, 1, 1], [], []>} : vector<16x16xbf16>, vector<16x16xbf16>, vector<16x16xf32> -> vector<16x16xf32>
    %74 = arith.addf %69, %73 : vector<16x16xf32>
    %c4_42 = arith.constant 4 : index
    %c0_43 = arith.constant 0 : index
    %c0_44 = arith.constant 0 : index
    %75 = vector.load %arg5[%c4_42, %c0_43, %c0_44] : memref<5x16x16xbf16, #tpu.memory_space<vmem>>, vector<1x16x16xbf16>
    %76 = vector.shape_cast %75 : vector<1x16x16xbf16> to vector<16x16xbf16>
    %77 = vector.extract_strided_slice %53 {offsets = [0, 4], sizes = [16, 16], strides = [1, 1]} : vector<16x20xbf16> to vector<16x16xbf16>
    %cst_45 = arith.constant dense<0.000000e+00> : vector<16x16xf32>
    %78 = tpu.matmul %76, %77, %cst_45 {dimension_numbers = #tpu.dot_dimension_numbers<[1], [0], [0], [1], [0, 0, 1, 1], [], []>} : vector<16x16xbf16>, vector<16x16xbf16>, vector<16x16xf32> -> vector<16x16xf32>
    %79 = arith.addf %74, %78 : vector<16x16xf32>
    %c0_46 = arith.constant 0 : index
    %c0_47 = arith.constant 0 : index
    %80 = vector.load %arg6[%c0_46, %c0_47] : memref<16x1xf32, #tpu.memory_space<vmem>>, vector<16x1xf32>
    %81 = vector.broadcast %80 : vector<16x1xf32> to vector<16x16xf32>
    %82 = arith.addf %79, %81 : vector<16x16xf32>
    %c0_48 = arith.constant 0 : index
    %c0_49 = arith.constant 0 : index
    %c4_50 = arith.constant 4 : index
    %83 = vector.load %arg2[%c0_48, %c0_49, %c4_50] : memref<1x16x24xbf16, #tpu.memory_space<vmem>>, vector<1x16x16xbf16>
    %84 = vector.shape_cast %83 : vector<1x16x16xbf16> to vector<16x16xbf16>
    %85 = arith.extf %84 : vector<16x16xbf16> to vector<16x16xf32>
    %86 = arith.addf %82, %85 : vector<16x16xf32>
    %87 = arith.truncf %86 : vector<16x16xf32> to vector<16x16xbf16>
    %c0_51 = arith.constant 0 : index
    %c0_52 = arith.constant 0 : index
    %c0_53 = arith.constant 0 : index
    %88 = vector.load %arg7[%c0_51, %c0_52, %c0_53] : memref<1x16x16xbf16, #tpu.memory_space<vmem>>, vector<1x16x16xbf16>
    %89 = vector.shape_cast %88 : vector<1x16x16xbf16> to vector<16x16xbf16>
    %90 = vector.shape_cast %87 : vector<16x16xbf16> to vector<1x16x16xbf16>
    tpu.vector_store %arg7[%c0_51, %c0_52, %c0_53], %90 {strides = array<i32>} : memref<1x16x16xbf16, #tpu.memory_space<vmem>>, vector<1x16x16xbf16>,
    return
  }
  func.func @transform_0(%arg0: i32, %arg1: i32) -> (i32, i32, i32) {
    %c0_i32 = arith.constant 0 : i32
    %c0_i32_0 = arith.constant 0 : i32
    %c0_i32_1 = arith.constant 0 : i32
    return %arg0, %c0_i32, %c0_i32_0 : i32, i32, i32
  }
  func.func @transform_1(%arg0: i32, %arg1: i32) -> (i32, i32, i32) {
    %c0_i32 = arith.constant 0 : i32
    %c0_i32_0 = arith.constant 0 : i32
    %c0_i32_1 = arith.constant 0 : i32
    %c0_i32_2 = arith.constant 0 : i32
    return %c0_i32, %c0_i32_0, %c0_i32_1 : i32, i32, i32
  }
  func.func @transform_2(%arg0: i32, %arg1: i32) -> (i32, i32) {
    %c0_i32 = arith.constant 0 : i32
    %c0_i32_0 = arith.constant 0 : i32
    %c0_i32_1 = arith.constant 0 : i32
    return %c0_i32, %c0_i32_0 : i32, i32
  }
  func.func @transform_3(%arg0: i32, %arg1: i32) -> (i32, i32, i32) {
    %c0_i32 = arith.constant 0 : i32
    %c0_i32_0 = arith.constant 0 : i32
    %c0_i32_1 = arith.constant 0 : i32
    %c0_i32_2 = arith.constant 0 : i32
    return %c0_i32, %c0_i32_0, %c0_i32_1 : i32, i32, i32
  }
  func.func @transform_4(%arg0: i32, %arg1: i32) -> (i32, i32) {
    %c0_i32 = arith.constant 0 : i32
    %c0_i32_0 = arith.constant 0 : i32
    %c0_i32_1 = arith.constant 0 : i32
    return %c0_i32, %c0_i32_0 : i32, i32
  }
  func.func @transform_5(%arg0: i32, %arg1: i32) -> (i32, i32, i32) {
    %c0_i32 = arith.constant 0 : i32
    %c0_i32_0 = arith.constant 0 : i32
    return %arg0, %c0_i32, %arg1 : i32, i32, i32
  }
}

module attributes {stable_mosaic.version = 11 : i64} {
  func.func @_conv_pair_kernel(%arg0: i32, %arg1: i32, %arg2: memref<1x16x40xbf16, #tpu.memory_space<vmem>>, %arg3: memref<5x16x16xbf16, #tpu.memory_space<vmem>>, %arg4: memref<16x1xf32, #tpu.memory_space<vmem>>, %arg5: memref<5x16x16xbf16, #tpu.memory_space<vmem>>, %arg6: memref<16x1xf32, #tpu.memory_space<vmem>>, %arg7: memref<1x16x16xbf16, #tpu.memory_space<vmem>>, %arg8: memref<1x16x16xbf16, #tpu.memory_space<vmem>>) attributes {dimension_semantics = [#tpu.dimension_semantics<parallel>, #tpu.dimension_semantics<parallel>], iteration_bounds = array<i64: 2, 1>, scalar_prefetch = 0 : i64, scratch_operands = 0 : i64, tpu.core_type = #tpu.core_type<tc>, window_params = [{transform_indices = @transform_0, window_bounds = array<i64: 1, 16, 40>}, {pipeline_mode = #tpu.pipeline_mode<synchronous>, transform_indices = @transform_1, window_bounds = array<i64: 5, 16, 16>}, {pipeline_mode = #tpu.pipeline_mode<synchronous>, transform_indices = @transform_2, window_bounds = array<i64: 16, 1>}, {pipeline_mode = #tpu.pipeline_mode<synchronous>, transform_indices = @transform_3, window_bounds = array<i64: 5, 16, 16>}, {pipeline_mode = #tpu.pipeline_mode<synchronous>, transform_indices = @transform_4, window_bounds = array<i64: 16, 1>}, {transform_indices = @transform_5, window_bounds = array<i64: 1, 16, 16>}, {transform_indices = @transform_6, window_bounds = array<i64: 1, 16, 16>}]} {
    %c0 = arith.constant 0 : index
    %c0_0 = arith.constant 0 : index
    %c0_1 = arith.constant 0 : index
    %0 = vector.load %arg2[%c0, %c0_0, %c0_1] : memref<1x16x40xbf16, #tpu.memory_space<vmem>>, vector<1x16x40xbf16>
    %1 = vector.shape_cast %0 : vector<1x16x40xbf16> to vector<16x40xbf16>
    %2 = arith.extf %1 : vector<16x40xbf16> to vector<16x40xf32>
    %cst = arith.constant 0.000000e+00 : f32
    %3 = vector.broadcast %cst : f32 to vector<16x40xf32>
    %4 = arith.cmpf oge, %2, %3 : vector<16x40xf32>
    %cst_2 = arith.constant 1.000000e-01 : f32
    %5 = vector.broadcast %cst_2 : f32 to vector<16x40xf32>
    %6 = arith.mulf %5, %2 : vector<16x40xf32>
    %7 = arith.select %4, %2, %6 : vector<16x40xi1>, vector<16x40xf32>
    %8 = arith.truncf %7 : vector<16x40xf32> to vector<16x40xbf16>
    %cst_3 = arith.constant 0.000000e+00 : f32
    %9 = vector.broadcast %cst_3 : f32 to vector<16x20xf32>
    %c0_4 = arith.constant 0 : index
    %c0_5 = arith.constant 0 : index
    %c0_6 = arith.constant 0 : index
    %10 = vector.load %arg3[%c0_4, %c0_5, %c0_6] : memref<5x16x16xbf16, #tpu.memory_space<vmem>>, vector<1x16x16xbf16>
    %11 = vector.shape_cast %10 : vector<1x16x16xbf16> to vector<16x16xbf16>
    %12 = vector.extract_strided_slice %8 {offsets = [0, 0], sizes = [16, 20], strides = [1, 1]} : vector<16x40xbf16> to vector<16x20xbf16>
    %cst_7 = arith.constant dense<0.000000e+00> : vector<16x20xf32>
    %13 = tpu.matmul %11, %12, %cst_7 {dimension_numbers = #tpu.dot_dimension_numbers<[1], [0], [0], [1], [0, 0, 1, 1], [], []>} : vector<16x16xbf16>, vector<16x20xbf16>, vector<16x20xf32> -> vector<16x20xf32>
    %14 = arith.addf %9, %13 : vector<16x20xf32>
    %c1 = arith.constant 1 : index
    %c0_8 = arith.constant 0 : index
    %c0_9 = arith.constant 0 : index
    %15 = vector.load %arg3[%c1, %c0_8, %c0_9] : memref<5x16x16xbf16, #tpu.memory_space<vmem>>, vector<1x16x16xbf16>
    %16 = vector.shape_cast %15 : vector<1x16x16xbf16> to vector<16x16xbf16>
    %17 = vector.extract_strided_slice %8 {offsets = [0, 5], sizes = [16, 20], strides = [1, 1]} : vector<16x40xbf16> to vector<16x20xbf16>
    %cst_10 = arith.constant dense<0.000000e+00> : vector<16x20xf32>
    %18 = tpu.matmul %16, %17, %cst_10 {dimension_numbers = #tpu.dot_dimension_numbers<[1], [0], [0], [1], [0, 0, 1, 1], [], []>} : vector<16x16xbf16>, vector<16x20xbf16>, vector<16x20xf32> -> vector<16x20xf32>
    %19 = arith.addf %14, %18 : vector<16x20xf32>
    %c2 = arith.constant 2 : index
    %c0_11 = arith.constant 0 : index
    %c0_12 = arith.constant 0 : index
    %20 = vector.load %arg3[%c2, %c0_11, %c0_12] : memref<5x16x16xbf16, #tpu.memory_space<vmem>>, vector<1x16x16xbf16>
    %21 = vector.shape_cast %20 : vector<1x16x16xbf16> to vector<16x16xbf16>
    %22 = vector.extract_strided_slice %8 {offsets = [0, 10], sizes = [16, 20], strides = [1, 1]} : vector<16x40xbf16> to vector<16x20xbf16>
    %cst_13 = arith.constant dense<0.000000e+00> : vector<16x20xf32>
    %23 = tpu.matmul %21, %22, %cst_13 {dimension_numbers = #tpu.dot_dimension_numbers<[1], [0], [0], [1], [0, 0, 1, 1], [], []>} : vector<16x16xbf16>, vector<16x20xbf16>, vector<16x20xf32> -> vector<16x20xf32>
    %24 = arith.addf %19, %23 : vector<16x20xf32>
    %c3 = arith.constant 3 : index
    %c0_14 = arith.constant 0 : index
    %c0_15 = arith.constant 0 : index
    %25 = vector.load %arg3[%c3, %c0_14, %c0_15] : memref<5x16x16xbf16, #tpu.memory_space<vmem>>, vector<1x16x16xbf16>
    %26 = vector.shape_cast %25 : vector<1x16x16xbf16> to vector<16x16xbf16>
    %27 = vector.extract_strided_slice %8 {offsets = [0, 15], sizes = [16, 20], strides = [1, 1]} : vector<16x40xbf16> to vector<16x20xbf16>
    %cst_16 = arith.constant dense<0.000000e+00> : vector<16x20xf32>
    %28 = tpu.matmul %26, %27, %cst_16 {dimension_numbers = #tpu.dot_dimension_numbers<[1], [0], [0], [1], [0, 0, 1, 1], [], []>} : vector<16x16xbf16>, vector<16x20xbf16>, vector<16x20xf32> -> vector<16x20xf32>
    %29 = arith.addf %24, %28 : vector<16x20xf32>
    %c4 = arith.constant 4 : index
    %c0_17 = arith.constant 0 : index
    %c0_18 = arith.constant 0 : index
    %30 = vector.load %arg3[%c4, %c0_17, %c0_18] : memref<5x16x16xbf16, #tpu.memory_space<vmem>>, vector<1x16x16xbf16>
    %31 = vector.shape_cast %30 : vector<1x16x16xbf16> to vector<16x16xbf16>
    %32 = vector.extract_strided_slice %8 {offsets = [0, 20], sizes = [16, 20], strides = [1, 1]} : vector<16x40xbf16> to vector<16x20xbf16>
    %cst_19 = arith.constant dense<0.000000e+00> : vector<16x20xf32>
    %33 = tpu.matmul %31, %32, %cst_19 {dimension_numbers = #tpu.dot_dimension_numbers<[1], [0], [0], [1], [0, 0, 1, 1], [], []>} : vector<16x16xbf16>, vector<16x20xbf16>, vector<16x20xf32> -> vector<16x20xf32>
    %34 = arith.addf %29, %33 : vector<16x20xf32>
    %c0_20 = arith.constant 0 : index
    %c0_21 = arith.constant 0 : index
    %35 = vector.load %arg4[%c0_20, %c0_21] : memref<16x1xf32, #tpu.memory_space<vmem>>, vector<16x1xf32>
    %36 = vector.broadcast %35 : vector<16x1xf32> to vector<16x20xf32>
    %37 = arith.addf %34, %36 : vector<16x20xf32>
    %cst_22 = arith.constant 0.000000e+00 : f32
    %38 = vector.broadcast %cst_22 : f32 to vector<16x20xf32>
    %39 = arith.cmpf oge, %37, %38 : vector<16x20xf32>
    %cst_23 = arith.constant 1.000000e-01 : f32
    %40 = vector.broadcast %cst_23 : f32 to vector<16x20xf32>
    %41 = arith.mulf %40, %37 : vector<16x20xf32>
    %42 = arith.select %39, %37, %41 : vector<16x20xi1>, vector<16x20xf32>
    %43 = tpu.iota {dimensions = array<i32: 1>} : vector<16x20xi32>
    %c-2_i32 = arith.constant -2 : i32
    %44 = vector.broadcast %c-2_i32 : i32 to vector<16x20xi32>
    %45 = arith.addi %44, %43 : vector<16x20xi32>
    %c0_i32 = arith.constant 0 : i32
    %46 = vector.broadcast %c0_i32 : i32 to vector<16x20xi32>
    %47 = arith.cmpi sge, %45, %46 : vector<16x20xi32>
    %c16_i32 = arith.constant 16 : i32
    %48 = vector.broadcast %c16_i32 : i32 to vector<16x20xi32>
    %49 = arith.cmpi slt, %45, %48 : vector<16x20xi32>
    %50 = arith.andi %47, %49 : vector<16x20xi1>
    %cst_24 = arith.constant 0.000000e+00 : f32
    %51 = vector.broadcast %cst_24 : f32 to vector<16x20xf32>
    %52 = arith.select %50, %42, %51 : vector<16x20xi1>, vector<16x20xf32>
    %53 = arith.truncf %52 : vector<16x20xf32> to vector<16x20xbf16>
    %cst_25 = arith.constant 0.000000e+00 : f32
    %54 = vector.broadcast %cst_25 : f32 to vector<16x16xf32>
    %c0_26 = arith.constant 0 : index
    %c0_27 = arith.constant 0 : index
    %c0_28 = arith.constant 0 : index
    %55 = vector.load %arg5[%c0_26, %c0_27, %c0_28] : memref<5x16x16xbf16, #tpu.memory_space<vmem>>, vector<1x16x16xbf16>
    %56 = vector.shape_cast %55 : vector<1x16x16xbf16> to vector<16x16xbf16>
    %57 = vector.extract_strided_slice %53 {offsets = [0, 0], sizes = [16, 16], strides = [1, 1]} : vector<16x20xbf16> to vector<16x16xbf16>
    %cst_29 = arith.constant dense<0.000000e+00> : vector<16x16xf32>
    %58 = tpu.matmul %56, %57, %cst_29 {dimension_numbers = #tpu.dot_dimension_numbers<[1], [0], [0], [1], [0, 0, 1, 1], [], []>} : vector<16x16xbf16>, vector<16x16xbf16>, vector<16x16xf32> -> vector<16x16xf32>
    %59 = arith.addf %54, %58 : vector<16x16xf32>
    %c1_30 = arith.constant 1 : index
    %c0_31 = arith.constant 0 : index
    %c0_32 = arith.constant 0 : index
    %60 = vector.load %arg5[%c1_30, %c0_31, %c0_32] : memref<5x16x16xbf16, #tpu.memory_space<vmem>>, vector<1x16x16xbf16>
    %61 = vector.shape_cast %60 : vector<1x16x16xbf16> to vector<16x16xbf16>
    %62 = vector.extract_strided_slice %53 {offsets = [0, 1], sizes = [16, 16], strides = [1, 1]} : vector<16x20xbf16> to vector<16x16xbf16>
    %cst_33 = arith.constant dense<0.000000e+00> : vector<16x16xf32>
    %63 = tpu.matmul %61, %62, %cst_33 {dimension_numbers = #tpu.dot_dimension_numbers<[1], [0], [0], [1], [0, 0, 1, 1], [], []>} : vector<16x16xbf16>, vector<16x16xbf16>, vector<16x16xf32> -> vector<16x16xf32>
    %64 = arith.addf %59, %63 : vector<16x16xf32>
    %c2_34 = arith.constant 2 : index
    %c0_35 = arith.constant 0 : index
    %c0_36 = arith.constant 0 : index
    %65 = vector.load %arg5[%c2_34, %c0_35, %c0_36] : memref<5x16x16xbf16, #tpu.memory_space<vmem>>, vector<1x16x16xbf16>
    %66 = vector.shape_cast %65 : vector<1x16x16xbf16> to vector<16x16xbf16>
    %67 = vector.extract_strided_slice %53 {offsets = [0, 2], sizes = [16, 16], strides = [1, 1]} : vector<16x20xbf16> to vector<16x16xbf16>
    %cst_37 = arith.constant dense<0.000000e+00> : vector<16x16xf32>
    %68 = tpu.matmul %66, %67, %cst_37 {dimension_numbers = #tpu.dot_dimension_numbers<[1], [0], [0], [1], [0, 0, 1, 1], [], []>} : vector<16x16xbf16>, vector<16x16xbf16>, vector<16x16xf32> -> vector<16x16xf32>
    %69 = arith.addf %64, %68 : vector<16x16xf32>
    %c3_38 = arith.constant 3 : index
    %c0_39 = arith.constant 0 : index
    %c0_40 = arith.constant 0 : index
    %70 = vector.load %arg5[%c3_38, %c0_39, %c0_40] : memref<5x16x16xbf16, #tpu.memory_space<vmem>>, vector<1x16x16xbf16>
    %71 = vector.shape_cast %70 : vector<1x16x16xbf16> to vector<16x16xbf16>
    %72 = vector.extract_strided_slice %53 {offsets = [0, 3], sizes = [16, 16], strides = [1, 1]} : vector<16x20xbf16> to vector<16x16xbf16>
    %cst_41 = arith.constant dense<0.000000e+00> : vector<16x16xf32>
    %73 = tpu.matmul %71, %72, %cst_41 {dimension_numbers = #tpu.dot_dimension_numbers<[1], [0], [0], [1], [0, 0, 1, 1], [], []>} : vector<16x16xbf16>, vector<16x16xbf16>, vector<16x16xf32> -> vector<16x16xf32>
    %74 = arith.addf %69, %73 : vector<16x16xf32>
    %c4_42 = arith.constant 4 : index
    %c0_43 = arith.constant 0 : index
    %c0_44 = arith.constant 0 : index
    %75 = vector.load %arg5[%c4_42, %c0_43, %c0_44] : memref<5x16x16xbf16, #tpu.memory_space<vmem>>, vector<1x16x16xbf16>
    %76 = vector.shape_cast %75 : vector<1x16x16xbf16> to vector<16x16xbf16>
    %77 = vector.extract_strided_slice %53 {offsets = [0, 4], sizes = [16, 16], strides = [1, 1]} : vector<16x20xbf16> to vector<16x16xbf16>
    %cst_45 = arith.constant dense<0.000000e+00> : vector<16x16xf32>
    %78 = tpu.matmul %76, %77, %cst_45 {dimension_numbers = #tpu.dot_dimension_numbers<[1], [0], [0], [1], [0, 0, 1, 1], [], []>} : vector<16x16xbf16>, vector<16x16xbf16>, vector<16x16xf32> -> vector<16x16xf32>
    %79 = arith.addf %74, %78 : vector<16x16xf32>
    %c0_46 = arith.constant 0 : index
    %c0_47 = arith.constant 0 : index
    %80 = vector.load %arg6[%c0_46, %c0_47] : memref<16x1xf32, #tpu.memory_space<vmem>>, vector<16x1xf32>
    %81 = vector.broadcast %80 : vector<16x1xf32> to vector<16x16xf32>
    %82 = arith.addf %79, %81 : vector<16x16xf32>
    %c0_48 = arith.constant 0 : index
    %c0_49 = arith.constant 0 : index
    %c12 = arith.constant 12 : index
    %83 = vector.load %arg2[%c0_48, %c0_49, %c12] : memref<1x16x40xbf16, #tpu.memory_space<vmem>>, vector<1x16x16xbf16>
    %84 = vector.shape_cast %83 : vector<1x16x16xbf16> to vector<16x16xbf16>
    %85 = arith.extf %84 : vector<16x16xbf16> to vector<16x16xf32>
    %86 = arith.addf %82, %85 : vector<16x16xf32>
    %c0_50 = arith.constant 0 : index
    %c0_51 = arith.constant 0 : index
    %c0_52 = arith.constant 0 : index
    %87 = vector.load %arg7[%c0_50, %c0_51, %c0_52] : memref<1x16x16xbf16, #tpu.memory_space<vmem>>, vector<1x16x16xbf16>
    %88 = vector.shape_cast %87 : vector<1x16x16xbf16> to vector<16x16xbf16>
    %89 = arith.extf %88 : vector<16x16xbf16> to vector<16x16xf32>
    %90 = arith.addf %86, %89 : vector<16x16xf32>
    %cst_53 = arith.constant 5.000000e-01 : f32
    %91 = vector.broadcast %cst_53 : f32 to vector<16x16xf32>
    %92 = arith.mulf %90, %91 : vector<16x16xf32>
    %93 = arith.truncf %92 : vector<16x16xf32> to vector<16x16xbf16>
    %c0_54 = arith.constant 0 : index
    %c0_55 = arith.constant 0 : index
    %c0_56 = arith.constant 0 : index
    %94 = vector.load %arg8[%c0_54, %c0_55, %c0_56] : memref<1x16x16xbf16, #tpu.memory_space<vmem>>, vector<1x16x16xbf16>
    %95 = vector.shape_cast %94 : vector<1x16x16xbf16> to vector<16x16xbf16>
    %96 = vector.shape_cast %93 : vector<16x16xbf16> to vector<1x16x16xbf16>
    tpu.vector_store %arg8[%c0_54, %c0_55, %c0_56], %96 {strides = array<i32>} : memref<1x16x16xbf16, #tpu.memory_space<vmem>>, vector<1x16x16xbf16>,
    return
  }
  func.func @transform_0(%arg0: i32, %arg1: i32) -> (i32, i32, i32) {
    %c0_i32 = arith.constant 0 : i32
    %c0_i32_0 = arith.constant 0 : i32
    %c0_i32_1 = arith.constant 0 : i32
    return %arg0, %c0_i32, %c0_i32_0 : i32, i32, i32
  }
  func.func @transform_1(%arg0: i32, %arg1: i32) -> (i32, i32, i32) {
    %c0_i32 = arith.constant 0 : i32
    %c0_i32_0 = arith.constant 0 : i32
    %c0_i32_1 = arith.constant 0 : i32
    %c0_i32_2 = arith.constant 0 : i32
    return %c0_i32, %c0_i32_0, %c0_i32_1 : i32, i32, i32
  }
  func.func @transform_2(%arg0: i32, %arg1: i32) -> (i32, i32) {
    %c0_i32 = arith.constant 0 : i32
    %c0_i32_0 = arith.constant 0 : i32
    %c0_i32_1 = arith.constant 0 : i32
    return %c0_i32, %c0_i32_0 : i32, i32
  }
  func.func @transform_3(%arg0: i32, %arg1: i32) -> (i32, i32, i32) {
    %c0_i32 = arith.constant 0 : i32
    %c0_i32_0 = arith.constant 0 : i32
    %c0_i32_1 = arith.constant 0 : i32
    %c0_i32_2 = arith.constant 0 : i32
    return %c0_i32, %c0_i32_0, %c0_i32_1 : i32, i32, i32
  }
  func.func @transform_4(%arg0: i32, %arg1: i32) -> (i32, i32) {
    %c0_i32 = arith.constant 0 : i32
    %c0_i32_0 = arith.constant 0 : i32
    %c0_i32_1 = arith.constant 0 : i32
    return %c0_i32, %c0_i32_0 : i32, i32
  }
  func.func @transform_5(%arg0: i32, %arg1: i32) -> (i32, i32, i32) {
    %c0_i32 = arith.constant 0 : i32
    %c0_i32_0 = arith.constant 0 : i32
    return %arg0, %c0_i32, %arg1 : i32, i32, i32
  }
  func.func @transform_6(%arg0: i32, %arg1: i32) -> (i32, i32, i32) {
    %c0_i32 = arith.constant 0 : i32
    %c0_i32_0 = arith.constant 0 : i32
    return %arg0, %c0_i32, %arg1 : i32, i32, i32
  }
}

module attributes {stable_mosaic.version = 11 : i64} {
  func.func @_conv_pair_kernel(%arg0: i32, %arg1: i32, %arg2: memref<1x16x32xbf16, #tpu.memory_space<vmem>>, %arg3: memref<5x16x16xbf16, #tpu.memory_space<vmem>>, %arg4: memref<16x1xf32, #tpu.memory_space<vmem>>, %arg5: memref<5x16x16xbf16, #tpu.memory_space<vmem>>, %arg6: memref<16x1xf32, #tpu.memory_space<vmem>>, %arg7: memref<1x16x16xbf16, #tpu.memory_space<vmem>>) attributes {dimension_semantics = [#tpu.dimension_semantics<parallel>, #tpu.dimension_semantics<parallel>], iteration_bounds = array<i64: 2, 1>, scalar_prefetch = 0 : i64, scratch_operands = 0 : i64, tpu.core_type = #tpu.core_type<tc>, window_params = [{transform_indices = @transform_0, window_bounds = array<i64: 1, 16, 32>}, {pipeline_mode = #tpu.pipeline_mode<synchronous>, transform_indices = @transform_1, window_bounds = array<i64: 5, 16, 16>}, {pipeline_mode = #tpu.pipeline_mode<synchronous>, transform_indices = @transform_2, window_bounds = array<i64: 16, 1>}, {pipeline_mode = #tpu.pipeline_mode<synchronous>, transform_indices = @transform_3, window_bounds = array<i64: 5, 16, 16>}, {pipeline_mode = #tpu.pipeline_mode<synchronous>, transform_indices = @transform_4, window_bounds = array<i64: 16, 1>}, {transform_indices = @transform_5, window_bounds = array<i64: 1, 16, 16>}]} {
    %c0 = arith.constant 0 : index
    %c0_0 = arith.constant 0 : index
    %c0_1 = arith.constant 0 : index
    %0 = vector.load %arg2[%c0, %c0_0, %c0_1] : memref<1x16x32xbf16, #tpu.memory_space<vmem>>, vector<1x16x32xbf16>
    %1 = vector.shape_cast %0 : vector<1x16x32xbf16> to vector<16x32xbf16>
    %2 = arith.extf %1 : vector<16x32xbf16> to vector<16x32xf32>
    %cst = arith.constant 0.000000e+00 : f32
    %3 = vector.broadcast %cst : f32 to vector<16x32xf32>
    %4 = arith.cmpf oge, %2, %3 : vector<16x32xf32>
    %cst_2 = arith.constant 1.000000e-01 : f32
    %5 = vector.broadcast %cst_2 : f32 to vector<16x32xf32>
    %6 = arith.mulf %5, %2 : vector<16x32xf32>
    %7 = arith.select %4, %2, %6 : vector<16x32xi1>, vector<16x32xf32>
    %8 = arith.truncf %7 : vector<16x32xf32> to vector<16x32xbf16>
    %cst_3 = arith.constant 0.000000e+00 : f32
    %9 = vector.broadcast %cst_3 : f32 to vector<16x20xf32>
    %c0_4 = arith.constant 0 : index
    %c0_5 = arith.constant 0 : index
    %c0_6 = arith.constant 0 : index
    %10 = vector.load %arg3[%c0_4, %c0_5, %c0_6] : memref<5x16x16xbf16, #tpu.memory_space<vmem>>, vector<1x16x16xbf16>
    %11 = vector.shape_cast %10 : vector<1x16x16xbf16> to vector<16x16xbf16>
    %12 = vector.extract_strided_slice %8 {offsets = [0, 0], sizes = [16, 20], strides = [1, 1]} : vector<16x32xbf16> to vector<16x20xbf16>
    %cst_7 = arith.constant dense<0.000000e+00> : vector<16x20xf32>
    %13 = tpu.matmul %11, %12, %cst_7 {dimension_numbers = #tpu.dot_dimension_numbers<[1], [0], [0], [1], [0, 0, 1, 1], [], []>} : vector<16x16xbf16>, vector<16x20xbf16>, vector<16x20xf32> -> vector<16x20xf32>
    %14 = arith.addf %9, %13 : vector<16x20xf32>
    %c1 = arith.constant 1 : index
    %c0_8 = arith.constant 0 : index
    %c0_9 = arith.constant 0 : index
    %15 = vector.load %arg3[%c1, %c0_8, %c0_9] : memref<5x16x16xbf16, #tpu.memory_space<vmem>>, vector<1x16x16xbf16>
    %16 = vector.shape_cast %15 : vector<1x16x16xbf16> to vector<16x16xbf16>
    %17 = vector.extract_strided_slice %8 {offsets = [0, 3], sizes = [16, 20], strides = [1, 1]} : vector<16x32xbf16> to vector<16x20xbf16>
    %cst_10 = arith.constant dense<0.000000e+00> : vector<16x20xf32>
    %18 = tpu.matmul %16, %17, %cst_10 {dimension_numbers = #tpu.dot_dimension_numbers<[1], [0], [0], [1], [0, 0, 1, 1], [], []>} : vector<16x16xbf16>, vector<16x20xbf16>, vector<16x20xf32> -> vector<16x20xf32>
    %19 = arith.addf %14, %18 : vector<16x20xf32>
    %c2 = arith.constant 2 : index
    %c0_11 = arith.constant 0 : index
    %c0_12 = arith.constant 0 : index
    %20 = vector.load %arg3[%c2, %c0_11, %c0_12] : memref<5x16x16xbf16, #tpu.memory_space<vmem>>, vector<1x16x16xbf16>
    %21 = vector.shape_cast %20 : vector<1x16x16xbf16> to vector<16x16xbf16>
    %22 = vector.extract_strided_slice %8 {offsets = [0, 6], sizes = [16, 20], strides = [1, 1]} : vector<16x32xbf16> to vector<16x20xbf16>
    %cst_13 = arith.constant dense<0.000000e+00> : vector<16x20xf32>
    %23 = tpu.matmul %21, %22, %cst_13 {dimension_numbers = #tpu.dot_dimension_numbers<[1], [0], [0], [1], [0, 0, 1, 1], [], []>} : vector<16x16xbf16>, vector<16x20xbf16>, vector<16x20xf32> -> vector<16x20xf32>
    %24 = arith.addf %19, %23 : vector<16x20xf32>
    %c3 = arith.constant 3 : index
    %c0_14 = arith.constant 0 : index
    %c0_15 = arith.constant 0 : index
    %25 = vector.load %arg3[%c3, %c0_14, %c0_15] : memref<5x16x16xbf16, #tpu.memory_space<vmem>>, vector<1x16x16xbf16>
    %26 = vector.shape_cast %25 : vector<1x16x16xbf16> to vector<16x16xbf16>
    %27 = vector.extract_strided_slice %8 {offsets = [0, 9], sizes = [16, 20], strides = [1, 1]} : vector<16x32xbf16> to vector<16x20xbf16>
    %cst_16 = arith.constant dense<0.000000e+00> : vector<16x20xf32>
    %28 = tpu.matmul %26, %27, %cst_16 {dimension_numbers = #tpu.dot_dimension_numbers<[1], [0], [0], [1], [0, 0, 1, 1], [], []>} : vector<16x16xbf16>, vector<16x20xbf16>, vector<16x20xf32> -> vector<16x20xf32>
    %29 = arith.addf %24, %28 : vector<16x20xf32>
    %c4 = arith.constant 4 : index
    %c0_17 = arith.constant 0 : index
    %c0_18 = arith.constant 0 : index
    %30 = vector.load %arg3[%c4, %c0_17, %c0_18] : memref<5x16x16xbf16, #tpu.memory_space<vmem>>, vector<1x16x16xbf16>
    %31 = vector.shape_cast %30 : vector<1x16x16xbf16> to vector<16x16xbf16>
    %32 = vector.extract_strided_slice %8 {offsets = [0, 12], sizes = [16, 20], strides = [1, 1]} : vector<16x32xbf16> to vector<16x20xbf16>
    %cst_19 = arith.constant dense<0.000000e+00> : vector<16x20xf32>
    %33 = tpu.matmul %31, %32, %cst_19 {dimension_numbers = #tpu.dot_dimension_numbers<[1], [0], [0], [1], [0, 0, 1, 1], [], []>} : vector<16x16xbf16>, vector<16x20xbf16>, vector<16x20xf32> -> vector<16x20xf32>
    %34 = arith.addf %29, %33 : vector<16x20xf32>
    %c0_20 = arith.constant 0 : index
    %c0_21 = arith.constant 0 : index
    %35 = vector.load %arg4[%c0_20, %c0_21] : memref<16x1xf32, #tpu.memory_space<vmem>>, vector<16x1xf32>
    %36 = vector.broadcast %35 : vector<16x1xf32> to vector<16x20xf32>
    %37 = arith.addf %34, %36 : vector<16x20xf32>
    %cst_22 = arith.constant 0.000000e+00 : f32
    %38 = vector.broadcast %cst_22 : f32 to vector<16x20xf32>
    %39 = arith.cmpf oge, %37, %38 : vector<16x20xf32>
    %cst_23 = arith.constant 1.000000e-01 : f32
    %40 = vector.broadcast %cst_23 : f32 to vector<16x20xf32>
    %41 = arith.mulf %40, %37 : vector<16x20xf32>
    %42 = arith.select %39, %37, %41 : vector<16x20xi1>, vector<16x20xf32>
    %43 = tpu.iota {dimensions = array<i32: 1>} : vector<16x20xi32>
    %c-2_i32 = arith.constant -2 : i32
    %44 = vector.broadcast %c-2_i32 : i32 to vector<16x20xi32>
    %45 = arith.addi %44, %43 : vector<16x20xi32>
    %c0_i32 = arith.constant 0 : i32
    %46 = vector.broadcast %c0_i32 : i32 to vector<16x20xi32>
    %47 = arith.cmpi sge, %45, %46 : vector<16x20xi32>
    %c16_i32 = arith.constant 16 : i32
    %48 = vector.broadcast %c16_i32 : i32 to vector<16x20xi32>
    %49 = arith.cmpi slt, %45, %48 : vector<16x20xi32>
    %50 = arith.andi %47, %49 : vector<16x20xi1>
    %cst_24 = arith.constant 0.000000e+00 : f32
    %51 = vector.broadcast %cst_24 : f32 to vector<16x20xf32>
    %52 = arith.select %50, %42, %51 : vector<16x20xi1>, vector<16x20xf32>
    %53 = arith.truncf %52 : vector<16x20xf32> to vector<16x20xbf16>
    %cst_25 = arith.constant 0.000000e+00 : f32
    %54 = vector.broadcast %cst_25 : f32 to vector<16x16xf32>
    %c0_26 = arith.constant 0 : index
    %c0_27 = arith.constant 0 : index
    %c0_28 = arith.constant 0 : index
    %55 = vector.load %arg5[%c0_26, %c0_27, %c0_28] : memref<5x16x16xbf16, #tpu.memory_space<vmem>>, vector<1x16x16xbf16>
    %56 = vector.shape_cast %55 : vector<1x16x16xbf16> to vector<16x16xbf16>
    %57 = vector.extract_strided_slice %53 {offsets = [0, 0], sizes = [16, 16], strides = [1, 1]} : vector<16x20xbf16> to vector<16x16xbf16>
    %cst_29 = arith.constant dense<0.000000e+00> : vector<16x16xf32>
    %58 = tpu.matmul %56, %57, %cst_29 {dimension_numbers = #tpu.dot_dimension_numbers<[1], [0], [0], [1], [0, 0, 1, 1], [], []>} : vector<16x16xbf16>, vector<16x16xbf16>, vector<16x16xf32> -> vector<16x16xf32>
    %59 = arith.addf %54, %58 : vector<16x16xf32>
    %c1_30 = arith.constant 1 : index
    %c0_31 = arith.constant 0 : index
    %c0_32 = arith.constant 0 : index
    %60 = vector.load %arg5[%c1_30, %c0_31, %c0_32] : memref<5x16x16xbf16, #tpu.memory_space<vmem>>, vector<1x16x16xbf16>
    %61 = vector.shape_cast %60 : vector<1x16x16xbf16> to vector<16x16xbf16>
    %62 = vector.extract_strided_slice %53 {offsets = [0, 1], sizes = [16, 16], strides = [1, 1]} : vector<16x20xbf16> to vector<16x16xbf16>
    %cst_33 = arith.constant dense<0.000000e+00> : vector<16x16xf32>
    %63 = tpu.matmul %61, %62, %cst_33 {dimension_numbers = #tpu.dot_dimension_numbers<[1], [0], [0], [1], [0, 0, 1, 1], [], []>} : vector<16x16xbf16>, vector<16x16xbf16>, vector<16x16xf32> -> vector<16x16xf32>
    %64 = arith.addf %59, %63 : vector<16x16xf32>
    %c2_34 = arith.constant 2 : index
    %c0_35 = arith.constant 0 : index
    %c0_36 = arith.constant 0 : index
    %65 = vector.load %arg5[%c2_34, %c0_35, %c0_36] : memref<5x16x16xbf16, #tpu.memory_space<vmem>>, vector<1x16x16xbf16>
    %66 = vector.shape_cast %65 : vector<1x16x16xbf16> to vector<16x16xbf16>
    %67 = vector.extract_strided_slice %53 {offsets = [0, 2], sizes = [16, 16], strides = [1, 1]} : vector<16x20xbf16> to vector<16x16xbf16>
    %cst_37 = arith.constant dense<0.000000e+00> : vector<16x16xf32>
    %68 = tpu.matmul %66, %67, %cst_37 {dimension_numbers = #tpu.dot_dimension_numbers<[1], [0], [0], [1], [0, 0, 1, 1], [], []>} : vector<16x16xbf16>, vector<16x16xbf16>, vector<16x16xf32> -> vector<16x16xf32>
    %69 = arith.addf %64, %68 : vector<16x16xf32>
    %c3_38 = arith.constant 3 : index
    %c0_39 = arith.constant 0 : index
    %c0_40 = arith.constant 0 : index
    %70 = vector.load %arg5[%c3_38, %c0_39, %c0_40] : memref<5x16x16xbf16, #tpu.memory_space<vmem>>, vector<1x16x16xbf16>
    %71 = vector.shape_cast %70 : vector<1x16x16xbf16> to vector<16x16xbf16>
    %72 = vector.extract_strided_slice %53 {offsets = [0, 3], sizes = [16, 16], strides = [1, 1]} : vector<16x20xbf16> to vector<16x16xbf16>
    %cst_41 = arith.constant dense<0.000000e+00> : vector<16x16xf32>
    %73 = tpu.matmul %71, %72, %cst_41 {dimension_numbers = #tpu.dot_dimension_numbers<[1], [0], [0], [1], [0, 0, 1, 1], [], []>} : vector<16x16xbf16>, vector<16x16xbf16>, vector<16x16xf32> -> vector<16x16xf32>
    %74 = arith.addf %69, %73 : vector<16x16xf32>
    %c4_42 = arith.constant 4 : index
    %c0_43 = arith.constant 0 : index
    %c0_44 = arith.constant 0 : index
    %75 = vector.load %arg5[%c4_42, %c0_43, %c0_44] : memref<5x16x16xbf16, #tpu.memory_space<vmem>>, vector<1x16x16xbf16>
    %76 = vector.shape_cast %75 : vector<1x16x16xbf16> to vector<16x16xbf16>
    %77 = vector.extract_strided_slice %53 {offsets = [0, 4], sizes = [16, 16], strides = [1, 1]} : vector<16x20xbf16> to vector<16x16xbf16>
    %cst_45 = arith.constant dense<0.000000e+00> : vector<16x16xf32>
    %78 = tpu.matmul %76, %77, %cst_45 {dimension_numbers = #tpu.dot_dimension_numbers<[1], [0], [0], [1], [0, 0, 1, 1], [], []>} : vector<16x16xbf16>, vector<16x16xbf16>, vector<16x16xf32> -> vector<16x16xf32>
    %79 = arith.addf %74, %78 : vector<16x16xf32>
    %c0_46 = arith.constant 0 : index
    %c0_47 = arith.constant 0 : index
    %80 = vector.load %arg6[%c0_46, %c0_47] : memref<16x1xf32, #tpu.memory_space<vmem>>, vector<16x1xf32>
    %81 = vector.broadcast %80 : vector<16x1xf32> to vector<16x16xf32>
    %82 = arith.addf %79, %81 : vector<16x16xf32>
    %c0_48 = arith.constant 0 : index
    %c0_49 = arith.constant 0 : index
    %c8 = arith.constant 8 : index
    %83 = vector.load %arg2[%c0_48, %c0_49, %c8] : memref<1x16x32xbf16, #tpu.memory_space<vmem>>, vector<1x16x16xbf16>
    %84 = vector.shape_cast %83 : vector<1x16x16xbf16> to vector<16x16xbf16>
    %85 = arith.extf %84 : vector<16x16xbf16> to vector<16x16xf32>
    %86 = arith.addf %82, %85 : vector<16x16xf32>
    %87 = arith.truncf %86 : vector<16x16xf32> to vector<16x16xbf16>
    %c0_50 = arith.constant 0 : index
    %c0_51 = arith.constant 0 : index
    %c0_52 = arith.constant 0 : index
    %88 = vector.load %arg7[%c0_50, %c0_51, %c0_52] : memref<1x16x16xbf16, #tpu.memory_space<vmem>>, vector<1x16x16xbf16>
    %89 = vector.shape_cast %88 : vector<1x16x16xbf16> to vector<16x16xbf16>
    %90 = vector.shape_cast %87 : vector<16x16xbf16> to vector<1x16x16xbf16>
    tpu.vector_store %arg7[%c0_50, %c0_51, %c0_52], %90 {strides = array<i32>} : memref<1x16x16xbf16, #tpu.memory_space<vmem>>, vector<1x16x16xbf16>,
    return
  }
  func.func @transform_0(%arg0: i32, %arg1: i32) -> (i32, i32, i32) {
    %c0_i32 = arith.constant 0 : i32
    %c0_i32_0 = arith.constant 0 : i32
    %c0_i32_1 = arith.constant 0 : i32
    return %arg0, %c0_i32, %c0_i32_0 : i32, i32, i32
  }
  func.func @transform_1(%arg0: i32, %arg1: i32) -> (i32, i32, i32) {
    %c0_i32 = arith.constant 0 : i32
    %c0_i32_0 = arith.constant 0 : i32
    %c0_i32_1 = arith.constant 0 : i32
    %c0_i32_2 = arith.constant 0 : i32
    return %c0_i32, %c0_i32_0, %c0_i32_1 : i32, i32, i32
  }
  func.func @transform_2(%arg0: i32, %arg1: i32) -> (i32, i32) {
    %c0_i32 = arith.constant 0 : i32
    %c0_i32_0 = arith.constant 0 : i32
    %c0_i32_1 = arith.constant 0 : i32
    return %c0_i32, %c0_i32_0 : i32, i32
  }
  func.func @transform_3(%arg0: i32, %arg1: i32) -> (i32, i32, i32) {
    %c0_i32 = arith.constant 0 : i32
    %c0_i32_0 = arith.constant 0 : i32
    %c0_i32_1 = arith.constant 0 : i32
    %c0_i32_2 = arith.constant 0 : i32
    return %c0_i32, %c0_i32_0, %c0_i32_1 : i32, i32, i32
  }
  func.func @transform_4(%arg0: i32, %arg1: i32) -> (i32, i32) {
    %c0_i32 = arith.constant 0 : i32
    %c0_i32_0 = arith.constant 0 : i32
    %c0_i32_1 = arith.constant 0 : i32
    return %c0_i32, %c0_i32_0 : i32, i32
  }
  func.func @transform_5(%arg0: i32, %arg1: i32) -> (i32, i32, i32) {
    %c0_i32 = arith.constant 0 : i32
    %c0_i32_0 = arith.constant 0 : i32
    return %arg0, %c0_i32, %arg1 : i32, i32, i32
  }
}

module attributes {stable_mosaic.version = 11 : i64} {
  func.func @_tconv_kernel(%arg0: i32, %arg1: i32, %arg2: memref<1x16x18xbf16, #tpu.memory_space<vmem>>, %arg3: memref<4x8x16xbf16, #tpu.memory_space<vmem>>, %arg4: memref<8x1xf32, #tpu.memory_space<vmem>>, %arg5: memref<1x2x8x16xbf16, #tpu.memory_space<vmem>>) attributes {dimension_semantics = [#tpu.dimension_semantics<parallel>, #tpu.dimension_semantics<parallel>], iteration_bounds = array<i64: 2, 1>, scalar_prefetch = 0 : i64, scratch_operands = 0 : i64, tpu.core_type = #tpu.core_type<tc>, window_params = [{transform_indices = @transform_0, window_bounds = array<i64: 1, 16, 18>}, {pipeline_mode = #tpu.pipeline_mode<synchronous>, transform_indices = @transform_1, window_bounds = array<i64: 4, 8, 16>}, {pipeline_mode = #tpu.pipeline_mode<synchronous>, transform_indices = @transform_2, window_bounds = array<i64: 8, 1>}, {transform_indices = @transform_3, window_bounds = array<i64: 1, 2, 8, 16>}]} {
    %c0 = arith.constant 0 : index
    %c0_0 = arith.constant 0 : index
    %c0_1 = arith.constant 0 : index
    %0 = vector.load %arg2[%c0, %c0_0, %c0_1] : memref<1x16x18xbf16, #tpu.memory_space<vmem>>, vector<1x16x18xbf16>
    %1 = vector.shape_cast %0 : vector<1x16x18xbf16> to vector<16x18xbf16>
    %2 = arith.extf %1 : vector<16x18xbf16> to vector<16x18xf32>
    %cst = arith.constant 0.000000e+00 : f32
    %3 = vector.broadcast %cst : f32 to vector<16x18xf32>
    %4 = arith.cmpf oge, %2, %3 : vector<16x18xf32>
    %cst_2 = arith.constant 1.000000e-01 : f32
    %5 = vector.broadcast %cst_2 : f32 to vector<16x18xf32>
    %6 = arith.mulf %5, %2 : vector<16x18xf32>
    %7 = arith.select %4, %2, %6 : vector<16x18xi1>, vector<16x18xf32>
    %8 = arith.truncf %7 : vector<16x18xf32> to vector<16x18xbf16>
    %cst_3 = arith.constant 0.000000e+00 : f32
    %9 = vector.broadcast %cst_3 : f32 to vector<8x16xf32>
    %c1 = arith.constant 1 : index
    %c0_4 = arith.constant 0 : index
    %c0_5 = arith.constant 0 : index
    %10 = vector.load %arg3[%c1, %c0_4, %c0_5] : memref<4x8x16xbf16, #tpu.memory_space<vmem>>, vector<1x8x16xbf16>
    %11 = vector.shape_cast %10 : vector<1x8x16xbf16> to vector<8x16xbf16>
    %12 = vector.extract_strided_slice %8 {offsets = [0, 1], sizes = [16, 16], strides = [1, 1]} : vector<16x18xbf16> to vector<16x16xbf16>
    %cst_6 = arith.constant dense<0.000000e+00> : vector<8x16xf32>
    %13 = tpu.matmul %11, %12, %cst_6 {dimension_numbers = #tpu.dot_dimension_numbers<[1], [0], [0], [1], [0, 0, 1, 1], [], []>} : vector<8x16xbf16>, vector<16x16xbf16>, vector<8x16xf32> -> vector<8x16xf32>
    %14 = arith.addf %9, %13 : vector<8x16xf32>
    %c3 = arith.constant 3 : index
    %c0_7 = arith.constant 0 : index
    %c0_8 = arith.constant 0 : index
    %15 = vector.load %arg3[%c3, %c0_7, %c0_8] : memref<4x8x16xbf16, #tpu.memory_space<vmem>>, vector<1x8x16xbf16>
    %16 = vector.shape_cast %15 : vector<1x8x16xbf16> to vector<8x16xbf16>
    %17 = vector.extract_strided_slice %8 {offsets = [0, 0], sizes = [16, 16], strides = [1, 1]} : vector<16x18xbf16> to vector<16x16xbf16>
    %cst_9 = arith.constant dense<0.000000e+00> : vector<8x16xf32>
    %18 = tpu.matmul %16, %17, %cst_9 {dimension_numbers = #tpu.dot_dimension_numbers<[1], [0], [0], [1], [0, 0, 1, 1], [], []>} : vector<8x16xbf16>, vector<16x16xbf16>, vector<8x16xf32> -> vector<8x16xf32>
    %19 = arith.addf %14, %18 : vector<8x16xf32>
    %c0_10 = arith.constant 0 : index
    %c0_11 = arith.constant 0 : index
    %20 = vector.load %arg4[%c0_10, %c0_11] : memref<8x1xf32, #tpu.memory_space<vmem>>, vector<8x1xf32>
    %21 = vector.broadcast %20 : vector<8x1xf32> to vector<8x16xf32>
    %22 = arith.addf %19, %21 : vector<8x16xf32>
    %23 = arith.truncf %22 : vector<8x16xf32> to vector<8x16xbf16>
    %c0_12 = arith.constant 0 : index
    %c0_13 = arith.constant 0 : index
    %c0_14 = arith.constant 0 : index
    %c0_15 = arith.constant 0 : index
    %24 = vector.load %arg5[%c0_12, %c0_13, %c0_14, %c0_15] : memref<1x2x8x16xbf16, #tpu.memory_space<vmem>>, vector<1x1x8x16xbf16>
    %25 = vector.shape_cast %24 : vector<1x1x8x16xbf16> to vector<8x16xbf16>
    %26 = vector.shape_cast %23 : vector<8x16xbf16> to vector<1x1x8x16xbf16>
    tpu.vector_store %arg5[%c0_12, %c0_13, %c0_14, %c0_15], %26 {strides = array<i32>} : memref<1x2x8x16xbf16, #tpu.memory_space<vmem>>, vector<1x1x8x16xbf16>,
    %cst_16 = arith.constant 0.000000e+00 : f32
    %27 = vector.broadcast %cst_16 : f32 to vector<8x16xf32>
    %c0_17 = arith.constant 0 : index
    %c0_18 = arith.constant 0 : index
    %c0_19 = arith.constant 0 : index
    %28 = vector.load %arg3[%c0_17, %c0_18, %c0_19] : memref<4x8x16xbf16, #tpu.memory_space<vmem>>, vector<1x8x16xbf16>
    %29 = vector.shape_cast %28 : vector<1x8x16xbf16> to vector<8x16xbf16>
    %30 = vector.extract_strided_slice %8 {offsets = [0, 2], sizes = [16, 16], strides = [1, 1]} : vector<16x18xbf16> to vector<16x16xbf16>
    %cst_20 = arith.constant dense<0.000000e+00> : vector<8x16xf32>
    %31 = tpu.matmul %29, %30, %cst_20 {dimension_numbers = #tpu.dot_dimension_numbers<[1], [0], [0], [1], [0, 0, 1, 1], [], []>} : vector<8x16xbf16>, vector<16x16xbf16>, vector<8x16xf32> -> vector<8x16xf32>
    %32 = arith.addf %27, %31 : vector<8x16xf32>
    %c2 = arith.constant 2 : index
    %c0_21 = arith.constant 0 : index
    %c0_22 = arith.constant 0 : index
    %33 = vector.load %arg3[%c2, %c0_21, %c0_22] : memref<4x8x16xbf16, #tpu.memory_space<vmem>>, vector<1x8x16xbf16>
    %34 = vector.shape_cast %33 : vector<1x8x16xbf16> to vector<8x16xbf16>
    %35 = vector.extract_strided_slice %8 {offsets = [0, 1], sizes = [16, 16], strides = [1, 1]} : vector<16x18xbf16> to vector<16x16xbf16>
    %cst_23 = arith.constant dense<0.000000e+00> : vector<8x16xf32>
    %36 = tpu.matmul %34, %35, %cst_23 {dimension_numbers = #tpu.dot_dimension_numbers<[1], [0], [0], [1], [0, 0, 1, 1], [], []>} : vector<8x16xbf16>, vector<16x16xbf16>, vector<8x16xf32> -> vector<8x16xf32>
    %37 = arith.addf %32, %36 : vector<8x16xf32>
    %c0_24 = arith.constant 0 : index
    %c0_25 = arith.constant 0 : index
    %38 = vector.load %arg4[%c0_24, %c0_25] : memref<8x1xf32, #tpu.memory_space<vmem>>, vector<8x1xf32>
    %39 = vector.broadcast %38 : vector<8x1xf32> to vector<8x16xf32>
    %40 = arith.addf %37, %39 : vector<8x16xf32>
    %41 = arith.truncf %40 : vector<8x16xf32> to vector<8x16xbf16>
    %c0_26 = arith.constant 0 : index
    %c1_27 = arith.constant 1 : index
    %c0_28 = arith.constant 0 : index
    %c0_29 = arith.constant 0 : index
    %42 = vector.load %arg5[%c0_26, %c1_27, %c0_28, %c0_29] : memref<1x2x8x16xbf16, #tpu.memory_space<vmem>>, vector<1x1x8x16xbf16>
    %43 = vector.shape_cast %42 : vector<1x1x8x16xbf16> to vector<8x16xbf16>
    %44 = vector.shape_cast %41 : vector<8x16xbf16> to vector<1x1x8x16xbf16>
    tpu.vector_store %arg5[%c0_26, %c1_27, %c0_28, %c0_29], %44 {strides = array<i32>} : memref<1x2x8x16xbf16, #tpu.memory_space<vmem>>, vector<1x1x8x16xbf16>,
    return
  }
  func.func @transform_0(%arg0: i32, %arg1: i32) -> (i32, i32, i32) {
    %c0_i32 = arith.constant 0 : i32
    %c0_i32_0 = arith.constant 0 : i32
    %c0_i32_1 = arith.constant 0 : i32
    return %arg0, %c0_i32, %c0_i32_0 : i32, i32, i32
  }
  func.func @transform_1(%arg0: i32, %arg1: i32) -> (i32, i32, i32) {
    %c0_i32 = arith.constant 0 : i32
    %c0_i32_0 = arith.constant 0 : i32
    %c0_i32_1 = arith.constant 0 : i32
    %c0_i32_2 = arith.constant 0 : i32
    return %c0_i32, %c0_i32_0, %c0_i32_1 : i32, i32, i32
  }
  func.func @transform_2(%arg0: i32, %arg1: i32) -> (i32, i32) {
    %c0_i32 = arith.constant 0 : i32
    %c0_i32_0 = arith.constant 0 : i32
    %c0_i32_1 = arith.constant 0 : i32
    return %c0_i32, %c0_i32_0 : i32, i32
  }
  func.func @transform_3(%arg0: i32, %arg1: i32) -> (i32, i32, i32, i32) {
    %c0_i32 = arith.constant 0 : i32
    %c0_i32_0 = arith.constant 0 : i32
    %c0_i32_1 = arith.constant 0 : i32
    return %arg0, %c0_i32, %c0_i32_0, %arg1 : i32, i32, i32, i32
  }
}

module attributes {stable_mosaic.version = 11 : i64} {
  func.func @_conv_pair_kernel(%arg0: i32, %arg1: i32, %arg2: memref<1x8x36xbf16, #tpu.memory_space<vmem>>, %arg3: memref<3x8x8xbf16, #tpu.memory_space<vmem>>, %arg4: memref<8x1xf32, #tpu.memory_space<vmem>>, %arg5: memref<3x8x8xbf16, #tpu.memory_space<vmem>>, %arg6: memref<8x1xf32, #tpu.memory_space<vmem>>, %arg7: memref<1x8x32xbf16, #tpu.memory_space<vmem>>) attributes {dimension_semantics = [#tpu.dimension_semantics<parallel>, #tpu.dimension_semantics<parallel>], iteration_bounds = array<i64: 2, 1>, scalar_prefetch = 0 : i64, scratch_operands = 0 : i64, tpu.core_type = #tpu.core_type<tc>, window_params = [{transform_indices = @transform_0, window_bounds = array<i64: 1, 8, 36>}, {pipeline_mode = #tpu.pipeline_mode<synchronous>, transform_indices = @transform_1, window_bounds = array<i64: 3, 8, 8>}, {pipeline_mode = #tpu.pipeline_mode<synchronous>, transform_indices = @transform_2, window_bounds = array<i64: 8, 1>}, {pipeline_mode = #tpu.pipeline_mode<synchronous>, transform_indices = @transform_3, window_bounds = array<i64: 3, 8, 8>}, {pipeline_mode = #tpu.pipeline_mode<synchronous>, transform_indices = @transform_4, window_bounds = array<i64: 8, 1>}, {transform_indices = @transform_5, window_bounds = array<i64: 1, 8, 32>}]} {
    %c0 = arith.constant 0 : index
    %c0_0 = arith.constant 0 : index
    %c0_1 = arith.constant 0 : index
    %0 = vector.load %arg2[%c0, %c0_0, %c0_1] : memref<1x8x36xbf16, #tpu.memory_space<vmem>>, vector<1x8x36xbf16>
    %1 = vector.shape_cast %0 : vector<1x8x36xbf16> to vector<8x36xbf16>
    %2 = arith.extf %1 : vector<8x36xbf16> to vector<8x36xf32>
    %cst = arith.constant 0.000000e+00 : f32
    %3 = vector.broadcast %cst : f32 to vector<8x36xf32>
    %4 = arith.cmpf oge, %2, %3 : vector<8x36xf32>
    %cst_2 = arith.constant 1.000000e-01 : f32
    %5 = vector.broadcast %cst_2 : f32 to vector<8x36xf32>
    %6 = arith.mulf %5, %2 : vector<8x36xf32>
    %7 = arith.select %4, %2, %6 : vector<8x36xi1>, vector<8x36xf32>
    %8 = arith.truncf %7 : vector<8x36xf32> to vector<8x36xbf16>
    %cst_3 = arith.constant 0.000000e+00 : f32
    %9 = vector.broadcast %cst_3 : f32 to vector<8x34xf32>
    %c0_4 = arith.constant 0 : index
    %c0_5 = arith.constant 0 : index
    %c0_6 = arith.constant 0 : index
    %10 = vector.load %arg3[%c0_4, %c0_5, %c0_6] : memref<3x8x8xbf16, #tpu.memory_space<vmem>>, vector<1x8x8xbf16>
    %11 = vector.shape_cast %10 : vector<1x8x8xbf16> to vector<8x8xbf16>
    %12 = vector.extract_strided_slice %8 {offsets = [0, 0], sizes = [8, 34], strides = [1, 1]} : vector<8x36xbf16> to vector<8x34xbf16>
    %cst_7 = arith.constant dense<0.000000e+00> : vector<8x34xf32>
    %13 = tpu.matmul %11, %12, %cst_7 {dimension_numbers = #tpu.dot_dimension_numbers<[1], [0], [0], [1], [0, 0, 1, 1], [], []>} : vector<8x8xbf16>, vector<8x34xbf16>, vector<8x34xf32> -> vector<8x34xf32>
    %14 = arith.addf %9, %13 : vector<8x34xf32>
    %c1 = arith.constant 1 : index
    %c0_8 = arith.constant 0 : index
    %c0_9 = arith.constant 0 : index
    %15 = vector.load %arg3[%c1, %c0_8, %c0_9] : memref<3x8x8xbf16, #tpu.memory_space<vmem>>, vector<1x8x8xbf16>
    %16 = vector.shape_cast %15 : vector<1x8x8xbf16> to vector<8x8xbf16>
    %17 = vector.extract_strided_slice %8 {offsets = [0, 1], sizes = [8, 34], strides = [1, 1]} : vector<8x36xbf16> to vector<8x34xbf16>
    %cst_10 = arith.constant dense<0.000000e+00> : vector<8x34xf32>
    %18 = tpu.matmul %16, %17, %cst_10 {dimension_numbers = #tpu.dot_dimension_numbers<[1], [0], [0], [1], [0, 0, 1, 1], [], []>} : vector<8x8xbf16>, vector<8x34xbf16>, vector<8x34xf32> -> vector<8x34xf32>
    %19 = arith.addf %14, %18 : vector<8x34xf32>
    %c2 = arith.constant 2 : index
    %c0_11 = arith.constant 0 : index
    %c0_12 = arith.constant 0 : index
    %20 = vector.load %arg3[%c2, %c0_11, %c0_12] : memref<3x8x8xbf16, #tpu.memory_space<vmem>>, vector<1x8x8xbf16>
    %21 = vector.shape_cast %20 : vector<1x8x8xbf16> to vector<8x8xbf16>
    %22 = vector.extract_strided_slice %8 {offsets = [0, 2], sizes = [8, 34], strides = [1, 1]} : vector<8x36xbf16> to vector<8x34xbf16>
    %cst_13 = arith.constant dense<0.000000e+00> : vector<8x34xf32>
    %23 = tpu.matmul %21, %22, %cst_13 {dimension_numbers = #tpu.dot_dimension_numbers<[1], [0], [0], [1], [0, 0, 1, 1], [], []>} : vector<8x8xbf16>, vector<8x34xbf16>, vector<8x34xf32> -> vector<8x34xf32>
    %24 = arith.addf %19, %23 : vector<8x34xf32>
    %c0_14 = arith.constant 0 : index
    %c0_15 = arith.constant 0 : index
    %25 = vector.load %arg4[%c0_14, %c0_15] : memref<8x1xf32, #tpu.memory_space<vmem>>, vector<8x1xf32>
    %26 = vector.broadcast %25 : vector<8x1xf32> to vector<8x34xf32>
    %27 = arith.addf %24, %26 : vector<8x34xf32>
    %cst_16 = arith.constant 0.000000e+00 : f32
    %28 = vector.broadcast %cst_16 : f32 to vector<8x34xf32>
    %29 = arith.cmpf oge, %27, %28 : vector<8x34xf32>
    %cst_17 = arith.constant 1.000000e-01 : f32
    %30 = vector.broadcast %cst_17 : f32 to vector<8x34xf32>
    %31 = arith.mulf %30, %27 : vector<8x34xf32>
    %32 = arith.select %29, %27, %31 : vector<8x34xi1>, vector<8x34xf32>
    %33 = tpu.iota {dimensions = array<i32: 1>} : vector<8x34xi32>
    %c-1_i32 = arith.constant -1 : i32
    %34 = vector.broadcast %c-1_i32 : i32 to vector<8x34xi32>
    %35 = arith.addi %34, %33 : vector<8x34xi32>
    %c0_i32 = arith.constant 0 : i32
    %36 = vector.broadcast %c0_i32 : i32 to vector<8x34xi32>
    %37 = arith.cmpi sge, %35, %36 : vector<8x34xi32>
    %c32_i32 = arith.constant 32 : i32
    %38 = vector.broadcast %c32_i32 : i32 to vector<8x34xi32>
    %39 = arith.cmpi slt, %35, %38 : vector<8x34xi32>
    %40 = arith.andi %37, %39 : vector<8x34xi1>
    %cst_18 = arith.constant 0.000000e+00 : f32
    %41 = vector.broadcast %cst_18 : f32 to vector<8x34xf32>
    %42 = arith.select %40, %32, %41 : vector<8x34xi1>, vector<8x34xf32>
    %43 = arith.truncf %42 : vector<8x34xf32> to vector<8x34xbf16>
    %cst_19 = arith.constant 0.000000e+00 : f32
    %44 = vector.broadcast %cst_19 : f32 to vector<8x32xf32>
    %c0_20 = arith.constant 0 : index
    %c0_21 = arith.constant 0 : index
    %c0_22 = arith.constant 0 : index
    %45 = vector.load %arg5[%c0_20, %c0_21, %c0_22] : memref<3x8x8xbf16, #tpu.memory_space<vmem>>, vector<1x8x8xbf16>
    %46 = vector.shape_cast %45 : vector<1x8x8xbf16> to vector<8x8xbf16>
    %47 = vector.extract_strided_slice %43 {offsets = [0, 0], sizes = [8, 32], strides = [1, 1]} : vector<8x34xbf16> to vector<8x32xbf16>
    %cst_23 = arith.constant dense<0.000000e+00> : vector<8x32xf32>
    %48 = tpu.matmul %46, %47, %cst_23 {dimension_numbers = #tpu.dot_dimension_numbers<[1], [0], [0], [1], [0, 0, 1, 1], [], []>} : vector<8x8xbf16>, vector<8x32xbf16>, vector<8x32xf32> -> vector<8x32xf32>
    %49 = arith.addf %44, %48 : vector<8x32xf32>
    %c1_24 = arith.constant 1 : index
    %c0_25 = arith.constant 0 : index
    %c0_26 = arith.constant 0 : index
    %50 = vector.load %arg5[%c1_24, %c0_25, %c0_26] : memref<3x8x8xbf16, #tpu.memory_space<vmem>>, vector<1x8x8xbf16>
    %51 = vector.shape_cast %50 : vector<1x8x8xbf16> to vector<8x8xbf16>
    %52 = vector.extract_strided_slice %43 {offsets = [0, 1], sizes = [8, 32], strides = [1, 1]} : vector<8x34xbf16> to vector<8x32xbf16>
    %cst_27 = arith.constant dense<0.000000e+00> : vector<8x32xf32>
    %53 = tpu.matmul %51, %52, %cst_27 {dimension_numbers = #tpu.dot_dimension_numbers<[1], [0], [0], [1], [0, 0, 1, 1], [], []>} : vector<8x8xbf16>, vector<8x32xbf16>, vector<8x32xf32> -> vector<8x32xf32>
    %54 = arith.addf %49, %53 : vector<8x32xf32>
    %c2_28 = arith.constant 2 : index
    %c0_29 = arith.constant 0 : index
    %c0_30 = arith.constant 0 : index
    %55 = vector.load %arg5[%c2_28, %c0_29, %c0_30] : memref<3x8x8xbf16, #tpu.memory_space<vmem>>, vector<1x8x8xbf16>
    %56 = vector.shape_cast %55 : vector<1x8x8xbf16> to vector<8x8xbf16>
    %57 = vector.extract_strided_slice %43 {offsets = [0, 2], sizes = [8, 32], strides = [1, 1]} : vector<8x34xbf16> to vector<8x32xbf16>
    %cst_31 = arith.constant dense<0.000000e+00> : vector<8x32xf32>
    %58 = tpu.matmul %56, %57, %cst_31 {dimension_numbers = #tpu.dot_dimension_numbers<[1], [0], [0], [1], [0, 0, 1, 1], [], []>} : vector<8x8xbf16>, vector<8x32xbf16>, vector<8x32xf32> -> vector<8x32xf32>
    %59 = arith.addf %54, %58 : vector<8x32xf32>
    %c0_32 = arith.constant 0 : index
    %c0_33 = arith.constant 0 : index
    %60 = vector.load %arg6[%c0_32, %c0_33] : memref<8x1xf32, #tpu.memory_space<vmem>>, vector<8x1xf32>
    %61 = vector.broadcast %60 : vector<8x1xf32> to vector<8x32xf32>
    %62 = arith.addf %59, %61 : vector<8x32xf32>
    %c0_34 = arith.constant 0 : index
    %c0_35 = arith.constant 0 : index
    %c2_36 = arith.constant 2 : index
    %63 = vector.load %arg2[%c0_34, %c0_35, %c2_36] : memref<1x8x36xbf16, #tpu.memory_space<vmem>>, vector<1x8x32xbf16>
    %64 = vector.shape_cast %63 : vector<1x8x32xbf16> to vector<8x32xbf16>
    %65 = arith.extf %64 : vector<8x32xbf16> to vector<8x32xf32>
    %66 = arith.addf %62, %65 : vector<8x32xf32>
    %67 = arith.truncf %66 : vector<8x32xf32> to vector<8x32xbf16>
    %c0_37 = arith.constant 0 : index
    %c0_38 = arith.constant 0 : index
    %c0_39 = arith.constant 0 : index
    %68 = vector.load %arg7[%c0_37, %c0_38, %c0_39] : memref<1x8x32xbf16, #tpu.memory_space<vmem>>, vector<1x8x32xbf16>
    %69 = vector.shape_cast %68 : vector<1x8x32xbf16> to vector<8x32xbf16>
    %70 = vector.shape_cast %67 : vector<8x32xbf16> to vector<1x8x32xbf16>
    tpu.vector_store %arg7[%c0_37, %c0_38, %c0_39], %70 {strides = array<i32>} : memref<1x8x32xbf16, #tpu.memory_space<vmem>>, vector<1x8x32xbf16>,
    return
  }
  func.func @transform_0(%arg0: i32, %arg1: i32) -> (i32, i32, i32) {
    %c0_i32 = arith.constant 0 : i32
    %c0_i32_0 = arith.constant 0 : i32
    %c0_i32_1 = arith.constant 0 : i32
    return %arg0, %c0_i32, %c0_i32_0 : i32, i32, i32
  }
  func.func @transform_1(%arg0: i32, %arg1: i32) -> (i32, i32, i32) {
    %c0_i32 = arith.constant 0 : i32
    %c0_i32_0 = arith.constant 0 : i32
    %c0_i32_1 = arith.constant 0 : i32
    %c0_i32_2 = arith.constant 0 : i32
    return %c0_i32, %c0_i32_0, %c0_i32_1 : i32, i32, i32
  }
  func.func @transform_2(%arg0: i32, %arg1: i32) -> (i32, i32) {
    %c0_i32 = arith.constant 0 : i32
    %c0_i32_0 = arith.constant 0 : i32
    %c0_i32_1 = arith.constant 0 : i32
    return %c0_i32, %c0_i32_0 : i32, i32
  }
  func.func @transform_3(%arg0: i32, %arg1: i32) -> (i32, i32, i32) {
    %c0_i32 = arith.constant 0 : i32
    %c0_i32_0 = arith.constant 0 : i32
    %c0_i32_1 = arith.constant 0 : i32
    %c0_i32_2 = arith.constant 0 : i32
    return %c0_i32, %c0_i32_0, %c0_i32_1 : i32, i32, i32
  }
  func.func @transform_4(%arg0: i32, %arg1: i32) -> (i32, i32) {
    %c0_i32 = arith.constant 0 : i32
    %c0_i32_0 = arith.constant 0 : i32
    %c0_i32_1 = arith.constant 0 : i32
    return %c0_i32, %c0_i32_0 : i32, i32
  }
  func.func @transform_5(%arg0: i32, %arg1: i32) -> (i32, i32, i32) {
    %c0_i32 = arith.constant 0 : i32
    %c0_i32_0 = arith.constant 0 : i32
    return %arg0, %c0_i32, %arg1 : i32, i32, i32
  }
}

module attributes {stable_mosaic.version = 11 : i64} {
  func.func @_conv_pair_kernel(%arg0: i32, %arg1: i32, %arg2: memref<1x8x40xbf16, #tpu.memory_space<vmem>>, %arg3: memref<3x8x8xbf16, #tpu.memory_space<vmem>>, %arg4: memref<8x1xf32, #tpu.memory_space<vmem>>, %arg5: memref<3x8x8xbf16, #tpu.memory_space<vmem>>, %arg6: memref<8x1xf32, #tpu.memory_space<vmem>>, %arg7: memref<1x8x32xbf16, #tpu.memory_space<vmem>>) attributes {dimension_semantics = [#tpu.dimension_semantics<parallel>, #tpu.dimension_semantics<parallel>], iteration_bounds = array<i64: 2, 1>, scalar_prefetch = 0 : i64, scratch_operands = 0 : i64, tpu.core_type = #tpu.core_type<tc>, window_params = [{transform_indices = @transform_0, window_bounds = array<i64: 1, 8, 40>}, {pipeline_mode = #tpu.pipeline_mode<synchronous>, transform_indices = @transform_1, window_bounds = array<i64: 3, 8, 8>}, {pipeline_mode = #tpu.pipeline_mode<synchronous>, transform_indices = @transform_2, window_bounds = array<i64: 8, 1>}, {pipeline_mode = #tpu.pipeline_mode<synchronous>, transform_indices = @transform_3, window_bounds = array<i64: 3, 8, 8>}, {pipeline_mode = #tpu.pipeline_mode<synchronous>, transform_indices = @transform_4, window_bounds = array<i64: 8, 1>}, {transform_indices = @transform_5, window_bounds = array<i64: 1, 8, 32>}]} {
    %c0 = arith.constant 0 : index
    %c0_0 = arith.constant 0 : index
    %c0_1 = arith.constant 0 : index
    %0 = vector.load %arg2[%c0, %c0_0, %c0_1] : memref<1x8x40xbf16, #tpu.memory_space<vmem>>, vector<1x8x40xbf16>
    %1 = vector.shape_cast %0 : vector<1x8x40xbf16> to vector<8x40xbf16>
    %2 = arith.extf %1 : vector<8x40xbf16> to vector<8x40xf32>
    %cst = arith.constant 0.000000e+00 : f32
    %3 = vector.broadcast %cst : f32 to vector<8x40xf32>
    %4 = arith.cmpf oge, %2, %3 : vector<8x40xf32>
    %cst_2 = arith.constant 1.000000e-01 : f32
    %5 = vector.broadcast %cst_2 : f32 to vector<8x40xf32>
    %6 = arith.mulf %5, %2 : vector<8x40xf32>
    %7 = arith.select %4, %2, %6 : vector<8x40xi1>, vector<8x40xf32>
    %8 = arith.truncf %7 : vector<8x40xf32> to vector<8x40xbf16>
    %cst_3 = arith.constant 0.000000e+00 : f32
    %9 = vector.broadcast %cst_3 : f32 to vector<8x34xf32>
    %c0_4 = arith.constant 0 : index
    %c0_5 = arith.constant 0 : index
    %c0_6 = arith.constant 0 : index
    %10 = vector.load %arg3[%c0_4, %c0_5, %c0_6] : memref<3x8x8xbf16, #tpu.memory_space<vmem>>, vector<1x8x8xbf16>
    %11 = vector.shape_cast %10 : vector<1x8x8xbf16> to vector<8x8xbf16>
    %12 = vector.extract_strided_slice %8 {offsets = [0, 0], sizes = [8, 34], strides = [1, 1]} : vector<8x40xbf16> to vector<8x34xbf16>
    %cst_7 = arith.constant dense<0.000000e+00> : vector<8x34xf32>
    %13 = tpu.matmul %11, %12, %cst_7 {dimension_numbers = #tpu.dot_dimension_numbers<[1], [0], [0], [1], [0, 0, 1, 1], [], []>} : vector<8x8xbf16>, vector<8x34xbf16>, vector<8x34xf32> -> vector<8x34xf32>
    %14 = arith.addf %9, %13 : vector<8x34xf32>
    %c1 = arith.constant 1 : index
    %c0_8 = arith.constant 0 : index
    %c0_9 = arith.constant 0 : index
    %15 = vector.load %arg3[%c1, %c0_8, %c0_9] : memref<3x8x8xbf16, #tpu.memory_space<vmem>>, vector<1x8x8xbf16>
    %16 = vector.shape_cast %15 : vector<1x8x8xbf16> to vector<8x8xbf16>
    %17 = vector.extract_strided_slice %8 {offsets = [0, 3], sizes = [8, 34], strides = [1, 1]} : vector<8x40xbf16> to vector<8x34xbf16>
    %cst_10 = arith.constant dense<0.000000e+00> : vector<8x34xf32>
    %18 = tpu.matmul %16, %17, %cst_10 {dimension_numbers = #tpu.dot_dimension_numbers<[1], [0], [0], [1], [0, 0, 1, 1], [], []>} : vector<8x8xbf16>, vector<8x34xbf16>, vector<8x34xf32> -> vector<8x34xf32>
    %19 = arith.addf %14, %18 : vector<8x34xf32>
    %c2 = arith.constant 2 : index
    %c0_11 = arith.constant 0 : index
    %c0_12 = arith.constant 0 : index
    %20 = vector.load %arg3[%c2, %c0_11, %c0_12] : memref<3x8x8xbf16, #tpu.memory_space<vmem>>, vector<1x8x8xbf16>
    %21 = vector.shape_cast %20 : vector<1x8x8xbf16> to vector<8x8xbf16>
    %22 = vector.extract_strided_slice %8 {offsets = [0, 6], sizes = [8, 34], strides = [1, 1]} : vector<8x40xbf16> to vector<8x34xbf16>
    %cst_13 = arith.constant dense<0.000000e+00> : vector<8x34xf32>
    %23 = tpu.matmul %21, %22, %cst_13 {dimension_numbers = #tpu.dot_dimension_numbers<[1], [0], [0], [1], [0, 0, 1, 1], [], []>} : vector<8x8xbf16>, vector<8x34xbf16>, vector<8x34xf32> -> vector<8x34xf32>
    %24 = arith.addf %19, %23 : vector<8x34xf32>
    %c0_14 = arith.constant 0 : index
    %c0_15 = arith.constant 0 : index
    %25 = vector.load %arg4[%c0_14, %c0_15] : memref<8x1xf32, #tpu.memory_space<vmem>>, vector<8x1xf32>
    %26 = vector.broadcast %25 : vector<8x1xf32> to vector<8x34xf32>
    %27 = arith.addf %24, %26 : vector<8x34xf32>
    %cst_16 = arith.constant 0.000000e+00 : f32
    %28 = vector.broadcast %cst_16 : f32 to vector<8x34xf32>
    %29 = arith.cmpf oge, %27, %28 : vector<8x34xf32>
    %cst_17 = arith.constant 1.000000e-01 : f32
    %30 = vector.broadcast %cst_17 : f32 to vector<8x34xf32>
    %31 = arith.mulf %30, %27 : vector<8x34xf32>
    %32 = arith.select %29, %27, %31 : vector<8x34xi1>, vector<8x34xf32>
    %33 = tpu.iota {dimensions = array<i32: 1>} : vector<8x34xi32>
    %c-1_i32 = arith.constant -1 : i32
    %34 = vector.broadcast %c-1_i32 : i32 to vector<8x34xi32>
    %35 = arith.addi %34, %33 : vector<8x34xi32>
    %c0_i32 = arith.constant 0 : i32
    %36 = vector.broadcast %c0_i32 : i32 to vector<8x34xi32>
    %37 = arith.cmpi sge, %35, %36 : vector<8x34xi32>
    %c32_i32 = arith.constant 32 : i32
    %38 = vector.broadcast %c32_i32 : i32 to vector<8x34xi32>
    %39 = arith.cmpi slt, %35, %38 : vector<8x34xi32>
    %40 = arith.andi %37, %39 : vector<8x34xi1>
    %cst_18 = arith.constant 0.000000e+00 : f32
    %41 = vector.broadcast %cst_18 : f32 to vector<8x34xf32>
    %42 = arith.select %40, %32, %41 : vector<8x34xi1>, vector<8x34xf32>
    %43 = arith.truncf %42 : vector<8x34xf32> to vector<8x34xbf16>
    %cst_19 = arith.constant 0.000000e+00 : f32
    %44 = vector.broadcast %cst_19 : f32 to vector<8x32xf32>
    %c0_20 = arith.constant 0 : index
    %c0_21 = arith.constant 0 : index
    %c0_22 = arith.constant 0 : index
    %45 = vector.load %arg5[%c0_20, %c0_21, %c0_22] : memref<3x8x8xbf16, #tpu.memory_space<vmem>>, vector<1x8x8xbf16>
    %46 = vector.shape_cast %45 : vector<1x8x8xbf16> to vector<8x8xbf16>
    %47 = vector.extract_strided_slice %43 {offsets = [0, 0], sizes = [8, 32], strides = [1, 1]} : vector<8x34xbf16> to vector<8x32xbf16>
    %cst_23 = arith.constant dense<0.000000e+00> : vector<8x32xf32>
    %48 = tpu.matmul %46, %47, %cst_23 {dimension_numbers = #tpu.dot_dimension_numbers<[1], [0], [0], [1], [0, 0, 1, 1], [], []>} : vector<8x8xbf16>, vector<8x32xbf16>, vector<8x32xf32> -> vector<8x32xf32>
    %49 = arith.addf %44, %48 : vector<8x32xf32>
    %c1_24 = arith.constant 1 : index
    %c0_25 = arith.constant 0 : index
    %c0_26 = arith.constant 0 : index
    %50 = vector.load %arg5[%c1_24, %c0_25, %c0_26] : memref<3x8x8xbf16, #tpu.memory_space<vmem>>, vector<1x8x8xbf16>
    %51 = vector.shape_cast %50 : vector<1x8x8xbf16> to vector<8x8xbf16>
    %52 = vector.extract_strided_slice %43 {offsets = [0, 1], sizes = [8, 32], strides = [1, 1]} : vector<8x34xbf16> to vector<8x32xbf16>
    %cst_27 = arith.constant dense<0.000000e+00> : vector<8x32xf32>
    %53 = tpu.matmul %51, %52, %cst_27 {dimension_numbers = #tpu.dot_dimension_numbers<[1], [0], [0], [1], [0, 0, 1, 1], [], []>} : vector<8x8xbf16>, vector<8x32xbf16>, vector<8x32xf32> -> vector<8x32xf32>
    %54 = arith.addf %49, %53 : vector<8x32xf32>
    %c2_28 = arith.constant 2 : index
    %c0_29 = arith.constant 0 : index
    %c0_30 = arith.constant 0 : index
    %55 = vector.load %arg5[%c2_28, %c0_29, %c0_30] : memref<3x8x8xbf16, #tpu.memory_space<vmem>>, vector<1x8x8xbf16>
    %56 = vector.shape_cast %55 : vector<1x8x8xbf16> to vector<8x8xbf16>
    %57 = vector.extract_strided_slice %43 {offsets = [0, 2], sizes = [8, 32], strides = [1, 1]} : vector<8x34xbf16> to vector<8x32xbf16>
    %cst_31 = arith.constant dense<0.000000e+00> : vector<8x32xf32>
    %58 = tpu.matmul %56, %57, %cst_31 {dimension_numbers = #tpu.dot_dimension_numbers<[1], [0], [0], [1], [0, 0, 1, 1], [], []>} : vector<8x8xbf16>, vector<8x32xbf16>, vector<8x32xf32> -> vector<8x32xf32>
    %59 = arith.addf %54, %58 : vector<8x32xf32>
    %c0_32 = arith.constant 0 : index
    %c0_33 = arith.constant 0 : index
    %60 = vector.load %arg6[%c0_32, %c0_33] : memref<8x1xf32, #tpu.memory_space<vmem>>, vector<8x1xf32>
    %61 = vector.broadcast %60 : vector<8x1xf32> to vector<8x32xf32>
    %62 = arith.addf %59, %61 : vector<8x32xf32>
    %c0_34 = arith.constant 0 : index
    %c0_35 = arith.constant 0 : index
    %c4 = arith.constant 4 : index
    %63 = vector.load %arg2[%c0_34, %c0_35, %c4] : memref<1x8x40xbf16, #tpu.memory_space<vmem>>, vector<1x8x32xbf16>
    %64 = vector.shape_cast %63 : vector<1x8x32xbf16> to vector<8x32xbf16>
    %65 = arith.extf %64 : vector<8x32xbf16> to vector<8x32xf32>
    %66 = arith.addf %62, %65 : vector<8x32xf32>
    %67 = arith.truncf %66 : vector<8x32xf32> to vector<8x32xbf16>
    %c0_36 = arith.constant 0 : index
    %c0_37 = arith.constant 0 : index
    %c0_38 = arith.constant 0 : index
    %68 = vector.load %arg7[%c0_36, %c0_37, %c0_38] : memref<1x8x32xbf16, #tpu.memory_space<vmem>>, vector<1x8x32xbf16>
    %69 = vector.shape_cast %68 : vector<1x8x32xbf16> to vector<8x32xbf16>
    %70 = vector.shape_cast %67 : vector<8x32xbf16> to vector<1x8x32xbf16>
    tpu.vector_store %arg7[%c0_36, %c0_37, %c0_38], %70 {strides = array<i32>} : memref<1x8x32xbf16, #tpu.memory_space<vmem>>, vector<1x8x32xbf16>,
    return
  }
  func.func @transform_0(%arg0: i32, %arg1: i32) -> (i32, i32, i32) {
    %c0_i32 = arith.constant 0 : i32
    %c0_i32_0 = arith.constant 0 : i32
    %c0_i32_1 = arith.constant 0 : i32
    return %arg0, %c0_i32, %c0_i32_0 : i32, i32, i32
  }
  func.func @transform_1(%arg0: i32, %arg1: i32) -> (i32, i32, i32) {
    %c0_i32 = arith.constant 0 : i32
    %c0_i32_0 = arith.constant 0 : i32
    %c0_i32_1 = arith.constant 0 : i32
    %c0_i32_2 = arith.constant 0 : i32
    return %c0_i32, %c0_i32_0, %c0_i32_1 : i32, i32, i32
  }
  func.func @transform_2(%arg0: i32, %arg1: i32) -> (i32, i32) {
    %c0_i32 = arith.constant 0 : i32
    %c0_i32_0 = arith.constant 0 : i32
    %c0_i32_1 = arith.constant 0 : i32
    return %c0_i32, %c0_i32_0 : i32, i32
  }
  func.func @transform_3(%arg0: i32, %arg1: i32) -> (i32, i32, i32) {
    %c0_i32 = arith.constant 0 : i32
    %c0_i32_0 = arith.constant 0 : i32
    %c0_i32_1 = arith.constant 0 : i32
    %c0_i32_2 = arith.constant 0 : i32
    return %c0_i32, %c0_i32_0, %c0_i32_1 : i32, i32, i32
  }
  func.func @transform_4(%arg0: i32, %arg1: i32) -> (i32, i32) {
    %c0_i32 = arith.constant 0 : i32
    %c0_i32_0 = arith.constant 0 : i32
    %c0_i32_1 = arith.constant 0 : i32
    return %c0_i32, %c0_i32_0 : i32, i32
  }
  func.func @transform_5(%arg0: i32, %arg1: i32) -> (i32, i32, i32) {
    %c0_i32 = arith.constant 0 : i32
    %c0_i32_0 = arith.constant 0 : i32
    return %arg0, %c0_i32, %arg1 : i32, i32, i32
  }
}

module attributes {stable_mosaic.version = 11 : i64} {
  func.func @_conv_pair_kernel(%arg0: i32, %arg1: i32, %arg2: memref<1x8x44xbf16, #tpu.memory_space<vmem>>, %arg3: memref<3x8x8xbf16, #tpu.memory_space<vmem>>, %arg4: memref<8x1xf32, #tpu.memory_space<vmem>>, %arg5: memref<3x8x8xbf16, #tpu.memory_space<vmem>>, %arg6: memref<8x1xf32, #tpu.memory_space<vmem>>, %arg7: memref<1x8x32xbf16, #tpu.memory_space<vmem>>) attributes {dimension_semantics = [#tpu.dimension_semantics<parallel>, #tpu.dimension_semantics<parallel>], iteration_bounds = array<i64: 2, 1>, scalar_prefetch = 0 : i64, scratch_operands = 0 : i64, tpu.core_type = #tpu.core_type<tc>, window_params = [{transform_indices = @transform_0, window_bounds = array<i64: 1, 8, 44>}, {pipeline_mode = #tpu.pipeline_mode<synchronous>, transform_indices = @transform_1, window_bounds = array<i64: 3, 8, 8>}, {pipeline_mode = #tpu.pipeline_mode<synchronous>, transform_indices = @transform_2, window_bounds = array<i64: 8, 1>}, {pipeline_mode = #tpu.pipeline_mode<synchronous>, transform_indices = @transform_3, window_bounds = array<i64: 3, 8, 8>}, {pipeline_mode = #tpu.pipeline_mode<synchronous>, transform_indices = @transform_4, window_bounds = array<i64: 8, 1>}, {transform_indices = @transform_5, window_bounds = array<i64: 1, 8, 32>}]} {
    %c0 = arith.constant 0 : index
    %c0_0 = arith.constant 0 : index
    %c0_1 = arith.constant 0 : index
    %0 = vector.load %arg2[%c0, %c0_0, %c0_1] : memref<1x8x44xbf16, #tpu.memory_space<vmem>>, vector<1x8x44xbf16>
    %1 = vector.shape_cast %0 : vector<1x8x44xbf16> to vector<8x44xbf16>
    %2 = arith.extf %1 : vector<8x44xbf16> to vector<8x44xf32>
    %cst = arith.constant 0.000000e+00 : f32
    %3 = vector.broadcast %cst : f32 to vector<8x44xf32>
    %4 = arith.cmpf oge, %2, %3 : vector<8x44xf32>
    %cst_2 = arith.constant 1.000000e-01 : f32
    %5 = vector.broadcast %cst_2 : f32 to vector<8x44xf32>
    %6 = arith.mulf %5, %2 : vector<8x44xf32>
    %7 = arith.select %4, %2, %6 : vector<8x44xi1>, vector<8x44xf32>
    %8 = arith.truncf %7 : vector<8x44xf32> to vector<8x44xbf16>
    %cst_3 = arith.constant 0.000000e+00 : f32
    %9 = vector.broadcast %cst_3 : f32 to vector<8x34xf32>
    %c0_4 = arith.constant 0 : index
    %c0_5 = arith.constant 0 : index
    %c0_6 = arith.constant 0 : index
    %10 = vector.load %arg3[%c0_4, %c0_5, %c0_6] : memref<3x8x8xbf16, #tpu.memory_space<vmem>>, vector<1x8x8xbf16>
    %11 = vector.shape_cast %10 : vector<1x8x8xbf16> to vector<8x8xbf16>
    %12 = vector.extract_strided_slice %8 {offsets = [0, 0], sizes = [8, 34], strides = [1, 1]} : vector<8x44xbf16> to vector<8x34xbf16>
    %cst_7 = arith.constant dense<0.000000e+00> : vector<8x34xf32>
    %13 = tpu.matmul %11, %12, %cst_7 {dimension_numbers = #tpu.dot_dimension_numbers<[1], [0], [0], [1], [0, 0, 1, 1], [], []>} : vector<8x8xbf16>, vector<8x34xbf16>, vector<8x34xf32> -> vector<8x34xf32>
    %14 = arith.addf %9, %13 : vector<8x34xf32>
    %c1 = arith.constant 1 : index
    %c0_8 = arith.constant 0 : index
    %c0_9 = arith.constant 0 : index
    %15 = vector.load %arg3[%c1, %c0_8, %c0_9] : memref<3x8x8xbf16, #tpu.memory_space<vmem>>, vector<1x8x8xbf16>
    %16 = vector.shape_cast %15 : vector<1x8x8xbf16> to vector<8x8xbf16>
    %17 = vector.extract_strided_slice %8 {offsets = [0, 5], sizes = [8, 34], strides = [1, 1]} : vector<8x44xbf16> to vector<8x34xbf16>
    %cst_10 = arith.constant dense<0.000000e+00> : vector<8x34xf32>
    %18 = tpu.matmul %16, %17, %cst_10 {dimension_numbers = #tpu.dot_dimension_numbers<[1], [0], [0], [1], [0, 0, 1, 1], [], []>} : vector<8x8xbf16>, vector<8x34xbf16>, vector<8x34xf32> -> vector<8x34xf32>
    %19 = arith.addf %14, %18 : vector<8x34xf32>
    %c2 = arith.constant 2 : index
    %c0_11 = arith.constant 0 : index
    %c0_12 = arith.constant 0 : index
    %20 = vector.load %arg3[%c2, %c0_11, %c0_12] : memref<3x8x8xbf16, #tpu.memory_space<vmem>>, vector<1x8x8xbf16>
    %21 = vector.shape_cast %20 : vector<1x8x8xbf16> to vector<8x8xbf16>
    %22 = vector.extract_strided_slice %8 {offsets = [0, 10], sizes = [8, 34], strides = [1, 1]} : vector<8x44xbf16> to vector<8x34xbf16>
    %cst_13 = arith.constant dense<0.000000e+00> : vector<8x34xf32>
    %23 = tpu.matmul %21, %22, %cst_13 {dimension_numbers = #tpu.dot_dimension_numbers<[1], [0], [0], [1], [0, 0, 1, 1], [], []>} : vector<8x8xbf16>, vector<8x34xbf16>, vector<8x34xf32> -> vector<8x34xf32>
    %24 = arith.addf %19, %23 : vector<8x34xf32>
    %c0_14 = arith.constant 0 : index
    %c0_15 = arith.constant 0 : index
    %25 = vector.load %arg4[%c0_14, %c0_15] : memref<8x1xf32, #tpu.memory_space<vmem>>, vector<8x1xf32>
    %26 = vector.broadcast %25 : vector<8x1xf32> to vector<8x34xf32>
    %27 = arith.addf %24, %26 : vector<8x34xf32>
    %cst_16 = arith.constant 0.000000e+00 : f32
    %28 = vector.broadcast %cst_16 : f32 to vector<8x34xf32>
    %29 = arith.cmpf oge, %27, %28 : vector<8x34xf32>
    %cst_17 = arith.constant 1.000000e-01 : f32
    %30 = vector.broadcast %cst_17 : f32 to vector<8x34xf32>
    %31 = arith.mulf %30, %27 : vector<8x34xf32>
    %32 = arith.select %29, %27, %31 : vector<8x34xi1>, vector<8x34xf32>
    %33 = tpu.iota {dimensions = array<i32: 1>} : vector<8x34xi32>
    %c-1_i32 = arith.constant -1 : i32
    %34 = vector.broadcast %c-1_i32 : i32 to vector<8x34xi32>
    %35 = arith.addi %34, %33 : vector<8x34xi32>
    %c0_i32 = arith.constant 0 : i32
    %36 = vector.broadcast %c0_i32 : i32 to vector<8x34xi32>
    %37 = arith.cmpi sge, %35, %36 : vector<8x34xi32>
    %c32_i32 = arith.constant 32 : i32
    %38 = vector.broadcast %c32_i32 : i32 to vector<8x34xi32>
    %39 = arith.cmpi slt, %35, %38 : vector<8x34xi32>
    %40 = arith.andi %37, %39 : vector<8x34xi1>
    %cst_18 = arith.constant 0.000000e+00 : f32
    %41 = vector.broadcast %cst_18 : f32 to vector<8x34xf32>
    %42 = arith.select %40, %32, %41 : vector<8x34xi1>, vector<8x34xf32>
    %43 = arith.truncf %42 : vector<8x34xf32> to vector<8x34xbf16>
    %cst_19 = arith.constant 0.000000e+00 : f32
    %44 = vector.broadcast %cst_19 : f32 to vector<8x32xf32>
    %c0_20 = arith.constant 0 : index
    %c0_21 = arith.constant 0 : index
    %c0_22 = arith.constant 0 : index
    %45 = vector.load %arg5[%c0_20, %c0_21, %c0_22] : memref<3x8x8xbf16, #tpu.memory_space<vmem>>, vector<1x8x8xbf16>
    %46 = vector.shape_cast %45 : vector<1x8x8xbf16> to vector<8x8xbf16>
    %47 = vector.extract_strided_slice %43 {offsets = [0, 0], sizes = [8, 32], strides = [1, 1]} : vector<8x34xbf16> to vector<8x32xbf16>
    %cst_23 = arith.constant dense<0.000000e+00> : vector<8x32xf32>
    %48 = tpu.matmul %46, %47, %cst_23 {dimension_numbers = #tpu.dot_dimension_numbers<[1], [0], [0], [1], [0, 0, 1, 1], [], []>} : vector<8x8xbf16>, vector<8x32xbf16>, vector<8x32xf32> -> vector<8x32xf32>
    %49 = arith.addf %44, %48 : vector<8x32xf32>
    %c1_24 = arith.constant 1 : index
    %c0_25 = arith.constant 0 : index
    %c0_26 = arith.constant 0 : index
    %50 = vector.load %arg5[%c1_24, %c0_25, %c0_26] : memref<3x8x8xbf16, #tpu.memory_space<vmem>>, vector<1x8x8xbf16>
    %51 = vector.shape_cast %50 : vector<1x8x8xbf16> to vector<8x8xbf16>
    %52 = vector.extract_strided_slice %43 {offsets = [0, 1], sizes = [8, 32], strides = [1, 1]} : vector<8x34xbf16> to vector<8x32xbf16>
    %cst_27 = arith.constant dense<0.000000e+00> : vector<8x32xf32>
    %53 = tpu.matmul %51, %52, %cst_27 {dimension_numbers = #tpu.dot_dimension_numbers<[1], [0], [0], [1], [0, 0, 1, 1], [], []>} : vector<8x8xbf16>, vector<8x32xbf16>, vector<8x32xf32> -> vector<8x32xf32>
    %54 = arith.addf %49, %53 : vector<8x32xf32>
    %c2_28 = arith.constant 2 : index
    %c0_29 = arith.constant 0 : index
    %c0_30 = arith.constant 0 : index
    %55 = vector.load %arg5[%c2_28, %c0_29, %c0_30] : memref<3x8x8xbf16, #tpu.memory_space<vmem>>, vector<1x8x8xbf16>
    %56 = vector.shape_cast %55 : vector<1x8x8xbf16> to vector<8x8xbf16>
    %57 = vector.extract_strided_slice %43 {offsets = [0, 2], sizes = [8, 32], strides = [1, 1]} : vector<8x34xbf16> to vector<8x32xbf16>
    %cst_31 = arith.constant dense<0.000000e+00> : vector<8x32xf32>
    %58 = tpu.matmul %56, %57, %cst_31 {dimension_numbers = #tpu.dot_dimension_numbers<[1], [0], [0], [1], [0, 0, 1, 1], [], []>} : vector<8x8xbf16>, vector<8x32xbf16>, vector<8x32xf32> -> vector<8x32xf32>
    %59 = arith.addf %54, %58 : vector<8x32xf32>
    %c0_32 = arith.constant 0 : index
    %c0_33 = arith.constant 0 : index
    %60 = vector.load %arg6[%c0_32, %c0_33] : memref<8x1xf32, #tpu.memory_space<vmem>>, vector<8x1xf32>
    %61 = vector.broadcast %60 : vector<8x1xf32> to vector<8x32xf32>
    %62 = arith.addf %59, %61 : vector<8x32xf32>
    %c0_34 = arith.constant 0 : index
    %c0_35 = arith.constant 0 : index
    %c6 = arith.constant 6 : index
    %63 = vector.load %arg2[%c0_34, %c0_35, %c6] : memref<1x8x44xbf16, #tpu.memory_space<vmem>>, vector<1x8x32xbf16>
    %64 = vector.shape_cast %63 : vector<1x8x32xbf16> to vector<8x32xbf16>
    %65 = arith.extf %64 : vector<8x32xbf16> to vector<8x32xf32>
    %66 = arith.addf %62, %65 : vector<8x32xf32>
    %67 = arith.truncf %66 : vector<8x32xf32> to vector<8x32xbf16>
    %c0_36 = arith.constant 0 : index
    %c0_37 = arith.constant 0 : index
    %c0_38 = arith.constant 0 : index
    %68 = vector.load %arg7[%c0_36, %c0_37, %c0_38] : memref<1x8x32xbf16, #tpu.memory_space<vmem>>, vector<1x8x32xbf16>
    %69 = vector.shape_cast %68 : vector<1x8x32xbf16> to vector<8x32xbf16>
    %70 = vector.shape_cast %67 : vector<8x32xbf16> to vector<1x8x32xbf16>
    tpu.vector_store %arg7[%c0_36, %c0_37, %c0_38], %70 {strides = array<i32>} : memref<1x8x32xbf16, #tpu.memory_space<vmem>>, vector<1x8x32xbf16>,
    return
  }
  func.func @transform_0(%arg0: i32, %arg1: i32) -> (i32, i32, i32) {
    %c0_i32 = arith.constant 0 : i32
    %c0_i32_0 = arith.constant 0 : i32
    %c0_i32_1 = arith.constant 0 : i32
    return %arg0, %c0_i32, %c0_i32_0 : i32, i32, i32
  }
  func.func @transform_1(%arg0: i32, %arg1: i32) -> (i32, i32, i32) {
    %c0_i32 = arith.constant 0 : i32
    %c0_i32_0 = arith.constant 0 : i32
    %c0_i32_1 = arith.constant 0 : i32
    %c0_i32_2 = arith.constant 0 : i32
    return %c0_i32, %c0_i32_0, %c0_i32_1 : i32, i32, i32
  }
  func.func @transform_2(%arg0: i32, %arg1: i32) -> (i32, i32) {
    %c0_i32 = arith.constant 0 : i32
    %c0_i32_0 = arith.constant 0 : i32
    %c0_i32_1 = arith.constant 0 : i32
    return %c0_i32, %c0_i32_0 : i32, i32
  }
  func.func @transform_3(%arg0: i32, %arg1: i32) -> (i32, i32, i32) {
    %c0_i32 = arith.constant 0 : i32
    %c0_i32_0 = arith.constant 0 : i32
    %c0_i32_1 = arith.constant 0 : i32
    %c0_i32_2 = arith.constant 0 : i32
    return %c0_i32, %c0_i32_0, %c0_i32_1 : i32, i32, i32
  }
  func.func @transform_4(%arg0: i32, %arg1: i32) -> (i32, i32) {
    %c0_i32 = arith.constant 0 : i32
    %c0_i32_0 = arith.constant 0 : i32
    %c0_i32_1 = arith.constant 0 : i32
    return %c0_i32, %c0_i32_0 : i32, i32
  }
  func.func @transform_5(%arg0: i32, %arg1: i32) -> (i32, i32, i32) {
    %c0_i32 = arith.constant 0 : i32
    %c0_i32_0 = arith.constant 0 : i32
    return %arg0, %c0_i32, %arg1 : i32, i32, i32
  }
}

module attributes {stable_mosaic.version = 11 : i64} {
  func.func @_conv_pair_kernel(%arg0: i32, %arg1: i32, %arg2: memref<1x8x40xbf16, #tpu.memory_space<vmem>>, %arg3: memref<5x8x8xbf16, #tpu.memory_space<vmem>>, %arg4: memref<8x1xf32, #tpu.memory_space<vmem>>, %arg5: memref<5x8x8xbf16, #tpu.memory_space<vmem>>, %arg6: memref<8x1xf32, #tpu.memory_space<vmem>>, %arg7: memref<1x8x32xbf16, #tpu.memory_space<vmem>>) attributes {dimension_semantics = [#tpu.dimension_semantics<parallel>, #tpu.dimension_semantics<parallel>], iteration_bounds = array<i64: 2, 1>, scalar_prefetch = 0 : i64, scratch_operands = 0 : i64, tpu.core_type = #tpu.core_type<tc>, window_params = [{transform_indices = @transform_0, window_bounds = array<i64: 1, 8, 40>}, {pipeline_mode = #tpu.pipeline_mode<synchronous>, transform_indices = @transform_1, window_bounds = array<i64: 5, 8, 8>}, {pipeline_mode = #tpu.pipeline_mode<synchronous>, transform_indices = @transform_2, window_bounds = array<i64: 8, 1>}, {pipeline_mode = #tpu.pipeline_mode<synchronous>, transform_indices = @transform_3, window_bounds = array<i64: 5, 8, 8>}, {pipeline_mode = #tpu.pipeline_mode<synchronous>, transform_indices = @transform_4, window_bounds = array<i64: 8, 1>}, {transform_indices = @transform_5, window_bounds = array<i64: 1, 8, 32>}]} {
    %c0 = arith.constant 0 : index
    %c0_0 = arith.constant 0 : index
    %c0_1 = arith.constant 0 : index
    %0 = vector.load %arg2[%c0, %c0_0, %c0_1] : memref<1x8x40xbf16, #tpu.memory_space<vmem>>, vector<1x8x40xbf16>
    %1 = vector.shape_cast %0 : vector<1x8x40xbf16> to vector<8x40xbf16>
    %2 = arith.extf %1 : vector<8x40xbf16> to vector<8x40xf32>
    %cst = arith.constant 0.000000e+00 : f32
    %3 = vector.broadcast %cst : f32 to vector<8x40xf32>
    %4 = arith.cmpf oge, %2, %3 : vector<8x40xf32>
    %cst_2 = arith.constant 1.000000e-01 : f32
    %5 = vector.broadcast %cst_2 : f32 to vector<8x40xf32>
    %6 = arith.mulf %5, %2 : vector<8x40xf32>
    %7 = arith.select %4, %2, %6 : vector<8x40xi1>, vector<8x40xf32>
    %8 = arith.truncf %7 : vector<8x40xf32> to vector<8x40xbf16>
    %cst_3 = arith.constant 0.000000e+00 : f32
    %9 = vector.broadcast %cst_3 : f32 to vector<8x36xf32>
    %c0_4 = arith.constant 0 : index
    %c0_5 = arith.constant 0 : index
    %c0_6 = arith.constant 0 : index
    %10 = vector.load %arg3[%c0_4, %c0_5, %c0_6] : memref<5x8x8xbf16, #tpu.memory_space<vmem>>, vector<1x8x8xbf16>
    %11 = vector.shape_cast %10 : vector<1x8x8xbf16> to vector<8x8xbf16>
    %12 = vector.extract_strided_slice %8 {offsets = [0, 0], sizes = [8, 36], strides = [1, 1]} : vector<8x40xbf16> to vector<8x36xbf16>
    %cst_7 = arith.constant dense<0.000000e+00> : vector<8x36xf32>
    %13 = tpu.matmul %11, %12, %cst_7 {dimension_numbers = #tpu.dot_dimension_numbers<[1], [0], [0], [1], [0, 0, 1, 1], [], []>} : vector<8x8xbf16>, vector<8x36xbf16>, vector<8x36xf32> -> vector<8x36xf32>
    %14 = arith.addf %9, %13 : vector<8x36xf32>
    %c1 = arith.constant 1 : index
    %c0_8 = arith.constant 0 : index
    %c0_9 = arith.constant 0 : index
    %15 = vector.load %arg3[%c1, %c0_8, %c0_9] : memref<5x8x8xbf16, #tpu.memory_space<vmem>>, vector<1x8x8xbf16>
    %16 = vector.shape_cast %15 : vector<1x8x8xbf16> to vector<8x8xbf16>
    %17 = vector.extract_strided_slice %8 {offsets = [0, 1], sizes = [8, 36], strides = [1, 1]} : vector<8x40xbf16> to vector<8x36xbf16>
    %cst_10 = arith.constant dense<0.000000e+00> : vector<8x36xf32>
    %18 = tpu.matmul %16, %17, %cst_10 {dimension_numbers = #tpu.dot_dimension_numbers<[1], [0], [0], [1], [0, 0, 1, 1], [], []>} : vector<8x8xbf16>, vector<8x36xbf16>, vector<8x36xf32> -> vector<8x36xf32>
    %19 = arith.addf %14, %18 : vector<8x36xf32>
    %c2 = arith.constant 2 : index
    %c0_11 = arith.constant 0 : index
    %c0_12 = arith.constant 0 : index
    %20 = vector.load %arg3[%c2, %c0_11, %c0_12] : memref<5x8x8xbf16, #tpu.memory_space<vmem>>, vector<1x8x8xbf16>
    %21 = vector.shape_cast %20 : vector<1x8x8xbf16> to vector<8x8xbf16>
    %22 = vector.extract_strided_slice %8 {offsets = [0, 2], sizes = [8, 36], strides = [1, 1]} : vector<8x40xbf16> to vector<8x36xbf16>
    %cst_13 = arith.constant dense<0.000000e+00> : vector<8x36xf32>
    %23 = tpu.matmul %21, %22, %cst_13 {dimension_numbers = #tpu.dot_dimension_numbers<[1], [0], [0], [1], [0, 0, 1, 1], [], []>} : vector<8x8xbf16>, vector<8x36xbf16>, vector<8x36xf32> -> vector<8x36xf32>
    %24 = arith.addf %19, %23 : vector<8x36xf32>
    %c3 = arith.constant 3 : index
    %c0_14 = arith.constant 0 : index
    %c0_15 = arith.constant 0 : index
    %25 = vector.load %arg3[%c3, %c0_14, %c0_15] : memref<5x8x8xbf16, #tpu.memory_space<vmem>>, vector<1x8x8xbf16>
    %26 = vector.shape_cast %25 : vector<1x8x8xbf16> to vector<8x8xbf16>
    %27 = vector.extract_strided_slice %8 {offsets = [0, 3], sizes = [8, 36], strides = [1, 1]} : vector<8x40xbf16> to vector<8x36xbf16>
    %cst_16 = arith.constant dense<0.000000e+00> : vector<8x36xf32>
    %28 = tpu.matmul %26, %27, %cst_16 {dimension_numbers = #tpu.dot_dimension_numbers<[1], [0], [0], [1], [0, 0, 1, 1], [], []>} : vector<8x8xbf16>, vector<8x36xbf16>, vector<8x36xf32> -> vector<8x36xf32>
    %29 = arith.addf %24, %28 : vector<8x36xf32>
    %c4 = arith.constant 4 : index
    %c0_17 = arith.constant 0 : index
    %c0_18 = arith.constant 0 : index
    %30 = vector.load %arg3[%c4, %c0_17, %c0_18] : memref<5x8x8xbf16, #tpu.memory_space<vmem>>, vector<1x8x8xbf16>
    %31 = vector.shape_cast %30 : vector<1x8x8xbf16> to vector<8x8xbf16>
    %32 = vector.extract_strided_slice %8 {offsets = [0, 4], sizes = [8, 36], strides = [1, 1]} : vector<8x40xbf16> to vector<8x36xbf16>
    %cst_19 = arith.constant dense<0.000000e+00> : vector<8x36xf32>
    %33 = tpu.matmul %31, %32, %cst_19 {dimension_numbers = #tpu.dot_dimension_numbers<[1], [0], [0], [1], [0, 0, 1, 1], [], []>} : vector<8x8xbf16>, vector<8x36xbf16>, vector<8x36xf32> -> vector<8x36xf32>
    %34 = arith.addf %29, %33 : vector<8x36xf32>
    %c0_20 = arith.constant 0 : index
    %c0_21 = arith.constant 0 : index
    %35 = vector.load %arg4[%c0_20, %c0_21] : memref<8x1xf32, #tpu.memory_space<vmem>>, vector<8x1xf32>
    %36 = vector.broadcast %35 : vector<8x1xf32> to vector<8x36xf32>
    %37 = arith.addf %34, %36 : vector<8x36xf32>
    %cst_22 = arith.constant 0.000000e+00 : f32
    %38 = vector.broadcast %cst_22 : f32 to vector<8x36xf32>
    %39 = arith.cmpf oge, %37, %38 : vector<8x36xf32>
    %cst_23 = arith.constant 1.000000e-01 : f32
    %40 = vector.broadcast %cst_23 : f32 to vector<8x36xf32>
    %41 = arith.mulf %40, %37 : vector<8x36xf32>
    %42 = arith.select %39, %37, %41 : vector<8x36xi1>, vector<8x36xf32>
    %43 = tpu.iota {dimensions = array<i32: 1>} : vector<8x36xi32>
    %c-2_i32 = arith.constant -2 : i32
    %44 = vector.broadcast %c-2_i32 : i32 to vector<8x36xi32>
    %45 = arith.addi %44, %43 : vector<8x36xi32>
    %c0_i32 = arith.constant 0 : i32
    %46 = vector.broadcast %c0_i32 : i32 to vector<8x36xi32>
    %47 = arith.cmpi sge, %45, %46 : vector<8x36xi32>
    %c32_i32 = arith.constant 32 : i32
    %48 = vector.broadcast %c32_i32 : i32 to vector<8x36xi32>
    %49 = arith.cmpi slt, %45, %48 : vector<8x36xi32>
    %50 = arith.andi %47, %49 : vector<8x36xi1>
    %cst_24 = arith.constant 0.000000e+00 : f32
    %51 = vector.broadcast %cst_24 : f32 to vector<8x36xf32>
    %52 = arith.select %50, %42, %51 : vector<8x36xi1>, vector<8x36xf32>
    %53 = arith.truncf %52 : vector<8x36xf32> to vector<8x36xbf16>
    %cst_25 = arith.constant 0.000000e+00 : f32
    %54 = vector.broadcast %cst_25 : f32 to vector<8x32xf32>
    %c0_26 = arith.constant 0 : index
    %c0_27 = arith.constant 0 : index
    %c0_28 = arith.constant 0 : index
    %55 = vector.load %arg5[%c0_26, %c0_27, %c0_28] : memref<5x8x8xbf16, #tpu.memory_space<vmem>>, vector<1x8x8xbf16>
    %56 = vector.shape_cast %55 : vector<1x8x8xbf16> to vector<8x8xbf16>
    %57 = vector.extract_strided_slice %53 {offsets = [0, 0], sizes = [8, 32], strides = [1, 1]} : vector<8x36xbf16> to vector<8x32xbf16>
    %cst_29 = arith.constant dense<0.000000e+00> : vector<8x32xf32>
    %58 = tpu.matmul %56, %57, %cst_29 {dimension_numbers = #tpu.dot_dimension_numbers<[1], [0], [0], [1], [0, 0, 1, 1], [], []>} : vector<8x8xbf16>, vector<8x32xbf16>, vector<8x32xf32> -> vector<8x32xf32>
    %59 = arith.addf %54, %58 : vector<8x32xf32>
    %c1_30 = arith.constant 1 : index
    %c0_31 = arith.constant 0 : index
    %c0_32 = arith.constant 0 : index
    %60 = vector.load %arg5[%c1_30, %c0_31, %c0_32] : memref<5x8x8xbf16, #tpu.memory_space<vmem>>, vector<1x8x8xbf16>
    %61 = vector.shape_cast %60 : vector<1x8x8xbf16> to vector<8x8xbf16>
    %62 = vector.extract_strided_slice %53 {offsets = [0, 1], sizes = [8, 32], strides = [1, 1]} : vector<8x36xbf16> to vector<8x32xbf16>
    %cst_33 = arith.constant dense<0.000000e+00> : vector<8x32xf32>
    %63 = tpu.matmul %61, %62, %cst_33 {dimension_numbers = #tpu.dot_dimension_numbers<[1], [0], [0], [1], [0, 0, 1, 1], [], []>} : vector<8x8xbf16>, vector<8x32xbf16>, vector<8x32xf32> -> vector<8x32xf32>
    %64 = arith.addf %59, %63 : vector<8x32xf32>
    %c2_34 = arith.constant 2 : index
    %c0_35 = arith.constant 0 : index
    %c0_36 = arith.constant 0 : index
    %65 = vector.load %arg5[%c2_34, %c0_35, %c0_36] : memref<5x8x8xbf16, #tpu.memory_space<vmem>>, vector<1x8x8xbf16>
    %66 = vector.shape_cast %65 : vector<1x8x8xbf16> to vector<8x8xbf16>
    %67 = vector.extract_strided_slice %53 {offsets = [0, 2], sizes = [8, 32], strides = [1, 1]} : vector<8x36xbf16> to vector<8x32xbf16>
    %cst_37 = arith.constant dense<0.000000e+00> : vector<8x32xf32>
    %68 = tpu.matmul %66, %67, %cst_37 {dimension_numbers = #tpu.dot_dimension_numbers<[1], [0], [0], [1], [0, 0, 1, 1], [], []>} : vector<8x8xbf16>, vector<8x32xbf16>, vector<8x32xf32> -> vector<8x32xf32>
    %69 = arith.addf %64, %68 : vector<8x32xf32>
    %c3_38 = arith.constant 3 : index
    %c0_39 = arith.constant 0 : index
    %c0_40 = arith.constant 0 : index
    %70 = vector.load %arg5[%c3_38, %c0_39, %c0_40] : memref<5x8x8xbf16, #tpu.memory_space<vmem>>, vector<1x8x8xbf16>
    %71 = vector.shape_cast %70 : vector<1x8x8xbf16> to vector<8x8xbf16>
    %72 = vector.extract_strided_slice %53 {offsets = [0, 3], sizes = [8, 32], strides = [1, 1]} : vector<8x36xbf16> to vector<8x32xbf16>
    %cst_41 = arith.constant dense<0.000000e+00> : vector<8x32xf32>
    %73 = tpu.matmul %71, %72, %cst_41 {dimension_numbers = #tpu.dot_dimension_numbers<[1], [0], [0], [1], [0, 0, 1, 1], [], []>} : vector<8x8xbf16>, vector<8x32xbf16>, vector<8x32xf32> -> vector<8x32xf32>
    %74 = arith.addf %69, %73 : vector<8x32xf32>
    %c4_42 = arith.constant 4 : index
    %c0_43 = arith.constant 0 : index
    %c0_44 = arith.constant 0 : index
    %75 = vector.load %arg5[%c4_42, %c0_43, %c0_44] : memref<5x8x8xbf16, #tpu.memory_space<vmem>>, vector<1x8x8xbf16>
    %76 = vector.shape_cast %75 : vector<1x8x8xbf16> to vector<8x8xbf16>
    %77 = vector.extract_strided_slice %53 {offsets = [0, 4], sizes = [8, 32], strides = [1, 1]} : vector<8x36xbf16> to vector<8x32xbf16>
    %cst_45 = arith.constant dense<0.000000e+00> : vector<8x32xf32>
    %78 = tpu.matmul %76, %77, %cst_45 {dimension_numbers = #tpu.dot_dimension_numbers<[1], [0], [0], [1], [0, 0, 1, 1], [], []>} : vector<8x8xbf16>, vector<8x32xbf16>, vector<8x32xf32> -> vector<8x32xf32>
    %79 = arith.addf %74, %78 : vector<8x32xf32>
    %c0_46 = arith.constant 0 : index
    %c0_47 = arith.constant 0 : index
    %80 = vector.load %arg6[%c0_46, %c0_47] : memref<8x1xf32, #tpu.memory_space<vmem>>, vector<8x1xf32>
    %81 = vector.broadcast %80 : vector<8x1xf32> to vector<8x32xf32>
    %82 = arith.addf %79, %81 : vector<8x32xf32>
    %c0_48 = arith.constant 0 : index
    %c0_49 = arith.constant 0 : index
    %c4_50 = arith.constant 4 : index
    %83 = vector.load %arg2[%c0_48, %c0_49, %c4_50] : memref<1x8x40xbf16, #tpu.memory_space<vmem>>, vector<1x8x32xbf16>
    %84 = vector.shape_cast %83 : vector<1x8x32xbf16> to vector<8x32xbf16>
    %85 = arith.extf %84 : vector<8x32xbf16> to vector<8x32xf32>
    %86 = arith.addf %82, %85 : vector<8x32xf32>
    %87 = arith.truncf %86 : vector<8x32xf32> to vector<8x32xbf16>
    %c0_51 = arith.constant 0 : index
    %c0_52 = arith.constant 0 : index
    %c0_53 = arith.constant 0 : index
    %88 = vector.load %arg7[%c0_51, %c0_52, %c0_53] : memref<1x8x32xbf16, #tpu.memory_space<vmem>>, vector<1x8x32xbf16>
    %89 = vector.shape_cast %88 : vector<1x8x32xbf16> to vector<8x32xbf16>
    %90 = vector.shape_cast %87 : vector<8x32xbf16> to vector<1x8x32xbf16>
    tpu.vector_store %arg7[%c0_51, %c0_52, %c0_53], %90 {strides = array<i32>} : memref<1x8x32xbf16, #tpu.memory_space<vmem>>, vector<1x8x32xbf16>,
    return
  }
  func.func @transform_0(%arg0: i32, %arg1: i32) -> (i32, i32, i32) {
    %c0_i32 = arith.constant 0 : i32
    %c0_i32_0 = arith.constant 0 : i32
    %c0_i32_1 = arith.constant 0 : i32
    return %arg0, %c0_i32, %c0_i32_0 : i32, i32, i32
  }
  func.func @transform_1(%arg0: i32, %arg1: i32) -> (i32, i32, i32) {
    %c0_i32 = arith.constant 0 : i32
    %c0_i32_0 = arith.constant 0 : i32
    %c0_i32_1 = arith.constant 0 : i32
    %c0_i32_2 = arith.constant 0 : i32
    return %c0_i32, %c0_i32_0, %c0_i32_1 : i32, i32, i32
  }
  func.func @transform_2(%arg0: i32, %arg1: i32) -> (i32, i32) {
    %c0_i32 = arith.constant 0 : i32
    %c0_i32_0 = arith.constant 0 : i32
    %c0_i32_1 = arith.constant 0 : i32
    return %c0_i32, %c0_i32_0 : i32, i32
  }
  func.func @transform_3(%arg0: i32, %arg1: i32) -> (i32, i32, i32) {
    %c0_i32 = arith.constant 0 : i32
    %c0_i32_0 = arith.constant 0 : i32
    %c0_i32_1 = arith.constant 0 : i32
    %c0_i32_2 = arith.constant 0 : i32
    return %c0_i32, %c0_i32_0, %c0_i32_1 : i32, i32, i32
  }
  func.func @transform_4(%arg0: i32, %arg1: i32) -> (i32, i32) {
    %c0_i32 = arith.constant 0 : i32
    %c0_i32_0 = arith.constant 0 : i32
    %c0_i32_1 = arith.constant 0 : i32
    return %c0_i32, %c0_i32_0 : i32, i32
  }
  func.func @transform_5(%arg0: i32, %arg1: i32) -> (i32, i32, i32) {
    %c0_i32 = arith.constant 0 : i32
    %c0_i32_0 = arith.constant 0 : i32
    return %arg0, %c0_i32, %arg1 : i32, i32, i32
  }
}

module attributes {stable_mosaic.version = 11 : i64} {
  func.func @_conv_pair_kernel(%arg0: i32, %arg1: i32, %arg2: memref<1x8x48xbf16, #tpu.memory_space<vmem>>, %arg3: memref<5x8x8xbf16, #tpu.memory_space<vmem>>, %arg4: memref<8x1xf32, #tpu.memory_space<vmem>>, %arg5: memref<5x8x8xbf16, #tpu.memory_space<vmem>>, %arg6: memref<8x1xf32, #tpu.memory_space<vmem>>, %arg7: memref<1x8x32xbf16, #tpu.memory_space<vmem>>) attributes {dimension_semantics = [#tpu.dimension_semantics<parallel>, #tpu.dimension_semantics<parallel>], iteration_bounds = array<i64: 2, 1>, scalar_prefetch = 0 : i64, scratch_operands = 0 : i64, tpu.core_type = #tpu.core_type<tc>, window_params = [{transform_indices = @transform_0, window_bounds = array<i64: 1, 8, 48>}, {pipeline_mode = #tpu.pipeline_mode<synchronous>, transform_indices = @transform_1, window_bounds = array<i64: 5, 8, 8>}, {pipeline_mode = #tpu.pipeline_mode<synchronous>, transform_indices = @transform_2, window_bounds = array<i64: 8, 1>}, {pipeline_mode = #tpu.pipeline_mode<synchronous>, transform_indices = @transform_3, window_bounds = array<i64: 5, 8, 8>}, {pipeline_mode = #tpu.pipeline_mode<synchronous>, transform_indices = @transform_4, window_bounds = array<i64: 8, 1>}, {transform_indices = @transform_5, window_bounds = array<i64: 1, 8, 32>}]} {
    %c0 = arith.constant 0 : index
    %c0_0 = arith.constant 0 : index
    %c0_1 = arith.constant 0 : index
    %0 = vector.load %arg2[%c0, %c0_0, %c0_1] : memref<1x8x48xbf16, #tpu.memory_space<vmem>>, vector<1x8x48xbf16>
    %1 = vector.shape_cast %0 : vector<1x8x48xbf16> to vector<8x48xbf16>
    %2 = arith.extf %1 : vector<8x48xbf16> to vector<8x48xf32>
    %cst = arith.constant 0.000000e+00 : f32
    %3 = vector.broadcast %cst : f32 to vector<8x48xf32>
    %4 = arith.cmpf oge, %2, %3 : vector<8x48xf32>
    %cst_2 = arith.constant 1.000000e-01 : f32
    %5 = vector.broadcast %cst_2 : f32 to vector<8x48xf32>
    %6 = arith.mulf %5, %2 : vector<8x48xf32>
    %7 = arith.select %4, %2, %6 : vector<8x48xi1>, vector<8x48xf32>
    %8 = arith.truncf %7 : vector<8x48xf32> to vector<8x48xbf16>
    %cst_3 = arith.constant 0.000000e+00 : f32
    %9 = vector.broadcast %cst_3 : f32 to vector<8x36xf32>
    %c0_4 = arith.constant 0 : index
    %c0_5 = arith.constant 0 : index
    %c0_6 = arith.constant 0 : index
    %10 = vector.load %arg3[%c0_4, %c0_5, %c0_6] : memref<5x8x8xbf16, #tpu.memory_space<vmem>>, vector<1x8x8xbf16>
    %11 = vector.shape_cast %10 : vector<1x8x8xbf16> to vector<8x8xbf16>
    %12 = vector.extract_strided_slice %8 {offsets = [0, 0], sizes = [8, 36], strides = [1, 1]} : vector<8x48xbf16> to vector<8x36xbf16>
    %cst_7 = arith.constant dense<0.000000e+00> : vector<8x36xf32>
    %13 = tpu.matmul %11, %12, %cst_7 {dimension_numbers = #tpu.dot_dimension_numbers<[1], [0], [0], [1], [0, 0, 1, 1], [], []>} : vector<8x8xbf16>, vector<8x36xbf16>, vector<8x36xf32> -> vector<8x36xf32>
    %14 = arith.addf %9, %13 : vector<8x36xf32>
    %c1 = arith.constant 1 : index
    %c0_8 = arith.constant 0 : index
    %c0_9 = arith.constant 0 : index
    %15 = vector.load %arg3[%c1, %c0_8, %c0_9] : memref<5x8x8xbf16, #tpu.memory_space<vmem>>, vector<1x8x8xbf16>
    %16 = vector.shape_cast %15 : vector<1x8x8xbf16> to vector<8x8xbf16>
    %17 = vector.extract_strided_slice %8 {offsets = [0, 3], sizes = [8, 36], strides = [1, 1]} : vector<8x48xbf16> to vector<8x36xbf16>
    %cst_10 = arith.constant dense<0.000000e+00> : vector<8x36xf32>
    %18 = tpu.matmul %16, %17, %cst_10 {dimension_numbers = #tpu.dot_dimension_numbers<[1], [0], [0], [1], [0, 0, 1, 1], [], []>} : vector<8x8xbf16>, vector<8x36xbf16>, vector<8x36xf32> -> vector<8x36xf32>
    %19 = arith.addf %14, %18 : vector<8x36xf32>
    %c2 = arith.constant 2 : index
    %c0_11 = arith.constant 0 : index
    %c0_12 = arith.constant 0 : index
    %20 = vector.load %arg3[%c2, %c0_11, %c0_12] : memref<5x8x8xbf16, #tpu.memory_space<vmem>>, vector<1x8x8xbf16>
    %21 = vector.shape_cast %20 : vector<1x8x8xbf16> to vector<8x8xbf16>
    %22 = vector.extract_strided_slice %8 {offsets = [0, 6], sizes = [8, 36], strides = [1, 1]} : vector<8x48xbf16> to vector<8x36xbf16>
    %cst_13 = arith.constant dense<0.000000e+00> : vector<8x36xf32>
    %23 = tpu.matmul %21, %22, %cst_13 {dimension_numbers = #tpu.dot_dimension_numbers<[1], [0], [0], [1], [0, 0, 1, 1], [], []>} : vector<8x8xbf16>, vector<8x36xbf16>, vector<8x36xf32> -> vector<8x36xf32>
    %24 = arith.addf %19, %23 : vector<8x36xf32>
    %c3 = arith.constant 3 : index
    %c0_14 = arith.constant 0 : index
    %c0_15 = arith.constant 0 : index
    %25 = vector.load %arg3[%c3, %c0_14, %c0_15] : memref<5x8x8xbf16, #tpu.memory_space<vmem>>, vector<1x8x8xbf16>
    %26 = vector.shape_cast %25 : vector<1x8x8xbf16> to vector<8x8xbf16>
    %27 = vector.extract_strided_slice %8 {offsets = [0, 9], sizes = [8, 36], strides = [1, 1]} : vector<8x48xbf16> to vector<8x36xbf16>
    %cst_16 = arith.constant dense<0.000000e+00> : vector<8x36xf32>
    %28 = tpu.matmul %26, %27, %cst_16 {dimension_numbers = #tpu.dot_dimension_numbers<[1], [0], [0], [1], [0, 0, 1, 1], [], []>} : vector<8x8xbf16>, vector<8x36xbf16>, vector<8x36xf32> -> vector<8x36xf32>
    %29 = arith.addf %24, %28 : vector<8x36xf32>
    %c4 = arith.constant 4 : index
    %c0_17 = arith.constant 0 : index
    %c0_18 = arith.constant 0 : index
    %30 = vector.load %arg3[%c4, %c0_17, %c0_18] : memref<5x8x8xbf16, #tpu.memory_space<vmem>>, vector<1x8x8xbf16>
    %31 = vector.shape_cast %30 : vector<1x8x8xbf16> to vector<8x8xbf16>
    %32 = vector.extract_strided_slice %8 {offsets = [0, 12], sizes = [8, 36], strides = [1, 1]} : vector<8x48xbf16> to vector<8x36xbf16>
    %cst_19 = arith.constant dense<0.000000e+00> : vector<8x36xf32>
    %33 = tpu.matmul %31, %32, %cst_19 {dimension_numbers = #tpu.dot_dimension_numbers<[1], [0], [0], [1], [0, 0, 1, 1], [], []>} : vector<8x8xbf16>, vector<8x36xbf16>, vector<8x36xf32> -> vector<8x36xf32>
    %34 = arith.addf %29, %33 : vector<8x36xf32>
    %c0_20 = arith.constant 0 : index
    %c0_21 = arith.constant 0 : index
    %35 = vector.load %arg4[%c0_20, %c0_21] : memref<8x1xf32, #tpu.memory_space<vmem>>, vector<8x1xf32>
    %36 = vector.broadcast %35 : vector<8x1xf32> to vector<8x36xf32>
    %37 = arith.addf %34, %36 : vector<8x36xf32>
    %cst_22 = arith.constant 0.000000e+00 : f32
    %38 = vector.broadcast %cst_22 : f32 to vector<8x36xf32>
    %39 = arith.cmpf oge, %37, %38 : vector<8x36xf32>
    %cst_23 = arith.constant 1.000000e-01 : f32
    %40 = vector.broadcast %cst_23 : f32 to vector<8x36xf32>
    %41 = arith.mulf %40, %37 : vector<8x36xf32>
    %42 = arith.select %39, %37, %41 : vector<8x36xi1>, vector<8x36xf32>
    %43 = tpu.iota {dimensions = array<i32: 1>} : vector<8x36xi32>
    %c-2_i32 = arith.constant -2 : i32
    %44 = vector.broadcast %c-2_i32 : i32 to vector<8x36xi32>
    %45 = arith.addi %44, %43 : vector<8x36xi32>
    %c0_i32 = arith.constant 0 : i32
    %46 = vector.broadcast %c0_i32 : i32 to vector<8x36xi32>
    %47 = arith.cmpi sge, %45, %46 : vector<8x36xi32>
    %c32_i32 = arith.constant 32 : i32
    %48 = vector.broadcast %c32_i32 : i32 to vector<8x36xi32>
    %49 = arith.cmpi slt, %45, %48 : vector<8x36xi32>
    %50 = arith.andi %47, %49 : vector<8x36xi1>
    %cst_24 = arith.constant 0.000000e+00 : f32
    %51 = vector.broadcast %cst_24 : f32 to vector<8x36xf32>
    %52 = arith.select %50, %42, %51 : vector<8x36xi1>, vector<8x36xf32>
    %53 = arith.truncf %52 : vector<8x36xf32> to vector<8x36xbf16>
    %cst_25 = arith.constant 0.000000e+00 : f32
    %54 = vector.broadcast %cst_25 : f32 to vector<8x32xf32>
    %c0_26 = arith.constant 0 : index
    %c0_27 = arith.constant 0 : index
    %c0_28 = arith.constant 0 : index
    %55 = vector.load %arg5[%c0_26, %c0_27, %c0_28] : memref<5x8x8xbf16, #tpu.memory_space<vmem>>, vector<1x8x8xbf16>
    %56 = vector.shape_cast %55 : vector<1x8x8xbf16> to vector<8x8xbf16>
    %57 = vector.extract_strided_slice %53 {offsets = [0, 0], sizes = [8, 32], strides = [1, 1]} : vector<8x36xbf16> to vector<8x32xbf16>
    %cst_29 = arith.constant dense<0.000000e+00> : vector<8x32xf32>
    %58 = tpu.matmul %56, %57, %cst_29 {dimension_numbers = #tpu.dot_dimension_numbers<[1], [0], [0], [1], [0, 0, 1, 1], [], []>} : vector<8x8xbf16>, vector<8x32xbf16>, vector<8x32xf32> -> vector<8x32xf32>
    %59 = arith.addf %54, %58 : vector<8x32xf32>
    %c1_30 = arith.constant 1 : index
    %c0_31 = arith.constant 0 : index
    %c0_32 = arith.constant 0 : index
    %60 = vector.load %arg5[%c1_30, %c0_31, %c0_32] : memref<5x8x8xbf16, #tpu.memory_space<vmem>>, vector<1x8x8xbf16>
    %61 = vector.shape_cast %60 : vector<1x8x8xbf16> to vector<8x8xbf16>
    %62 = vector.extract_strided_slice %53 {offsets = [0, 1], sizes = [8, 32], strides = [1, 1]} : vector<8x36xbf16> to vector<8x32xbf16>
    %cst_33 = arith.constant dense<0.000000e+00> : vector<8x32xf32>
    %63 = tpu.matmul %61, %62, %cst_33 {dimension_numbers = #tpu.dot_dimension_numbers<[1], [0], [0], [1], [0, 0, 1, 1], [], []>} : vector<8x8xbf16>, vector<8x32xbf16>, vector<8x32xf32> -> vector<8x32xf32>
    %64 = arith.addf %59, %63 : vector<8x32xf32>
    %c2_34 = arith.constant 2 : index
    %c0_35 = arith.constant 0 : index
    %c0_36 = arith.constant 0 : index
    %65 = vector.load %arg5[%c2_34, %c0_35, %c0_36] : memref<5x8x8xbf16, #tpu.memory_space<vmem>>, vector<1x8x8xbf16>
    %66 = vector.shape_cast %65 : vector<1x8x8xbf16> to vector<8x8xbf16>
    %67 = vector.extract_strided_slice %53 {offsets = [0, 2], sizes = [8, 32], strides = [1, 1]} : vector<8x36xbf16> to vector<8x32xbf16>
    %cst_37 = arith.constant dense<0.000000e+00> : vector<8x32xf32>
    %68 = tpu.matmul %66, %67, %cst_37 {dimension_numbers = #tpu.dot_dimension_numbers<[1], [0], [0], [1], [0, 0, 1, 1], [], []>} : vector<8x8xbf16>, vector<8x32xbf16>, vector<8x32xf32> -> vector<8x32xf32>
    %69 = arith.addf %64, %68 : vector<8x32xf32>
    %c3_38 = arith.constant 3 : index
    %c0_39 = arith.constant 0 : index
    %c0_40 = arith.constant 0 : index
    %70 = vector.load %arg5[%c3_38, %c0_39, %c0_40] : memref<5x8x8xbf16, #tpu.memory_space<vmem>>, vector<1x8x8xbf16>
    %71 = vector.shape_cast %70 : vector<1x8x8xbf16> to vector<8x8xbf16>
    %72 = vector.extract_strided_slice %53 {offsets = [0, 3], sizes = [8, 32], strides = [1, 1]} : vector<8x36xbf16> to vector<8x32xbf16>
    %cst_41 = arith.constant dense<0.000000e+00> : vector<8x32xf32>
    %73 = tpu.matmul %71, %72, %cst_41 {dimension_numbers = #tpu.dot_dimension_numbers<[1], [0], [0], [1], [0, 0, 1, 1], [], []>} : vector<8x8xbf16>, vector<8x32xbf16>, vector<8x32xf32> -> vector<8x32xf32>
    %74 = arith.addf %69, %73 : vector<8x32xf32>
    %c4_42 = arith.constant 4 : index
    %c0_43 = arith.constant 0 : index
    %c0_44 = arith.constant 0 : index
    %75 = vector.load %arg5[%c4_42, %c0_43, %c0_44] : memref<5x8x8xbf16, #tpu.memory_space<vmem>>, vector<1x8x8xbf16>
    %76 = vector.shape_cast %75 : vector<1x8x8xbf16> to vector<8x8xbf16>
    %77 = vector.extract_strided_slice %53 {offsets = [0, 4], sizes = [8, 32], strides = [1, 1]} : vector<8x36xbf16> to vector<8x32xbf16>
    %cst_45 = arith.constant dense<0.000000e+00> : vector<8x32xf32>
    %78 = tpu.matmul %76, %77, %cst_45 {dimension_numbers = #tpu.dot_dimension_numbers<[1], [0], [0], [1], [0, 0, 1, 1], [], []>} : vector<8x8xbf16>, vector<8x32xbf16>, vector<8x32xf32> -> vector<8x32xf32>
    %79 = arith.addf %74, %78 : vector<8x32xf32>
    %c0_46 = arith.constant 0 : index
    %c0_47 = arith.constant 0 : index
    %80 = vector.load %arg6[%c0_46, %c0_47] : memref<8x1xf32, #tpu.memory_space<vmem>>, vector<8x1xf32>
    %81 = vector.broadcast %80 : vector<8x1xf32> to vector<8x32xf32>
    %82 = arith.addf %79, %81 : vector<8x32xf32>
    %c0_48 = arith.constant 0 : index
    %c0_49 = arith.constant 0 : index
    %c8 = arith.constant 8 : index
    %83 = vector.load %arg2[%c0_48, %c0_49, %c8] : memref<1x8x48xbf16, #tpu.memory_space<vmem>>, vector<1x8x32xbf16>
    %84 = vector.shape_cast %83 : vector<1x8x32xbf16> to vector<8x32xbf16>
    %85 = arith.extf %84 : vector<8x32xbf16> to vector<8x32xf32>
    %86 = arith.addf %82, %85 : vector<8x32xf32>
    %87 = arith.truncf %86 : vector<8x32xf32> to vector<8x32xbf16>
    %c0_50 = arith.constant 0 : index
    %c0_51 = arith.constant 0 : index
    %c0_52 = arith.constant 0 : index
    %88 = vector.load %arg7[%c0_50, %c0_51, %c0_52] : memref<1x8x32xbf16, #tpu.memory_space<vmem>>, vector<1x8x32xbf16>
    %89 = vector.shape_cast %88 : vector<1x8x32xbf16> to vector<8x32xbf16>
    %90 = vector.shape_cast %87 : vector<8x32xbf16> to vector<1x8x32xbf16>
    tpu.vector_store %arg7[%c0_50, %c0_51, %c0_52], %90 {strides = array<i32>} : memref<1x8x32xbf16, #tpu.memory_space<vmem>>, vector<1x8x32xbf16>,
    return
  }
  func.func @transform_0(%arg0: i32, %arg1: i32) -> (i32, i32, i32) {
    %c0_i32 = arith.constant 0 : i32
    %c0_i32_0 = arith.constant 0 : i32
    %c0_i32_1 = arith.constant 0 : i32
    return %arg0, %c0_i32, %c0_i32_0 : i32, i32, i32
  }
  func.func @transform_1(%arg0: i32, %arg1: i32) -> (i32, i32, i32) {
    %c0_i32 = arith.constant 0 : i32
    %c0_i32_0 = arith.constant 0 : i32
    %c0_i32_1 = arith.constant 0 : i32
    %c0_i32_2 = arith.constant 0 : i32
    return %c0_i32, %c0_i32_0, %c0_i32_1 : i32, i32, i32
  }
  func.func @transform_2(%arg0: i32, %arg1: i32) -> (i32, i32) {
    %c0_i32 = arith.constant 0 : i32
    %c0_i32_0 = arith.constant 0 : i32
    %c0_i32_1 = arith.constant 0 : i32
    return %c0_i32, %c0_i32_0 : i32, i32
  }
  func.func @transform_3(%arg0: i32, %arg1: i32) -> (i32, i32, i32) {
    %c0_i32 = arith.constant 0 : i32
    %c0_i32_0 = arith.constant 0 : i32
    %c0_i32_1 = arith.constant 0 : i32
    %c0_i32_2 = arith.constant 0 : i32
    return %c0_i32, %c0_i32_0, %c0_i32_1 : i32, i32, i32
  }
  func.func @transform_4(%arg0: i32, %arg1: i32) -> (i32, i32) {
    %c0_i32 = arith.constant 0 : i32
    %c0_i32_0 = arith.constant 0 : i32
    %c0_i32_1 = arith.constant 0 : i32
    return %c0_i32, %c0_i32_0 : i32, i32
  }
  func.func @transform_5(%arg0: i32, %arg1: i32) -> (i32, i32, i32) {
    %c0_i32 = arith.constant 0 : i32
    %c0_i32_0 = arith.constant 0 : i32
    return %arg0, %c0_i32, %arg1 : i32, i32, i32
  }
}

module attributes {stable_mosaic.version = 11 : i64} {
  func.func @_conv_pair_kernel(%arg0: i32, %arg1: i32, %arg2: memref<1x8x56xbf16, #tpu.memory_space<vmem>>, %arg3: memref<5x8x8xbf16, #tpu.memory_space<vmem>>, %arg4: memref<8x1xf32, #tpu.memory_space<vmem>>, %arg5: memref<5x8x8xbf16, #tpu.memory_space<vmem>>, %arg6: memref<8x1xf32, #tpu.memory_space<vmem>>, %arg7: memref<1x8x32xbf16, #tpu.memory_space<vmem>>, %arg8: memref<1x8x32xbf16, #tpu.memory_space<vmem>>) attributes {dimension_semantics = [#tpu.dimension_semantics<parallel>, #tpu.dimension_semantics<parallel>], iteration_bounds = array<i64: 2, 1>, scalar_prefetch = 0 : i64, scratch_operands = 0 : i64, tpu.core_type = #tpu.core_type<tc>, window_params = [{transform_indices = @transform_0, window_bounds = array<i64: 1, 8, 56>}, {pipeline_mode = #tpu.pipeline_mode<synchronous>, transform_indices = @transform_1, window_bounds = array<i64: 5, 8, 8>}, {pipeline_mode = #tpu.pipeline_mode<synchronous>, transform_indices = @transform_2, window_bounds = array<i64: 8, 1>}, {pipeline_mode = #tpu.pipeline_mode<synchronous>, transform_indices = @transform_3, window_bounds = array<i64: 5, 8, 8>}, {pipeline_mode = #tpu.pipeline_mode<synchronous>, transform_indices = @transform_4, window_bounds = array<i64: 8, 1>}, {transform_indices = @transform_5, window_bounds = array<i64: 1, 8, 32>}, {transform_indices = @transform_6, window_bounds = array<i64: 1, 8, 32>}]} {
    %c0 = arith.constant 0 : index
    %c0_0 = arith.constant 0 : index
    %c0_1 = arith.constant 0 : index
    %0 = vector.load %arg2[%c0, %c0_0, %c0_1] : memref<1x8x56xbf16, #tpu.memory_space<vmem>>, vector<1x8x56xbf16>
    %1 = vector.shape_cast %0 : vector<1x8x56xbf16> to vector<8x56xbf16>
    %2 = arith.extf %1 : vector<8x56xbf16> to vector<8x56xf32>
    %cst = arith.constant 0.000000e+00 : f32
    %3 = vector.broadcast %cst : f32 to vector<8x56xf32>
    %4 = arith.cmpf oge, %2, %3 : vector<8x56xf32>
    %cst_2 = arith.constant 1.000000e-01 : f32
    %5 = vector.broadcast %cst_2 : f32 to vector<8x56xf32>
    %6 = arith.mulf %5, %2 : vector<8x56xf32>
    %7 = arith.select %4, %2, %6 : vector<8x56xi1>, vector<8x56xf32>
    %8 = arith.truncf %7 : vector<8x56xf32> to vector<8x56xbf16>
    %cst_3 = arith.constant 0.000000e+00 : f32
    %9 = vector.broadcast %cst_3 : f32 to vector<8x36xf32>
    %c0_4 = arith.constant 0 : index
    %c0_5 = arith.constant 0 : index
    %c0_6 = arith.constant 0 : index
    %10 = vector.load %arg3[%c0_4, %c0_5, %c0_6] : memref<5x8x8xbf16, #tpu.memory_space<vmem>>, vector<1x8x8xbf16>
    %11 = vector.shape_cast %10 : vector<1x8x8xbf16> to vector<8x8xbf16>
    %12 = vector.extract_strided_slice %8 {offsets = [0, 0], sizes = [8, 36], strides = [1, 1]} : vector<8x56xbf16> to vector<8x36xbf16>
    %cst_7 = arith.constant dense<0.000000e+00> : vector<8x36xf32>
    %13 = tpu.matmul %11, %12, %cst_7 {dimension_numbers = #tpu.dot_dimension_numbers<[1], [0], [0], [1], [0, 0, 1, 1], [], []>} : vector<8x8xbf16>, vector<8x36xbf16>, vector<8x36xf32> -> vector<8x36xf32>
    %14 = arith.addf %9, %13 : vector<8x36xf32>
    %c1 = arith.constant 1 : index
    %c0_8 = arith.constant 0 : index
    %c0_9 = arith.constant 0 : index
    %15 = vector.load %arg3[%c1, %c0_8, %c0_9] : memref<5x8x8xbf16, #tpu.memory_space<vmem>>, vector<1x8x8xbf16>
    %16 = vector.shape_cast %15 : vector<1x8x8xbf16> to vector<8x8xbf16>
    %17 = vector.extract_strided_slice %8 {offsets = [0, 5], sizes = [8, 36], strides = [1, 1]} : vector<8x56xbf16> to vector<8x36xbf16>
    %cst_10 = arith.constant dense<0.000000e+00> : vector<8x36xf32>
    %18 = tpu.matmul %16, %17, %cst_10 {dimension_numbers = #tpu.dot_dimension_numbers<[1], [0], [0], [1], [0, 0, 1, 1], [], []>} : vector<8x8xbf16>, vector<8x36xbf16>, vector<8x36xf32> -> vector<8x36xf32>
    %19 = arith.addf %14, %18 : vector<8x36xf32>
    %c2 = arith.constant 2 : index
    %c0_11 = arith.constant 0 : index
    %c0_12 = arith.constant 0 : index
    %20 = vector.load %arg3[%c2, %c0_11, %c0_12] : memref<5x8x8xbf16, #tpu.memory_space<vmem>>, vector<1x8x8xbf16>
    %21 = vector.shape_cast %20 : vector<1x8x8xbf16> to vector<8x8xbf16>
    %22 = vector.extract_strided_slice %8 {offsets = [0, 10], sizes = [8, 36], strides = [1, 1]} : vector<8x56xbf16> to vector<8x36xbf16>
    %cst_13 = arith.constant dense<0.000000e+00> : vector<8x36xf32>
    %23 = tpu.matmul %21, %22, %cst_13 {dimension_numbers = #tpu.dot_dimension_numbers<[1], [0], [0], [1], [0, 0, 1, 1], [], []>} : vector<8x8xbf16>, vector<8x36xbf16>, vector<8x36xf32> -> vector<8x36xf32>
    %24 = arith.addf %19, %23 : vector<8x36xf32>
    %c3 = arith.constant 3 : index
    %c0_14 = arith.constant 0 : index
    %c0_15 = arith.constant 0 : index
    %25 = vector.load %arg3[%c3, %c0_14, %c0_15] : memref<5x8x8xbf16, #tpu.memory_space<vmem>>, vector<1x8x8xbf16>
    %26 = vector.shape_cast %25 : vector<1x8x8xbf16> to vector<8x8xbf16>
    %27 = vector.extract_strided_slice %8 {offsets = [0, 15], sizes = [8, 36], strides = [1, 1]} : vector<8x56xbf16> to vector<8x36xbf16>
    %cst_16 = arith.constant dense<0.000000e+00> : vector<8x36xf32>
    %28 = tpu.matmul %26, %27, %cst_16 {dimension_numbers = #tpu.dot_dimension_numbers<[1], [0], [0], [1], [0, 0, 1, 1], [], []>} : vector<8x8xbf16>, vector<8x36xbf16>, vector<8x36xf32> -> vector<8x36xf32>
    %29 = arith.addf %24, %28 : vector<8x36xf32>
    %c4 = arith.constant 4 : index
    %c0_17 = arith.constant 0 : index
    %c0_18 = arith.constant 0 : index
    %30 = vector.load %arg3[%c4, %c0_17, %c0_18] : memref<5x8x8xbf16, #tpu.memory_space<vmem>>, vector<1x8x8xbf16>
    %31 = vector.shape_cast %30 : vector<1x8x8xbf16> to vector<8x8xbf16>
    %32 = vector.extract_strided_slice %8 {offsets = [0, 20], sizes = [8, 36], strides = [1, 1]} : vector<8x56xbf16> to vector<8x36xbf16>
    %cst_19 = arith.constant dense<0.000000e+00> : vector<8x36xf32>
    %33 = tpu.matmul %31, %32, %cst_19 {dimension_numbers = #tpu.dot_dimension_numbers<[1], [0], [0], [1], [0, 0, 1, 1], [], []>} : vector<8x8xbf16>, vector<8x36xbf16>, vector<8x36xf32> -> vector<8x36xf32>
    %34 = arith.addf %29, %33 : vector<8x36xf32>
    %c0_20 = arith.constant 0 : index
    %c0_21 = arith.constant 0 : index
    %35 = vector.load %arg4[%c0_20, %c0_21] : memref<8x1xf32, #tpu.memory_space<vmem>>, vector<8x1xf32>
    %36 = vector.broadcast %35 : vector<8x1xf32> to vector<8x36xf32>
    %37 = arith.addf %34, %36 : vector<8x36xf32>
    %cst_22 = arith.constant 0.000000e+00 : f32
    %38 = vector.broadcast %cst_22 : f32 to vector<8x36xf32>
    %39 = arith.cmpf oge, %37, %38 : vector<8x36xf32>
    %cst_23 = arith.constant 1.000000e-01 : f32
    %40 = vector.broadcast %cst_23 : f32 to vector<8x36xf32>
    %41 = arith.mulf %40, %37 : vector<8x36xf32>
    %42 = arith.select %39, %37, %41 : vector<8x36xi1>, vector<8x36xf32>
    %43 = tpu.iota {dimensions = array<i32: 1>} : vector<8x36xi32>
    %c-2_i32 = arith.constant -2 : i32
    %44 = vector.broadcast %c-2_i32 : i32 to vector<8x36xi32>
    %45 = arith.addi %44, %43 : vector<8x36xi32>
    %c0_i32 = arith.constant 0 : i32
    %46 = vector.broadcast %c0_i32 : i32 to vector<8x36xi32>
    %47 = arith.cmpi sge, %45, %46 : vector<8x36xi32>
    %c32_i32 = arith.constant 32 : i32
    %48 = vector.broadcast %c32_i32 : i32 to vector<8x36xi32>
    %49 = arith.cmpi slt, %45, %48 : vector<8x36xi32>
    %50 = arith.andi %47, %49 : vector<8x36xi1>
    %cst_24 = arith.constant 0.000000e+00 : f32
    %51 = vector.broadcast %cst_24 : f32 to vector<8x36xf32>
    %52 = arith.select %50, %42, %51 : vector<8x36xi1>, vector<8x36xf32>
    %53 = arith.truncf %52 : vector<8x36xf32> to vector<8x36xbf16>
    %cst_25 = arith.constant 0.000000e+00 : f32
    %54 = vector.broadcast %cst_25 : f32 to vector<8x32xf32>
    %c0_26 = arith.constant 0 : index
    %c0_27 = arith.constant 0 : index
    %c0_28 = arith.constant 0 : index
    %55 = vector.load %arg5[%c0_26, %c0_27, %c0_28] : memref<5x8x8xbf16, #tpu.memory_space<vmem>>, vector<1x8x8xbf16>
    %56 = vector.shape_cast %55 : vector<1x8x8xbf16> to vector<8x8xbf16>
    %57 = vector.extract_strided_slice %53 {offsets = [0, 0], sizes = [8, 32], strides = [1, 1]} : vector<8x36xbf16> to vector<8x32xbf16>
    %cst_29 = arith.constant dense<0.000000e+00> : vector<8x32xf32>
    %58 = tpu.matmul %56, %57, %cst_29 {dimension_numbers = #tpu.dot_dimension_numbers<[1], [0], [0], [1], [0, 0, 1, 1], [], []>} : vector<8x8xbf16>, vector<8x32xbf16>, vector<8x32xf32> -> vector<8x32xf32>
    %59 = arith.addf %54, %58 : vector<8x32xf32>
    %c1_30 = arith.constant 1 : index
    %c0_31 = arith.constant 0 : index
    %c0_32 = arith.constant 0 : index
    %60 = vector.load %arg5[%c1_30, %c0_31, %c0_32] : memref<5x8x8xbf16, #tpu.memory_space<vmem>>, vector<1x8x8xbf16>
    %61 = vector.shape_cast %60 : vector<1x8x8xbf16> to vector<8x8xbf16>
    %62 = vector.extract_strided_slice %53 {offsets = [0, 1], sizes = [8, 32], strides = [1, 1]} : vector<8x36xbf16> to vector<8x32xbf16>
    %cst_33 = arith.constant dense<0.000000e+00> : vector<8x32xf32>
    %63 = tpu.matmul %61, %62, %cst_33 {dimension_numbers = #tpu.dot_dimension_numbers<[1], [0], [0], [1], [0, 0, 1, 1], [], []>} : vector<8x8xbf16>, vector<8x32xbf16>, vector<8x32xf32> -> vector<8x32xf32>
    %64 = arith.addf %59, %63 : vector<8x32xf32>
    %c2_34 = arith.constant 2 : index
    %c0_35 = arith.constant 0 : index
    %c0_36 = arith.constant 0 : index
    %65 = vector.load %arg5[%c2_34, %c0_35, %c0_36] : memref<5x8x8xbf16, #tpu.memory_space<vmem>>, vector<1x8x8xbf16>
    %66 = vector.shape_cast %65 : vector<1x8x8xbf16> to vector<8x8xbf16>
    %67 = vector.extract_strided_slice %53 {offsets = [0, 2], sizes = [8, 32], strides = [1, 1]} : vector<8x36xbf16> to vector<8x32xbf16>
    %cst_37 = arith.constant dense<0.000000e+00> : vector<8x32xf32>
    %68 = tpu.matmul %66, %67, %cst_37 {dimension_numbers = #tpu.dot_dimension_numbers<[1], [0], [0], [1], [0, 0, 1, 1], [], []>} : vector<8x8xbf16>, vector<8x32xbf16>, vector<8x32xf32> -> vector<8x32xf32>
    %69 = arith.addf %64, %68 : vector<8x32xf32>
    %c3_38 = arith.constant 3 : index
    %c0_39 = arith.constant 0 : index
    %c0_40 = arith.constant 0 : index
    %70 = vector.load %arg5[%c3_38, %c0_39, %c0_40] : memref<5x8x8xbf16, #tpu.memory_space<vmem>>, vector<1x8x8xbf16>
    %71 = vector.shape_cast %70 : vector<1x8x8xbf16> to vector<8x8xbf16>
    %72 = vector.extract_strided_slice %53 {offsets = [0, 3], sizes = [8, 32], strides = [1, 1]} : vector<8x36xbf16> to vector<8x32xbf16>
    %cst_41 = arith.constant dense<0.000000e+00> : vector<8x32xf32>
    %73 = tpu.matmul %71, %72, %cst_41 {dimension_numbers = #tpu.dot_dimension_numbers<[1], [0], [0], [1], [0, 0, 1, 1], [], []>} : vector<8x8xbf16>, vector<8x32xbf16>, vector<8x32xf32> -> vector<8x32xf32>
    %74 = arith.addf %69, %73 : vector<8x32xf32>
    %c4_42 = arith.constant 4 : index
    %c0_43 = arith.constant 0 : index
    %c0_44 = arith.constant 0 : index
    %75 = vector.load %arg5[%c4_42, %c0_43, %c0_44] : memref<5x8x8xbf16, #tpu.memory_space<vmem>>, vector<1x8x8xbf16>
    %76 = vector.shape_cast %75 : vector<1x8x8xbf16> to vector<8x8xbf16>
    %77 = vector.extract_strided_slice %53 {offsets = [0, 4], sizes = [8, 32], strides = [1, 1]} : vector<8x36xbf16> to vector<8x32xbf16>
    %cst_45 = arith.constant dense<0.000000e+00> : vector<8x32xf32>
    %78 = tpu.matmul %76, %77, %cst_45 {dimension_numbers = #tpu.dot_dimension_numbers<[1], [0], [0], [1], [0, 0, 1, 1], [], []>} : vector<8x8xbf16>, vector<8x32xbf16>, vector<8x32xf32> -> vector<8x32xf32>
    %79 = arith.addf %74, %78 : vector<8x32xf32>
    %c0_46 = arith.constant 0 : index
    %c0_47 = arith.constant 0 : index
    %80 = vector.load %arg6[%c0_46, %c0_47] : memref<8x1xf32, #tpu.memory_space<vmem>>, vector<8x1xf32>
    %81 = vector.broadcast %80 : vector<8x1xf32> to vector<8x32xf32>
    %82 = arith.addf %79, %81 : vector<8x32xf32>
    %c0_48 = arith.constant 0 : index
    %c0_49 = arith.constant 0 : index
    %c12 = arith.constant 12 : index
    %83 = vector.load %arg2[%c0_48, %c0_49, %c12] : memref<1x8x56xbf16, #tpu.memory_space<vmem>>, vector<1x8x32xbf16>
    %84 = vector.shape_cast %83 : vector<1x8x32xbf16> to vector<8x32xbf16>
    %85 = arith.extf %84 : vector<8x32xbf16> to vector<8x32xf32>
    %86 = arith.addf %82, %85 : vector<8x32xf32>
    %c0_50 = arith.constant 0 : index
    %c0_51 = arith.constant 0 : index
    %c0_52 = arith.constant 0 : index
    %87 = vector.load %arg7[%c0_50, %c0_51, %c0_52] : memref<1x8x32xbf16, #tpu.memory_space<vmem>>, vector<1x8x32xbf16>
    %88 = vector.shape_cast %87 : vector<1x8x32xbf16> to vector<8x32xbf16>
    %89 = arith.extf %88 : vector<8x32xbf16> to vector<8x32xf32>
    %90 = arith.addf %86, %89 : vector<8x32xf32>
    %cst_53 = arith.constant 5.000000e-01 : f32
    %91 = vector.broadcast %cst_53 : f32 to vector<8x32xf32>
    %92 = arith.mulf %90, %91 : vector<8x32xf32>
    %93 = arith.truncf %92 : vector<8x32xf32> to vector<8x32xbf16>
    %c0_54 = arith.constant 0 : index
    %c0_55 = arith.constant 0 : index
    %c0_56 = arith.constant 0 : index
    %94 = vector.load %arg8[%c0_54, %c0_55, %c0_56] : memref<1x8x32xbf16, #tpu.memory_space<vmem>>, vector<1x8x32xbf16>
    %95 = vector.shape_cast %94 : vector<1x8x32xbf16> to vector<8x32xbf16>
    %96 = vector.shape_cast %93 : vector<8x32xbf16> to vector<1x8x32xbf16>
    tpu.vector_store %arg8[%c0_54, %c0_55, %c0_56], %96 {strides = array<i32>} : memref<1x8x32xbf16, #tpu.memory_space<vmem>>, vector<1x8x32xbf16>,
    return
  }
  func.func @transform_0(%arg0: i32, %arg1: i32) -> (i32, i32, i32) {
    %c0_i32 = arith.constant 0 : i32
    %c0_i32_0 = arith.constant 0 : i32
    %c0_i32_1 = arith.constant 0 : i32
    return %arg0, %c0_i32, %c0_i32_0 : i32, i32, i32
  }
  func.func @transform_1(%arg0: i32, %arg1: i32) -> (i32, i32, i32) {
    %c0_i32 = arith.constant 0 : i32
    %c0_i32_0 = arith.constant 0 : i32
    %c0_i32_1 = arith.constant 0 : i32
    %c0_i32_2 = arith.constant 0 : i32
    return %c0_i32, %c0_i32_0, %c0_i32_1 : i32, i32, i32
  }
  func.func @transform_2(%arg0: i32, %arg1: i32) -> (i32, i32) {
    %c0_i32 = arith.constant 0 : i32
    %c0_i32_0 = arith.constant 0 : i32
    %c0_i32_1 = arith.constant 0 : i32
    return %c0_i32, %c0_i32_0 : i32, i32
  }
  func.func @transform_3(%arg0: i32, %arg1: i32) -> (i32, i32, i32) {
    %c0_i32 = arith.constant 0 : i32
    %c0_i32_0 = arith.constant 0 : i32
    %c0_i32_1 = arith.constant 0 : i32
    %c0_i32_2 = arith.constant 0 : i32
    return %c0_i32, %c0_i32_0, %c0_i32_1 : i32, i32, i32
  }
  func.func @transform_4(%arg0: i32, %arg1: i32) -> (i32, i32) {
    %c0_i32 = arith.constant 0 : i32
    %c0_i32_0 = arith.constant 0 : i32
    %c0_i32_1 = arith.constant 0 : i32
    return %c0_i32, %c0_i32_0 : i32, i32
  }
  func.func @transform_5(%arg0: i32, %arg1: i32) -> (i32, i32, i32) {
    %c0_i32 = arith.constant 0 : i32
    %c0_i32_0 = arith.constant 0 : i32
    return %arg0, %c0_i32, %arg1 : i32, i32, i32
  }
  func.func @transform_6(%arg0: i32, %arg1: i32) -> (i32, i32, i32) {
    %c0_i32 = arith.constant 0 : i32
    %c0_i32_0 = arith.constant 0 : i32
    return %arg0, %c0_i32, %arg1 : i32, i32, i32
  }
}

module attributes {stable_mosaic.version = 11 : i64} {
  func.func @_conv_pair_kernel(%arg0: i32, %arg1: i32, %arg2: memref<1x8x42xbf16, #tpu.memory_space<vmem>>, %arg3: memref<7x4x8xbf16, #tpu.memory_space<vmem>>, %arg4: memref<4x1xf32, #tpu.memory_space<vmem>>, %arg5: memref<5x1x4xbf16, #tpu.memory_space<vmem>>, %arg6: memref<1x1xf32, #tpu.memory_space<vmem>>, %arg7: memref<1x1x32xf32, #tpu.memory_space<vmem>>) attributes {dimension_semantics = [#tpu.dimension_semantics<parallel>, #tpu.dimension_semantics<parallel>], iteration_bounds = array<i64: 2, 1>, scalar_prefetch = 0 : i64, scratch_operands = 0 : i64, tpu.core_type = #tpu.core_type<tc>, window_params = [{transform_indices = @transform_0, window_bounds = array<i64: 1, 8, 42>}, {pipeline_mode = #tpu.pipeline_mode<synchronous>, transform_indices = @transform_1, window_bounds = array<i64: 7, 4, 8>}, {pipeline_mode = #tpu.pipeline_mode<synchronous>, transform_indices = @transform_2, window_bounds = array<i64: 4, 1>}, {pipeline_mode = #tpu.pipeline_mode<synchronous>, transform_indices = @transform_3, window_bounds = array<i64: 5, 1, 4>}, {pipeline_mode = #tpu.pipeline_mode<synchronous>, transform_indices = @transform_4, window_bounds = array<i64: 1, 1>}, {transform_indices = @transform_5, window_bounds = array<i64: 1, 1, 32>}]} {
    %c0 = arith.constant 0 : index
    %c0_0 = arith.constant 0 : index
    %c0_1 = arith.constant 0 : index
    %0 = vector.load %arg2[%c0, %c0_0, %c0_1] : memref<1x8x42xbf16, #tpu.memory_space<vmem>>, vector<1x8x42xbf16>
    %1 = vector.shape_cast %0 : vector<1x8x42xbf16> to vector<8x42xbf16>
    %2 = arith.extf %1 : vector<8x42xbf16> to vector<8x42xf32>
    %cst = arith.constant 0.000000e+00 : f32
    %3 = vector.broadcast %cst : f32 to vector<8x42xf32>
    %4 = arith.cmpf oge, %2, %3 : vector<8x42xf32>
    %cst_2 = arith.constant 0.00999999977 : f32
    %5 = vector.broadcast %cst_2 : f32 to vector<8x42xf32>
    %6 = arith.mulf %5, %2 : vector<8x42xf32>
    %7 = arith.select %4, %2, %6 : vector<8x42xi1>, vector<8x42xf32>
    %8 = arith.truncf %7 : vector<8x42xf32> to vector<8x42xbf16>
    %cst_3 = arith.constant 0.000000e+00 : f32
    %9 = vector.broadcast %cst_3 : f32 to vector<4x36xf32>
    %c0_4 = arith.constant 0 : index
    %c0_5 = arith.constant 0 : index
    %c0_6 = arith.constant 0 : index
    %10 = vector.load %arg3[%c0_4, %c0_5, %c0_6] : memref<7x4x8xbf16, #tpu.memory_space<vmem>>, vector<1x4x8xbf16>
    %11 = vector.shape_cast %10 : vector<1x4x8xbf16> to vector<4x8xbf16>
    %12 = vector.extract_strided_slice %8 {offsets = [0, 0], sizes = [8, 36], strides = [1, 1]} : vector<8x42xbf16> to vector<8x36xbf16>
    %cst_7 = arith.constant dense<0.000000e+00> : vector<4x36xf32>
    %13 = tpu.matmul %11, %12, %cst_7 {dimension_numbers = #tpu.dot_dimension_numbers<[1], [0], [0], [1], [0, 0, 1, 1], [], []>} : vector<4x8xbf16>, vector<8x36xbf16>, vector<4x36xf32> -> vector<4x36xf32>
    %14 = arith.addf %9, %13 : vector<4x36xf32>
    %c1 = arith.constant 1 : index
    %c0_8 = arith.constant 0 : index
    %c0_9 = arith.constant 0 : index
    %15 = vector.load %arg3[%c1, %c0_8, %c0_9] : memref<7x4x8xbf16, #tpu.memory_space<vmem>>, vector<1x4x8xbf16>
    %16 = vector.shape_cast %15 : vector<1x4x8xbf16> to vector<4x8xbf16>
    %17 = vector.extract_strided_slice %8 {offsets = [0, 1], sizes = [8, 36], strides = [1, 1]} : vector<8x42xbf16> to vector<8x36xbf16>
    %cst_10 = arith.constant dense<0.000000e+00> : vector<4x36xf32>
    %18 = tpu.matmul %16, %17, %cst_10 {dimension_numbers = #tpu.dot_dimension_numbers<[1], [0], [0], [1], [0, 0, 1, 1], [], []>} : vector<4x8xbf16>, vector<8x36xbf16>, vector<4x36xf32> -> vector<4x36xf32>
    %19 = arith.addf %14, %18 : vector<4x36xf32>
    %c2 = arith.constant 2 : index
    %c0_11 = arith.constant 0 : index
    %c0_12 = arith.constant 0 : index
    %20 = vector.load %arg3[%c2, %c0_11, %c0_12] : memref<7x4x8xbf16, #tpu.memory_space<vmem>>, vector<1x4x8xbf16>
    %21 = vector.shape_cast %20 : vector<1x4x8xbf16> to vector<4x8xbf16>
    %22 = vector.extract_strided_slice %8 {offsets = [0, 2], sizes = [8, 36], strides = [1, 1]} : vector<8x42xbf16> to vector<8x36xbf16>
    %cst_13 = arith.constant dense<0.000000e+00> : vector<4x36xf32>
    %23 = tpu.matmul %21, %22, %cst_13 {dimension_numbers = #tpu.dot_dimension_numbers<[1], [0], [0], [1], [0, 0, 1, 1], [], []>} : vector<4x8xbf16>, vector<8x36xbf16>, vector<4x36xf32> -> vector<4x36xf32>
    %24 = arith.addf %19, %23 : vector<4x36xf32>
    %c3 = arith.constant 3 : index
    %c0_14 = arith.constant 0 : index
    %c0_15 = arith.constant 0 : index
    %25 = vector.load %arg3[%c3, %c0_14, %c0_15] : memref<7x4x8xbf16, #tpu.memory_space<vmem>>, vector<1x4x8xbf16>
    %26 = vector.shape_cast %25 : vector<1x4x8xbf16> to vector<4x8xbf16>
    %27 = vector.extract_strided_slice %8 {offsets = [0, 3], sizes = [8, 36], strides = [1, 1]} : vector<8x42xbf16> to vector<8x36xbf16>
    %cst_16 = arith.constant dense<0.000000e+00> : vector<4x36xf32>
    %28 = tpu.matmul %26, %27, %cst_16 {dimension_numbers = #tpu.dot_dimension_numbers<[1], [0], [0], [1], [0, 0, 1, 1], [], []>} : vector<4x8xbf16>, vector<8x36xbf16>, vector<4x36xf32> -> vector<4x36xf32>
    %29 = arith.addf %24, %28 : vector<4x36xf32>
    %c4 = arith.constant 4 : index
    %c0_17 = arith.constant 0 : index
    %c0_18 = arith.constant 0 : index
    %30 = vector.load %arg3[%c4, %c0_17, %c0_18] : memref<7x4x8xbf16, #tpu.memory_space<vmem>>, vector<1x4x8xbf16>
    %31 = vector.shape_cast %30 : vector<1x4x8xbf16> to vector<4x8xbf16>
    %32 = vector.extract_strided_slice %8 {offsets = [0, 4], sizes = [8, 36], strides = [1, 1]} : vector<8x42xbf16> to vector<8x36xbf16>
    %cst_19 = arith.constant dense<0.000000e+00> : vector<4x36xf32>
    %33 = tpu.matmul %31, %32, %cst_19 {dimension_numbers = #tpu.dot_dimension_numbers<[1], [0], [0], [1], [0, 0, 1, 1], [], []>} : vector<4x8xbf16>, vector<8x36xbf16>, vector<4x36xf32> -> vector<4x36xf32>
    %34 = arith.addf %29, %33 : vector<4x36xf32>
    %c5 = arith.constant 5 : index
    %c0_20 = arith.constant 0 : index
    %c0_21 = arith.constant 0 : index
    %35 = vector.load %arg3[%c5, %c0_20, %c0_21] : memref<7x4x8xbf16, #tpu.memory_space<vmem>>, vector<1x4x8xbf16>
    %36 = vector.shape_cast %35 : vector<1x4x8xbf16> to vector<4x8xbf16>
    %37 = vector.extract_strided_slice %8 {offsets = [0, 5], sizes = [8, 36], strides = [1, 1]} : vector<8x42xbf16> to vector<8x36xbf16>
    %cst_22 = arith.constant dense<0.000000e+00> : vector<4x36xf32>
    %38 = tpu.matmul %36, %37, %cst_22 {dimension_numbers = #tpu.dot_dimension_numbers<[1], [0], [0], [1], [0, 0, 1, 1], [], []>} : vector<4x8xbf16>, vector<8x36xbf16>, vector<4x36xf32> -> vector<4x36xf32>
    %39 = arith.addf %34, %38 : vector<4x36xf32>
    %c6 = arith.constant 6 : index
    %c0_23 = arith.constant 0 : index
    %c0_24 = arith.constant 0 : index
    %40 = vector.load %arg3[%c6, %c0_23, %c0_24] : memref<7x4x8xbf16, #tpu.memory_space<vmem>>, vector<1x4x8xbf16>
    %41 = vector.shape_cast %40 : vector<1x4x8xbf16> to vector<4x8xbf16>
    %42 = vector.extract_strided_slice %8 {offsets = [0, 6], sizes = [8, 36], strides = [1, 1]} : vector<8x42xbf16> to vector<8x36xbf16>
    %cst_25 = arith.constant dense<0.000000e+00> : vector<4x36xf32>
    %43 = tpu.matmul %41, %42, %cst_25 {dimension_numbers = #tpu.dot_dimension_numbers<[1], [0], [0], [1], [0, 0, 1, 1], [], []>} : vector<4x8xbf16>, vector<8x36xbf16>, vector<4x36xf32> -> vector<4x36xf32>
    %44 = arith.addf %39, %43 : vector<4x36xf32>
    %c0_26 = arith.constant 0 : index
    %c0_27 = arith.constant 0 : index
    %45 = vector.load %arg4[%c0_26, %c0_27] : memref<4x1xf32, #tpu.memory_space<vmem>>, vector<4x1xf32>
    %46 = vector.broadcast %45 : vector<4x1xf32> to vector<4x36xf32>
    %47 = arith.addf %44, %46 : vector<4x36xf32>
    %48 = tpu.iota {dimensions = array<i32: 1>} : vector<4x36xi32>
    %c-2_i32 = arith.constant -2 : i32
    %49 = vector.broadcast %c-2_i32 : i32 to vector<4x36xi32>
    %50 = arith.addi %49, %48 : vector<4x36xi32>
    %c0_i32 = arith.constant 0 : i32
    %51 = vector.broadcast %c0_i32 : i32 to vector<4x36xi32>
    %52 = arith.cmpi sge, %50, %51 : vector<4x36xi32>
    %c32_i32 = arith.constant 32 : i32
    %53 = vector.broadcast %c32_i32 : i32 to vector<4x36xi32>
    %54 = arith.cmpi slt, %50, %53 : vector<4x36xi32>
    %55 = arith.andi %52, %54 : vector<4x36xi1>
    %cst_28 = arith.constant 0.000000e+00 : f32
    %56 = vector.broadcast %cst_28 : f32 to vector<4x36xf32>
    %57 = arith.select %55, %47, %56 : vector<4x36xi1>, vector<4x36xf32>
    %58 = arith.truncf %57 : vector<4x36xf32> to vector<4x36xbf16>
    %cst_29 = arith.constant 0.000000e+00 : f32
    %59 = vector.broadcast %cst_29 : f32 to vector<1x32xf32>
    %c0_30 = arith.constant 0 : index
    %c0_31 = arith.constant 0 : index
    %c0_32 = arith.constant 0 : index
    %60 = vector.load %arg5[%c0_30, %c0_31, %c0_32] : memref<5x1x4xbf16, #tpu.memory_space<vmem>>, vector<1x1x4xbf16>
    %61 = vector.shape_cast %60 : vector<1x1x4xbf16> to vector<1x4xbf16>
    %62 = vector.extract_strided_slice %58 {offsets = [0, 0], sizes = [4, 32], strides = [1, 1]} : vector<4x36xbf16> to vector<4x32xbf16>
    %cst_33 = arith.constant dense<0.000000e+00> : vector<1x32xf32>
    %63 = tpu.matmul %61, %62, %cst_33 {dimension_numbers = #tpu.dot_dimension_numbers<[1], [0], [0], [1], [0, 0, 1, 1], [], []>} : vector<1x4xbf16>, vector<4x32xbf16>, vector<1x32xf32> -> vector<1x32xf32>
    %64 = arith.addf %59, %63 : vector<1x32xf32>
    %c1_34 = arith.constant 1 : index
    %c0_35 = arith.constant 0 : index
    %c0_36 = arith.constant 0 : index
    %65 = vector.load %arg5[%c1_34, %c0_35, %c0_36] : memref<5x1x4xbf16, #tpu.memory_space<vmem>>, vector<1x1x4xbf16>
    %66 = vector.shape_cast %65 : vector<1x1x4xbf16> to vector<1x4xbf16>
    %67 = vector.extract_strided_slice %58 {offsets = [0, 1], sizes = [4, 32], strides = [1, 1]} : vector<4x36xbf16> to vector<4x32xbf16>
    %cst_37 = arith.constant dense<0.000000e+00> : vector<1x32xf32>
    %68 = tpu.matmul %66, %67, %cst_37 {dimension_numbers = #tpu.dot_dimension_numbers<[1], [0], [0], [1], [0, 0, 1, 1], [], []>} : vector<1x4xbf16>, vector<4x32xbf16>, vector<1x32xf32> -> vector<1x32xf32>
    %69 = arith.addf %64, %68 : vector<1x32xf32>
    %c2_38 = arith.constant 2 : index
    %c0_39 = arith.constant 0 : index
    %c0_40 = arith.constant 0 : index
    %70 = vector.load %arg5[%c2_38, %c0_39, %c0_40] : memref<5x1x4xbf16, #tpu.memory_space<vmem>>, vector<1x1x4xbf16>
    %71 = vector.shape_cast %70 : vector<1x1x4xbf16> to vector<1x4xbf16>
    %72 = vector.extract_strided_slice %58 {offsets = [0, 2], sizes = [4, 32], strides = [1, 1]} : vector<4x36xbf16> to vector<4x32xbf16>
    %cst_41 = arith.constant dense<0.000000e+00> : vector<1x32xf32>
    %73 = tpu.matmul %71, %72, %cst_41 {dimension_numbers = #tpu.dot_dimension_numbers<[1], [0], [0], [1], [0, 0, 1, 1], [], []>} : vector<1x4xbf16>, vector<4x32xbf16>, vector<1x32xf32> -> vector<1x32xf32>
    %74 = arith.addf %69, %73 : vector<1x32xf32>
    %c3_42 = arith.constant 3 : index
    %c0_43 = arith.constant 0 : index
    %c0_44 = arith.constant 0 : index
    %75 = vector.load %arg5[%c3_42, %c0_43, %c0_44] : memref<5x1x4xbf16, #tpu.memory_space<vmem>>, vector<1x1x4xbf16>
    %76 = vector.shape_cast %75 : vector<1x1x4xbf16> to vector<1x4xbf16>
    %77 = vector.extract_strided_slice %58 {offsets = [0, 3], sizes = [4, 32], strides = [1, 1]} : vector<4x36xbf16> to vector<4x32xbf16>
    %cst_45 = arith.constant dense<0.000000e+00> : vector<1x32xf32>
    %78 = tpu.matmul %76, %77, %cst_45 {dimension_numbers = #tpu.dot_dimension_numbers<[1], [0], [0], [1], [0, 0, 1, 1], [], []>} : vector<1x4xbf16>, vector<4x32xbf16>, vector<1x32xf32> -> vector<1x32xf32>
    %79 = arith.addf %74, %78 : vector<1x32xf32>
    %c4_46 = arith.constant 4 : index
    %c0_47 = arith.constant 0 : index
    %c0_48 = arith.constant 0 : index
    %80 = vector.load %arg5[%c4_46, %c0_47, %c0_48] : memref<5x1x4xbf16, #tpu.memory_space<vmem>>, vector<1x1x4xbf16>
    %81 = vector.shape_cast %80 : vector<1x1x4xbf16> to vector<1x4xbf16>
    %82 = vector.extract_strided_slice %58 {offsets = [0, 4], sizes = [4, 32], strides = [1, 1]} : vector<4x36xbf16> to vector<4x32xbf16>
    %cst_49 = arith.constant dense<0.000000e+00> : vector<1x32xf32>
    %83 = tpu.matmul %81, %82, %cst_49 {dimension_numbers = #tpu.dot_dimension_numbers<[1], [0], [0], [1], [0, 0, 1, 1], [], []>} : vector<1x4xbf16>, vector<4x32xbf16>, vector<1x32xf32> -> vector<1x32xf32>
    %84 = arith.addf %79, %83 : vector<1x32xf32>
    %c0_50 = arith.constant 0 : index
    %c0_51 = arith.constant 0 : index
    %85 = vector.load %arg6[%c0_50, %c0_51] : memref<1x1xf32, #tpu.memory_space<vmem>>, vector<1x1xf32>
    %86 = vector.broadcast %85 : vector<1x1xf32> to vector<1x32xf32>
    %87 = arith.addf %84, %86 : vector<1x32xf32>
    %88 = math.tanh %87 : vector<1x32xf32>
    %c0_52 = arith.constant 0 : index
    %c0_53 = arith.constant 0 : index
    %c0_54 = arith.constant 0 : index
    %89 = vector.load %arg7[%c0_52, %c0_53, %c0_54] : memref<1x1x32xf32, #tpu.memory_space<vmem>>, vector<1x1x32xf32>
    %90 = vector.shape_cast %89 : vector<1x1x32xf32> to vector<1x32xf32>
    %91 = vector.shape_cast %88 : vector<1x32xf32> to vector<1x1x32xf32>
    tpu.vector_store %arg7[%c0_52, %c0_53, %c0_54], %91 {strides = array<i32>} : memref<1x1x32xf32, #tpu.memory_space<vmem>>, vector<1x1x32xf32>,
    return
  }
  func.func @transform_0(%arg0: i32, %arg1: i32) -> (i32, i32, i32) {
    %c0_i32 = arith.constant 0 : i32
    %c0_i32_0 = arith.constant 0 : i32
    %c0_i32_1 = arith.constant 0 : i32
    return %arg0, %c0_i32, %c0_i32_0 : i32, i32, i32
  }
  func.func @transform_1(%arg0: i32, %arg1: i32) -> (i32, i32, i32) {
    %c0_i32 = arith.constant 0 : i32
    %c0_i32_0 = arith.constant 0 : i32
    %c0_i32_1 = arith.constant 0 : i32
    %c0_i32_2 = arith.constant 0 : i32
    return %c0_i32, %c0_i32_0, %c0_i32_1 : i32, i32, i32
  }
  func.func @transform_2(%arg0: i32, %arg1: i32) -> (i32, i32) {
    %c0_i32 = arith.constant 0 : i32
    %c0_i32_0 = arith.constant 0 : i32
    %c0_i32_1 = arith.constant 0 : i32
    return %c0_i32, %c0_i32_0 : i32, i32
  }
  func.func @transform_3(%arg0: i32, %arg1: i32) -> (i32, i32, i32) {
    %c0_i32 = arith.constant 0 : i32
    %c0_i32_0 = arith.constant 0 : i32
    %c0_i32_1 = arith.constant 0 : i32
    %c0_i32_2 = arith.constant 0 : i32
    return %c0_i32, %c0_i32_0, %c0_i32_1 : i32, i32, i32
  }
  func.func @transform_4(%arg0: i32, %arg1: i32) -> (i32, i32) {
    %c0_i32 = arith.constant 0 : i32
    %c0_i32_0 = arith.constant 0 : i32
    %c0_i32_1 = arith.constant 0 : i32
    return %c0_i32, %c0_i32_0 : i32, i32
  }
  func.func @transform_5(%arg0: i32, %arg1: i32) -> (i32, i32, i32) {
    %c0_i32 = arith.constant 0 : i32
    %c0_i32_0 = arith.constant 0 : i32
    return %arg0, %c0_i32, %arg1 : i32, i32, i32
  }
}

</mosaic_0001>

<bundles_post_ra>
// kernel: _lambda_.17
= control target key start
LH: loop header
LB: loop body
LE: loop exit
PB: predicated region body
PF: predicated region fallthrough
CT: control target
= control target key end

     0   :  { %s737_s12 = smov 0   ;;  %s739_s13 = smov 0   ;;  %s819_s0 = inlined_call_operand.vmem [shape: bf16[2,32,10], index: 0, kind: input, shape index: {}]   ;;  %s820_s1 = inlined_call_operand.vmem [shape: bf16[4,16,32], index: 1, kind: input, shape index: {}]   ;;  %s821_s2 = inlined_call_operand.vmem [shape: f32[16,1], index: 2, kind: input, shape index: {}]   ;;  %s822_s3 = inlined_call_operand.vmem [shape: bf16[2,2,16,8], index: 3, kind: output, shape index: {}]  }
   0x1   :  { %s741_s14 = smov 0  }
   0x2 LB: > { %s25_s15 = sadd.s32 1, %s706_s13  ;;  %p567_p0 = scmp.ge.s32.totalorder %s710_s14, 1  ;;  %s710_s14 = sphi %s741_s14, %s13_s14   ;;  %s706_s13 = sphi %s739_s13, %s824_s13   ;;  %s702_s12 = sphi %s737_s12, %s823_s12  }
   0x3   : > { %p27_p1 = scmp.ge.s32.totalorder %s25_s15, 2  ;;  %p151_p2 = scmp.lt.s32.totalorder %s710_s14, 3 }
   0x5   : > { %s826_s15 = smov (%p27_p1, %s25_s15), 0  ;;  %p152_p3 = pnand %p567_p0, %p151_p2 }
   0x6   : > { %p178_p4 = scmp.lt.s32.totalorder (!%p152_p3), %s702_s12, 1  ;;  %v712_v0 = vmov (!%p152_p3), 0.0   ;;  %vm713_vm0 = vmmov (!%p152_p3), 0   ;;  %s714_s20 = smov (!%p152_p3), 127   ;;  %v716_v17 = vmov (!%p152_p3), 0   ;;  %v684_v18 = vld [vmem:[%s820_s1 + $0x18] sm:$0xff] (!%p152_p3)  }
   0x7   : > { %155 = sbr.rel (%p152_p3) target bundleno = 376 (0x178), region = 32  ;;  %621 = vmatprep.subr.bf16.mxu0 (!%p152_p3), %v712_v0  ;;  %625 = vmatprep.mubr.msk.bf16.mxu0 (!%p152_p3), %vm713_vm0, %v712_v0  ;;  %s715_s21 = smov (!%p152_p3), 126   ;;  %vm225_vm5 = vcmask (!%p152_p3), 261120   ;;  %v327_v19 = vld [vmem:[%s821_s2] sm:$0xff] (!%p152_p3)  ;;  %v328_v20 = vld [vmem:[%s821_s2 + $0x8] sm:$0xff] (!%p152_p3)  ;;  %v686_v25 = vld [vmem:[%s820_s1 + $0x10] sm:$0xff] (!%p152_p3)  }
   0x8   : > { %629 = vmatprep.subr.bf16.mxu1 (!%p152_p3), %v712_v0  ;;  %633 = vmatprep.mubr.msk.bf16.mxu1 (!%p152_p3), %vm713_vm0, %v712_v0  ;;  %v685_v24 = vld [vmem:[%s820_s1 + $0x8] sm:$0xff] (!%p152_p3)   ;;  %v687_v27 = vld [vmem:[%s820_s1] sm:$0xff] (!%p152_p3)   ;;  %vm349_vm6 = vcmask (!%p152_p3), 60416  }
   0x9   : > { %682 = vset.pattern.permute.xlu0 (!%p152_p3), %v716_v17  ;;  %683 = vset.pattern.permute.xlu1 (!%p152_p3), %v716_v17 }
   0xe   : > { %s828_s12 = smov (!%p178_p4, %s702_s12), 1 }
   0xf   : > { %s594_s16 = sshll.u32 %s828_s12, 4 }
  0x10   : > { %s182_s19 = scalar_lea.vmem %s819_s0, %s594_s16  ;;  %s190_s9 = scalar_lea.vmem %s822_s3, %s594_s16 }
  0x11   : > { %v601_v1 = vld [vmem:[%s182_s19] sm:$0xff]   ;;  %v608_v2 = vld [vmem:[%s182_s19 + $0x8] sm:$0xff]  }
  0x12   : > { %v602_v3 = vunpack.c.l.bf16 %v601_v1  ;;  %v603_v4 = vunpack.c.h.bf16 %v601_v1  ;;  %v606_v5 = vunpack.c.l.bf16 %v608_v2  ;;  %v607_v6 = vunpack.c.h.bf16 %v608_v2 }
  0x14   : > { %vm200_vm1 = vcmp.ge.f32.partialorder %v602_v3, 0.0  ;;  %vm201_vm2 = vcmp.ge.f32.partialorder %v603_v4, 0.0  ;;  %v204_v7 = vmul.f32 0.1, %v602_v3  ;;  %v205_v8 = vmul.f32 0.1, %v603_v4 }
  0x15   : > { %vm202_vm3 = vcmp.ge.f32.partialorder %v606_v5, 0.0  ;;  %vm203_vm4 = vcmp.ge.f32.partialorder %v607_v6, 0.0  ;;  %v206_v9 = vmul.f32 0.1, %v606_v5  ;;  %v207_v10 = vmul.f32 0.1, %v607_v6 }
  0x16   : > { %v208_v11 = vsel %vm200_vm1, %v602_v3, %v204_v7  ;;  %v209_v12 = vsel %vm201_vm2, %v603_v4, %v205_v8 }
  0x17   : > { %v212_v13 = vpack.c.bf16 %v209_v12, %v208_v11  ;;  %v210_v14 = vsel %vm202_vm3, %v606_v5, %v206_v9  ;;  %v211_v15 = vsel %vm203_vm4, %v607_v6, %v207_v10 }
  0x18   : > { %v213_v16 = vpack.c.bf16 %v211_v15, %v210_v14 }
  0x19   : > { %277 = vrot.lane.b32.xlu0 %v212_v13, %s714_s20  ;;  %411 = vrot.lane.b32.xlu1 %v212_v13, %s715_s21 }
  0x1a   : > { %622 = vmatpush3.bf16.msra.mxu0 %v212_v13 }
  0x1b   : > { %623 = vmatprep.subr.bf16.mxu0 %v712_v0 }
  0x1d   : > { %279 = vrot.lane.b32.xlu0 %v213_v16, %s714_s20  ;;  %413 = vrot.lane.b32.xlu1 %v213_v16, %s715_s21 }
  0x1e   : > { %624 = vmatpush3.bf16.msra.mxu0 %v213_v16 }
  0x1f   : > { %637 = vmatprep.subr.bf16.mxu0 %v712_v0 }
  0x21   : > { %626 = vmatmul.mubr.msk.bf16.vlgmr.msra.gmra.mrb[0].mxu0 %vm225_vm5, %v684_v18  ;;  %331 = vperm.xlu0 %682, %v327_v19  }
  0x22   : > { %641 = vmatprep.mubr.msk.bf16.mxu0 %vm713_vm0, %v712_v0  ;;  %336 = vperm.xlu1 %683, %v328_v20  }
  0x25   : > { %470 = vperm.xlu0 %682, %v328_v20  }
  0x26   : > { %465 = vperm.xlu1 %683, %v327_v19  }
  0x8b   : > { %v278_v21 = vpop.permute.xlu0 %277  ;;  %v412_v23 = vpop.permute.xlu1 %411 }
  0x8c   : > { %630 = vmatpush3.bf16.msra.mxu1 %v278_v21  ;;  %638 = vmatpush3.bf16.msra.mxu0 %v278_v21 }
  0x8d   : > { %631 = vmatprep.subr.bf16.mxu1 %v712_v0  ;;  %639 = vmatprep.subr.bf16.mxu0 %v712_v0 }
  0x8f   : > { %v280_v22 = vpop.permute.xlu0 %279  ;;  %v414_v26 = vpop.permute.xlu1 %413 }
  0x90   : > { %632 = vmatpush3.bf16.msra.mxu1 %v280_v22  ;;  %640 = vmatpush3.bf16.msra.mxu0 %v280_v22 }
  0x91   : > { %645 = vmatprep.subr.bf16.mxu1 %v712_v0 }
  0x93   : > { %634 = vmatmul.mubr.msk.bf16.vlgmr.msra.gmra.mrb[0].mxu1 %vm225_vm5, %v685_v24  ;;  %642 = vmatmul.mubr.msk.bf16.vlgmr.msra.gmra.mrb[4].mxu0 %vm225_vm5, %v686_v25 }
  0x94   : > { %646 = vmatpush3.bf16.msra.mxu1 %v412_v23  ;;  %649 = vmatprep.mubr.msk.bf16.mxu1 %vm713_vm0, %v712_v0 }
  0x95   : > { %647 = vmatprep.subr.bf16.mxu1 %v712_v0 }
  0x98   : > { %648 = vmatpush3.bf16.msra.mxu1 %v414_v26 }
  0x9b   : > { %650 = vmatmul.mubr.msk.bf16.vlgmr.msra.gmra.mrb[4].mxu1 %vm225_vm5, %v687_v27 }
  0xa0   : > { %v332_v32 = vpop.permute.xlu0 %331 }
  0xa1   : > { %v337_v33 = vpop.permute.xlu1 %336 }
  0xa4   : > { %v471_v56 = vpop.permute.xlu0 %470 }
  0xa5   : > { %v466_v51 = vpop.permute.xlu1 %465 }
  0xf4   : > { %v263_v28 = vpop.f32.mrb[0].mxu0 }
  0xf5   : > { %v627_v29 = vpop.f32.mrb[1].mxu0 }
  0xf6   : > { %v266_v30 = vpop.f32.mrb[2].mxu0 }
  0xf7   : > { %v628_v31 = vpop.f32.mrb[3].mxu0 }
 0x166   : > { %v320_v34 = vpop.f32.mrb[0].mxu1  ;;  %v399_v35 = vpop.f32.mrb[4].mxu0 }
 0x167   : > { %v321_v36 = vadd.f32 %v320_v34, %v263_v28  ;;  %v635_v37 = vpop.f32.mrb[1].mxu1  ;;  %v643_v38 = vpop.f32.mrb[5].mxu0 }
 0x168   : > { %v323_v39 = vpop.f32.mrb[2].mxu1  ;;  %v402_v40 = vpop.f32.mrb[6].mxu0 }
 0x169   : > { %v324_v41 = vadd.f32 %v323_v39, %v266_v30  ;;  %v636_v42 = vpop.f32.mrb[3].mxu1  ;;  %v339_v43 = vadd.f32 %v332_v32, %v321_v36  ;;  %v644_v44 = vpop.f32.mrb[7].mxu0 }
 0x16b   : > { %v596_v45 = vpack.c.bf16 %v339_v43, %v339_v43  ;;  %v340_v46 = vadd.f32 %v337_v33, %v324_v41 }
 0x16d   : > { %350 = vst.msk [vmem:[%s190_s9] sm:$0xf] %vm349_vm6, %v596_v45  ;;  %v597_v47 = vpack.c.bf16 %v340_v46, %v340_v46 }
 0x16e   : > { %v454_v48 = vpop.f32.mrb[4].mxu1 }
 0x16f   : > { %351 = vst.msk [vmem:[%s190_s9 + $0x4] sm:$0xf] %vm349_vm6, %v597_v47  ;;  %v455_v49 = vadd.f32 %v454_v48, %v399_v35  ;;  %v651_v50 = vpop.f32.mrb[5].mxu1 }
 0x170   : > { %v457_v52 = vpop.f32.mrb[6].mxu1 }
 0x171   : > { %v473_v53 = vadd.f32 %v466_v51, %v455_v49  ;;  %v458_v54 = vadd.f32 %v457_v52, %v402_v40  ;;  %v652_v55 = vpop.f32.mrb[7].mxu1 }
 0x173   : > { %v598_v57 = vpack.c.bf16 %v473_v53, %v473_v53  ;;  %v474_v58 = vadd.f32 %v471_v56, %v458_v54 }
 0x175   : > { %590 = vst.msk [vmem:[%s190_s9 + $0x8] sm:$0xf] %vm349_vm6, %v598_v57  ;;  %v599_v59 = vpack.c.bf16 %v474_v58, %v474_v58 }
 0x177   : > { %591 = vst.msk [vmem:[%s190_s9 + $0xc] sm:$0xf] %vm349_vm6, %v599_v59 }
 0x178 PF: > { %s13_s14 = sadd.s32 1, %s710_s14   ;;  %s823_s12 = smov %s706_s13 }
 0x179   : > { %p10_p5 = scmp.ge.s32.totalorder %s13_s14, 4   ;;  %s824_s13 = smov %s826_s15 }
 0x17b   :  { %12 = sbr.rel (!%p10_p5) target bundleno = 2 (0x2), region = 66 }

// kernel: _lambda_.18
= control target key start
LH: loop header
LB: loop body
LE: loop exit
PB: predicated region body
PF: predicated region fallthrough
CT: control target
= control target key end

     0   :  { %s922_s18 = smov 0   ;;  %s924_s19 = smov 0   ;;  %s1033_s0 = inlined_call_operand.vmem [shape: bf16[2,16,20], index: 0, kind: input, shape index: {}]   ;;  %s1034_s1 = inlined_call_operand.vmem [shape: bf16[3,16,16], index: 1, kind: input, shape index: {}]   ;;  %s1035_s2 = inlined_call_operand.vmem [shape: f32[16,1], index: 2, kind: input, shape index: {}]   ;;  %s1036_s3 = inlined_call_operand.vmem [shape: bf16[3,16,16], index: 3, kind: input, shape index: {}]   ;;  %s1037_s4 = inlined_call_operand.vmem [shape: f32[16,1], index: 4, kind: input, shape index: {}]   ;;  %s1038_s5 = inlined_call_operand.vmem [shape: bf16[2,16,16], index: 5, kind: output, shape index: {}]  }
   0x1   :  { %s926_s20 = smov 0  }
   0x2 LB: > { %s27_s21 = sadd.s32 1, %s881_s19  ;;  %p731_p0 = scmp.ge.s32.totalorder %s885_s20, 1  ;;  %s885_s20 = sphi %s926_s20, %s15_s20   ;;  %s881_s19 = sphi %s924_s19, %s1040_s19   ;;  %s877_s18 = sphi %s922_s18, %s1039_s18  }
   0x3   : > { %p29_p1 = scmp.ge.s32.totalorder %s27_s21, 2  ;;  %p201_p2 = scmp.lt.s32.totalorder %s885_s20, 3 }
   0x5   : > { %s1042_s21 = smov (%p29_p1, %s27_s21), 0  ;;  %p202_p3 = pnand %p731_p0, %p201_p2 }
   0x6   : > { %p232_p4 = scmp.lt.s32.totalorder (!%p202_p3), %s877_s18, 1  ;;  %v887_v0 = vmov (!%p202_p3), 0.0   ;;  %vm888_vm0 = vmmov (!%p202_p3), 0   ;;  %v422_v9 = vld [vmem:[%s1035_s2] sm:$0xff] (!%p202_p3)  ;;  %v889_v11 = vmov (!%p202_p3), 0   ;;  %s890_s30 = smov (!%p202_p3), 127   ;;  %v442_v22 = vlaneseq (!%p202_p3) }
   0x7   : > { %205 = sbr.rel (%p202_p3) target bundleno = 724 (0x2d4), region = 40  ;;  %783 = vmatprep.subr.bf16.mxu0 (!%p202_p3), %v887_v0  ;;  %789 = vmatprep.subr.bf16.mxu1 (!%p202_p3), %v887_v0  ;;  %v856_v10 = vld [vmem:[%s1034_s1] sm:$0xff] (!%p202_p3)   ;;  %vm271_vm3 = vcmask (!%p202_p3), 130048   ;;  %v423_v12 = vld [vmem:[%s1035_s2 + $0x8] sm:$0xff] (!%p202_p3)  ;;  %s891_s8 = smov (!%p202_p3), 126   ;;  %v857_v16 = vld [vmem:[%s1034_s1 + $0x10] sm:$0xff] (!%p202_p3)  }
   0x8   : > { %785 = vmatprep.mubr.msk.bf16.mxu0 (!%p202_p3), %vm888_vm0, %v887_v0  ;;  %791 = vmatprep.mubr.msk.bf16.mxu1 (!%p202_p3), %vm888_vm0, %v887_v0  ;;  %v855_v14 = vld [vmem:[%s1034_s1 + $0x8] sm:$0xff] (!%p202_p3)   ;;  %v443_v28 = vand.u32 (!%p202_p3), 127, %v442_v22  ;;  %v859_v48 = vld [vmem:[%s1036_s3] sm:$0xff] (!%p202_p3)   ;;  %v860_v55 = vld [vmem:[%s1036_s3 + $0x10] sm:$0xff] (!%p202_p3)   ;;  %vm647_vm10 = vcmask (!%p202_p3), 125952  }
   0x9   : > { %848 = vset.pattern.permute.xlu1 (!%p202_p3), %v889_v11  ;;  %849 = vset.pattern.permute.xlu0 (!%p202_p3), %v889_v11  ;;  %v616_v49 = vld [vmem:[%s1037_s4 + $0x8] sm:$0xff] (!%p202_p3)  ;;  %v615_v50 = vld [vmem:[%s1037_s4] sm:$0xff] (!%p202_p3) }
   0xa   : > { %426 = vperm.xlu1 (!%p202_p3), %848, %v422_v9   ;;  %v444_v31 = vadd.s32 (!%p202_p3), 4294967295, %v443_v28  ;;  %v858_v53 = vld [vmem:[%s1036_s3 + $0x8] sm:$0xff] (!%p202_p3)  }
   0xc   : > { %vm445_vm4 = vcmp.ge.s32.totalorder (!%p202_p3), %v444_v31, 0  ;;  %vm446_vm5 = vcmp.lt.s32.totalorder (!%p202_p3), %v444_v31, 16 }
   0xd   : > { %vm447_vm8 = vmand (!%p202_p3), %vm445_vm4, %vm446_vm5 }
   0xe   : > { %s1044_s18 = smov (!%p232_p4, %s877_s18), 1  ;;  %431 = vperm.xlu1 %848, %v423_v12   ;;  %vm751_vm9 = vmpackc.low %vm447_vm8, %vm447_vm8 }
   0xf   : > { %s763_s22 = sshll.u32 %s1044_s18, 3 }
  0x10   : > { %s236_s25 = scalar_lea.vmem %s1033_s0, %s763_s22 }
  0x11   : > { %v768_v1 = vld [vmem:[%s236_s25] sm:$0xff]  }
  0x12   : > { %v954_v2 = vunpack.c.l.bf16 %v768_v1  ;;  %v956_v3 = vunpack.c.h.bf16 %v768_v1 }
  0x14   : > { %vm250_vm1 = vcmp.ge.f32.partialorder %v954_v2, 0.0  ;;  %vm251_vm2 = vcmp.ge.f32.partialorder %v956_v3, 0.0  ;;  %v252_v4 = vmul.f32 0.1, %v954_v2  ;;  %v253_v5 = vmul.f32 0.1, %v956_v3 }
  0x15   : > { %v850_v51 = vpack.i.bf16 %v956_v3, %v954_v2 }
  0x16   : > { %v254_v6 = vsel %vm250_vm1, %v954_v2, %v252_v4  ;;  %v255_v7 = vsel %vm251_vm2, %v956_v3, %v253_v5 }
  0x17   : > { %v256_v8 = vpack.c.bf16 %v255_v7, %v254_v6 }
  0x19   : > { %268 = vrot.lane.b32.xlu0 %v256_v8, %s890_s30  ;;  %790 = vmatpush3.bf16.msra.mxu1 %v256_v8 }
  0x1a   : > { %801 = vmatprep.subr.bf16.mxu1 %v887_v0 }
  0x1c   : > { %792 = vmatmul.mubr.msk.bf16.vlgmr.msra.gmra.mrb[0].mxu1 %vm271_vm3, %v856_v10 }
  0x1d   : > { %373 = vrot.lane.b32.xlu0 %v256_v8, %s891_s8  ;;  %803 = vmatprep.mubr.msk.bf16.mxu1 %vm888_vm0, %v887_v0 }
  0x89   : > { %v427_v29 = vpop.permute.xlu1 %426 }
  0x8b   : > { %v269_v13 = vpop.permute.xlu0 %268 }
  0x8c   : > { %784 = vmatpush3.bf16.msra.mxu0 %v269_v13 }
  0x8d   : > { %795 = vmatprep.subr.bf16.mxu0 %v887_v0  ;;  %v432_v38 = vpop.permute.xlu1 %431 }
  0x8f   : > { %786 = vmatmul.mubr.msk.bf16.vlgmr.msra.gmra.mrb[0].mxu0 %vm271_vm3, %v855_v14  ;;  %v374_v15 = vpop.permute.xlu0 %373 }
  0x90   : > { %796 = vmatpush3.bf16.msra.mxu0 %v374_v15  ;;  %797 = vmatprep.mubr.msk.bf16.mxu0 %vm888_vm0, %v887_v0 }
  0x91   : > { %807 = vmatprep.subr.bf16.mxu0 %v887_v0 }
  0x97   : > { %798 = vmatmul.mubr.msk.bf16.vlgmr.msra.gmra.mrb[4].mxu0 %vm271_vm3, %v857_v16 }
  0x98   : > { %809 = vmatprep.mubr.msk.bf16.mxu0 %vm888_vm0, %v887_v0 }
  0xef   : > { %v358_v17 = vpop.f32.mrb[0].mxu1 }
  0xf0   : > { %v793_v18 = vpop.f32.mrb[1].mxu1 }
  0xf1   : > { %v361_v19 = vpop.f32.mrb[2].mxu1 }
  0xf2   : > { %v794_v20 = vpop.f32.mrb[3].mxu1 }
 0x162   : > { %v309_v21 = vpop.f32.mrb[0].mxu0 }
 0x163   : > { %v359_v23 = vadd.f32 %v358_v17, %v309_v21  ;;  %v787_v24 = vpop.f32.mrb[1].mxu0 }
 0x164   : > { %v312_v25 = vpop.f32.mrb[2].mxu0 }
 0x165   : > { %v362_v26 = vadd.f32 %v361_v19, %v312_v25  ;;  %v788_v27 = vpop.f32.mrb[3].mxu0 }
 0x16a   : > { %v413_v30 = vpop.f32.mrb[4].mxu0 }
 0x16b   : > { %v420_v32 = vadd.f32 %v413_v30, %v359_v23  ;;  %v799_v33 = vpop.f32.mrb[5].mxu0 }
 0x16c   : > { %v416_v34 = vpop.f32.mrb[6].mxu0 }
 0x16d   : > { %v434_v35 = vadd.f32 %v427_v29, %v420_v32  ;;  %v421_v36 = vadd.f32 %v416_v34, %v362_v26  ;;  %v800_v37 = vpop.f32.mrb[7].mxu0 }
 0x16f   : > { %vm436_vm6 = vcmp.ge.f32.partialorder %v434_v35, 0.0  ;;  %v438_v39 = vmul.f32 0.1, %v434_v35  ;;  %v435_v40 = vadd.f32 %v432_v38, %v421_v36 }
 0x171   : > { %v440_v41 = vsel %vm436_vm6, %v434_v35, %v438_v39  ;;  %vm437_vm7 = vcmp.ge.f32.partialorder %v435_v40, 0.0  ;;  %v439_v42 = vmul.f32 0.1, %v435_v40 }
 0x172   : > { %v448_v45 = vsel %vm447_vm8, %v440_v41, 0.0 }
 0x173   : > { %v441_v43 = vsel %vm437_vm7, %v435_v40, %v439_v42 }
 0x174   : > { %v752_v44 = vpack.c.bf16 %v441_v43, %v440_v41  ;;  %v449_v46 = vsel %vm447_vm8, %v441_v43, 0.0 }
 0x175   : > { %v450_v47 = vpack.c.bf16 %v449_v46, %v448_v45 }
 0x176   : > { %808 = vmatpush3.bf16.msk.msra.mxu0 %vm751_vm9, %v752_v44 }
 0x177   : > { %566 = vrot.lane.b32.xlu1 %v450_v47, %s891_s8  ;;  %462 = vrot.lane.b32.xlu0 %v450_v47, %s890_s30  ;;  %s244_s30 = scalar_lea.vmem %s1038_s5, %s763_s22 }
 0x179   : > { %810 = vmatmul.mubr.msk.bf16.vlgmr.msra.gmra.mrb[8].mxu0 %vm271_vm3, %v859_v48 }
 0x17b   : > { %624 = vperm.xlu1 %848, %v616_v49   ;;  %619 = vperm.xlu0 %849, %v615_v50  }
 0x17f   : > { %851 = vrot.lane.b32.xlu1 %v850_v51, %s891_s8 }
 0x1e9   : > { %v463_v52 = vpop.permute.xlu0 %462  ;;  %v567_v54 = vpop.permute.xlu1 %566 }
 0x1ea   : > { %802 = vmatpush3.bf16.msra.mxu1 %v463_v52 }
 0x1eb   : > { %813 = vmatprep.subr.bf16.mxu1 %v887_v0 }
 0x1ed   : > { %804 = vmatmul.mubr.msk.bf16.vlgmr.msra.gmra.mrb[4].mxu1 %vm271_vm3, %v858_v53 }
 0x1ee   : > { %814 = vmatpush3.bf16.msra.mxu1 %v567_v54  ;;  %815 = vmatprep.mubr.msk.bf16.mxu1 %vm888_vm0, %v887_v0 }
 0x1f5   : > { %816 = vmatmul.mubr.msk.bf16.vlgmr.msra.gmra.mrb[8].mxu1 %vm271_vm3, %v860_v55 }
 0x1fa   : > { %v625_v63 = vpop.permute.xlu1 %624  ;;  %v620_v5 = vpop.permute.xlu0 %619 }
 0x1fe   : > { %v852_v4 = vpop.permute.xlu1 %851 }
 0x24c   : > { %v551_v56 = vpop.f32.mrb[8].mxu0 }
 0x24d   : > { %v811_v57 = vpop.f32.mrb[9].mxu0 }
 0x24e   : > { %v554_v58 = vpop.f32.mrb[10].mxu0 }
 0x24f   : > { %v812_v59 = vpop.f32.mrb[11].mxu0 }
 0x2c0   : > { %v502_v60 = vpop.f32.mrb[4].mxu1 }
 0x2c1   : > { %v805_v61 = vpop.f32.mrb[5].mxu1  ;;  %v552_v62 = vadd.f32 %v551_v56, %v502_v60 }
 0x2c2   : > { %v505_v1 = vpop.f32.mrb[6].mxu1 }
 0x2c3   : > { %v806_v2 = vpop.f32.mrb[7].mxu1  ;;  %v555_v3 = vadd.f32 %v554_v58, %v505_v1 }
 0x2c8   : > { %v606_v0 = vpop.f32.mrb[8].mxu1 }
 0x2c9   : > { %v613_v6 = vadd.f32 %v606_v0, %v552_v62  ;;  %v817_v7 = vpop.f32.mrb[9].mxu1 }
 0x2ca   : > { %v609_v8 = vpop.f32.mrb[10].mxu1 }
 0x2cb   : > { %v627_v9 = vadd.f32 %v620_v5, %v613_v6  ;;  %v614_v10 = vadd.f32 %v609_v8, %v555_v3  ;;  %v818_v11 = vpop.f32.mrb[11].mxu1 }
 0x2cd   : > { %v861_v12 = vadd.low.f32.bf16 %v627_v9, %v852_v4  ;;  %v628_v13 = vadd.f32 %v625_v63, %v614_v10 }
 0x2cf   : > { %v765_v14 = vpack.c.bf16 %v861_v12, %v861_v12  ;;  %v862_v15 = vadd.high.f32.bf16 %v628_v13, %v852_v4 }
 0x2d1   : > { %648 = vst.msk [vmem:[%s244_s30] sm:$0xf] %vm647_vm10, %v765_v14  ;;  %v766_v16 = vpack.c.bf16 %v862_v15, %v862_v15 }
 0x2d3   : > { %649 = vst.msk [vmem:[%s244_s30 + $0x4] sm:$0xf] %vm647_vm10, %v766_v16 }
 0x2d4 PF: > { %s15_s20 = sadd.s32 1, %s885_s20   ;;  %s1039_s18 = smov %s881_s19 }
 0x2d5   : > { %p12_p5 = scmp.ge.s32.totalorder %s15_s20, 4   ;;  %s1040_s19 = smov %s1042_s21 }
 0x2d7   :  { %14 = sbr.rel (!%p12_p5) target bundleno = 2 (0x2), region = 74 }

// kernel: _lambda_.19
= control target key start
LH: loop header
LB: loop body
LE: loop exit
PB: predicated region body
PF: predicated region fallthrough
CT: control target
= control target key end

     0   :  { %s928_s18 = smov 0   ;;  %s930_s19 = smov 0   ;;  %s1034_s0 = inlined_call_operand.vmem [shape: bf16[2,16,24], index: 0, kind: input, shape index: {}]   ;;  %s1035_s1 = inlined_call_operand.vmem [shape: bf16[3,16,16], index: 1, kind: input, shape index: {}]   ;;  %s1036_s2 = inlined_call_operand.vmem [shape: f32[16,1], index: 2, kind: input, shape index: {}]   ;;  %s1037_s3 = inlined_call_operand.vmem [shape: bf16[3,16,16], index: 3, kind: input, shape index: {}]   ;;  %s1038_s4 = inlined_call_operand.vmem [shape: f32[16,1], index: 4, kind: input, shape index: {}]   ;;  %s1039_s5 = inlined_call_operand.vmem [shape: bf16[2,16,16], index: 5, kind: output, shape index: {}]  }
   0x1   :  { %s932_s20 = smov 0  }
   0x2 LB: > { %s27_s21 = sadd.s32 1, %s884_s19  ;;  %p731_p0 = scmp.ge.s32.totalorder %s888_s20, 1  ;;  %s888_s20 = sphi %s932_s20, %s15_s20   ;;  %s884_s19 = sphi %s930_s19, %s1041_s19   ;;  %s880_s18 = sphi %s928_s18, %s1040_s18  }
   0x3   : > { %p29_p1 = scmp.ge.s32.totalorder %s27_s21, 2  ;;  %p201_p2 = scmp.lt.s32.totalorder %s888_s20, 3 }
   0x5   : > { %s1043_s21 = smov (%p29_p1, %s27_s21), 0  ;;  %p202_p3 = pnand %p731_p0, %p201_p2 }
   0x6   : > { %p232_p4 = scmp.lt.s32.totalorder (!%p202_p3), %s880_s18, 1  ;;  %v890_v0 = vmov (!%p202_p3), 0.0   ;;  %vm891_vm0 = vmmov (!%p202_p3), 0   ;;  %v422_v9 = vld [vmem:[%s1036_s2] sm:$0xff] (!%p202_p3)  ;;  %v892_v11 = vmov (!%p202_p3), 0   ;;  %s893_s30 = smov (!%p202_p3), 125   ;;  %v442_v22 = vlaneseq (!%p202_p3) }
   0x7   : > { %205 = sbr.rel (%p202_p3) target bundleno = 724 (0x2d4), region = 40  ;;  %783 = vmatprep.subr.bf16.mxu0 (!%p202_p3), %v890_v0  ;;  %789 = vmatprep.subr.bf16.mxu1 (!%p202_p3), %v890_v0  ;;  %v859_v10 = vld [vmem:[%s1035_s1] sm:$0xff] (!%p202_p3)   ;;  %vm271_vm3 = vcmask (!%p202_p3), 130048   ;;  %v423_v12 = vld [vmem:[%s1036_s2 + $0x8] sm:$0xff] (!%p202_p3)  ;;  %s894_s8 = smov (!%p202_p3), 122   ;;  %v860_v16 = vld [vmem:[%s1035_s1 + $0x10] sm:$0xff] (!%p202_p3)  }
   0x8   : > { %785 = vmatprep.mubr.msk.bf16.mxu0 (!%p202_p3), %vm891_vm0, %v890_v0  ;;  %791 = vmatprep.mubr.msk.bf16.mxu1 (!%p202_p3), %vm891_vm0, %v890_v0  ;;  %v858_v14 = vld [vmem:[%s1035_s1 + $0x8] sm:$0xff] (!%p202_p3)   ;;  %v443_v28 = vand.u32 (!%p202_p3), 127, %v442_v22  ;;  %v862_v48 = vld [vmem:[%s1037_s3] sm:$0xff] (!%p202_p3)   ;;  %s895_s15 = smov (!%p202_p3), 126   ;;  %s896_s16 = smov (!%p202_p3), 127   ;;  %v863_v55 = vld [vmem:[%s1037_s3 + $0x10] sm:$0xff] (!%p202_p3)  }
   0x9   : > { %851 = vset.pattern.permute.xlu1 (!%p202_p3), %v892_v11  ;;  %852 = vset.pattern.permute.xlu0 (!%p202_p3), %v892_v11  ;;  %v616_v49 = vld [vmem:[%s1038_s4 + $0x8] sm:$0xff] (!%p202_p3)  ;;  %v615_v50 = vld [vmem:[%s1038_s4] sm:$0xff] (!%p202_p3)  ;;  %s897_s26 = smov (!%p202_p3), 124   ;;  %vm647_vm10 = vcmask (!%p202_p3), 125952  }
   0xa   : > { %426 = vperm.xlu1 (!%p202_p3), %851, %v422_v9   ;;  %v444_v31 = vadd.s32 (!%p202_p3), 4294967295, %v443_v28  ;;  %v861_v53 = vld [vmem:[%s1037_s3 + $0x8] sm:$0xff] (!%p202_p3)  }
   0xc   : > { %vm445_vm4 = vcmp.ge.s32.totalorder (!%p202_p3), %v444_v31, 0  ;;  %vm446_vm5 = vcmp.lt.s32.totalorder (!%p202_p3), %v444_v31, 16 }
   0xd   : > { %vm447_vm8 = vmand (!%p202_p3), %vm445_vm4, %vm446_vm5 }
   0xe   : > { %s1045_s18 = smov (!%p232_p4, %s880_s18), 1  ;;  %431 = vperm.xlu1 %851, %v423_v12   ;;  %vm751_vm9 = vmpackc.low %vm447_vm8, %vm447_vm8 }
   0xf   : > { %s763_s22 = sshll.u32 %s1045_s18, 3 }
  0x10   : > { %s236_s25 = scalar_lea.vmem %s1034_s0, %s763_s22 }
  0x11   : > { %v768_v1 = vld [vmem:[%s236_s25] sm:$0xff]  }
  0x12   : > { %v960_v2 = vunpack.c.l.bf16 %v768_v1  ;;  %v962_v3 = vunpack.c.h.bf16 %v768_v1 }
  0x14   : > { %vm250_vm1 = vcmp.ge.f32.partialorder %v960_v2, 0.0  ;;  %vm251_vm2 = vcmp.ge.f32.partialorder %v962_v3, 0.0  ;;  %v252_v4 = vmul.f32 0.1, %v960_v2  ;;  %v253_v5 = vmul.f32 0.1, %v962_v3 }
  0x15   : > { %v853_v51 = vpack.i.bf16 %v962_v3, %v960_v2 }
  0x16   : > { %v254_v6 = vsel %vm250_vm1, %v960_v2, %v252_v4  ;;  %v255_v7 = vsel %vm251_vm2, %v962_v3, %v253_v5 }
  0x17   : > { %v256_v8 = vpack.c.bf16 %v255_v7, %v254_v6 }
  0x19   : > { %268 = vrot.lane.b32.xlu0 %v256_v8, %s893_s30  ;;  %790 = vmatpush3.bf16.msra.mxu1 %v256_v8 }
  0x1a   : > { %801 = vmatprep.subr.bf16.mxu1 %v890_v0 }
  0x1c   : > { %792 = vmatmul.mubr.msk.bf16.vlgmr.msra.gmra.mrb[0].mxu1 %vm271_vm3, %v859_v10 }
  0x1d   : > { %373 = vrot.lane.b32.xlu0 %v256_v8, %s894_s8  ;;  %803 = vmatprep.mubr.msk.bf16.mxu1 %vm891_vm0, %v890_v0  ;;  %s244_s8 = scalar_lea.vmem %s1039_s5, %s763_s22 }
  0x89   : > { %v427_v29 = vpop.permute.xlu1 %426 }
  0x8b   : > { %v269_v13 = vpop.permute.xlu0 %268 }
  0x8c   : > { %784 = vmatpush3.bf16.msra.mxu0 %v269_v13 }
  0x8d   : > { %795 = vmatprep.subr.bf16.mxu0 %v890_v0  ;;  %v432_v38 = vpop.permute.xlu1 %431 }
  0x8f   : > { %786 = vmatmul.mubr.msk.bf16.vlgmr.msra.gmra.mrb[0].mxu0 %vm271_vm3, %v858_v14  ;;  %v374_v15 = vpop.permute.xlu0 %373 }
  0x90   : > { %796 = vmatpush3.bf16.msra.mxu0 %v374_v15  ;;  %797 = vmatprep.mubr.msk.bf16.mxu0 %vm891_vm0, %v890_v0 }
  0x91   : > { %807 = vmatprep.subr.bf16.mxu0 %v890_v0 }
  0x97   : > { %798 = vmatmul.mubr.msk.bf16.vlgmr.msra.gmra.mrb[4].mxu0 %vm271_vm3, %v860_v16 }
  0x98   : > { %809 = vmatprep.mubr.msk.bf16.mxu0 %vm891_vm0, %v890_v0 }
  0xef   : > { %v358_v17 = vpop.f32.mrb[0].mxu1 }
  0xf0   : > { %v793_v18 = vpop.f32.mrb[1].mxu1 }
  0xf1   : > { %v361_v19 = vpop.f32.mrb[2].mxu1 }
  0xf2   : > { %v794_v20 = vpop.f32.mrb[3].mxu1 }
 0x162   : > { %v309_v21 = vpop.f32.mrb[0].mxu0 }
 0x163   : > { %v359_v23 = vadd.f32 %v358_v17, %v309_v21  ;;  %v787_v24 = vpop.f32.mrb[1].mxu0 }
 0x164   : > { %v312_v25 = vpop.f32.mrb[2].mxu0 }
 0x165   : > { %v362_v26 = vadd.f32 %v361_v19, %v312_v25  ;;  %v788_v27 = vpop.f32.mrb[3].mxu0 }
 0x16a   : > { %v413_v30 = vpop.f32.mrb[4].mxu0 }
 0x16b   : > { %v420_v32 = vadd.f32 %v413_v30, %v359_v23  ;;  %v799_v33 = vpop.f32.mrb[5].mxu0 }
 0x16c   : > { %v416_v34 = vpop.f32.mrb[6].mxu0 }
 0x16d   : > { %v434_v35 = vadd.f32 %v427_v29, %v420_v32  ;;  %v421_v36 = vadd.f32 %v416_v34, %v362_v26  ;;  %v800_v37 = vpop.f32.mrb[7].mxu0 }
 0x16f   : > { %vm436_vm6 = vcmp.ge.f32.partialorder %v434_v35, 0.0  ;;  %v438_v39 = vmul.f32 0.1, %v434_v35  ;;  %v435_v40 = vadd.f32 %v432_v38, %v421_v36 }
 0x171   : > { %v440_v41 = vsel %vm436_vm6, %v434_v35, %v438_v39  ;;  %vm437_vm7 = vcmp.ge.f32.partialorder %v435_v40, 0.0  ;;  %v439_v42 = vmul.f32 0.1, %v435_v40 }
 0x172   : > { %v448_v45 = vsel %vm447_vm8, %v440_v41, 0.0 }
 0x173   : > { %v441_v43 = vsel %vm437_vm7, %v435_v40, %v439_v42 }
 0x174   : > { %v752_v44 = vpack.c.bf16 %v441_v43, %v440_v41  ;;  %v449_v46 = vsel %vm447_vm8, %v441_v43, 0.0 }
 0x175   : > { %v450_v47 = vpack.c.bf16 %v449_v46, %v448_v45 }
 0x176   : > { %808 = vmatpush3.bf16.msk.msra.mxu0 %vm751_vm9, %v752_v44 }
 0x177   : > { %566 = vrot.lane.b32.xlu1 %v450_v47, %s895_s15  ;;  %462 = vrot.lane.b32.xlu0 %v450_v47, %s896_s16 }
 0x179   : > { %810 = vmatmul.mubr.msk.bf16.vlgmr.msra.gmra.mrb[8].mxu0 %vm271_vm3, %v862_v48 }
 0x17b   : > { %624 = vperm.xlu1 %851, %v616_v49   ;;  %619 = vperm.xlu0 %852, %v615_v50  }
 0x17f   : > { %854 = vrot.lane.b32.xlu1 %v853_v51, %s897_s26 }
 0x1e9   : > { %v463_v52 = vpop.permute.xlu0 %462  ;;  %v567_v54 = vpop.permute.xlu1 %566 }
 0x1ea   : > { %802 = vmatpush3.bf16.msra.mxu1 %v463_v52 }
 0x1eb   : > { %813 = vmatprep.subr.bf16.mxu1 %v890_v0 }
 0x1ed   : > { %804 = vmatmul.mubr.msk.bf16.vlgmr.msra.gmra.mrb[4].mxu1 %vm271_vm3, %v861_v53 }
 0x1ee   : > { %814 = vmatpush3.bf16.msra.mxu1 %v567_v54  ;;  %815 = vmatprep.mubr.msk.bf16.mxu1 %vm891_vm0, %v890_v0 }
 0x1f5   : > { %816 = vmatmul.mubr.msk.bf16.vlgmr.msra.gmra.mrb[8].mxu1 %vm271_vm3, %v863_v55 }
 0x1fa   : > { %v625_v63 = vpop.permute.xlu1 %624  ;;  %v620_v5 = vpop.permute.xlu0 %619 }
 0x1fe   : > { %v855_v4 = vpop.permute.xlu1 %854 }
 0x24c   : > { %v551_v56 = vpop.f32.mrb[8].mxu0 }
 0x24d   : > { %v811_v57 = vpop.f32.mrb[9].mxu0 }
 0x24e   : > { %v554_v58 = vpop.f32.mrb[10].mxu0 }
 0x24f   : > { %v812_v59 = vpop.f32.mrb[11].mxu0 }
 0x2c0   : > { %v502_v60 = vpop.f32.mrb[4].mxu1 }
 0x2c1   : > { %v805_v61 = vpop.f32.mrb[5].mxu1  ;;  %v552_v62 = vadd.f32 %v551_v56, %v502_v60 }
 0x2c2   : > { %v505_v1 = vpop.f32.mrb[6].mxu1 }
 0x2c3   : > { %v806_v2 = vpop.f32.mrb[7].mxu1  ;;  %v555_v3 = vadd.f32 %v554_v58, %v505_v1 }
 0x2c8   : > { %v606_v0 = vpop.f32.mrb[8].mxu1 }
 0x2c9   : > { %v613_v6 = vadd.f32 %v606_v0, %v552_v62  ;;  %v817_v7 = vpop.f32.mrb[9].mxu1 }
 0x2ca   : > { %v609_v8 = vpop.f32.mrb[10].mxu1 }
 0x2cb   : > { %v627_v9 = vadd.f32 %v620_v5, %v613_v6  ;;  %v614_v10 = vadd.f32 %v609_v8, %v555_v3  ;;  %v818_v11 = vpop.f32.mrb[11].mxu1 }
 0x2cd   : > { %v864_v12 = vadd.low.f32.bf16 %v627_v9, %v855_v4  ;;  %v628_v13 = vadd.f32 %v625_v63, %v614_v10 }
 0x2cf   : > { %v765_v14 = vpack.c.bf16 %v864_v12, %v864_v12  ;;  %v865_v15 = vadd.high.f32.bf16 %v628_v13, %v855_v4 }
 0x2d1   : > { %648 = vst.msk [vmem:[%s244_s8] sm:$0xf] %vm647_vm10, %v765_v14  ;;  %v766_v16 = vpack.c.bf16 %v865_v15, %v865_v15 }
 0x2d3   : > { %649 = vst.msk [vmem:[%s244_s8 + $0x4] sm:$0xf] %vm647_vm10, %v766_v16 }
 0x2d4 PF: > { %s15_s20 = sadd.s32 1, %s888_s20   ;;  %s1040_s18 = smov %s884_s19 }
 0x2d5   : > { %p12_p5 = scmp.ge.s32.totalorder %s15_s20, 4   ;;  %s1041_s19 = smov %s1043_s21 }
 0x2d7   :  { %14 = sbr.rel (!%p12_p5) target bundleno = 2 (0x2), region = 74 }

// kernel: _lambda_.16
= control target key start
LH: loop header
LB: loop body
LE: loop exit
PB: predicated region body
PF: predicated region fallthrough
CT: control target
= control target key end

     0   :  { %s2537_s12 = smov 0   ;;  %s2539_s13 = smov 0   ;;  %s3032_s0 = inlined_call_operand.vmem [shape: bf16[2,320,14], index: 0, kind: input, shape index: {}]   ;;  %s3033_s1 = inlined_call_operand.vmem [shape: bf16[7,32,320], index: 1, kind: input, shape index: {}]   ;;  %s3034_s2 = inlined_call_operand.vmem [shape: f32[32,1], index: 2, kind: input, shape index: {}]   ;;  %s3035_s3 = inlined_call_operand.vmem [shape: bf16[2,32,8], index: 3, kind: output, shape index: {}]  }
   0x1   :  { %s2541_s14 = smov 0  }
   0x2 LB: > { %s25_s15 = sadd.s32 1, %s2504_s13  ;;  %p1863_p0 = scmp.ge.s32.totalorder %s2508_s14, 1  ;;  %s2508_s14 = sphi %s2541_s14, %s13_s14   ;;  %s2504_s13 = sphi %s2539_s13, %s3037_s13   ;;  %s2500_s12 = sphi %s2537_s12, %s3036_s12  }
   0x3   : > { %p27_p1 = scmp.ge.s32.totalorder %s25_s15, 2  ;;  %p151_p2 = scmp.lt.s32.totalorder %s2508_s14, 3 }
   0x5   : > { %s3039_s15 = smov (%p27_p1, %s25_s15), 0  ;;  %p152_p3 = pnand %p1863_p0, %p151_p2 }
   0x6   : > { %p178_p4 = scmp.lt.s32.totalorder (!%p152_p3), %s2500_s12, 1  ;;  %s2510_s20 = smov (!%p152_p3), 127   ;;  %vm439_vm0 = vcmask (!%p152_p3), 523264   ;;  %v2430_v13 = vld [vmem:[%s3033_s1 + $0x38] ss:$12 sps:$4 sm:$0xff] (!%p152_p3)   ;;  %vm1777_vm1 = vcmask (!%p152_p3), 60416  }
   0x7   : > { %155 = sbr.rel (%p152_p3) target bundleno = 604 (0x25c), region = 32  ;;  %2248 = vmatprep.mubr.msk.bf16.mxu1 (!%p152_p3), %vm439_vm0, %v2430_v13  ;;  %v2434_v18 = vld [vmem:[%s3033_s1 + $0x34] ss:$12 sps:$4 sm:$0xff] (!%p152_p3)   ;;  %s2511_s25 = smov (!%p152_p3), 126   ;;  %v2431_v32 = vld [vmem:[%s3033_s1 + $0x50] ss:$12 sps:$4 sm:$0xff] (!%p152_p3)  }
   0x8   : > { %478 = vmatprep.mubr.bf16.mxu0 (!%p152_p3), %v2434_v18  ;;  %s2512_s26 = smov (!%p152_p3), 125   ;;  %s2513_s27 = smov (!%p152_p3), 124   ;;  %v2437_v35 = vld [vmem:[%s3033_s1 + $0x4] ss:$12 sps:$4 sm:$0xff] (!%p152_p3)   ;;  %v2441_v47 = vld [vmem:[%s3033_s1 + $0x4c] ss:$12 sps:$4 sm:$0xff] (!%p152_p3)  }
   0x9   : > { %s2514_s5 = smov (!%p152_p3), 123   ;;  %v2432_v44 = vld [vmem:[%s3033_s1 + $0x30] ss:$12 sps:$4 sm:$0xff] (!%p152_p3)   ;;  %v2444_v50 = vld [vmem:[%s3033_s1 + $0x48] ss:$12 sps:$4 sm:$0xff] (!%p152_p3)  }
   0xa   : > { %v2448_v53 = vld [vmem:[%s3033_s1 + $0x64] ss:$12 sps:$4 sm:$0xff] (!%p152_p3)   ;;  %v2435_v54 = vld [vmem:[%s3033_s1] ss:$12 sps:$4 sm:$0xff] (!%p152_p3)   ;;  %v2438_v57 = vld [vmem:[%s3033_s1 + $0x1c] ss:$12 sps:$4 sm:$0xff] (!%p152_p3)  }
   0xb   : > { %v2440_v60 = vld [vmem:[%s3033_s1 + $0x18] ss:$12 sps:$4 sm:$0xff] (!%p152_p3)   ;;  %v2443_v63 = vld [vmem:[%s3033_s1 + $0x8] ss:$12 sps:$4 sm:$0xff] (!%p152_p3)  }
   0xe   : > { %s3041_s12 = smov (!%p178_p4, %s2500_s12), 1 }
   0xf   : > { %s2376_s16 = smul.u32 160, %s3041_s12  ;;  %s1997_s28 = sshll.u32 %s3041_s12, 4 }
  0x10   : > { %s190_s30 = scalar_lea.vmem %s3035_s3, %s1997_s28 }
  0x11   : > { %s2561_s19 = scalar_lea.vmem %s3032_s0, %s2376_s16 }
  0x12   : > { %v2564_v0 = vld [vmem:[%s2561_s19 + $0x88] sm:$0xff]   ;;  %v2567_v1 = vld [vmem:[%s2561_s19 + $0x80] sm:$0xff]   ;;  %v2582_v4 = vld [vmem:[%s2561_s19 + $0x90] sm:$0xff]  }
  0x13   : > { %413 = vrot.lane.b32.xlu1 %v2564_v0, %s2510_s20  ;;  %v2572_v2 = vld [vmem:[%s2561_s19 + $0x40] sm:$0xff]   ;;  %411 = vrot.lane.b32.xlu0 %v2567_v1, %s2510_s20  ;;  %v2587_v5 = vld [vmem:[%s2561_s19 + $0x48] sm:$0xff]  }
  0x14   : > { %v2577_v3 = vld [vmem:[%s2561_s19] sm:$0xff]   ;;  %v2592_v6 = vld [vmem:[%s2561_s19 + $0x50] sm:$0xff]   ;;  %v2597_v7 = vld [vmem:[%s2561_s19 + $0x8] sm:$0xff]  }
  0x15   : > { %v2602_v8 = vld [vmem:[%s2561_s19 + $0x10] sm:$0xff]   ;;  %v2607_v9 = vld [vmem:[%s2561_s19 + $0x98] sm:$0xff]   ;;  %v2620_v12 = vld [vmem:[%s2561_s19 + $0x20] sm:$0xff]  }
  0x16   : > { %v2612_v10 = vld [vmem:[%s2561_s19 + $0x18] sm:$0xff]   ;;  %v2626_v14 = vld [vmem:[%s2561_s19 + $0x60] sm:$0xff]   ;;  %v2634_v15 = vld [vmem:[%s2561_s19 + $0x28] sm:$0xff]  }
  0x17   : > { %379 = vrot.lane.b32.xlu1 %v2577_v3, %s2510_s20  ;;  %395 = vrot.lane.b32.xlu0 %v2572_v2, %s2510_s20  ;;  %v2617_v11 = vld [vmem:[%s2561_s19 + $0x58] sm:$0xff]   ;;  %v2637_v16 = vld [vmem:[%s2561_s19 + $0x68] sm:$0xff]  }
  0x18   : > { %v2644_v17 = vld [vmem:[%s2561_s19 + $0x30] sm:$0xff]   ;;  %v2659_v20 = vld [vmem:[%s2561_s19 + $0x38] sm:$0xff]  }
  0x19   : > { %v2654_v19 = vld [vmem:[%s2561_s19 + $0x70] sm:$0xff]   ;;  %v2664_v21 = vld [vmem:[%s2561_s19 + $0x78] sm:$0xff]  }
  0x1b   : > { %415 = vrot.lane.b32.xlu1 %v2582_v4, %s2510_s20  ;;  %397 = vrot.lane.b32.xlu0 %v2587_v5, %s2510_s20 }
  0x1f   : > { %399 = vrot.lane.b32.xlu1 %v2592_v6, %s2510_s20  ;;  %381 = vrot.lane.b32.xlu0 %v2597_v7, %s2510_s20 }
  0x23   : > { %383 = vrot.lane.b32.xlu1 %v2602_v8, %s2510_s20  ;;  %417 = vrot.lane.b32.xlu0 %v2607_v9, %s2510_s20 }
  0x27   : > { %385 = vrot.lane.b32.xlu1 %v2612_v10, %s2510_s20  ;;  %401 = vrot.lane.b32.xlu0 %v2617_v11, %s2510_s20 }
  0x2b   : > { %387 = vrot.lane.b32.xlu1 %v2620_v12, %s2510_s20  ;;  %403 = vrot.lane.b32.xlu0 %v2626_v14, %s2510_s20 }
  0x2f   : > { %389 = vrot.lane.b32.xlu1 %v2634_v15, %s2510_s20  ;;  %405 = vrot.lane.b32.xlu0 %v2637_v16, %s2510_s20 }
  0x33   : > { %391 = vrot.lane.b32.xlu1 %v2644_v17, %s2510_s20  ;;  %407 = vrot.lane.b32.xlu0 %v2654_v19, %s2510_s20 }
  0x37   : > { %393 = vrot.lane.b32.xlu1 %v2659_v20, %s2510_s20  ;;  %409 = vrot.lane.b32.xlu0 %v2664_v21, %s2510_s20 }
  0x3b   : > { %737 = vrot.lane.b32.xlu1 %v2577_v3, %s2511_s25  ;;  %753 = vrot.lane.b32.xlu0 %v2572_v2, %s2511_s25 }
  0x3f   : > { %739 = vrot.lane.b32.xlu1 %v2597_v7, %s2511_s25  ;;  %755 = vrot.lane.b32.xlu0 %v2587_v5, %s2511_s25 }
  0x43   : > { %741 = vrot.lane.b32.xlu1 %v2602_v8, %s2511_s25  ;;  %757 = vrot.lane.b32.xlu0 %v2592_v6, %s2511_s25 }
  0x47   : > { %743 = vrot.lane.b32.xlu1 %v2612_v10, %s2511_s25  ;;  %759 = vrot.lane.b32.xlu0 %v2617_v11, %s2511_s25 }
  0x4b   : > { %745 = vrot.lane.b32.xlu1 %v2620_v12, %s2511_s25  ;;  %761 = vrot.lane.b32.xlu0 %v2626_v14, %s2511_s25 }
  0x4f   : > { %747 = vrot.lane.b32.xlu1 %v2634_v15, %s2511_s25  ;;  %763 = vrot.lane.b32.xlu0 %v2637_v16, %s2511_s25 }
  0x53   : > { %749 = vrot.lane.b32.xlu1 %v2644_v17, %s2511_s25  ;;  %765 = vrot.lane.b32.xlu0 %v2654_v19, %s2511_s25 }
  0x57   : > { %769 = vrot.lane.b32.xlu1 %v2567_v1, %s2511_s25  ;;  %767 = vrot.lane.b32.xlu0 %v2664_v21, %s2511_s25 }
  0x5b   : > { %771 = vrot.lane.b32.xlu1 %v2564_v0, %s2511_s25  ;;  %751 = vrot.lane.b32.xlu0 %v2659_v20, %s2511_s25 }
  0x5f   : > { %944 = vrot.lane.b32.xlu1 %v2577_v3, %s2512_s26  ;;  %960 = vrot.lane.b32.xlu0 %v2572_v2, %s2512_s26 }
  0x63   : > { %962 = vrot.lane.b32.xlu1 %v2587_v5, %s2512_s26  ;;  %773 = vrot.lane.b32.xlu0 %v2582_v4, %s2511_s25 }
  0x67   : > { %775 = vrot.lane.b32.xlu1 %v2607_v9, %s2511_s25  ;;  %946 = vrot.lane.b32.xlu0 %v2597_v7, %s2512_s26 }
  0x6b   : > { %948 = vrot.lane.b32.xlu1 %v2602_v8, %s2512_s26  ;;  %964 = vrot.lane.b32.xlu0 %v2592_v6, %s2512_s26 }
  0x6f   : > { %976 = vrot.lane.b32.xlu1 %v2567_v1, %s2512_s26  ;;  %966 = vrot.lane.b32.xlu0 %v2617_v11, %s2512_s26 }
  0x73   : > { %968 = vrot.lane.b32.xlu1 %v2626_v14, %s2512_s26  ;;  %950 = vrot.lane.b32.xlu0 %v2612_v10, %s2512_s26 }
  0x77   : > { %952 = vrot.lane.b32.xlu1 %v2620_v12, %s2512_s26  ;;  %978 = vrot.lane.b32.xlu0 %v2564_v0, %s2512_s26 }
  0x7b   : > { %980 = vrot.lane.b32.xlu1 %v2582_v4, %s2512_s26  ;;  %970 = vrot.lane.b32.xlu0 %v2637_v16, %s2512_s26 }
  0x7f   : > { %972 = vrot.lane.b32.xlu1 %v2654_v19, %s2512_s26  ;;  %954 = vrot.lane.b32.xlu0 %v2634_v15, %s2512_s26 }
  0x83   : > { %956 = vrot.lane.b32.xlu1 %v2644_v17, %s2512_s26  ;;  %982 = vrot.lane.b32.xlu0 %v2607_v9, %s2512_s26 }
  0x85   : > { %v414_v22 = vpop.permute.xlu1 %413  ;;  %v412_v23 = vpop.permute.xlu0 %411 }
  0x86   : > { %2240 = vmatprep.subr.bf16.mxu1 %v412_v23 }
  0x87   : > { %1183 = vrot.lane.b32.xlu1 %v2567_v1, %s2513_s27  ;;  %2241 = vmatpush3.bf16.msra.mxu1 %v412_v23 }
  0x88   : > { %974 = vrot.lane.b32.xlu0 %v2664_v21, %s2512_s26  ;;  %2242 = vmatprep.subr.bf16.mxu1 %v414_v22 }
  0x89   : > { %v380_v24 = vpop.permute.xlu1 %379  ;;  %v396_v25 = vpop.permute.xlu0 %395 }
  0x8a   : > { %2002 = vmatprep.subr.bf16.mxu0 %v396_v25 }
  0x8b   : > { %1167 = vrot.lane.b32.xlu1 %v2572_v2, %s2513_s27  ;;  %2243 = vmatpush3.bf16.msra.mxu1 %v414_v22  ;;  %v2445_v22 = vld [vmem:[%s3033_s1 + $0x20] ss:$12 sps:$4 sm:$0xff]  }
  0x8c   : > { %958 = vrot.lane.b32.xlu0 %v2659_v20, %s2512_s26  ;;  %2003 = vmatpush3.bf16.msra.mxu0 %v380_v24  ;;  %s2515_s26 = smov 122   ;;  %v2449_v24 = vld [vmem:[%s3033_s1 + $0x68] ss:$12 sps:$4 sm:$0xff]  }
  0x8d   : > { %v416_v26 = vpop.permute.xlu1 %415  ;;  %v398_v27 = vpop.permute.xlu0 %397 }
  0x8e   : > { %2244 = vmatprep.subr.bf16.mxu1 %v416_v26  ;;  %2004 = vmatprep.subr.bf16.mxu0 %v398_v27  ;;  %v2446_v27 = vld [vmem:[%s3033_s1 + $0x60] ss:$12 sps:$4 sm:$0xff]  }
  0x8f   : > { %1151 = vrot.lane.b32.xlu1 %v2577_v3, %s2513_s27  ;;  %2245 = vmatpush3.bf16.msra.mxu1 %v416_v26 }
  0x90   : > { %1185 = vrot.lane.b32.xlu0 %v2564_v0, %s2513_s27 }
  0x91   : > { %v400_v28 = vpop.permute.xlu1 %399  ;;  %v382_v29 = vpop.permute.xlu0 %381 }
  0x92   : > { %2005 = vmatpush3.bf16.msra.mxu0 %v382_v29 }
  0x93   : > { %1187 = vrot.lane.b32.xlu1 %v2582_v4, %s2513_s27  ;;  %2006 = vmatprep.subr.bf16.mxu0 %v400_v28  ;;  %v2451_v28 = vld [vmem:[%s3033_s1 + $0x7c] ss:$12 sps:$4 sm:$0xff]  }
  0x94   : > { %1169 = vrot.lane.b32.xlu0 %v2587_v5, %s2513_s27 }
  0x95   : > { %v384_v30 = vpop.permute.xlu1 %383  ;;  %v418_v31 = vpop.permute.xlu0 %417 }
  0x96   : > { %2246 = vmatprep.subr.bf16.mxu1 %v418_v31  ;;  %2007 = vmatpush3.bf16.msra.mxu0 %v384_v30 }
  0x97   : > { %1171 = vrot.lane.b32.xlu1 %v2592_v6, %s2513_s27  ;;  %2247 = vmatpush3.bf16.msra.mxu1 %v418_v31  ;;  %v2453_v31 = vld [vmem:[%s3033_s1 + $0x78] ss:$12 sps:$4 sm:$0xff]  }
  0x98   : > { %1153 = vrot.lane.b32.xlu0 %v2597_v7, %s2513_s27  ;;  %2036 = vmatprep.subr.bf16.mxu1 %v2572_v2 }
  0x99   : > { %v386_v33 = vpop.permute.xlu1 %385  ;;  %v402_v34 = vpop.permute.xlu0 %401 }
  0x9a   : > { %2008 = vmatprep.subr.bf16.mxu0 %v402_v34  ;;  %2249 = vmatmul.mubr.msk.bf16.vlgmr.msra.gmra.mrb[0].mxu1 %vm439_vm0, %v2431_v32  ;;  %v2458_v32 = vld [vmem:[%s3033_s1 + $0x94] ss:$12 sps:$4 sm:$0xff]  }
  0x9b   : > { %1155 = vrot.lane.b32.xlu1 %v2602_v8, %s2513_s27  ;;  %2009 = vmatpush3.bf16.msra.mxu0 %v386_v33  ;;  %v2450_v34 = vld [vmem:[%s3033_s1 + $0x80] ss:$12 sps:$4 sm:$0xff]  }
  0x9c   : > { %1189 = vrot.lane.b32.xlu0 %v2607_v9, %s2513_s27  ;;  %2037 = vmatpush3.bf16.msra.mxu1 %v2577_v3 }
  0x9d   : > { %v388_v36 = vpop.permute.xlu1 %387  ;;  %v404_v37 = vpop.permute.xlu0 %403  ;;  %2038 = vmatprep.subr.bf16.mxu1 %v2587_v5  ;;  %632 = vmatprep.mubr.bf16.mxu1 %v2437_v35 }
  0x9e   : > { %2010 = vmatprep.subr.bf16.mxu0 %v404_v37 }
  0x9f   : > { %1374 = vrot.lane.b32.xlu1 %v2572_v2, %s2514_s5  ;;  %2011 = vmatpush3.bf16.msra.mxu0 %v388_v36  ;;  %v2454_v36 = vld [vmem:[%s3033_s1 + $0x98] ss:$12 sps:$4 sm:$0xff]  }
  0xa0   : > { %1173 = vrot.lane.b32.xlu0 %v2617_v11, %s2513_s27  ;;  %2039 = vmatpush3.bf16.msra.mxu1 %v2597_v7 }
  0xa1   : > { %v390_v38 = vpop.permute.xlu1 %389  ;;  %v406_v39 = vpop.permute.xlu0 %405  ;;  %2040 = vmatprep.subr.bf16.mxu1 %v2592_v6 }
  0xa2   : > { %2012 = vmatprep.subr.bf16.mxu0 %v406_v39 }
  0xa3   : > { %1358 = vrot.lane.b32.xlu1 %v2577_v3, %s2514_s5  ;;  %2013 = vmatpush3.bf16.msra.mxu0 %v390_v38 }
  0xa4   : > { %1157 = vrot.lane.b32.xlu0 %v2612_v10, %s2513_s27  ;;  %2041 = vmatpush3.bf16.msra.mxu1 %v2602_v8 }
  0xa5   : > { %v392_v40 = vpop.permute.xlu1 %391  ;;  %v408_v41 = vpop.permute.xlu0 %407  ;;  %2042 = vmatprep.subr.bf16.mxu1 %v2617_v11 }
  0xa6   : > { %2014 = vmatprep.subr.bf16.mxu0 %v408_v41 }
  0xa7   : > { %1376 = vrot.lane.b32.xlu1 %v2587_v5, %s2514_s5  ;;  %2015 = vmatpush3.bf16.msra.mxu0 %v392_v40 }
  0xa8   : > { %1175 = vrot.lane.b32.xlu0 %v2626_v14, %s2513_s27  ;;  %2043 = vmatpush3.bf16.msra.mxu1 %v2612_v10 }
  0xa9   : > { %v394_v42 = vpop.permute.xlu1 %393  ;;  %v410_v43 = vpop.permute.xlu0 %409  ;;  %2044 = vmatprep.subr.bf16.mxu1 %v2626_v14 }
  0xaa   : > { %2016 = vmatprep.subr.bf16.mxu0 %v410_v43 }
  0xab   : > { %1360 = vrot.lane.b32.xlu1 %v2597_v7, %s2514_s5  ;;  %2017 = vmatpush3.bf16.msra.mxu0 %v394_v42 }
  0xac   : > { %1159 = vrot.lane.b32.xlu0 %v2620_v12, %s2513_s27  ;;  %2045 = vmatpush3.bf16.msra.mxu1 %v2620_v12 }
  0xad   : > { %v738_v45 = vpop.permute.xlu1 %737  ;;  %v754_v46 = vpop.permute.xlu0 %753  ;;  %2046 = vmatprep.subr.bf16.mxu1 %v2637_v16 }
  0xae   : > { %2070 = vmatprep.subr.bf16.mxu0 %v754_v46  ;;  %479 = vmatmul.mubr.bf16.vlgmr.msra.gmra.mrb[0].mxu0 %v2432_v44  ;;  %v2456_v44 = vld [vmem:[%s3033_s1 + $0x90] ss:$12 sps:$4 sm:$0xff]  }
  0xaf   : > { %1378 = vrot.lane.b32.xlu1 %v2592_v6, %s2514_s5  ;;  %2071 = vmatpush3.bf16.msra.mxu0 %v738_v45 }
  0xb0   : > { %1177 = vrot.lane.b32.xlu0 %v2637_v16, %s2513_s27  ;;  %2047 = vmatpush3.bf16.msra.mxu1 %v2634_v15 }
  0xb1   : > { %v740_v48 = vpop.permute.xlu1 %739  ;;  %v756_v49 = vpop.permute.xlu0 %755  ;;  %2048 = vmatprep.subr.bf16.mxu1 %v2654_v19  ;;  %486 = vmatprep.mubr.bf16.mxu0 %v2441_v47 }
  0xb2   : > { %2072 = vmatprep.subr.bf16.mxu0 %v756_v49 }
  0xb3   : > { %1362 = vrot.lane.b32.xlu1 %v2602_v8, %s2514_s5  ;;  %2073 = vmatpush3.bf16.msra.mxu0 %v740_v48 }
  0xb4   : > { %1161 = vrot.lane.b32.xlu0 %v2634_v15, %s2513_s27  ;;  %2049 = vmatpush3.bf16.msra.mxu1 %v2644_v17 }
  0xb5   : > { %v742_v51 = vpop.permute.xlu1 %741  ;;  %v758_v52 = vpop.permute.xlu0 %757  ;;  %2050 = vmatprep.subr.bf16.mxu1 %v2664_v21 }
  0xb6   : > { %2074 = vmatprep.subr.bf16.mxu0 %v758_v52  ;;  %487 = vmatmul.mubr.bf16.gmra.mrb[4].mxu0 %v2444_v50  ;;  %v2463_v52 = vld [vmem:[%s3033_s1 + $0xe0] ss:$12 sps:$4 sm:$0xff]  }
  0xb7   : > { %1380 = vrot.lane.b32.xlu1 %v2617_v11, %s2514_s5  ;;  %2075 = vmatpush3.bf16.msra.mxu0 %v742_v51 }
  0xb8   : > { %1179 = vrot.lane.b32.xlu0 %v2654_v19, %s2513_s27  ;;  %2051 = vmatpush3.bf16.msra.mxu1 %v2659_v20 }
  0xb9   : > { %v744_v55 = vpop.permute.xlu1 %743  ;;  %v760_v56 = vpop.permute.xlu0 %759  ;;  %2252 = vmatprep.subr.bf16.mxu1 %v2567_v1  ;;  %835 = vmatprep.mubr.bf16.mxu0 %v2448_v53  ;;  %v2472_v53 = vld [vmem:[%s3033_s1 + $0xf4] ss:$12 sps:$4 sm:$0xff]  }
  0xba   : > { %2076 = vmatprep.subr.bf16.mxu0 %v760_v56 }
  0xbb   : > { %1364 = vrot.lane.b32.xlu1 %v2612_v10, %s2514_s5  ;;  %633 = vmatmul.mubr.bf16.vlgmr.msra.gmra.mrb[4].mxu1 %v2435_v54 }
  0xbc   : > { %1163 = vrot.lane.b32.xlu0 %v2644_v17, %s2513_s27  ;;  %2253 = vmatpush3.bf16.msra.mxu1 %v2567_v1 }
  0xbd   : > { %2077 = vmatpush3.bf16.msra.mxu0 %v744_v55  ;;  %v746_v58 = vpop.permute.xlu1 %745  ;;  %v762_v59 = vpop.permute.xlu0 %761  ;;  %2254 = vmatprep.subr.bf16.mxu1 %v2564_v0 }
  0xbe   : > { %640 = vmatprep.mubr.bf16.mxu1 %v2438_v57  ;;  %2078 = vmatprep.subr.bf16.mxu0 %v762_v59 }
  0xbf   : > { %1382 = vrot.lane.b32.xlu1 %v2626_v14, %s2514_s5 }
  0xc0   : > { %1181 = vrot.lane.b32.xlu0 %v2664_v21, %s2513_s27  ;;  %2255 = vmatpush3.bf16.msra.mxu1 %v2564_v0 }
  0xc1   : > { %2079 = vmatpush3.bf16.msra.mxu0 %v746_v58  ;;  %v748_v61 = vpop.permute.xlu1 %747  ;;  %v764_v62 = vpop.permute.xlu0 %763  ;;  %2256 = vmatprep.subr.bf16.mxu1 %v2582_v4 }
  0xc2   : > { %2080 = vmatprep.subr.bf16.mxu0 %v764_v62 }
  0xc3   : > { %1366 = vrot.lane.b32.xlu1 %v2620_v12, %s2514_s5  ;;  %641 = vmatmul.mubr.bf16.gmra.mrb[8].mxu1 %v2440_v60 }
  0xc4   : > { %1165 = vrot.lane.b32.xlu0 %v2659_v20, %s2513_s27  ;;  %2257 = vmatpush3.bf16.msra.mxu1 %v2582_v4 }
  0xc5   : > { %2081 = vmatpush3.bf16.msra.mxu0 %v748_v61  ;;  %v750_v13 = vpop.permute.xlu1 %749  ;;  %v766_v18 = vpop.permute.xlu0 %765  ;;  %2258 = vmatprep.subr.bf16.mxu1 %v2607_v9 }
  0xc6   : > { %2260 = vmatprep.mubr.msk.bf16.mxu1 %vm439_vm0, %v2443_v63  ;;  %2082 = vmatprep.subr.bf16.mxu0 %v766_v18 }
  0xc7   : > { %1581 = vrot.lane.b32.xlu1 %v2572_v2, %s2515_s26 }
  0xc8   : > { %1384 = vrot.lane.b32.xlu0 %v2637_v16, %s2514_s5  ;;  %2259 = vmatpush3.bf16.msra.mxu1 %v2607_v9 }
  0xc9   : > { %2083 = vmatpush3.bf16.msra.mxu0 %v750_v13  ;;  %v770_v23 = vpop.permute.xlu1 %769  ;;  %v768_v25 = vpop.permute.xlu0 %767 }
  0xca   : > { %2264 = vmatprep.subr.bf16.mxu1 %v770_v23  ;;  %2084 = vmatprep.subr.bf16.mxu0 %v768_v25  ;;  %v1734_v25 = vld [vmem:[%s3034_s2 + $0x8] sm:$0xff] }
  0xcb   : > { %1565 = vrot.lane.b32.xlu1 %v2577_v3, %s2515_s26  ;;  %2261 = vmatmul.mubr.msk.bf16.vlgmr.msra.gmra.mrb[0].mxu1 %vm439_vm0, %v2445_v22 }
  0xcc   : > { %1368 = vrot.lane.b32.xlu0 %v2634_v15, %s2514_s5  ;;  %2265 = vmatpush3.bf16.msra.mxu1 %v770_v23 }
  0xcd   : > { %v772_v2 = vpop.permute.xlu1 %771  ;;  %2272 = vmatprep.mubr.msk.bf16.mxu1 %vm439_vm0, %v2449_v24  ;;  %v752_v26 = vpop.permute.xlu0 %751  ;;  %v1733_v24 = vld [vmem:[%s3034_s2] sm:$0xff] }
  0xce   : > { %2266 = vmatprep.subr.bf16.mxu1 %v772_v2  ;;  %2085 = vmatpush3.bf16.msra.mxu0 %v752_v26 }
  0xcf   : > { %1583 = vrot.lane.b32.xlu1 %v2587_v5, %s2515_s26 }
  0xd0   : > { %1386 = vrot.lane.b32.xlu0 %v2654_v19, %s2514_s5  ;;  %2267 = vmatpush3.bf16.msra.mxu1 %v772_v2  ;;  %v2516_v2 = vmov 0  }
  0xd1   : > { %v945_v3 = vpop.permute.xlu1 %944  ;;  %v961_v29 = vpop.permute.xlu0 %960  ;;  %836 = vmatmul.mubr.bf16.vlgmr.msra.gmra.mrb[8].mxu0 %v2446_v27  ;;  %2409 = vset.pattern.permute.xlu1 %v2516_v2 }
  0xd2   : > { %2104 = vmatprep.subr.bf16.mxu0 %v961_v29  ;;  %843 = vmatprep.mubr.bf16.mxu0 %v2451_v28  ;;  %v1735_v28 = vld [vmem:[%s3034_s2 + $0x10] sm:$0xff] }
  0xd3   : > { %1567 = vrot.lane.b32.xlu1 %v2597_v7, %s2515_s26  ;;  %2105 = vmatpush3.bf16.msra.mxu0 %v945_v3  ;;  %v1736_v3 = vld [vmem:[%s3034_s2 + $0x18] sm:$0xff] }
  0xd4   : > { %1370 = vrot.lane.b32.xlu0 %v2644_v17, %s2514_s5 }
  0xd5   : > { %v963_v5 = vpop.permute.xlu1 %962  ;;  %v774_v30 = vpop.permute.xlu0 %773  ;;  %2408 = vset.pattern.permute.xlu0 %v2516_v2 }
  0xd6   : > { %2106 = vmatprep.subr.bf16.mxu0 %v963_v5  ;;  %2268 = vmatprep.subr.bf16.mxu1 %v774_v30 }
  0xd7   : > { %1585 = vrot.lane.b32.xlu1 %v2592_v6, %s2515_s26  ;;  %2269 = vmatpush3.bf16.msra.mxu1 %v774_v30 }
  0xd8   : > { %1388 = vrot.lane.b32.xlu0 %v2664_v21, %s2514_s5 }
  0xd9   : > { %v776_v7 = vpop.permute.xlu1 %775  ;;  %v947_v33 = vpop.permute.xlu0 %946  ;;  %844 = vmatmul.mubr.bf16.gmra.mrb[12].mxu0 %v2453_v31 }
  0xda   : > { %2270 = vmatprep.subr.bf16.mxu1 %v776_v7  ;;  %2107 = vmatpush3.bf16.msra.mxu0 %v947_v33 }
  0xdb   : > { %1569 = vrot.lane.b32.xlu1 %v2602_v8, %s2515_s26  ;;  %2271 = vmatpush3.bf16.msra.mxu1 %v776_v7  ;;  %v2464_v7 = vld [vmem:[%s3033_s1 + $0xc0] ss:$12 sps:$4 sm:$0xff]  }
  0xdc   : > { %1372 = vrot.lane.b32.xlu0 %v2659_v20, %s2514_s5  ;;  %1042 = vmatprep.mubr.bf16.mxu0 %v2458_v32  ;;  %v2467_v32 = vld [vmem:[%s3033_s1 + $0xdc] ss:$12 sps:$4 sm:$0xff]  }
  0xdd   : > { %v949_v6 = vpop.permute.xlu1 %948  ;;  %v965_v35 = vpop.permute.xlu0 %964 }
  0xde   : > { %2108 = vmatprep.subr.bf16.mxu0 %v965_v35  ;;  %2273 = vmatmul.mubr.msk.bf16.vlgmr.msra.gmra.mrb[0].mxu1 %vm439_vm0, %v2450_v34 }
  0xdf   : > { %1587 = vrot.lane.b32.xlu1 %v2617_v11, %s2515_s26  ;;  %2109 = vmatpush3.bf16.msra.mxu0 %v949_v6 }
  0xe0   : > { %1390 = vrot.lane.b32.xlu0 %v2567_v1, %s2514_s5  ;;  %2284 = vmatprep.mubr.msk.bf16.mxu1 %vm439_vm0, %v2454_v36  ;;  %v2469_v36 = vld [vmem:[%s3033_s1 + $0xd8] ss:$12 sps:$4 sm:$0xff]  }
  0xe1   : > { %v977_v8 = vpop.permute.xlu1 %976  ;;  %v967_v37 = vpop.permute.xlu0 %966 }
  0xe2   : > { %2276 = vmatprep.subr.bf16.mxu1 %v977_v8  ;;  %2110 = vmatprep.subr.bf16.mxu0 %v967_v37 }
  0xe3   : > { %1392 = vrot.lane.b32.xlu1 %v2564_v0, %s2514_s5  ;;  %2277 = vmatpush3.bf16.msra.mxu1 %v977_v8  ;;  %v2480_v8 = vld [vmem:[%s3033_s1 + $0x124] ss:$12 sps:$4 sm:$0xff]  }
  0xe4   : > { %1571 = vrot.lane.b32.xlu0 %v2612_v10, %s2515_s26 }
  0xe5   : > { %v969_v11 = vpop.permute.xlu1 %968  ;;  %v951_v38 = vpop.permute.xlu0 %950 }
  0xe6   : > { %2111 = vmatpush3.bf16.msra.mxu0 %v951_v38 }
  0xe7   : > { %1573 = vrot.lane.b32.xlu1 %v2620_v12, %s2515_s26  ;;  %2112 = vmatprep.subr.bf16.mxu0 %v969_v11 }
  0xe8   : > { %1589 = vrot.lane.b32.xlu0 %v2626_v14, %s2515_s26 }
  0xe9   : > { %v953_v39 = vpop.permute.xlu1 %952  ;;  %v979_v40 = vpop.permute.xlu0 %978 }
  0xea   : > { %2278 = vmatprep.subr.bf16.mxu1 %v979_v40  ;;  %2113 = vmatpush3.bf16.msra.mxu0 %v953_v39 }
  0xeb   : > { %1591 = vrot.lane.b32.xlu1 %v2637_v16, %s2515_s26  ;;  %2279 = vmatpush3.bf16.msra.mxu1 %v979_v40 }
  0xec   : > { %1394 = vrot.lane.b32.xlu0 %v2582_v4, %s2514_s5 }
  0xed   : > { %v981_v10 = vpop.permute.xlu1 %980  ;;  %v971_v41 = vpop.permute.xlu0 %970 }
  0xee   : > { %2280 = vmatprep.subr.bf16.mxu1 %v981_v10  ;;  %2114 = vmatprep.subr.bf16.mxu0 %v971_v41 }
  0xef   : > { %1396 = vrot.lane.b32.xlu1 %v2607_v9, %s2514_s5  ;;  %2281 = vmatpush3.bf16.msra.mxu1 %v981_v10 }
  0xf0   : > { %1575 = vrot.lane.b32.xlu0 %v2634_v15, %s2515_s26  ;;  %v2455_v15 = vld [vmem:[%s3033_s1 + $0xb0] ss:$12 sps:$4 sm:$0xff]  }
  0xf1   : > { %v973_v12 = vpop.permute.xlu1 %972  ;;  %v955_v14 = vpop.permute.xlu0 %954 }
  0xf2   : > { %2115 = vmatpush3.bf16.msra.mxu0 %v955_v14  ;;  %v2470_v14 = vld [vmem:[%s3033_s1 + $0xf0] ss:$12 sps:$4 sm:$0xff]  }
  0xf3   : > { %1577 = vrot.lane.b32.xlu1 %v2644_v17, %s2515_s26  ;;  %2116 = vmatprep.subr.bf16.mxu0 %v973_v12 }
  0xf4   : > { %1593 = vrot.lane.b32.xlu0 %v2654_v19, %s2515_s26  ;;  %v2462_v19 = vld [vmem:[%s3033_s1 + $0xc8] ss:$12 sps:$4 sm:$0xff]  }
  0xf5   : > { %v957_v16 = vpop.permute.xlu1 %956  ;;  %v983_v42 = vpop.permute.xlu0 %982 }
  0xf6   : > { %2282 = vmatprep.subr.bf16.mxu1 %v983_v42  ;;  %2117 = vmatpush3.bf16.msra.mxu0 %v957_v16  ;;  %v2473_v16 = vld [vmem:[%s3033_s1 + $0x10c] ss:$12 sps:$4 sm:$0xff]  }
  0xf7   : > { %1597 = vrot.lane.b32.xlu1 %v2567_v1, %s2515_s26  ;;  %2283 = vmatpush3.bf16.msra.mxu1 %v983_v42 }
  0xf8   : > { %1595 = vrot.lane.b32.xlu0 %v2664_v21, %s2515_s26 }
  0xf9   : > { %v1184_v17 = vpop.permute.xlu1 %1183 }
  0xfa   : > { %v975_v43 = vpop.permute.xlu0 %974  ;;  %2288 = vmatprep.subr.bf16.mxu1 %v1184_v17  ;;  %2285 = vmatmul.mubr.msk.bf16.vlgmr.msra.gmra.mrb[0].mxu1 %vm439_vm0, %v2455_v15 }
  0xfb   : > { %2118 = vmatprep.subr.bf16.mxu0 %v975_v43  ;;  %1599 = vrot.lane.b32.xlu1 %v2564_v0, %s2515_s26  ;;  %v2459_v0 = vld [vmem:[%s3033_s1 + $0xac] ss:$12 sps:$4 sm:$0xff]   ;;  %v2475_v43 = vld [vmem:[%s3033_s1 + $0x108] ss:$12 sps:$4 sm:$0xff]  }
  0xfc   : > { %1579 = vrot.lane.b32.xlu0 %v2659_v20, %s2515_s26  ;;  %2289 = vmatpush3.bf16.msra.mxu1 %v1184_v17 }
  0xfd   : > { %v1168_v1 = vpop.permute.xlu1 %1167  ;;  %2296 = vmatprep.mubr.msk.bf16.mxu1 %vm439_vm0, %v2462_v19 }
  0xfe   : > { %v959_v21 = vpop.permute.xlu0 %958 }
  0xff   : > { %2119 = vmatpush3.bf16.msra.mxu0 %v959_v21  ;;  %1603 = vrot.lane.b32.xlu1 %v2607_v9, %s2515_s26  ;;  %v2461_v9 = vld [vmem:[%s3033_s1 + $0xa8] ss:$12 sps:$4 sm:$0xff]  }
 0x100   : > { %1601 = vrot.lane.b32.xlu0 %v2582_v4, %s2515_s26  ;;  %2138 = vmatprep.subr.bf16.mxu0 %v1168_v1  ;;  %v2466_v4 = vld [vmem:[%s3033_s1 + $0xc4] ss:$12 sps:$4 sm:$0xff]  }
 0x101   : > { %v1152_v20 = vpop.permute.xlu1 %1151  ;;  %v2476_v1 = vld [vmem:[%s3033_s1 + $0xf8] ss:$12 sps:$4 sm:$0xff]  }
 0x102   : > { %v1186_v45 = vpop.permute.xlu0 %1185  ;;  %1043 = vmatmul.mubr.bf16.vlgmr.msra.gmra.mrb[16].mxu0 %v2456_v44 }
 0x103   : > { %2290 = vmatprep.subr.bf16.mxu1 %v1186_v45  ;;  %2139 = vmatpush3.bf16.msra.mxu0 %v1152_v20 }
 0x104   : > { %2291 = vmatpush3.bf16.msra.mxu1 %v1186_v45  ;;  %1050 = vmatprep.mubr.bf16.mxu0 %v2459_v0 }
 0x105   : > { %v1188_v46 = vpop.permute.xlu1 %1187  ;;  %1739 = vperm.xlu0 %2408, %v1733_v24   ;;  %1744 = vperm.xlu1 %2409, %v1734_v25  }
 0x106   : > { %v1170_v47 = vpop.permute.xlu0 %1169  ;;  %2292 = vmatprep.subr.bf16.mxu1 %v1188_v46 }
 0x107   : > { %2140 = vmatprep.subr.bf16.mxu0 %v1170_v47  ;;  %v2477_v47 = vld [vmem:[%s3033_s1 + $0x110] ss:$12 sps:$4 sm:$0xff]  }
 0x108   : > { %2293 = vmatpush3.bf16.msra.mxu1 %v1188_v46 }
 0x109   : > { %v1172_v48 = vpop.permute.xlu1 %1171  ;;  %1754 = vperm.xlu0 %2408, %v1736_v3   ;;  %1749 = vperm.xlu1 %2409, %v1735_v28  }
 0x10a   : > { %v1154_v49 = vpop.permute.xlu0 %1153  ;;  %1051 = vmatmul.mubr.bf16.gmra.mrb[20].mxu0 %v2461_v9  ;;  %v2484_v9 = vld [vmem:[%s3033_s1 + $0x128] ss:$12 sps:$4 sm:$0xff]  }
 0x10b   : > { %2141 = vmatpush3.bf16.msra.mxu0 %v1154_v49  ;;  %1249 = vmatprep.mubr.bf16.mxu0 %v2466_v4 }
 0x10c   : > { %2142 = vmatprep.subr.bf16.mxu0 %v1172_v48 }
 0x10d   : > { %v1156_v50 = vpop.permute.xlu1 %1155 }
 0x10e   : > { %v1190_v51 = vpop.permute.xlu0 %1189 }
 0x10f   : > { %2294 = vmatprep.subr.bf16.mxu1 %v1190_v51  ;;  %2143 = vmatpush3.bf16.msra.mxu0 %v1156_v50 }
 0x110   : > { %2295 = vmatpush3.bf16.msra.mxu1 %v1190_v51 }
 0x111   : > { %v1375_v54 = vpop.permute.xlu1 %1374 }
 0x112   : > { %v1174_v55 = vpop.permute.xlu0 %1173  ;;  %2172 = vmatprep.subr.bf16.mxu1 %v1375_v54  ;;  %v2481_v54 = vld [vmem:[%s3033_s1 + $0x13c] ss:$12 sps:$4 sm:$0xff]  }
 0x113   : > { %2144 = vmatprep.subr.bf16.mxu0 %v1174_v55  ;;  %2297 = vmatmul.mubr.msk.bf16.vlgmr.msra.gmra.mrb[0].mxu1 %vm439_vm0, %v2463_v52 }
 0x114   : > { %1456 = vmatprep.mubr.bf16.mxu1 %v2472_v53  ;;  %v2478_v53 = vld [vmem:[%s3033_s1 + $0x120] ss:$12 sps:$4 sm:$0xff]  }
 0x115   : > { %v1359_v56 = vpop.permute.xlu1 %1358 }
 0x116   : > { %v1158_v57 = vpop.permute.xlu0 %1157  ;;  %2173 = vmatpush3.bf16.msra.mxu1 %v1359_v56 }
 0x117   : > { %2145 = vmatpush3.bf16.msra.mxu0 %v1158_v57  ;;  %v2483_v57 = vld [vmem:[%s3033_s1 + $0x138] ss:$12 sps:$4 sm:$0xff]  }
 0x119   : > { %v1377_v58 = vpop.permute.xlu1 %1376 }
 0x11a   : > { %v1176_v59 = vpop.permute.xlu0 %1175  ;;  %2174 = vmatprep.subr.bf16.mxu1 %v1377_v58  ;;  %v2485_v58 = vld [vmem:[%s3033_s1 + $0x140] ss:$12 sps:$4 sm:$0xff]  }
 0x11b   : > { %2146 = vmatprep.subr.bf16.mxu0 %v1176_v59 }
 0x11d   : > { %v1361_v60 = vpop.permute.xlu1 %1360 }
 0x11e   : > { %v1160_v61 = vpop.permute.xlu0 %1159  ;;  %2175 = vmatpush3.bf16.msra.mxu1 %v1361_v60 }
 0x11f   : > { %2147 = vmatpush3.bf16.msra.mxu0 %v1160_v61 }
 0x121   : > { %v1379_v62 = vpop.permute.xlu1 %1378 }
 0x122   : > { %v1178_v63 = vpop.permute.xlu0 %1177  ;;  %2176 = vmatprep.subr.bf16.mxu1 %v1379_v62 }
 0x123   : > { %2148 = vmatprep.subr.bf16.mxu0 %v1178_v63 }
 0x125   : > { %v1363_v13 = vpop.permute.xlu1 %1362 }
 0x126   : > { %v1162_v18 = vpop.permute.xlu0 %1161  ;;  %2177 = vmatpush3.bf16.msra.mxu1 %v1363_v13 }
 0x127   : > { %2149 = vmatpush3.bf16.msra.mxu0 %v1162_v18 }
 0x129   : > { %v1381_v22 = vpop.permute.xlu1 %1380 }
 0x12a   : > { %v1180_v23 = vpop.permute.xlu0 %1179  ;;  %2178 = vmatprep.subr.bf16.mxu1 %v1381_v22 }
 0x12b   : > { %2150 = vmatprep.subr.bf16.mxu0 %v1180_v23 }
 0x12d   : > { %v1365_v26 = vpop.permute.xlu1 %1364 }
 0x12e   : > { %v1164_v27 = vpop.permute.xlu0 %1163  ;;  %2179 = vmatpush3.bf16.msra.mxu1 %v1365_v26 }
 0x12f   : > { %2151 = vmatpush3.bf16.msra.mxu0 %v1164_v27 }
 0x131   : > { %v1383_v29 = vpop.permute.xlu1 %1382 }
 0x132   : > { %v1182_v5 = vpop.permute.xlu0 %1181  ;;  %2180 = vmatprep.subr.bf16.mxu1 %v1383_v29 }
 0x133   : > { %2152 = vmatprep.subr.bf16.mxu0 %v1182_v5 }
 0x135   : > { %v1367_v30 = vpop.permute.xlu1 %1366 }
 0x136   : > { %v1166_v31 = vpop.permute.xlu0 %1165  ;;  %2181 = vmatpush3.bf16.msra.mxu1 %v1367_v30 }
 0x137   : > { %2153 = vmatpush3.bf16.msra.mxu0 %v1166_v31 }
 0x139   : > { %v1582_v33 = vpop.permute.xlu1 %1581 }
 0x13a   : > { %v1385_v6 = vpop.permute.xlu0 %1384  ;;  %1250 = vmatmul.mubr.bf16.vlgmr.msra.gmra.mrb[24].mxu0 %v2464_v7  ;;  %2206 = vmatprep.subr.bf16.mxu0 %v1582_v33 }
 0x13b   : > { %2182 = vmatprep.subr.bf16.mxu1 %v1385_v6  ;;  %1257 = vmatprep.mubr.bf16.mxu0 %v2467_v32 }
 0x13d   : > { %v1566_v34 = vpop.permute.xlu1 %1565 }
 0x13e   : > { %v1369_v35 = vpop.permute.xlu0 %1368  ;;  %2207 = vmatpush3.bf16.msra.mxu0 %v1566_v34 }
 0x13f   : > { %2183 = vmatpush3.bf16.msra.mxu1 %v1369_v35 }
 0x141   : > { %v1584_v37 = vpop.permute.xlu1 %1583 }
 0x142   : > { %v1387_v11 = vpop.permute.xlu0 %1386  ;;  %1258 = vmatmul.mubr.bf16.gmra.mrb[28].mxu0 %v2469_v36  ;;  %2208 = vmatprep.subr.bf16.mxu0 %v1584_v37 }
 0x143   : > { %2184 = vmatprep.subr.bf16.mxu1 %v1387_v11  ;;  %1663 = vmatprep.mubr.bf16.mxu0 %v2480_v8 }
 0x145   : > { %v1568_v38 = vpop.permute.xlu1 %1567 }
 0x146   : > { %v1371_v39 = vpop.permute.xlu0 %1370  ;;  %2209 = vmatpush3.bf16.msra.mxu0 %v1568_v38 }
 0x147   : > { %2185 = vmatpush3.bf16.msra.mxu1 %v1371_v39 }
 0x149   : > { %v1586_v40 = vpop.permute.xlu1 %1585 }
 0x14a   : > { %v1389_v10 = vpop.permute.xlu0 %1388  ;;  %2210 = vmatprep.subr.bf16.mxu0 %v1586_v40 }
 0x14b   : > { %2186 = vmatprep.subr.bf16.mxu1 %v1389_v10 }
 0x14d   : > { %v1570_v41 = vpop.permute.xlu1 %1569 }
 0x14e   : > { %v1373_v12 = vpop.permute.xlu0 %1372  ;;  %2211 = vmatpush3.bf16.msra.mxu0 %v1570_v41 }
 0x14f   : > { %2187 = vmatpush3.bf16.msra.mxu1 %v1373_v12 }
 0x151   : > { %v1588_v42 = vpop.permute.xlu1 %1587 }
 0x152   : > { %v1391_v15 = vpop.permute.xlu0 %1390  ;;  %1457 = vmatmul.mubr.bf16.vlgmr.msra.gmra.mrb[12].mxu1 %v2470_v14  ;;  %2212 = vmatprep.subr.bf16.mxu0 %v1588_v42 }
 0x153   : > { %2300 = vmatprep.subr.bf16.mxu1 %v1391_v15  ;;  %1464 = vmatprep.mubr.bf16.mxu1 %v2473_v16 }
 0x154   : > { %2301 = vmatpush3.bf16.msra.mxu1 %v1391_v15 }
 0x155   : > { %v1393_v17 = vpop.permute.xlu1 %1392 }
 0x156   : > { %v1572_v19 = vpop.permute.xlu0 %1571  ;;  %2302 = vmatprep.subr.bf16.mxu1 %v1393_v17 }
 0x157   : > { %2213 = vmatpush3.bf16.msra.mxu0 %v1572_v19 }
 0x158   : > { %2303 = vmatpush3.bf16.msra.mxu1 %v1393_v17 }
 0x159   : > { %v1574_v21 = vpop.permute.xlu1 %1573 }
 0x15a   : > { %v1590_v44 = vpop.permute.xlu0 %1589  ;;  %1465 = vmatmul.mubr.bf16.gmra.mrb[16].mxu1 %v2475_v43 }
 0x15b   : > { %2214 = vmatprep.subr.bf16.mxu0 %v1590_v44  ;;  %2308 = vmatprep.mubr.msk.bf16.mxu1 %vm439_vm0, %v2476_v1 }
 0x15c   : > { %2215 = vmatpush3.bf16.msra.mxu0 %v1574_v21 }
 0x15d   : > { %v1592_v0 = vpop.permute.xlu1 %1591 }
 0x15e   : > { %v1395_v20 = vpop.permute.xlu0 %1394  ;;  %2216 = vmatprep.subr.bf16.mxu0 %v1592_v0 }
 0x15f   : > { %2304 = vmatprep.subr.bf16.mxu1 %v1395_v20 }
 0x160   : > { %2305 = vmatpush3.bf16.msra.mxu1 %v1395_v20 }
 0x161   : > { %v1397_v45 = vpop.permute.xlu1 %1396 }
 0x162   : > { %v1576_v46 = vpop.permute.xlu0 %1575  ;;  %2306 = vmatprep.subr.bf16.mxu1 %v1397_v45 }
 0x163   : > { %2217 = vmatpush3.bf16.msra.mxu0 %v1576_v46 }
 0x164   : > { %2307 = vmatpush3.bf16.msra.mxu1 %v1397_v45 }
 0x165   : > { %v1578_v4 = vpop.permute.xlu1 %1577 }
 0x166   : > { %v1594_v48 = vpop.permute.xlu0 %1593 }
 0x167   : > { %2218 = vmatprep.subr.bf16.mxu0 %v1594_v48  ;;  %2309 = vmatmul.mubr.msk.bf16.vlgmr.msra.gmra.mrb[0].mxu1 %vm439_vm0, %v2477_v47 }
 0x168   : > { %2219 = vmatpush3.bf16.msra.mxu0 %v1578_v4  ;;  %2320 = vmatprep.mubr.msk.bf16.mxu1 %vm439_vm0, %v2484_v9 }
 0x169   : > { %v1598_v49 = vpop.permute.xlu1 %1597 }
 0x16a   : > { %v1596_v50 = vpop.permute.xlu0 %1595  ;;  %2312 = vmatprep.subr.bf16.mxu1 %v1598_v49 }
 0x16b   : > { %2220 = vmatprep.subr.bf16.mxu0 %v1596_v50  ;;  %2313 = vmatpush3.bf16.msra.mxu1 %v1598_v49 }
 0x16d   : > { %v1600_v51 = vpop.permute.xlu1 %1599 }
 0x16e   : > { %v1580_v52 = vpop.permute.xlu0 %1579  ;;  %2314 = vmatprep.subr.bf16.mxu1 %v1600_v51 }
 0x16f   : > { %2221 = vmatpush3.bf16.msra.mxu0 %v1580_v52  ;;  %2315 = vmatpush3.bf16.msra.mxu1 %v1600_v51 }
 0x171   : > { %v1604_v56 = vpop.permute.xlu1 %1603 }
 0x172   : > { %v1602_v55 = vpop.permute.xlu0 %1601  ;;  %1664 = vmatmul.mubr.bf16.vlgmr.msra.gmra.mrb[32].mxu0 %v2478_v53 }
 0x173   : > { %2316 = vmatprep.subr.bf16.mxu1 %v1602_v55  ;;  %1671 = vmatprep.mubr.bf16.mxu0 %v2481_v54 }
 0x174   : > { %2317 = vmatpush3.bf16.msra.mxu1 %v1602_v55 }
 0x175   : > { %2318 = vmatprep.subr.bf16.mxu1 %v1604_v56 }
 0x178   : > { %2319 = vmatpush3.bf16.msra.mxu1 %v1604_v56 }
 0x17a   : > { %1672 = vmatmul.mubr.bf16.gmra.mrb[36].mxu0 %v2483_v57 }
 0x17b   : > { %2321 = vmatmul.mubr.msk.bf16.vlgmr.msra.gmra.mrb[0].mxu1 %vm439_vm0, %v2485_v58 }
 0x181   : > { %v2018_v59 = vpop.f32.mrb[0].mxu0 }
 0x182   : > { %v2019_v60 = vpop.f32.mrb[1].mxu0 }
 0x183   : > { %v2020_v61 = vadd.f32 %v2019_v60, %v2018_v59  ;;  %v2021_v62 = vpop.f32.mrb[2].mxu0 }
 0x184   : > { %v2022_v63 = vpop.f32.mrb[3].mxu0 }
 0x185   : > { %v2023_v13 = vadd.f32 %v2022_v63, %v2021_v62 }
 0x189   : > { %v2024_v18 = vpop.f32.mrb[4].mxu0 }
 0x18a   : > { %v2025_v22 = vpop.f32.mrb[5].mxu0 }
 0x18b   : > { %v2026_v23 = vadd.f32 %v2025_v22, %v2024_v18  ;;  %v2027_v24 = vpop.f32.mrb[6].mxu0 }
 0x18c   : > { %v2028_v25 = vpop.f32.mrb[7].mxu0 }
 0x18d   : > { %v2029_v26 = vadd.f32 %v2028_v25, %v2027_v24 }
 0x18e   : > { %v2052_v2 = vpop.f32.mrb[4].mxu1 }
 0x18f   : > { %v2053_v27 = vpop.f32.mrb[5].mxu1 }
 0x190   : > { %v2054_v3 = vadd.f32 %v2053_v27, %v2052_v2  ;;  %v2055_v28 = vpop.f32.mrb[6].mxu1 }
 0x191   : > { %v2056_v29 = vpop.f32.mrb[7].mxu1 }
 0x192   : > { %v2331_v5 = vadd.f32 %v2054_v3, %v2020_v61  ;;  %v2057_v30 = vadd.f32 %v2056_v29, %v2055_v28 }
 0x194   : > { %v2345_v31 = vadd.f32 %v2057_v30, %v2023_v13 }
 0x196   : > { %v2058_v7 = vpop.f32.mrb[8].mxu1 }
 0x197   : > { %v2059_v32 = vpop.f32.mrb[9].mxu1 }
 0x198   : > { %v2060_v33 = vadd.f32 %v2059_v32, %v2058_v7  ;;  %v2061_v6 = vpop.f32.mrb[10].mxu1 }
 0x199   : > { %v2062_v34 = vpop.f32.mrb[11].mxu1 }
 0x19a   : > { %v2324_v35 = vadd.f32 %v2060_v33, %v2026_v23  ;;  %v2063_v36 = vadd.f32 %v2062_v34, %v2061_v6 }
 0x19c   : > { %v2338_v8 = vadd.f32 %v2063_v36, %v2029_v26 }
 0x1a4   : > { %v2086_v37 = vpop.f32.mrb[8].mxu0 }
 0x1a5   : > { %v2087_v11 = vpop.f32.mrb[9].mxu0 }
 0x1a6   : > { %v2088_v38 = vadd.f32 %v2087_v11, %v2086_v37  ;;  %v2089_v39 = vpop.f32.mrb[10].mxu0 }
 0x1a7   : > { %v2090_v40 = vpop.f32.mrb[11].mxu0 }
 0x1a8   : > { %v2332_v10 = vadd.f32 %v2331_v5, %v2088_v38  ;;  %v2091_v41 = vadd.f32 %v2090_v40, %v2089_v39 }
 0x1aa   : > { %v2346_v12 = vadd.f32 %v2345_v31, %v2091_v41 }
 0x1ac   : > { %v2092_v14 = vpop.f32.mrb[12].mxu0 }
 0x1ad   : > { %v2093_v16 = vpop.f32.mrb[13].mxu0 }
 0x1ae   : > { %v2094_v42 = vadd.f32 %v2093_v16, %v2092_v14  ;;  %v2095_v15 = vpop.f32.mrb[14].mxu0  ;;  %v1740_v14 = vpop.permute.xlu0 %1739 }
 0x1af   : > { %v2096_v17 = vpop.f32.mrb[15].mxu0 }
 0x1b0   : > { %v2097_v19 = vadd.f32 %v2096_v17, %v2095_v15  ;;  %v2325_v43 = vadd.f32 %v2324_v35, %v2094_v42  ;;  %v1745_v42 = vpop.permute.xlu1 %1744 }
 0x1b2   : > { %v2339_v1 = vadd.f32 %v2338_v8, %v2097_v19 }
 0x1d5   : > { %v2120_v21 = vpop.f32.mrb[16].mxu0 }
 0x1d6   : > { %v2121_v44 = vpop.f32.mrb[17].mxu0 }
 0x1d7   : > { %v2122_v0 = vadd.f32 %v2121_v44, %v2120_v21  ;;  %v2123_v20 = vpop.f32.mrb[18].mxu0 }
 0x1d8   : > { %v2124_v45 = vpop.f32.mrb[19].mxu0 }
 0x1d9   : > { %v2333_v46 = vadd.f32 %v2332_v10, %v2122_v0  ;;  %v2125_v47 = vadd.f32 %v2124_v45, %v2123_v20 }
 0x1db   : > { %v2347_v9 = vadd.f32 %v2346_v12, %v2125_v47 }
 0x1dd   : > { %v2126_v4 = vpop.f32.mrb[20].mxu0 }
 0x1de   : > { %v2127_v48 = vpop.f32.mrb[21].mxu0 }
 0x1df   : > { %v2128_v49 = vadd.f32 %v2127_v48, %v2126_v4  ;;  %v2129_v50 = vpop.f32.mrb[22].mxu0 }
 0x1e0   : > { %v2130_v51 = vpop.f32.mrb[23].mxu0 }
 0x1e1   : > { %v2326_v52 = vadd.f32 %v2325_v43, %v2128_v49  ;;  %v2131_v53 = vadd.f32 %v2130_v51, %v2129_v50  ;;  %v1750_v51 = vpop.permute.xlu1 %1749 }
 0x1e3   : > { %v2340_v54 = vadd.f32 %v2339_v1, %v2131_v53 }
 0x20d   : > { %v2154_v55 = vpop.f32.mrb[24].mxu0 }
 0x20e   : > { %v2155_v56 = vpop.f32.mrb[25].mxu0 }
 0x20f   : > { %v2156_v57 = vadd.f32 %v2155_v56, %v2154_v55  ;;  %v2157_v58 = vpop.f32.mrb[26].mxu0  ;;  %v1755_v55 = vpop.permute.xlu0 %1754 }
 0x210   : > { %v2158_v59 = vpop.f32.mrb[27].mxu0 }
 0x211   : > { %v2334_v60 = vadd.f32 %v2333_v46, %v2156_v57  ;;  %v2159_v61 = vadd.f32 %v2158_v59, %v2157_v58 }
 0x213   : > { %v2348_v62 = vadd.f32 %v2347_v9, %v2159_v61 }
 0x215   : > { %v2160_v63 = vpop.f32.mrb[28].mxu0 }
 0x216   : > { %v2161_v13 = vpop.f32.mrb[29].mxu0 }
 0x217   : > { %v2162_v18 = vadd.f32 %v2161_v13, %v2160_v63  ;;  %v2163_v22 = vpop.f32.mrb[30].mxu0 }
 0x218   : > { %v2164_v23 = vpop.f32.mrb[31].mxu0 }
 0x219   : > { %v2327_v24 = vadd.f32 %v2326_v52, %v2162_v18  ;;  %v2165_v25 = vadd.f32 %v2164_v23, %v2163_v22 }
 0x21b   : > { %v2341_v2 = vadd.f32 %v2340_v54, %v2165_v25 }
 0x225   : > { %v2188_v26 = vpop.f32.mrb[12].mxu1 }
 0x226   : > { %v2189_v27 = vpop.f32.mrb[13].mxu1 }
 0x227   : > { %v2190_v3 = vadd.f32 %v2189_v27, %v2188_v26  ;;  %v2191_v28 = vpop.f32.mrb[14].mxu1 }
 0x228   : > { %v2192_v29 = vpop.f32.mrb[15].mxu1 }
 0x229   : > { %v2335_v5 = vadd.f32 %v2334_v60, %v2190_v3  ;;  %v2193_v30 = vadd.f32 %v2192_v29, %v2191_v28 }
 0x22b   : > { %v2349_v31 = vadd.f32 %v2348_v62, %v2193_v30 }
 0x22d   : > { %v2194_v7 = vpop.f32.mrb[16].mxu1 }
 0x22e   : > { %v2195_v32 = vpop.f32.mrb[17].mxu1 }
 0x22f   : > { %v2196_v33 = vadd.f32 %v2195_v32, %v2194_v7  ;;  %v2197_v6 = vpop.f32.mrb[18].mxu1 }
 0x230   : > { %v2198_v34 = vpop.f32.mrb[19].mxu1 }
 0x231   : > { %v2328_v35 = vadd.f32 %v2327_v24, %v2196_v33  ;;  %v2199_v36 = vadd.f32 %v2198_v34, %v2197_v6 }
 0x233   : > { %v2342_v8 = vadd.f32 %v2341_v2, %v2199_v36 }
 0x245   : > { %v2222_v37 = vpop.f32.mrb[32].mxu0 }
 0x246   : > { %v2223_v11 = vpop.f32.mrb[33].mxu0 }
 0x247   : > { %v2224_v38 = vadd.f32 %v2223_v11, %v2222_v37  ;;  %v2225_v39 = vpop.f32.mrb[34].mxu0 }
 0x248   : > { %v2226_v40 = vpop.f32.mrb[35].mxu0 }
 0x249   : > { %v2227_v10 = vadd.f32 %v2226_v40, %v2225_v39  ;;  %v2336_v41 = vadd.f32 %v2335_v5, %v2224_v38 }
 0x24b   : > { %v2350_v12 = vadd.f32 %v2349_v31, %v2227_v10 }
 0x24d   : > { %v2228_v16 = vpop.f32.mrb[36].mxu0 }
 0x24e   : > { %v2229_v15 = vpop.f32.mrb[37].mxu0  ;;  %v2322_v17 = vpop.f32.mrb[0].mxu1 }
 0x24f   : > { %v2230_v19 = vadd.f32 %v2229_v15, %v2228_v16  ;;  %v2231_v43 = vpop.f32.mrb[38].mxu0  ;;  %v1714_v1 = vpop.f32.mrb[1].mxu1 }
 0x250   : > { %v2337_v21 = vadd.f32 %v2336_v41, %v1714_v1  ;;  %v2232_v44 = vpop.f32.mrb[39].mxu0  ;;  %v2323_v0 = vpop.f32.mrb[2].mxu1 }
 0x251   : > { %v2329_v20 = vadd.f32 %v2328_v35, %v2230_v19  ;;  %v2233_v45 = vadd.f32 %v2232_v44, %v2231_v43  ;;  %v1717_v46 = vpop.f32.mrb[3].mxu1 }
 0x252   : > { %v1757_v47 = vadd.f32 %v2337_v21, %v1740_v14  ;;  %v2351_v9 = vadd.f32 %v2350_v12, %v1717_v46 }
 0x253   : > { %v2330_v4 = vadd.f32 %v2329_v20, %v2322_v17  ;;  %v2343_v48 = vadd.f32 %v2342_v8, %v2233_v45 }
 0x254   : > { %v1998_v49 = vpack.c.bf16 %v1757_v47, %v1757_v47  ;;  %v1758_v50 = vadd.f32 %v2351_v9, %v1745_v42 }
 0x255   : > { %v2344_v52 = vadd.f32 %v2343_v48, %v2323_v0  ;;  %v1759_v53 = vadd.f32 %v2330_v4, %v1750_v51 }
 0x256   : > { %1778 = vst.msk [vmem:[%s190_s30] sm:$0xf] %vm1777_vm1, %v1998_v49  ;;  %v1999_v54 = vpack.c.bf16 %v1758_v50, %v1758_v50 }
 0x257   : > { %v1760_v56 = vadd.f32 %v2344_v52, %v1755_v55  ;;  %v2000_v57 = vpack.c.bf16 %v1759_v53, %v1759_v53 }
 0x258   : > { %1779 = vst.msk [vmem:[%s190_s30 + $0x4] sm:$0xf] %vm1777_vm1, %v1999_v54 }
 0x259   : > { %v2001_v58 = vpack.c.bf16 %v1760_v56, %v1760_v56  ;;  %1780 = vst.msk [vmem:[%s190_s30 + $0x8] sm:$0xf] %vm1777_vm1, %v2000_v57 }
 0x25b   : > { %1781 = vst.msk [vmem:[%s190_s30 + $0xc] sm:$0xf] %vm1777_vm1, %v2001_v58 }
 0x25c PF: > { %s13_s14 = sadd.s32 1, %s2508_s14   ;;  %s3036_s12 = smov %s2504_s13 }
 0x25d   : > { %p10_p5 = scmp.ge.s32.totalorder %s13_s14, 4   ;;  %s3037_s13 = smov %s3039_s15 }
 0x25f   :  { %12 = sbr.rel (!%p10_p5) target bundleno = 2 (0x2), region = 68 }

// kernel: _lambda_.20
= control target key start
LH: loop header
LB: loop body
LE: loop exit
PB: predicated region body
PF: predicated region fallthrough
CT: control target
= control target key end

     0   :  { %s928_s18 = smov 0   ;;  %s930_s19 = smov 0   ;;  %s1034_s0 = inlined_call_operand.vmem [shape: bf16[2,16,28], index: 0, kind: input, shape index: {}]   ;;  %s1035_s1 = inlined_call_operand.vmem [shape: bf16[3,16,16], index: 1, kind: input, shape index: {}]   ;;  %s1036_s2 = inlined_call_operand.vmem [shape: f32[16,1], index: 2, kind: input, shape index: {}]   ;;  %s1037_s3 = inlined_call_operand.vmem [shape: bf16[3,16,16], index: 3, kind: input, shape index: {}]   ;;  %s1038_s4 = inlined_call_operand.vmem [shape: f32[16,1], index: 4, kind: input, shape index: {}]   ;;  %s1039_s5 = inlined_call_operand.vmem [shape: bf16[2,16,16], index: 5, kind: output, shape index: {}]  }
   0x1   :  { %s932_s20 = smov 0  }
   0x2 LB: > { %s27_s21 = sadd.s32 1, %s884_s19  ;;  %p731_p0 = scmp.ge.s32.totalorder %s888_s20, 1  ;;  %s888_s20 = sphi %s932_s20, %s15_s20   ;;  %s884_s19 = sphi %s930_s19, %s1041_s19   ;;  %s880_s18 = sphi %s928_s18, %s1040_s18  }
   0x3   : > { %p29_p1 = scmp.ge.s32.totalorder %s27_s21, 2  ;;  %p201_p2 = scmp.lt.s32.totalorder %s888_s20, 3 }
   0x5   : > { %s1043_s21 = smov (%p29_p1, %s27_s21), 0  ;;  %p202_p3 = pnand %p731_p0, %p201_p2 }
   0x6   : > { %p232_p4 = scmp.lt.s32.totalorder (!%p202_p3), %s880_s18, 1  ;;  %v890_v0 = vmov (!%p202_p3), 0.0   ;;  %vm891_vm0 = vmmov (!%p202_p3), 0   ;;  %v422_v9 = vld [vmem:[%s1036_s2] sm:$0xff] (!%p202_p3)  ;;  %v892_v11 = vmov (!%p202_p3), 0   ;;  %s893_s30 = smov (!%p202_p3), 123   ;;  %v442_v22 = vlaneseq (!%p202_p3) }
   0x7   : > { %205 = sbr.rel (%p202_p3) target bundleno = 724 (0x2d4), region = 40  ;;  %783 = vmatprep.subr.bf16.mxu0 (!%p202_p3), %v890_v0  ;;  %789 = vmatprep.subr.bf16.mxu1 (!%p202_p3), %v890_v0  ;;  %v859_v10 = vld [vmem:[%s1035_s1] sm:$0xff] (!%p202_p3)   ;;  %vm271_vm3 = vcmask (!%p202_p3), 130048   ;;  %v423_v12 = vld [vmem:[%s1036_s2 + $0x8] sm:$0xff] (!%p202_p3)  ;;  %s894_s8 = smov (!%p202_p3), 118   ;;  %v860_v16 = vld [vmem:[%s1035_s1 + $0x10] sm:$0xff] (!%p202_p3)  }
   0x8   : > { %785 = vmatprep.mubr.msk.bf16.mxu0 (!%p202_p3), %vm891_vm0, %v890_v0  ;;  %791 = vmatprep.mubr.msk.bf16.mxu1 (!%p202_p3), %vm891_vm0, %v890_v0  ;;  %v858_v14 = vld [vmem:[%s1035_s1 + $0x8] sm:$0xff] (!%p202_p3)   ;;  %v443_v28 = vand.u32 (!%p202_p3), 127, %v442_v22  ;;  %v862_v48 = vld [vmem:[%s1037_s3] sm:$0xff] (!%p202_p3)   ;;  %s895_s15 = smov (!%p202_p3), 126   ;;  %s896_s16 = smov (!%p202_p3), 127   ;;  %v863_v55 = vld [vmem:[%s1037_s3 + $0x10] sm:$0xff] (!%p202_p3)  }
   0x9   : > { %851 = vset.pattern.permute.xlu1 (!%p202_p3), %v892_v11  ;;  %852 = vset.pattern.permute.xlu0 (!%p202_p3), %v892_v11  ;;  %v616_v49 = vld [vmem:[%s1038_s4 + $0x8] sm:$0xff] (!%p202_p3)  ;;  %v615_v50 = vld [vmem:[%s1038_s4] sm:$0xff] (!%p202_p3)  ;;  %s897_s26 = smov (!%p202_p3), 122   ;;  %vm647_vm10 = vcmask (!%p202_p3), 125952  }
   0xa   : > { %426 = vperm.xlu1 (!%p202_p3), %851, %v422_v9   ;;  %v444_v31 = vadd.s32 (!%p202_p3), 4294967295, %v443_v28  ;;  %v861_v53 = vld [vmem:[%s1037_s3 + $0x8] sm:$0xff] (!%p202_p3)  }
   0xc   : > { %vm445_vm4 = vcmp.ge.s32.totalorder (!%p202_p3), %v444_v31, 0  ;;  %vm446_vm5 = vcmp.lt.s32.totalorder (!%p202_p3), %v444_v31, 16 }
   0xd   : > { %vm447_vm8 = vmand (!%p202_p3), %vm445_vm4, %vm446_vm5 }
   0xe   : > { %s1045_s18 = smov (!%p232_p4, %s880_s18), 1  ;;  %431 = vperm.xlu1 %851, %v423_v12   ;;  %vm751_vm9 = vmpackc.low %vm447_vm8, %vm447_vm8 }
   0xf   : > { %s763_s22 = sshll.u32 %s1045_s18, 3 }
  0x10   : > { %s236_s25 = scalar_lea.vmem %s1034_s0, %s763_s22 }
  0x11   : > { %v768_v1 = vld [vmem:[%s236_s25] sm:$0xff]  }
  0x12   : > { %v960_v2 = vunpack.c.l.bf16 %v768_v1  ;;  %v962_v3 = vunpack.c.h.bf16 %v768_v1 }
  0x14   : > { %vm250_vm1 = vcmp.ge.f32.partialorder %v960_v2, 0.0  ;;  %vm251_vm2 = vcmp.ge.f32.partialorder %v962_v3, 0.0  ;;  %v252_v4 = vmul.f32 0.1, %v960_v2  ;;  %v253_v5 = vmul.f32 0.1, %v962_v3 }
  0x15   : > { %v853_v51 = vpack.i.bf16 %v962_v3, %v960_v2 }
  0x16   : > { %v254_v6 = vsel %vm250_vm1, %v960_v2, %v252_v4  ;;  %v255_v7 = vsel %vm251_vm2, %v962_v3, %v253_v5 }
  0x17   : > { %v256_v8 = vpack.c.bf16 %v255_v7, %v254_v6 }
  0x19   : > { %268 = vrot.lane.b32.xlu0 %v256_v8, %s893_s30  ;;  %790 = vmatpush3.bf16.msra.mxu1 %v256_v8 }
  0x1a   : > { %801 = vmatprep.subr.bf16.mxu1 %v890_v0 }
  0x1c   : > { %792 = vmatmul.mubr.msk.bf16.vlgmr.msra.gmra.mrb[0].mxu1 %vm271_vm3, %v859_v10 }
  0x1d   : > { %373 = vrot.lane.b32.xlu0 %v256_v8, %s894_s8  ;;  %803 = vmatprep.mubr.msk.bf16.mxu1 %vm891_vm0, %v890_v0  ;;  %s244_s8 = scalar_lea.vmem %s1039_s5, %s763_s22 }
  0x89   : > { %v427_v29 = vpop.permute.xlu1 %426 }
  0x8b   : > { %v269_v13 = vpop.permute.xlu0 %268 }
  0x8c   : > { %784 = vmatpush3.bf16.msra.mxu0 %v269_v13 }
  0x8d   : > { %795 = vmatprep.subr.bf16.mxu0 %v890_v0  ;;  %v432_v38 = vpop.permute.xlu1 %431 }
  0x8f   : > { %786 = vmatmul.mubr.msk.bf16.vlgmr.msra.gmra.mrb[0].mxu0 %vm271_vm3, %v858_v14  ;;  %v374_v15 = vpop.permute.xlu0 %373 }
  0x90   : > { %796 = vmatpush3.bf16.msra.mxu0 %v374_v15  ;;  %797 = vmatprep.mubr.msk.bf16.mxu0 %vm891_vm0, %v890_v0 }
  0x91   : > { %807 = vmatprep.subr.bf16.mxu0 %v890_v0 }
  0x97   : > { %798 = vmatmul.mubr.msk.bf16.vlgmr.msra.gmra.mrb[4].mxu0 %vm271_vm3, %v860_v16 }
  0x98   : > { %809 = vmatprep.mubr.msk.bf16.mxu0 %vm891_vm0, %v890_v0 }
  0xef   : > { %v358_v17 = vpop.f32.mrb[0].mxu1 }
  0xf0   : > { %v793_v18 = vpop.f32.mrb[1].mxu1 }
  0xf1   : > { %v361_v19 = vpop.f32.mrb[2].mxu1 }
  0xf2   : > { %v794_v20 = vpop.f32.mrb[3].mxu1 }
 0x162   : > { %v309_v21 = vpop.f32.mrb[0].mxu0 }
 0x163   : > { %v359_v23 = vadd.f32 %v358_v17, %v309_v21  ;;  %v787_v24 = vpop.f32.mrb[1].mxu0 }
 0x164   : > { %v312_v25 = vpop.f32.mrb[2].mxu0 }
 0x165   : > { %v362_v26 = vadd.f32 %v361_v19, %v312_v25  ;;  %v788_v27 = vpop.f32.mrb[3].mxu0 }
 0x16a   : > { %v413_v30 = vpop.f32.mrb[4].mxu0 }
 0x16b   : > { %v420_v32 = vadd.f32 %v413_v30, %v359_v23  ;;  %v799_v33 = vpop.f32.mrb[5].mxu0 }
 0x16c   : > { %v416_v34 = vpop.f32.mrb[6].mxu0 }
 0x16d   : > { %v434_v35 = vadd.f32 %v427_v29, %v420_v32  ;;  %v421_v36 = vadd.f32 %v416_v34, %v362_v26  ;;  %v800_v37 = vpop.f32.mrb[7].mxu0 }
 0x16f   : > { %vm436_vm6 = vcmp.ge.f32.partialorder %v434_v35, 0.0  ;;  %v438_v39 = vmul.f32 0.1, %v434_v35  ;;  %v435_v40 = vadd.f32 %v432_v38, %v421_v36 }
 0x171   : > { %v440_v41 = vsel %vm436_vm6, %v434_v35, %v438_v39  ;;  %vm437_vm7 = vcmp.ge.f32.partialorder %v435_v40, 0.0  ;;  %v439_v42 = vmul.f32 0.1, %v435_v40 }
 0x172   : > { %v448_v45 = vsel %vm447_vm8, %v440_v41, 0.0 }
 0x173   : > { %v441_v43 = vsel %vm437_vm7, %v435_v40, %v439_v42 }
 0x174   : > { %v752_v44 = vpack.c.bf16 %v441_v43, %v440_v41  ;;  %v449_v46 = vsel %vm447_vm8, %v441_v43, 0.0 }
 0x175   : > { %v450_v47 = vpack.c.bf16 %v449_v46, %v448_v45 }
 0x176   : > { %808 = vmatpush3.bf16.msk.msra.mxu0 %vm751_vm9, %v752_v44 }
 0x177   : > { %566 = vrot.lane.b32.xlu1 %v450_v47, %s895_s15  ;;  %462 = vrot.lane.b32.xlu0 %v450_v47, %s896_s16 }
 0x179   : > { %810 = vmatmul.mubr.msk.bf16.vlgmr.msra.gmra.mrb[8].mxu0 %vm271_vm3, %v862_v48 }
 0x17b   : > { %624 = vperm.xlu1 %851, %v616_v49   ;;  %619 = vperm.xlu0 %852, %v615_v50  }
 0x17f   : > { %854 = vrot.lane.b32.xlu1 %v853_v51, %s897_s26 }
 0x1e9   : > { %v463_v52 = vpop.permute.xlu0 %462  ;;  %v567_v54 = vpop.permute.xlu1 %566 }
 0x1ea   : > { %802 = vmatpush3.bf16.msra.mxu1 %v463_v52 }
 0x1eb   : > { %813 = vmatprep.subr.bf16.mxu1 %v890_v0 }
 0x1ed   : > { %804 = vmatmul.mubr.msk.bf16.vlgmr.msra.gmra.mrb[4].mxu1 %vm271_vm3, %v861_v53 }
 0x1ee   : > { %814 = vmatpush3.bf16.msra.mxu1 %v567_v54  ;;  %815 = vmatprep.mubr.msk.bf16.mxu1 %vm891_vm0, %v890_v0 }
 0x1f5   : > { %816 = vmatmul.mubr.msk.bf16.vlgmr.msra.gmra.mrb[8].mxu1 %vm271_vm3, %v863_v55 }
 0x1fa   : > { %v625_v63 = vpop.permute.xlu1 %624  ;;  %v620_v5 = vpop.permute.xlu0 %619 }
 0x1fe   : > { %v855_v4 = vpop.permute.xlu1 %854 }
 0x24c   : > { %v551_v56 = vpop.f32.mrb[8].mxu0 }
 0x24d   : > { %v811_v57 = vpop.f32.mrb[9].mxu0 }
 0x24e   : > { %v554_v58 = vpop.f32.mrb[10].mxu0 }
 0x24f   : > { %v812_v59 = vpop.f32.mrb[11].mxu0 }
 0x2c0   : > { %v502_v60 = vpop.f32.mrb[4].mxu1 }
 0x2c1   : > { %v805_v61 = vpop.f32.mrb[5].mxu1  ;;  %v552_v62 = vadd.f32 %v551_v56, %v502_v60 }
 0x2c2   : > { %v505_v1 = vpop.f32.mrb[6].mxu1 }
 0x2c3   : > { %v806_v2 = vpop.f32.mrb[7].mxu1  ;;  %v555_v3 = vadd.f32 %v554_v58, %v505_v1 }
 0x2c8   : > { %v606_v0 = vpop.f32.mrb[8].mxu1 }
 0x2c9   : > { %v613_v6 = vadd.f32 %v606_v0, %v552_v62  ;;  %v817_v7 = vpop.f32.mrb[9].mxu1 }
 0x2ca   : > { %v609_v8 = vpop.f32.mrb[10].mxu1 }
 0x2cb   : > { %v627_v9 = vadd.f32 %v620_v5, %v613_v6  ;;  %v614_v10 = vadd.f32 %v609_v8, %v555_v3  ;;  %v818_v11 = vpop.f32.mrb[11].mxu1 }
 0x2cd   : > { %v864_v12 = vadd.low.f32.bf16 %v627_v9, %v855_v4  ;;  %v628_v13 = vadd.f32 %v625_v63, %v614_v10 }
 0x2cf   : > { %v765_v14 = vpack.c.bf16 %v864_v12, %v864_v12  ;;  %v865_v15 = vadd.high.f32.bf16 %v628_v13, %v855_v4 }
 0x2d1   : > { %648 = vst.msk [vmem:[%s244_s8] sm:$0xf] %vm647_vm10, %v765_v14  ;;  %v766_v16 = vpack.c.bf16 %v865_v15, %v865_v15 }
 0x2d3   : > { %649 = vst.msk [vmem:[%s244_s8 + $0x4] sm:$0xf] %vm647_vm10, %v766_v16 }
 0x2d4 PF: > { %s15_s20 = sadd.s32 1, %s888_s20   ;;  %s1040_s18 = smov %s884_s19 }
 0x2d5   : > { %p12_p5 = scmp.ge.s32.totalorder %s15_s20, 4   ;;  %s1041_s19 = smov %s1043_s21 }
 0x2d7   :  { %14 = sbr.rel (!%p12_p5) target bundleno = 2 (0x2), region = 74 }

// kernel: _lambda_.23
= control target key start
LH: loop header
LB: loop body
LE: loop exit
PB: predicated region body
PF: predicated region fallthrough
CT: control target
= control target key end

     0   :  { %s1312_s21 = smov 0   ;;  %s1314_s22 = smov 0   ;;  %s1447_s0 = inlined_call_operand.vmem [shape: bf16[2,16,40], index: 0, kind: input, shape index: {}]   ;;  %s1448_s1 = inlined_call_operand.vmem [shape: bf16[5,16,16], index: 1, kind: input, shape index: {}]   ;;  %s1449_s2 = inlined_call_operand.vmem [shape: f32[16,1], index: 2, kind: input, shape index: {}]   ;;  %s1450_s3 = inlined_call_operand.vmem [shape: bf16[5,16,16], index: 3, kind: input, shape index: {}]   ;;  %s1451_s4 = inlined_call_operand.vmem [shape: f32[16,1], index: 4, kind: input, shape index: {}]   ;;  %s1452_s5 = inlined_call_operand.vmem [shape: bf16[2,16,16], index: 5, kind: input, shape index: {}]   ;;  %s1453_s6 = inlined_call_operand.vmem [shape: bf16[2,16,16], index: 6, kind: output, shape index: {}]  }
   0x1   :  { %s1316_s23 = smov 0  }
   0x2 LB: > { %s28_s24 = sadd.s32 1, %s1259_s22  ;;  %p1043_p0 = scmp.ge.s32.totalorder %s1263_s23, 1  ;;  %s1263_s23 = sphi %s1316_s23, %s16_s23   ;;  %s1259_s22 = sphi %s1314_s22, %s1455_s22   ;;  %s1255_s21 = sphi %s1312_s21, %s1454_s21  }
   0x3   : > { %p30_p1 = scmp.ge.s32.totalorder %s28_s24, 2  ;;  %p241_p2 = scmp.lt.s32.totalorder %s1263_s23, 3 }
   0x5   : > { %s1457_s24 = smov (%p30_p1, %s28_s24), 0  ;;  %p242_p3 = pnand %p1043_p0, %p241_p2 }
   0x6   : > { %p282_p4 = scmp.lt.s32.totalorder (!%p242_p3), %s1255_s21, 1  ;;  %v1265_v0 = vmov (!%p242_p3), 0.0   ;;  %vm1266_vm0 = vmmov (!%p242_p3), 0   ;;  %s1267_s29 = smov (!%p242_p3), 123   ;;  %v1230_v9 = vld [vmem:[%s1448_s1] sm:$0xff] (!%p242_p3)   ;;  %vm329_vm3 = vcmask (!%p242_p3), 130048   ;;  %v614_v36 = vlaneseq (!%p242_p3) }
   0x7   : > { %245 = sbr.rel (%p242_p3) target bundleno = 744 (0x2e8), region = 44  ;;  %1126 = vmatprep.subr.bf16.mxu0 (!%p242_p3), %v1265_v0  ;;  %1132 = vmatprep.subr.bf16.mxu1 (!%p242_p3), %v1265_v0  ;;  %s1268_s30 = smov (!%p242_p3), 113   ;;  %v594_v10 = vld [vmem:[%s1449_s2] sm:$0xff] (!%p242_p3)  ;;  %v595_v11 = vld [vmem:[%s1449_s2 + $0x8] sm:$0xff] (!%p242_p3)  ;;  %v1271_v12 = vmov (!%p242_p3), 0   ;;  %v1232_v16 = vld [vmem:[%s1448_s1 + $0x18] sm:$0xff] (!%p242_p3)  }
   0x8   : > { %1128 = vmatprep.mubr.msk.bf16.mxu0 (!%p242_p3), %vm1266_vm0, %v1265_v0  ;;  %1134 = vmatprep.mubr.msk.bf16.mxu1 (!%p242_p3), %vm1266_vm0, %v1265_v0  ;;  %s1269_s9 = smov (!%p242_p3), 118   ;;  %s1270_s10 = smov (!%p242_p3), 108   ;;  %v1229_v14 = vld [vmem:[%s1448_s1 + $0x8] sm:$0xff] (!%p242_p3)   ;;  %v1231_v18 = vld [vmem:[%s1448_s1 + $0x10] sm:$0xff] (!%p242_p3)   ;;  %v1233_v20 = vld [vmem:[%s1448_s1 + $0x20] sm:$0xff] (!%p242_p3)   ;;  %v615_v43 = vand.u32 (!%p242_p3), 127, %v614_v36 }
   0x9   : > { %1222 = vset.pattern.permute.xlu0 (!%p242_p3), %v1271_v12  ;;  %1223 = vset.pattern.permute.xlu1 (!%p242_p3), %v1271_v12  ;;  %s1274_s7 = smov (!%p242_p3), 124   ;;  %s1275_s8 = smov (!%p242_p3), 125   ;;  %v1238_v12 = vld [vmem:[%s1450_s3 + $0x20] sm:$0xff] (!%p242_p3)   ;;  %vm941_vm10 = vcmask (!%p242_p3), 125952  }
   0xa   : > { %v616_v46 = vadd.s32 (!%p242_p3), 4294967294, %v615_v43  ;;  %s1276_s13 = smov (!%p242_p3), 116  }
   0xc   : > { %vm617_vm4 = vcmp.ge.s32.totalorder (!%p242_p3), %v616_v46, 0  ;;  %vm618_vm5 = vcmp.lt.s32.totalorder (!%p242_p3), %v616_v46, 16 }
   0xd   : > { %vm619_vm7 = vmand (!%p242_p3), %vm617_vm4, %vm618_vm5 }
   0xe   : > { %s1459_s21 = smov (!%p282_p4, %s1255_s21), 1  ;;  %vm1073_vm9 = vmpackc.low %vm619_vm7, %vm619_vm7 }
   0xf   : > { %s1336_s25 = sshll.u32 %s1459_s21, 3 }
  0x10   : > { %s286_s28 = scalar_lea.vmem %s1447_s0, %s1336_s25 }
  0x11   : > { %v1099_v1 = vld [vmem:[%s286_s28] sm:$0xff]   ;;  %s294_s28 = scalar_lea.vmem %s1452_s5, %s1336_s25 }
  0x12   : > { %v1342_v2 = vunpack.c.l.bf16 %v1099_v1  ;;  %v1344_v3 = vunpack.c.h.bf16 %v1099_v1  ;;  %v1235_v1 = vld [vmem:[%s1450_s3] sm:$0xff]  }
  0x14   : > { %vm308_vm1 = vcmp.ge.f32.partialorder %v1342_v2, 0.0  ;;  %vm309_vm2 = vcmp.ge.f32.partialorder %v1344_v3, 0.0  ;;  %v310_v4 = vmul.f32 0.1, %v1342_v2  ;;  %v311_v5 = vmul.f32 0.1, %v1344_v3 }
  0x16   : > { %v312_v6 = vsel %vm308_vm1, %v1342_v2, %v310_v4  ;;  %v313_v7 = vsel %vm309_vm2, %v1344_v3, %v311_v5  ;;  %v902_v4 = vld [vmem:[%s1451_s4 + $0x8] sm:$0xff]  ;;  %v901_v5 = vld [vmem:[%s1451_s4] sm:$0xff] }
  0x17   : > { %v314_v8 = vpack.c.bf16 %v313_v7, %v312_v6  ;;  %v1224_v6 = vpack.i.bf16 %v1344_v3, %v1342_v2  ;;  %v1236_v2 = vld [vmem:[%s1450_s3 + $0x10] sm:$0xff]  }
  0x19   : > { %326 = vrot.lane.b32.xlu0 %v314_v8, %s1267_s29  ;;  %488 = vrot.lane.b32.xlu1 %v314_v8, %s1268_s30  ;;  %s1272_s29 = smov 126   ;;  %s1273_s30 = smov 127  }
  0x1a   : > { %1133 = vmatpush3.bf16.msra.mxu1 %v314_v8 }
  0x1b   : > { %1144 = vmatprep.subr.bf16.mxu1 %v1265_v0 }
  0x1d   : > { %431 = vrot.lane.b32.xlu0 %v314_v8, %s1269_s9  ;;  %545 = vrot.lane.b32.xlu1 %v314_v8, %s1270_s10  ;;  %v1234_v8 = vld [vmem:[%s1450_s3 + $0x8] sm:$0xff]  }
  0x1e   : > { %1135 = vmatmul.mubr.msk.bf16.vlgmr.msra.gmra.mrb[0].mxu1 %vm329_vm3, %v1230_v9 }
  0x1f   : > { %1146 = vmatprep.mubr.msk.bf16.mxu1 %vm1266_vm0, %v1265_v0 }
  0x21   : > { %598 = vperm.xlu0 %1222, %v594_v10   ;;  %603 = vperm.xlu1 %1223, %v595_v11   ;;  %v1237_v11 = vld [vmem:[%s1450_s3 + $0x18] sm:$0xff]  }
  0x8b   : > { %v327_v13 = vpop.permute.xlu0 %326  ;;  %v489_v15 = vpop.permute.xlu1 %488 }
  0x8c   : > { %1127 = vmatpush3.bf16.msra.mxu0 %v327_v13  ;;  %1145 = vmatpush3.bf16.msra.mxu1 %v489_v15 }
  0x8d   : > { %1138 = vmatprep.subr.bf16.mxu0 %v1265_v0  ;;  %1156 = vmatprep.subr.bf16.mxu1 %v1265_v0 }
  0x8f   : > { %1129 = vmatmul.mubr.msk.bf16.vlgmr.msra.gmra.mrb[0].mxu0 %vm329_vm3, %v1229_v14  ;;  %v432_v17 = vpop.permute.xlu0 %431  ;;  %1147 = vmatmul.mubr.msk.bf16.vlgmr.msra.gmra.mrb[4].mxu1 %vm329_vm3, %v1232_v16  ;;  %v546_v19 = vpop.permute.xlu1 %545 }
  0x90   : > { %1139 = vmatpush3.bf16.msra.mxu0 %v432_v17  ;;  %1140 = vmatprep.mubr.msk.bf16.mxu0 %vm1266_vm0, %v1265_v0 }
  0x91   : > { %1150 = vmatprep.subr.bf16.mxu0 %v1265_v0  ;;  %1158 = vmatprep.mubr.msk.bf16.mxu1 %vm1266_vm0, %v1265_v0 }
  0x97   : > { %1141 = vmatmul.mubr.msk.bf16.vlgmr.msra.gmra.mrb[4].mxu0 %vm329_vm3, %v1231_v18 }
  0x98   : > { %1151 = vmatpush3.bf16.msra.mxu0 %v546_v19  ;;  %1152 = vmatprep.mubr.msk.bf16.mxu0 %vm1266_vm0, %v1265_v0 }
  0x99   : > { %1162 = vmatprep.subr.bf16.mxu0 %v1265_v0 }
  0x9f   : > { %1153 = vmatmul.mubr.msk.bf16.vlgmr.msra.gmra.mrb[8].mxu0 %vm329_vm3, %v1233_v20 }
  0xa0   : > { %1164 = vmatprep.mubr.msk.bf16.mxu0 %vm1266_vm0, %v1265_v0  ;;  %v599_v47 = vpop.permute.xlu0 %598  ;;  %v604_v51 = vpop.permute.xlu1 %603 }
  0xf1   : > { %v416_v21 = vpop.f32.mrb[0].mxu1 }
  0xf2   : > { %v1136_v22 = vpop.f32.mrb[1].mxu1 }
  0xf3   : > { %v419_v23 = vpop.f32.mrb[2].mxu1 }
  0xf4   : > { %v1137_v24 = vpop.f32.mrb[3].mxu1 }
 0x162   : > { %v367_v25 = vpop.f32.mrb[0].mxu0  ;;  %v528_v26 = vpop.f32.mrb[4].mxu1 }
 0x163   : > { %v417_v27 = vadd.f32 %v416_v21, %v367_v25  ;;  %v1130_v28 = vpop.f32.mrb[1].mxu0  ;;  %v1148_v29 = vpop.f32.mrb[5].mxu1 }
 0x164   : > { %v370_v30 = vpop.f32.mrb[2].mxu0  ;;  %v531_v31 = vpop.f32.mrb[6].mxu1 }
 0x165   : > { %v420_v32 = vadd.f32 %v419_v23, %v370_v30  ;;  %v1131_v33 = vpop.f32.mrb[3].mxu0  ;;  %v1149_v34 = vpop.f32.mrb[7].mxu1 }
 0x16a   : > { %v471_v35 = vpop.f32.mrb[4].mxu0 }
 0x16b   : > { %v478_v37 = vadd.f32 %v471_v35, %v417_v27  ;;  %v1142_v38 = vpop.f32.mrb[5].mxu0 }
 0x16c   : > { %v474_v39 = vpop.f32.mrb[6].mxu0 }
 0x16d   : > { %v479_v40 = vadd.f32 %v474_v39, %v420_v32  ;;  %v535_v41 = vadd.f32 %v528_v26, %v478_v37  ;;  %v1143_v42 = vpop.f32.mrb[7].mxu0  ;;  %v1103_v37 = vld [vmem:[%s294_s28] sm:$0xff]  }
 0x16e   : > { %v1104_v42 = vunpack.c.l.bf16 %v1103_v37 }
 0x16f   : > { %v536_v44 = vadd.f32 %v531_v31, %v479_v40 }
 0x172   : > { %v585_v45 = vpop.f32.mrb[8].mxu0 }
 0x173   : > { %v592_v48 = vadd.f32 %v585_v45, %v535_v41  ;;  %v1154_v49 = vpop.f32.mrb[9].mxu0 }
 0x174   : > { %v588_v50 = vpop.f32.mrb[10].mxu0 }
 0x175   : > { %v593_v52 = vadd.f32 %v588_v50, %v536_v44  ;;  %v606_v53 = vadd.f32 %v599_v47, %v592_v48  ;;  %v1155_v54 = vpop.f32.mrb[11].mxu0  ;;  %v1105_v48 = vunpack.c.h.bf16 %v1103_v37 }
 0x177   : > { %vm608_vm6 = vcmp.ge.f32.partialorder %v606_v53, 0.0  ;;  %v610_v55 = vmul.f32 0.1, %v606_v53  ;;  %v607_v56 = vadd.f32 %v604_v51, %v593_v52 }
 0x179   : > { %v612_v57 = vsel %vm608_vm6, %v606_v53, %v610_v55  ;;  %vm609_vm8 = vcmp.ge.f32.partialorder %v607_v56, 0.0  ;;  %v611_v58 = vmul.f32 0.1, %v607_v56 }
 0x17a   : > { %v620_v60 = vsel %vm619_vm7, %v612_v57, 0.0 }
 0x17b   : > { %v613_v59 = vsel %vm609_vm8, %v607_v56, %v611_v58 }
 0x17c   : > { %v621_v61 = vsel %vm619_vm7, %v613_v59, 0.0  ;;  %v1074_v62 = vpack.c.bf16 %v613_v59, %v612_v57 }
 0x17d   : > { %v622_v63 = vpack.c.bf16 %v621_v61, %v620_v60 }
 0x17e   : > { %1163 = vmatpush3.bf16.msk.msra.mxu0 %vm1073_vm9, %v1074_v62 }
 0x17f   : > { %738 = vrot.lane.b32.xlu0 %v622_v63, %s1272_s29  ;;  %634 = vrot.lane.b32.xlu1 %v622_v63, %s1273_s30 }
 0x180   : > { %1174 = vmatprep.subr.bf16.mxu0 %v1265_v0 }
 0x181   : > { %1165 = vmatmul.mubr.msk.bf16.vlgmr.msra.gmra.mrb[12].mxu0 %vm329_vm3, %v1235_v1 }
 0x182   : > { %1176 = vmatprep.mubr.msk.bf16.mxu0 %vm1266_vm0, %v1265_v0 }
 0x183   : > { %852 = vrot.lane.b32.xlu0 %v622_v63, %s1274_s7  ;;  %795 = vrot.lane.b32.xlu1 %v622_v63, %s1275_s8  ;;  %s302_s7 = scalar_lea.vmem %s1453_s6, %s1336_s25 }
 0x187   : > { %910 = vperm.xlu0 %1222, %v902_v4   ;;  %905 = vperm.xlu1 %1223, %v901_v5  }
 0x18b   : > { %1225 = vrot.lane.b32.xlu1 %v1224_v6, %s1276_s13 }
 0x1f1   : > { %v635_v7 = vpop.permute.xlu1 %634  ;;  %v739_v9 = vpop.permute.xlu0 %738 }
 0x1f2   : > { %1157 = vmatpush3.bf16.msra.mxu1 %v635_v7 }
 0x1f3   : > { %1168 = vmatprep.subr.bf16.mxu1 %v1265_v0 }
 0x1f5   : > { %1159 = vmatmul.mubr.msk.bf16.vlgmr.msra.gmra.mrb[8].mxu1 %vm329_vm3, %v1234_v8  ;;  %v796_v10 = vpop.permute.xlu1 %795  ;;  %v853_v3 = vpop.permute.xlu0 %852 }
 0x1f6   : > { %1169 = vmatpush3.bf16.msra.mxu1 %v739_v9  ;;  %1175 = vmatpush3.bf16.msra.mxu0 %v796_v10 }
 0x1f7   : > { %1170 = vmatprep.mubr.msk.bf16.mxu1 %vm1266_vm0, %v1265_v0  ;;  %1180 = vmatprep.subr.bf16.mxu1 %v1265_v0 }
 0x1f9   : > { %1177 = vmatmul.mubr.msk.bf16.vlgmr.msra.gmra.mrb[16].mxu0 %vm329_vm3, %v1237_v11 }
 0x1fd   : > { %1171 = vmatmul.mubr.msk.bf16.vlgmr.msra.gmra.mrb[12].mxu1 %vm329_vm3, %v1236_v2 }
 0x1fe   : > { %1181 = vmatpush3.bf16.msra.mxu1 %v853_v3  ;;  %1182 = vmatprep.mubr.msk.bf16.mxu1 %vm1266_vm0, %v1265_v0 }
 0x205   : > { %1183 = vmatmul.mubr.msk.bf16.vlgmr.msra.gmra.mrb[16].mxu1 %vm329_vm3, %v1238_v12 }
 0x206   : > { %v906_v29 = vpop.permute.xlu1 %905  ;;  %v911_v45 = vpop.permute.xlu0 %910 }
 0x20a   : > { %v1226_v35 = vpop.permute.xlu1 %1225 }
 0x254   : > { %v723_v13 = vpop.f32.mrb[12].mxu0 }
 0x255   : > { %v1166_v14 = vpop.f32.mrb[13].mxu0 }
 0x256   : > { %v726_v15 = vpop.f32.mrb[14].mxu0 }
 0x257   : > { %v1167_v16 = vpop.f32.mrb[15].mxu0 }
 0x2c8   : > { %v674_v17 = vpop.f32.mrb[8].mxu1 }
 0x2c9   : > { %v1160_v18 = vpop.f32.mrb[9].mxu1  ;;  %v724_v19 = vadd.f32 %v723_v13, %v674_v17 }
 0x2ca   : > { %v677_v20 = vpop.f32.mrb[10].mxu1 }
 0x2cb   : > { %v1161_v21 = vpop.f32.mrb[11].mxu1  ;;  %v727_v22 = vadd.f32 %v726_v15, %v677_v20 }
 0x2cc   : > { %v835_v23 = vpop.f32.mrb[16].mxu0 }
 0x2cd   : > { %v1178_v24 = vpop.f32.mrb[17].mxu0 }
 0x2ce   : > { %v838_v0 = vpop.f32.mrb[18].mxu0 }
 0x2cf   : > { %v1179_v25 = vpop.f32.mrb[19].mxu0 }
 0x2d0   : > { %v778_v26 = vpop.f32.mrb[12].mxu1 }
 0x2d1   : > { %v785_v27 = vadd.f32 %v778_v26, %v724_v19  ;;  %v1172_v28 = vpop.f32.mrb[13].mxu1 }
 0x2d2   : > { %v781_v30 = vpop.f32.mrb[14].mxu1 }
 0x2d3   : > { %v786_v31 = vadd.f32 %v781_v30, %v727_v22  ;;  %v842_v32 = vadd.f32 %v835_v23, %v785_v27  ;;  %v1173_v33 = vpop.f32.mrb[15].mxu1 }
 0x2d5   : > { %v843_v34 = vadd.f32 %v838_v0, %v786_v31 }
 0x2d8   : > { %v892_v36 = vpop.f32.mrb[16].mxu1 }
 0x2d9   : > { %v899_v38 = vadd.f32 %v892_v36, %v842_v32  ;;  %v1184_v39 = vpop.f32.mrb[17].mxu1 }
 0x2da   : > { %v895_v40 = vpop.f32.mrb[18].mxu1 }
 0x2db   : > { %v913_v41 = vadd.f32 %v906_v29, %v899_v38  ;;  %v900_v43 = vadd.f32 %v895_v40, %v843_v34  ;;  %v1185_v44 = vpop.f32.mrb[19].mxu1 }
 0x2dd   : > { %v1239_v46 = vadd.low.f32.bf16 %v913_v41, %v1226_v35  ;;  %v914_v47 = vadd.f32 %v911_v45, %v900_v43 }
 0x2df   : > { %v929_v49 = vadd.f32 %v1239_v46, %v1104_v42  ;;  %v1240_v50 = vadd.high.f32.bf16 %v914_v47, %v1226_v35 }
 0x2e1   : > { %v931_v51 = vmul.f32 0.5, %v929_v49  ;;  %v930_v52 = vadd.f32 %v1240_v50, %v1105_v48 }
 0x2e3   : > { %v1096_v53 = vpack.c.bf16 %v931_v51, %v931_v51  ;;  %v932_v54 = vmul.f32 0.5, %v930_v52 }
 0x2e5   : > { %942 = vst.msk [vmem:[%s302_s7] sm:$0xf] %vm941_vm10, %v1096_v53  ;;  %v1097_v55 = vpack.c.bf16 %v932_v54, %v932_v54 }
 0x2e7   : > { %943 = vst.msk [vmem:[%s302_s7 + $0x4] sm:$0xf] %vm941_vm10, %v1097_v55 }
 0x2e8 PF: > { %s16_s23 = sadd.s32 1, %s1263_s23   ;;  %s1454_s21 = smov %s1259_s22 }
 0x2e9   : > { %p13_p5 = scmp.ge.s32.totalorder %s16_s23, 4   ;;  %s1455_s22 = smov %s1457_s24 }
 0x2eb   :  { %15 = sbr.rel (!%p13_p5) target bundleno = 2 (0x2), region = 85 }

// kernel: _lambda_.21
= control target key start
LH: loop header
LB: loop body
LE: loop exit
PB: predicated region body
PF: predicated region fallthrough
CT: control target
= control target key end

     0   :  { %s1206_s18 = smov 0   ;;  %s1208_s19 = smov 0   ;;  %s1349_s0 = inlined_call_operand.vmem [shape: bf16[2,16,24], index: 0, kind: input, shape index: {}]   ;;  %s1350_s1 = inlined_call_operand.vmem [shape: bf16[5,16,16], index: 1, kind: input, shape index: {}]   ;;  %s1351_s2 = inlined_call_operand.vmem [shape: f32[16,1], index: 2, kind: input, shape index: {}]   ;;  %s1352_s3 = inlined_call_operand.vmem [shape: bf16[5,16,16], index: 3, kind: input, shape index: {}]   ;;  %s1353_s4 = inlined_call_operand.vmem [shape: f32[16,1], index: 4, kind: input, shape index: {}]   ;;  %s1354_s5 = inlined_call_operand.vmem [shape: bf16[2,16,16], index: 5, kind: output, shape index: {}]  }
   0x1   :  { %s1210_s20 = smov 0  }
   0x2 LB: > { %s27_s21 = sadd.s32 1, %s1163_s19  ;;  %p959_p0 = scmp.ge.s32.totalorder %s1167_s20, 1  ;;  %s1167_s20 = sphi %s1210_s20, %s15_s20   ;;  %s1163_s19 = sphi %s1208_s19, %s1356_s19   ;;  %s1159_s18 = sphi %s1206_s18, %s1355_s18  }
   0x3   : > { %p29_p1 = scmp.ge.s32.totalorder %s27_s21, 2  ;;  %p201_p2 = scmp.lt.s32.totalorder %s1167_s20, 3 }
   0x5   : > { %s1358_s21 = smov (%p29_p1, %s27_s21), 0  ;;  %p202_p3 = pnand %p959_p0, %p201_p2 }
   0x6   : > { %p232_p4 = scmp.lt.s32.totalorder (!%p202_p3), %s1159_s18, 1  ;;  %v1169_v0 = vmov (!%p202_p3), 0.0   ;;  %vm1170_vm0 = vmmov (!%p202_p3), 0   ;;  %s1171_s26 = smov (!%p202_p3), 127   ;;  %v1134_v9 = vld [vmem:[%s1350_s1] sm:$0xff] (!%p202_p3)   ;;  %vm271_vm3 = vcmask (!%p202_p3), 130048   ;;  %v556_v36 = vlaneseq (!%p202_p3) }
   0x7   : > { %205 = sbr.rel (%p202_p3) target bundleno = 740 (0x2e4), region = 40  ;;  %1035 = vmatprep.subr.bf16.mxu0 (!%p202_p3), %v1169_v0  ;;  %1041 = vmatprep.subr.bf16.mxu1 (!%p202_p3), %v1169_v0  ;;  %s1172_s27 = smov (!%p202_p3), 125   ;;  %v536_v10 = vld [vmem:[%s1351_s2] sm:$0xff] (!%p202_p3)  ;;  %v537_v11 = vld [vmem:[%s1351_s2 + $0x8] sm:$0xff] (!%p202_p3)  ;;  %v1175_v12 = vmov (!%p202_p3), 0   ;;  %v1136_v16 = vld [vmem:[%s1350_s1 + $0x18] sm:$0xff] (!%p202_p3)  }
   0x8   : > { %1037 = vmatprep.mubr.msk.bf16.mxu0 (!%p202_p3), %vm1170_vm0, %v1169_v0  ;;  %1043 = vmatprep.mubr.msk.bf16.mxu1 (!%p202_p3), %vm1170_vm0, %v1169_v0  ;;  %s1173_s30 = smov (!%p202_p3), 126   ;;  %s1174_s6 = smov (!%p202_p3), 124   ;;  %v1133_v14 = vld [vmem:[%s1350_s1 + $0x8] sm:$0xff] (!%p202_p3)   ;;  %v1135_v18 = vld [vmem:[%s1350_s1 + $0x10] sm:$0xff] (!%p202_p3)   ;;  %v1137_v20 = vld [vmem:[%s1350_s1 + $0x20] sm:$0xff] (!%p202_p3)   ;;  %v557_v43 = vand.u32 (!%p202_p3), 127, %v556_v36 }
   0x9   : > { %1126 = vset.pattern.permute.xlu0 (!%p202_p3), %v1175_v12  ;;  %1127 = vset.pattern.permute.xlu1 (!%p202_p3), %v1175_v12  ;;  %v1142_v12 = vld [vmem:[%s1352_s3 + $0x20] sm:$0xff] (!%p202_p3)   ;;  %vm875_vm10 = vcmask (!%p202_p3), 125952  }
   0xa   : > { %v558_v46 = vadd.s32 (!%p202_p3), 4294967294, %v557_v43 }
   0xc   : > { %vm559_vm4 = vcmp.ge.s32.totalorder (!%p202_p3), %v558_v46, 0  ;;  %vm560_vm5 = vcmp.lt.s32.totalorder (!%p202_p3), %v558_v46, 16 }
   0xd   : > { %vm561_vm7 = vmand (!%p202_p3), %vm559_vm4, %vm560_vm5 }
   0xe   : > { %s1360_s18 = smov (!%p232_p4, %s1159_s18), 1  ;;  %vm987_vm9 = vmpackc.low %vm561_vm7, %vm561_vm7 }
   0xf   : > { %s1007_s22 = sshll.u32 %s1360_s18, 3 }
  0x10   : > { %s236_s25 = scalar_lea.vmem %s1349_s0, %s1007_s22  ;;  %s244_s15 = scalar_lea.vmem %s1354_s5, %s1007_s22 }
  0x11   : > { %v1012_v1 = vld [vmem:[%s236_s25] sm:$0xff]  }
  0x12   : > { %v1238_v2 = vunpack.c.l.bf16 %v1012_v1  ;;  %v1240_v3 = vunpack.c.h.bf16 %v1012_v1  ;;  %v1139_v1 = vld [vmem:[%s1352_s3] sm:$0xff]  }
  0x14   : > { %vm250_vm1 = vcmp.ge.f32.partialorder %v1238_v2, 0.0  ;;  %vm251_vm2 = vcmp.ge.f32.partialorder %v1240_v3, 0.0  ;;  %v252_v4 = vmul.f32 0.1, %v1238_v2  ;;  %v253_v5 = vmul.f32 0.1, %v1240_v3 }
  0x16   : > { %v254_v6 = vsel %vm250_vm1, %v1238_v2, %v252_v4  ;;  %v255_v7 = vsel %vm251_vm2, %v1240_v3, %v253_v5  ;;  %v844_v4 = vld [vmem:[%s1353_s4 + $0x8] sm:$0xff]  ;;  %v843_v5 = vld [vmem:[%s1353_s4] sm:$0xff] }
  0x17   : > { %v256_v8 = vpack.c.bf16 %v255_v7, %v254_v6  ;;  %v1128_v6 = vpack.i.bf16 %v1240_v3, %v1238_v2  ;;  %v1140_v2 = vld [vmem:[%s1352_s3 + $0x10] sm:$0xff]  }
  0x19   : > { %268 = vrot.lane.b32.xlu0 %v256_v8, %s1171_s26  ;;  %430 = vrot.lane.b32.xlu1 %v256_v8, %s1172_s27 }
  0x1a   : > { %1042 = vmatpush3.bf16.msra.mxu1 %v256_v8 }
  0x1b   : > { %1053 = vmatprep.subr.bf16.mxu1 %v1169_v0 }
  0x1d   : > { %373 = vrot.lane.b32.xlu0 %v256_v8, %s1173_s30  ;;  %487 = vrot.lane.b32.xlu1 %v256_v8, %s1174_s6  ;;  %v1138_v8 = vld [vmem:[%s1352_s3 + $0x8] sm:$0xff]  }
  0x1e   : > { %1044 = vmatmul.mubr.msk.bf16.vlgmr.msra.gmra.mrb[0].mxu1 %vm271_vm3, %v1134_v9 }
  0x1f   : > { %1055 = vmatprep.mubr.msk.bf16.mxu1 %vm1170_vm0, %v1169_v0 }
  0x21   : > { %540 = vperm.xlu0 %1126, %v536_v10   ;;  %545 = vperm.xlu1 %1127, %v537_v11   ;;  %v1141_v11 = vld [vmem:[%s1352_s3 + $0x18] sm:$0xff]  }
  0x8b   : > { %v269_v13 = vpop.permute.xlu0 %268  ;;  %v431_v15 = vpop.permute.xlu1 %430 }
  0x8c   : > { %1036 = vmatpush3.bf16.msra.mxu0 %v269_v13  ;;  %1054 = vmatpush3.bf16.msra.mxu1 %v431_v15 }
  0x8d   : > { %1047 = vmatprep.subr.bf16.mxu0 %v1169_v0  ;;  %1065 = vmatprep.subr.bf16.mxu1 %v1169_v0 }
  0x8f   : > { %1038 = vmatmul.mubr.msk.bf16.vlgmr.msra.gmra.mrb[0].mxu0 %vm271_vm3, %v1133_v14  ;;  %v374_v17 = vpop.permute.xlu0 %373  ;;  %1056 = vmatmul.mubr.msk.bf16.vlgmr.msra.gmra.mrb[4].mxu1 %vm271_vm3, %v1136_v16  ;;  %v488_v19 = vpop.permute.xlu1 %487 }
  0x90   : > { %1048 = vmatpush3.bf16.msra.mxu0 %v374_v17  ;;  %1049 = vmatprep.mubr.msk.bf16.mxu0 %vm1170_vm0, %v1169_v0 }
  0x91   : > { %1059 = vmatprep.subr.bf16.mxu0 %v1169_v0  ;;  %1067 = vmatprep.mubr.msk.bf16.mxu1 %vm1170_vm0, %v1169_v0 }
  0x97   : > { %1050 = vmatmul.mubr.msk.bf16.vlgmr.msra.gmra.mrb[4].mxu0 %vm271_vm3, %v1135_v18 }
  0x98   : > { %1060 = vmatpush3.bf16.msra.mxu0 %v488_v19  ;;  %1061 = vmatprep.mubr.msk.bf16.mxu0 %vm1170_vm0, %v1169_v0 }
  0x99   : > { %1071 = vmatprep.subr.bf16.mxu0 %v1169_v0 }
  0x9f   : > { %1062 = vmatmul.mubr.msk.bf16.vlgmr.msra.gmra.mrb[8].mxu0 %vm271_vm3, %v1137_v20 }
  0xa0   : > { %1073 = vmatprep.mubr.msk.bf16.mxu0 %vm1170_vm0, %v1169_v0  ;;  %v541_v47 = vpop.permute.xlu0 %540  ;;  %v546_v51 = vpop.permute.xlu1 %545 }
  0xf1   : > { %v358_v21 = vpop.f32.mrb[0].mxu1 }
  0xf2   : > { %v1045_v22 = vpop.f32.mrb[1].mxu1 }
  0xf3   : > { %v361_v23 = vpop.f32.mrb[2].mxu1 }
  0xf4   : > { %v1046_v24 = vpop.f32.mrb[3].mxu1 }
 0x162   : > { %v309_v25 = vpop.f32.mrb[0].mxu0  ;;  %v470_v26 = vpop.f32.mrb[4].mxu1 }
 0x163   : > { %v359_v27 = vadd.f32 %v358_v21, %v309_v25  ;;  %v1039_v28 = vpop.f32.mrb[1].mxu0  ;;  %v1057_v29 = vpop.f32.mrb[5].mxu1 }
 0x164   : > { %v312_v30 = vpop.f32.mrb[2].mxu0  ;;  %v473_v31 = vpop.f32.mrb[6].mxu1 }
 0x165   : > { %v362_v32 = vadd.f32 %v361_v23, %v312_v30  ;;  %v1040_v33 = vpop.f32.mrb[3].mxu0  ;;  %v1058_v34 = vpop.f32.mrb[7].mxu1 }
 0x16a   : > { %v413_v35 = vpop.f32.mrb[4].mxu0 }
 0x16b   : > { %v420_v37 = vadd.f32 %v413_v35, %v359_v27  ;;  %v1051_v38 = vpop.f32.mrb[5].mxu0 }
 0x16c   : > { %v416_v39 = vpop.f32.mrb[6].mxu0 }
 0x16d   : > { %v421_v40 = vadd.f32 %v416_v39, %v362_v32  ;;  %v477_v41 = vadd.f32 %v470_v26, %v420_v37  ;;  %v1052_v42 = vpop.f32.mrb[7].mxu0 }
 0x16f   : > { %v478_v44 = vadd.f32 %v473_v31, %v421_v40 }
 0x172   : > { %v527_v45 = vpop.f32.mrb[8].mxu0 }
 0x173   : > { %v534_v48 = vadd.f32 %v527_v45, %v477_v41  ;;  %v1063_v49 = vpop.f32.mrb[9].mxu0 }
 0x174   : > { %v530_v50 = vpop.f32.mrb[10].mxu0 }
 0x175   : > { %v535_v52 = vadd.f32 %v530_v50, %v478_v44  ;;  %v548_v53 = vadd.f32 %v541_v47, %v534_v48  ;;  %v1064_v54 = vpop.f32.mrb[11].mxu0 }
 0x177   : > { %vm550_vm6 = vcmp.ge.f32.partialorder %v548_v53, 0.0  ;;  %v552_v55 = vmul.f32 0.1, %v548_v53  ;;  %v549_v56 = vadd.f32 %v546_v51, %v535_v52 }
 0x179   : > { %v554_v57 = vsel %vm550_vm6, %v548_v53, %v552_v55  ;;  %vm551_vm8 = vcmp.ge.f32.partialorder %v549_v56, 0.0  ;;  %v553_v58 = vmul.f32 0.1, %v549_v56 }
 0x17a   : > { %v562_v60 = vsel %vm561_vm7, %v554_v57, 0.0 }
 0x17b   : > { %v555_v59 = vsel %vm551_vm8, %v549_v56, %v553_v58 }
 0x17c   : > { %v563_v61 = vsel %vm561_vm7, %v555_v59, 0.0  ;;  %v988_v62 = vpack.c.bf16 %v555_v59, %v554_v57 }
 0x17d   : > { %v564_v63 = vpack.c.bf16 %v563_v61, %v562_v60 }
 0x17e   : > { %1072 = vmatpush3.bf16.msk.msra.mxu0 %vm987_vm9, %v988_v62 }
 0x17f   : > { %680 = vrot.lane.b32.xlu0 %v564_v63, %s1173_s30  ;;  %576 = vrot.lane.b32.xlu1 %v564_v63, %s1171_s26 }
 0x180   : > { %1083 = vmatprep.subr.bf16.mxu0 %v1169_v0 }
 0x181   : > { %1074 = vmatmul.mubr.msk.bf16.vlgmr.msra.gmra.mrb[12].mxu0 %vm271_vm3, %v1139_v1 }
 0x182   : > { %1085 = vmatprep.mubr.msk.bf16.mxu0 %vm1170_vm0, %v1169_v0 }
 0x183   : > { %794 = vrot.lane.b32.xlu0 %v564_v63, %s1174_s6  ;;  %737 = vrot.lane.b32.xlu1 %v564_v63, %s1172_s27 }
 0x187   : > { %852 = vperm.xlu0 %1126, %v844_v4   ;;  %847 = vperm.xlu1 %1127, %v843_v5  }
 0x18b   : > { %1129 = vrot.lane.b32.xlu1 %v1128_v6, %s1174_s6 }
 0x1f1   : > { %v577_v7 = vpop.permute.xlu1 %576  ;;  %v681_v9 = vpop.permute.xlu0 %680 }
 0x1f2   : > { %1066 = vmatpush3.bf16.msra.mxu1 %v577_v7 }
 0x1f3   : > { %1077 = vmatprep.subr.bf16.mxu1 %v1169_v0 }
 0x1f5   : > { %1068 = vmatmul.mubr.msk.bf16.vlgmr.msra.gmra.mrb[8].mxu1 %vm271_vm3, %v1138_v8  ;;  %v738_v10 = vpop.permute.xlu1 %737  ;;  %v795_v3 = vpop.permute.xlu0 %794 }
 0x1f6   : > { %1078 = vmatpush3.bf16.msra.mxu1 %v681_v9  ;;  %1084 = vmatpush3.bf16.msra.mxu0 %v738_v10 }
 0x1f7   : > { %1079 = vmatprep.mubr.msk.bf16.mxu1 %vm1170_vm0, %v1169_v0  ;;  %1089 = vmatprep.subr.bf16.mxu1 %v1169_v0 }
 0x1f9   : > { %1086 = vmatmul.mubr.msk.bf16.vlgmr.msra.gmra.mrb[16].mxu0 %vm271_vm3, %v1141_v11 }
 0x1fd   : > { %1080 = vmatmul.mubr.msk.bf16.vlgmr.msra.gmra.mrb[12].mxu1 %vm271_vm3, %v1140_v2 }
 0x1fe   : > { %1090 = vmatpush3.bf16.msra.mxu1 %v795_v3  ;;  %1091 = vmatprep.mubr.msk.bf16.mxu1 %vm1170_vm0, %v1169_v0 }
 0x205   : > { %1092 = vmatmul.mubr.msk.bf16.vlgmr.msra.gmra.mrb[16].mxu1 %vm271_vm3, %v1142_v12 }
 0x206   : > { %v848_v29 = vpop.permute.xlu1 %847  ;;  %v853_v43 = vpop.permute.xlu0 %852 }
 0x20a   : > { %v1130_v35 = vpop.permute.xlu1 %1129 }
 0x254   : > { %v665_v13 = vpop.f32.mrb[12].mxu0 }
 0x255   : > { %v1075_v14 = vpop.f32.mrb[13].mxu0 }
 0x256   : > { %v668_v15 = vpop.f32.mrb[14].mxu0 }
 0x257   : > { %v1076_v16 = vpop.f32.mrb[15].mxu0 }
 0x2c8   : > { %v616_v17 = vpop.f32.mrb[8].mxu1 }
 0x2c9   : > { %v1069_v18 = vpop.f32.mrb[9].mxu1  ;;  %v666_v19 = vadd.f32 %v665_v13, %v616_v17 }
 0x2ca   : > { %v619_v20 = vpop.f32.mrb[10].mxu1 }
 0x2cb   : > { %v1070_v21 = vpop.f32.mrb[11].mxu1  ;;  %v669_v22 = vadd.f32 %v668_v15, %v619_v20 }
 0x2cc   : > { %v777_v23 = vpop.f32.mrb[16].mxu0 }
 0x2cd   : > { %v1087_v24 = vpop.f32.mrb[17].mxu0 }
 0x2ce   : > { %v780_v25 = vpop.f32.mrb[18].mxu0 }
 0x2cf   : > { %v1088_v0 = vpop.f32.mrb[19].mxu0 }
 0x2d0   : > { %v720_v26 = vpop.f32.mrb[12].mxu1 }
 0x2d1   : > { %v727_v27 = vadd.f32 %v720_v26, %v666_v19  ;;  %v1081_v28 = vpop.f32.mrb[13].mxu1 }
 0x2d2   : > { %v723_v30 = vpop.f32.mrb[14].mxu1 }
 0x2d3   : > { %v728_v31 = vadd.f32 %v723_v30, %v669_v22  ;;  %v784_v32 = vadd.f32 %v777_v23, %v727_v27  ;;  %v1082_v33 = vpop.f32.mrb[15].mxu1 }
 0x2d5   : > { %v785_v34 = vadd.f32 %v780_v25, %v728_v31 }
 0x2d8   : > { %v834_v36 = vpop.f32.mrb[16].mxu1 }
 0x2d9   : > { %v841_v37 = vadd.f32 %v834_v36, %v784_v32  ;;  %v1093_v38 = vpop.f32.mrb[17].mxu1 }
 0x2da   : > { %v837_v39 = vpop.f32.mrb[18].mxu1 }
 0x2db   : > { %v855_v40 = vadd.f32 %v848_v29, %v841_v37  ;;  %v842_v41 = vadd.f32 %v837_v39, %v785_v34  ;;  %v1094_v42 = vpop.f32.mrb[19].mxu1 }
 0x2dd   : > { %v1143_v44 = vadd.low.f32.bf16 %v855_v40, %v1130_v35  ;;  %v856_v45 = vadd.f32 %v853_v43, %v842_v41 }
 0x2df   : > { %v1009_v46 = vpack.c.bf16 %v1143_v44, %v1143_v44  ;;  %v1144_v47 = vadd.high.f32.bf16 %v856_v45, %v1130_v35 }
 0x2e1   : > { %876 = vst.msk [vmem:[%s244_s15] sm:$0xf] %vm875_vm10, %v1009_v46  ;;  %v1010_v48 = vpack.c.bf16 %v1144_v47, %v1144_v47 }
 0x2e3   : > { %877 = vst.msk [vmem:[%s244_s15 + $0x4] sm:$0xf] %vm875_vm10, %v1010_v48 }
 0x2e4 PF: > { %s15_s20 = sadd.s32 1, %s1167_s20   ;;  %s1355_s18 = smov %s1163_s19 }
 0x2e5   : > { %p12_p5 = scmp.ge.s32.totalorder %s15_s20, 4   ;;  %s1356_s19 = smov %s1358_s21 }
 0x2e7   :  { %14 = sbr.rel (!%p12_p5) target bundleno = 2 (0x2), region = 78 }

// kernel: _lambda_.22
= control target key start
LH: loop header
LB: loop body
LE: loop exit
PB: predicated region body
PF: predicated region fallthrough
CT: control target
= control target key end

     0   :  { %s1214_s18 = smov 0   ;;  %s1216_s19 = smov 0   ;;  %s1350_s0 = inlined_call_operand.vmem [shape: bf16[2,16,32], index: 0, kind: input, shape index: {}]   ;;  %s1351_s1 = inlined_call_operand.vmem [shape: bf16[5,16,16], index: 1, kind: input, shape index: {}]   ;;  %s1352_s2 = inlined_call_operand.vmem [shape: f32[16,1], index: 2, kind: input, shape index: {}]   ;;  %s1353_s3 = inlined_call_operand.vmem [shape: bf16[5,16,16], index: 3, kind: input, shape index: {}]   ;;  %s1354_s4 = inlined_call_operand.vmem [shape: f32[16,1], index: 4, kind: input, shape index: {}]   ;;  %s1355_s5 = inlined_call_operand.vmem [shape: bf16[2,16,16], index: 5, kind: output, shape index: {}]  }
   0x1   :  { %s1218_s20 = smov 0  }
   0x2 LB: > { %s27_s21 = sadd.s32 1, %s1167_s19  ;;  %p959_p0 = scmp.ge.s32.totalorder %s1171_s20, 1  ;;  %s1171_s20 = sphi %s1218_s20, %s15_s20   ;;  %s1167_s19 = sphi %s1216_s19, %s1357_s19   ;;  %s1163_s18 = sphi %s1214_s18, %s1356_s18  }
   0x3   : > { %p29_p1 = scmp.ge.s32.totalorder %s27_s21, 2  ;;  %p201_p2 = scmp.lt.s32.totalorder %s1171_s20, 3 }
   0x5   : > { %s1359_s21 = smov (%p29_p1, %s27_s21), 0  ;;  %p202_p3 = pnand %p959_p0, %p201_p2 }
   0x6   : > { %p232_p4 = scmp.lt.s32.totalorder (!%p202_p3), %s1163_s18, 1  ;;  %v1173_v0 = vmov (!%p202_p3), 0.0   ;;  %vm1174_vm0 = vmmov (!%p202_p3), 0   ;;  %s1175_s26 = smov (!%p202_p3), 125   ;;  %v1138_v9 = vld [vmem:[%s1351_s1] sm:$0xff] (!%p202_p3)   ;;  %vm271_vm3 = vcmask (!%p202_p3), 130048   ;;  %v556_v36 = vlaneseq (!%p202_p3) }
   0x7   : > { %205 = sbr.rel (%p202_p3) target bundleno = 740 (0x2e4), region = 40  ;;  %1035 = vmatprep.subr.bf16.mxu0 (!%p202_p3), %v1173_v0  ;;  %1041 = vmatprep.subr.bf16.mxu1 (!%p202_p3), %v1173_v0  ;;  %s1176_s27 = smov (!%p202_p3), 119   ;;  %v536_v10 = vld [vmem:[%s1352_s2] sm:$0xff] (!%p202_p3)  ;;  %v537_v11 = vld [vmem:[%s1352_s2 + $0x8] sm:$0xff] (!%p202_p3)  ;;  %v1179_v12 = vmov (!%p202_p3), 0   ;;  %v1140_v16 = vld [vmem:[%s1351_s1 + $0x18] sm:$0xff] (!%p202_p3)  }
   0x8   : > { %1037 = vmatprep.mubr.msk.bf16.mxu0 (!%p202_p3), %vm1174_vm0, %v1173_v0  ;;  %1043 = vmatprep.mubr.msk.bf16.mxu1 (!%p202_p3), %vm1174_vm0, %v1173_v0  ;;  %s1177_s30 = smov (!%p202_p3), 122   ;;  %s1178_s6 = smov (!%p202_p3), 116   ;;  %v1137_v14 = vld [vmem:[%s1351_s1 + $0x8] sm:$0xff] (!%p202_p3)   ;;  %v1139_v18 = vld [vmem:[%s1351_s1 + $0x10] sm:$0xff] (!%p202_p3)   ;;  %v1141_v20 = vld [vmem:[%s1351_s1 + $0x20] sm:$0xff] (!%p202_p3)   ;;  %v557_v43 = vand.u32 (!%p202_p3), 127, %v556_v36 }
   0x9   : > { %1130 = vset.pattern.permute.xlu0 (!%p202_p3), %v1179_v12  ;;  %1131 = vset.pattern.permute.xlu1 (!%p202_p3), %v1179_v12  ;;  %s1181_s28 = smov (!%p202_p3), 127   ;;  %s1182_s29 = smov (!%p202_p3), 124   ;;  %v1146_v12 = vld [vmem:[%s1353_s3 + $0x20] sm:$0xff] (!%p202_p3)   ;;  %vm875_vm10 = vcmask (!%p202_p3), 125952  }
   0xa   : > { %v558_v46 = vadd.s32 (!%p202_p3), 4294967294, %v557_v43  ;;  %s1183_s9 = smov (!%p202_p3), 120  }
   0xc   : > { %vm559_vm4 = vcmp.ge.s32.totalorder (!%p202_p3), %v558_v46, 0  ;;  %vm560_vm5 = vcmp.lt.s32.totalorder (!%p202_p3), %v558_v46, 16 }
   0xd   : > { %vm561_vm7 = vmand (!%p202_p3), %vm559_vm4, %vm560_vm5 }
   0xe   : > { %s1361_s18 = smov (!%p232_p4, %s1163_s18), 1  ;;  %vm987_vm9 = vmpackc.low %vm561_vm7, %vm561_vm7 }
   0xf   : > { %s1007_s22 = sshll.u32 %s1361_s18, 3 }
  0x10   : > { %s236_s25 = scalar_lea.vmem %s1350_s0, %s1007_s22  ;;  %s244_s24 = scalar_lea.vmem %s1355_s5, %s1007_s22 }
  0x11   : > { %v1012_v1 = vld [vmem:[%s236_s25] sm:$0xff]  }
  0x12   : > { %v1246_v2 = vunpack.c.l.bf16 %v1012_v1  ;;  %v1248_v3 = vunpack.c.h.bf16 %v1012_v1  ;;  %v1143_v1 = vld [vmem:[%s1353_s3] sm:$0xff]  }
  0x14   : > { %vm250_vm1 = vcmp.ge.f32.partialorder %v1246_v2, 0.0  ;;  %vm251_vm2 = vcmp.ge.f32.partialorder %v1248_v3, 0.0  ;;  %v252_v4 = vmul.f32 0.1, %v1246_v2  ;;  %v253_v5 = vmul.f32 0.1, %v1248_v3 }
  0x16   : > { %v254_v6 = vsel %vm250_vm1, %v1246_v2, %v252_v4  ;;  %v255_v7 = vsel %vm251_vm2, %v1248_v3, %v253_v5  ;;  %v844_v4 = vld [vmem:[%s1354_s4 + $0x8] sm:$0xff]  ;;  %v843_v5 = vld [vmem:[%s1354_s4] sm:$0xff] }
  0x17   : > { %v256_v8 = vpack.c.bf16 %v255_v7, %v254_v6  ;;  %v1132_v6 = vpack.i.bf16 %v1248_v3, %v1246_v2  ;;  %v1144_v2 = vld [vmem:[%s1353_s3 + $0x10] sm:$0xff]  }
  0x19   : > { %268 = vrot.lane.b32.xlu0 %v256_v8, %s1175_s26  ;;  %430 = vrot.lane.b32.xlu1 %v256_v8, %s1176_s27  ;;  %s1180_s27 = smov 126  }
  0x1a   : > { %1042 = vmatpush3.bf16.msra.mxu1 %v256_v8 }
  0x1b   : > { %1053 = vmatprep.subr.bf16.mxu1 %v1173_v0 }
  0x1d   : > { %373 = vrot.lane.b32.xlu0 %v256_v8, %s1177_s30  ;;  %487 = vrot.lane.b32.xlu1 %v256_v8, %s1178_s6  ;;  %v1142_v8 = vld [vmem:[%s1353_s3 + $0x8] sm:$0xff]  }
  0x1e   : > { %1044 = vmatmul.mubr.msk.bf16.vlgmr.msra.gmra.mrb[0].mxu1 %vm271_vm3, %v1138_v9 }
  0x1f   : > { %1055 = vmatprep.mubr.msk.bf16.mxu1 %vm1174_vm0, %v1173_v0 }
  0x21   : > { %540 = vperm.xlu0 %1130, %v536_v10   ;;  %545 = vperm.xlu1 %1131, %v537_v11   ;;  %v1145_v11 = vld [vmem:[%s1353_s3 + $0x18] sm:$0xff]  }
  0x8b   : > { %v269_v13 = vpop.permute.xlu0 %268  ;;  %v431_v15 = vpop.permute.xlu1 %430 }
  0x8c   : > { %1036 = vmatpush3.bf16.msra.mxu0 %v269_v13  ;;  %1054 = vmatpush3.bf16.msra.mxu1 %v431_v15 }
  0x8d   : > { %1047 = vmatprep.subr.bf16.mxu0 %v1173_v0  ;;  %1065 = vmatprep.subr.bf16.mxu1 %v1173_v0 }
  0x8f   : > { %1038 = vmatmul.mubr.msk.bf16.vlgmr.msra.gmra.mrb[0].mxu0 %vm271_vm3, %v1137_v14  ;;  %v374_v17 = vpop.permute.xlu0 %373  ;;  %1056 = vmatmul.mubr.msk.bf16.vlgmr.msra.gmra.mrb[4].mxu1 %vm271_vm3, %v1140_v16  ;;  %v488_v19 = vpop.permute.xlu1 %487 }
  0x90   : > { %1048 = vmatpush3.bf16.msra.mxu0 %v374_v17  ;;  %1049 = vmatprep.mubr.msk.bf16.mxu0 %vm1174_vm0, %v1173_v0 }
  0x91   : > { %1059 = vmatprep.subr.bf16.mxu0 %v1173_v0  ;;  %1067 = vmatprep.mubr.msk.bf16.mxu1 %vm1174_vm0, %v1173_v0 }
  0x97   : > { %1050 = vmatmul.mubr.msk.bf16.vlgmr.msra.gmra.mrb[4].mxu0 %vm271_vm3, %v1139_v18 }
  0x98   : > { %1060 = vmatpush3.bf16.msra.mxu0 %v488_v19  ;;  %1061 = vmatprep.mubr.msk.bf16.mxu0 %vm1174_vm0, %v1173_v0 }
  0x99   : > { %1071 = vmatprep.subr.bf16.mxu0 %v1173_v0 }
  0x9f   : > { %1062 = vmatmul.mubr.msk.bf16.vlgmr.msra.gmra.mrb[8].mxu0 %vm271_vm3, %v1141_v20 }
  0xa0   : > { %1073 = vmatprep.mubr.msk.bf16.mxu0 %vm1174_vm0, %v1173_v0  ;;  %v541_v47 = vpop.permute.xlu0 %540  ;;  %v546_v51 = vpop.permute.xlu1 %545 }
  0xf1   : > { %v358_v21 = vpop.f32.mrb[0].mxu1 }
  0xf2   : > { %v1045_v22 = vpop.f32.mrb[1].mxu1 }
  0xf3   : > { %v361_v23 = vpop.f32.mrb[2].mxu1 }
  0xf4   : > { %v1046_v24 = vpop.f32.mrb[3].mxu1 }
 0x162   : > { %v309_v25 = vpop.f32.mrb[0].mxu0  ;;  %v470_v26 = vpop.f32.mrb[4].mxu1 }
 0x163   : > { %v359_v27 = vadd.f32 %v358_v21, %v309_v25  ;;  %v1039_v28 = vpop.f32.mrb[1].mxu0  ;;  %v1057_v29 = vpop.f32.mrb[5].mxu1 }
 0x164   : > { %v312_v30 = vpop.f32.mrb[2].mxu0  ;;  %v473_v31 = vpop.f32.mrb[6].mxu1 }
 0x165   : > { %v362_v32 = vadd.f32 %v361_v23, %v312_v30  ;;  %v1040_v33 = vpop.f32.mrb[3].mxu0  ;;  %v1058_v34 = vpop.f32.mrb[7].mxu1 }
 0x16a   : > { %v413_v35 = vpop.f32.mrb[4].mxu0 }
 0x16b   : > { %v420_v37 = vadd.f32 %v413_v35, %v359_v27  ;;  %v1051_v38 = vpop.f32.mrb[5].mxu0 }
 0x16c   : > { %v416_v39 = vpop.f32.mrb[6].mxu0 }
 0x16d   : > { %v421_v40 = vadd.f32 %v416_v39, %v362_v32  ;;  %v477_v41 = vadd.f32 %v470_v26, %v420_v37  ;;  %v1052_v42 = vpop.f32.mrb[7].mxu0 }
 0x16f   : > { %v478_v44 = vadd.f32 %v473_v31, %v421_v40 }
 0x172   : > { %v527_v45 = vpop.f32.mrb[8].mxu0 }
 0x173   : > { %v534_v48 = vadd.f32 %v527_v45, %v477_v41  ;;  %v1063_v49 = vpop.f32.mrb[9].mxu0 }
 0x174   : > { %v530_v50 = vpop.f32.mrb[10].mxu0 }
 0x175   : > { %v535_v52 = vadd.f32 %v530_v50, %v478_v44  ;;  %v548_v53 = vadd.f32 %v541_v47, %v534_v48  ;;  %v1064_v54 = vpop.f32.mrb[11].mxu0 }
 0x177   : > { %vm550_vm6 = vcmp.ge.f32.partialorder %v548_v53, 0.0  ;;  %v552_v55 = vmul.f32 0.1, %v548_v53  ;;  %v549_v56 = vadd.f32 %v546_v51, %v535_v52 }
 0x179   : > { %v554_v57 = vsel %vm550_vm6, %v548_v53, %v552_v55  ;;  %vm551_vm8 = vcmp.ge.f32.partialorder %v549_v56, 0.0  ;;  %v553_v58 = vmul.f32 0.1, %v549_v56 }
 0x17a   : > { %v562_v60 = vsel %vm561_vm7, %v554_v57, 0.0 }
 0x17b   : > { %v555_v59 = vsel %vm551_vm8, %v549_v56, %v553_v58 }
 0x17c   : > { %v563_v61 = vsel %vm561_vm7, %v555_v59, 0.0  ;;  %v988_v62 = vpack.c.bf16 %v555_v59, %v554_v57 }
 0x17d   : > { %v564_v63 = vpack.c.bf16 %v563_v61, %v562_v60 }
 0x17e   : > { %1072 = vmatpush3.bf16.msk.msra.mxu0 %vm987_vm9, %v988_v62 }
 0x17f   : > { %680 = vrot.lane.b32.xlu0 %v564_v63, %s1180_s27  ;;  %576 = vrot.lane.b32.xlu1 %v564_v63, %s1181_s28 }
 0x180   : > { %1083 = vmatprep.subr.bf16.mxu0 %v1173_v0 }
 0x181   : > { %1074 = vmatmul.mubr.msk.bf16.vlgmr.msra.gmra.mrb[12].mxu0 %vm271_vm3, %v1143_v1 }
 0x182   : > { %1085 = vmatprep.mubr.msk.bf16.mxu0 %vm1174_vm0, %v1173_v0 }
 0x183   : > { %794 = vrot.lane.b32.xlu0 %v564_v63, %s1182_s29  ;;  %737 = vrot.lane.b32.xlu1 %v564_v63, %s1175_s26 }
 0x187   : > { %852 = vperm.xlu0 %1130, %v844_v4   ;;  %847 = vperm.xlu1 %1131, %v843_v5  }
 0x18b   : > { %1133 = vrot.lane.b32.xlu1 %v1132_v6, %s1183_s9 }
 0x1f1   : > { %v577_v7 = vpop.permute.xlu1 %576  ;;  %v681_v9 = vpop.permute.xlu0 %680 }
 0x1f2   : > { %1066 = vmatpush3.bf16.msra.mxu1 %v577_v7 }
 0x1f3   : > { %1077 = vmatprep.subr.bf16.mxu1 %v1173_v0 }
 0x1f5   : > { %1068 = vmatmul.mubr.msk.bf16.vlgmr.msra.gmra.mrb[8].mxu1 %vm271_vm3, %v1142_v8  ;;  %v738_v10 = vpop.permute.xlu1 %737  ;;  %v795_v3 = vpop.permute.xlu0 %794 }
 0x1f6   : > { %1078 = vmatpush3.bf16.msra.mxu1 %v681_v9  ;;  %1084 = vmatpush3.bf16.msra.mxu0 %v738_v10 }
 0x1f7   : > { %1079 = vmatprep.mubr.msk.bf16.mxu1 %vm1174_vm0, %v1173_v0  ;;  %1089 = vmatprep.subr.bf16.mxu1 %v1173_v0 }
 0x1f9   : > { %1086 = vmatmul.mubr.msk.bf16.vlgmr.msra.gmra.mrb[16].mxu0 %vm271_vm3, %v1145_v11 }
 0x1fd   : > { %1080 = vmatmul.mubr.msk.bf16.vlgmr.msra.gmra.mrb[12].mxu1 %vm271_vm3, %v1144_v2 }
 0x1fe   : > { %1090 = vmatpush3.bf16.msra.mxu1 %v795_v3  ;;  %1091 = vmatprep.mubr.msk.bf16.mxu1 %vm1174_vm0, %v1173_v0 }
 0x205   : > { %1092 = vmatmul.mubr.msk.bf16.vlgmr.msra.gmra.mrb[16].mxu1 %vm271_vm3, %v1146_v12 }
 0x206   : > { %v848_v29 = vpop.permute.xlu1 %847  ;;  %v853_v43 = vpop.permute.xlu0 %852 }
 0x20a   : > { %v1134_v35 = vpop.permute.xlu1 %1133 }
 0x254   : > { %v665_v13 = vpop.f32.mrb[12].mxu0 }
 0x255   : > { %v1075_v14 = vpop.f32.mrb[13].mxu0 }
 0x256   : > { %v668_v15 = vpop.f32.mrb[14].mxu0 }
 0x257   : > { %v1076_v16 = vpop.f32.mrb[15].mxu0 }
 0x2c8   : > { %v616_v17 = vpop.f32.mrb[8].mxu1 }
 0x2c9   : > { %v1069_v18 = vpop.f32.mrb[9].mxu1  ;;  %v666_v19 = vadd.f32 %v665_v13, %v616_v17 }
 0x2ca   : > { %v619_v20 = vpop.f32.mrb[10].mxu1 }
 0x2cb   : > { %v1070_v21 = vpop.f32.mrb[11].mxu1  ;;  %v669_v22 = vadd.f32 %v668_v15, %v619_v20 }
 0x2cc   : > { %v777_v23 = vpop.f32.mrb[16].mxu0 }
 0x2cd   : > { %v1087_v24 = vpop.f32.mrb[17].mxu0 }
 0x2ce   : > { %v780_v25 = vpop.f32.mrb[18].mxu0 }
 0x2cf   : > { %v1088_v0 = vpop.f32.mrb[19].mxu0 }
 0x2d0   : > { %v720_v26 = vpop.f32.mrb[12].mxu1 }
 0x2d1   : > { %v727_v27 = vadd.f32 %v720_v26, %v666_v19  ;;  %v1081_v28 = vpop.f32.mrb[13].mxu1 }
 0x2d2   : > { %v723_v30 = vpop.f32.mrb[14].mxu1 }
 0x2d3   : > { %v728_v31 = vadd.f32 %v723_v30, %v669_v22  ;;  %v784_v32 = vadd.f32 %v777_v23, %v727_v27  ;;  %v1082_v33 = vpop.f32.mrb[15].mxu1 }
 0x2d5   : > { %v785_v34 = vadd.f32 %v780_v25, %v728_v31 }
 0x2d8   : > { %v834_v36 = vpop.f32.mrb[16].mxu1 }
 0x2d9   : > { %v841_v37 = vadd.f32 %v834_v36, %v784_v32  ;;  %v1093_v38 = vpop.f32.mrb[17].mxu1 }
 0x2da   : > { %v837_v39 = vpop.f32.mrb[18].mxu1 }
 0x2db   : > { %v855_v40 = vadd.f32 %v848_v29, %v841_v37  ;;  %v842_v41 = vadd.f32 %v837_v39, %v785_v34  ;;  %v1094_v42 = vpop.f32.mrb[19].mxu1 }
 0x2dd   : > { %v1147_v44 = vadd.low.f32.bf16 %v855_v40, %v1134_v35  ;;  %v856_v45 = vadd.f32 %v853_v43, %v842_v41 }
 0x2df   : > { %v1009_v46 = vpack.c.bf16 %v1147_v44, %v1147_v44  ;;  %v1148_v47 = vadd.high.f32.bf16 %v856_v45, %v1134_v35 }
 0x2e1   : > { %876 = vst.msk [vmem:[%s244_s24] sm:$0xf] %vm875_vm10, %v1009_v46  ;;  %v1010_v48 = vpack.c.bf16 %v1148_v47, %v1148_v47 }
 0x2e3   : > { %877 = vst.msk [vmem:[%s244_s24 + $0x4] sm:$0xf] %vm875_vm10, %v1010_v48 }
 0x2e4 PF: > { %s15_s20 = sadd.s32 1, %s1171_s20   ;;  %s1356_s18 = smov %s1167_s19 }
 0x2e5   : > { %p12_p5 = scmp.ge.s32.totalorder %s15_s20, 4   ;;  %s1357_s19 = smov %s1359_s21 }
 0x2e7   :  { %14 = sbr.rel (!%p12_p5) target bundleno = 2 (0x2), region = 78 }

// kernel: _lambda_.24
= control target key start
LH: loop header
LB: loop body
LE: loop exit
PB: predicated region body
PF: predicated region fallthrough
CT: control target
= control target key end

     0   :  { %s624_s12 = smov 0   ;;  %s626_s13 = smov 0   ;;  %s687_s0 = inlined_call_operand.vmem [shape: bf16[2,16,18], index: 0, kind: input, shape index: {}]   ;;  %s688_s1 = inlined_call_operand.vmem [shape: bf16[4,8,16], index: 1, kind: input, shape index: {}]   ;;  %s689_s2 = inlined_call_operand.vmem [shape: f32[8,1], index: 2, kind: input, shape index: {}]   ;;  %s690_s3 = inlined_call_operand.vmem [shape: bf16[2,2,8,16], index: 3, kind: output, shape index: {}]  }
   0x1   :  { %s628_s14 = smov 0  }
   0x2 LB: > { %s25_s15 = sadd.s32 1, %s593_s13  ;;  %p491_p0 = scmp.ge.s32.totalorder %s597_s14, 1  ;;  %s597_s14 = sphi %s628_s14, %s13_s14   ;;  %s593_s13 = sphi %s626_s13, %s692_s13   ;;  %s589_s12 = sphi %s624_s12, %s691_s12  }
   0x3   : > { %p27_p1 = scmp.ge.s32.totalorder %s25_s15, 2  ;;  %p151_p2 = scmp.lt.s32.totalorder %s597_s14, 3 }
   0x5   : > { %s694_s15 = smov (%p27_p1, %s25_s15), 0  ;;  %p152_p3 = pnand %p491_p0, %p151_p2 }
   0x6   : > { %p178_p4 = scmp.lt.s32.totalorder (!%p152_p3), %s589_s12, 1  ;;  %v599_v0 = vmov (!%p152_p3), 0.0   ;;  %vm600_vm0 = vmmov (!%p152_p3), 0   ;;  %v298_v9 = vld [vmem:[%s689_s2] sm:$0xff] (!%p152_p3)  ;;  %v601_v10 = vmov (!%p152_p3), 0   ;;  %s602_s22 = smov (!%p152_p3), 127  }
   0x7   : > { %155 = sbr.rel (%p152_p3) target bundleno = 370 (0x172), region = 32  ;;  %520 = vmatprep.subr.bf16.mxu0 (!%p152_p3), %v599_v0  ;;  %522 = vmatprep.mubr.msk.bf16.mxu0 (!%p152_p3), %vm600_vm0, %v599_v0  ;;  %v497_v11 = vld [vmem:[%s688_s1 + $0xc] sm:$0xf] (!%p152_p3)  ;;  %vm207_vm3 = vcmask (!%p152_p3), 130048   ;;  %s603_s25 = smov (!%p152_p3), 126   ;;  %vm306_vm4 = vcmask (!%p152_p3), 125952  }
   0x8   : > { %526 = vmatprep.subr.bf16.mxu1 (!%p152_p3), %v599_v0  ;;  %528 = vmatprep.mubr.msk.bf16.mxu1 (!%p152_p3), %vm600_vm0, %v599_v0  ;;  %v496_v13 = vld [vmem:[%s688_s1 + $0x4] sm:$0xf] (!%p152_p3)  ;;  %v500_v14 = vld [vmem:[%s688_s1 + $0x8] sm:$0xf] (!%p152_p3)  ;;  %v308_v16 = vld [vmem:[%s688_s1] sm:$0xf] (!%p152_p3) }
   0x9   : > { %573 = vset.pattern.permute.xlu1 (!%p152_p3), %v601_v10  ;;  %574 = vset.pattern.permute.xlu0 (!%p152_p3), %v601_v10 }
   0xa   : > { %301 = vperm.xlu1 (!%p152_p3), %573, %v298_v9  }
   0xe   : > { %s696_s12 = smov (!%p178_p4, %s589_s12), 1  ;;  %403 = vperm.xlu1 %573, %v298_v9  }
   0xf   : > { %s506_s16 = sshll.u32 %s696_s12, 3 }
  0x10   : > { %s182_s19 = scalar_lea.vmem %s687_s0, %s506_s16  ;;  %s190_s7 = scalar_lea.vmem %s690_s3, %s506_s16 }
  0x11   : > { %v509_v1 = vld [vmem:[%s182_s19] sm:$0xff]  }
  0x12   : > { %v510_v2 = vunpack.c.l.bf16 %v509_v1  ;;  %v511_v3 = vunpack.c.h.bf16 %v509_v1 }
  0x14   : > { %vm196_vm1 = vcmp.ge.f32.partialorder %v510_v2, 0.0  ;;  %vm197_vm2 = vcmp.ge.f32.partialorder %v511_v3, 0.0  ;;  %v198_v4 = vmul.f32 0.1, %v510_v2  ;;  %v199_v5 = vmul.f32 0.1, %v511_v3 }
  0x16   : > { %v200_v6 = vsel %vm196_vm1, %v510_v2, %v198_v4  ;;  %v201_v7 = vsel %vm197_vm2, %v511_v3, %v199_v5 }
  0x17   : > { %v202_v8 = vpack.c.bf16 %v201_v7, %v200_v6 }
  0x19   : > { %252 = vrot.lane.b32.xlu0 %v202_v8, %s602_s22  ;;  %521 = vmatpush3.bf16.msra.mxu0 %v202_v8 }
  0x1a   : > { %532 = vmatprep.subr.bf16.mxu0 %v599_v0 }
  0x1c   : > { %523 = vmatmul.mubr.msk.bf16.vlgmr.msra.gmra.mrb[0].mxu0 %vm207_vm3, %v497_v11 }
  0x1d   : > { %354 = vrot.lane.b32.xlu0 %v202_v8, %s603_s25  ;;  %534 = vmatprep.mubr.msk.bf16.mxu0 %vm600_vm0, %v599_v0 }
  0x89   : > { %v302_v21 = vpop.permute.xlu1 %301 }
  0x8b   : > { %v253_v12 = vpop.permute.xlu0 %252 }
  0x8c   : > { %527 = vmatpush3.bf16.msra.mxu1 %v253_v12  ;;  %533 = vmatpush3.bf16.msra.mxu0 %v253_v12 }
  0x8d   : > { %538 = vmatprep.subr.bf16.mxu1 %v599_v0  ;;  %v404_v36 = vpop.permute.xlu1 %403 }
  0x8f   : > { %529 = vmatmul.mubr.msk.bf16.vlgmr.msra.gmra.mrb[0].mxu1 %vm207_vm3, %v496_v13  ;;  %v355_v15 = vpop.permute.xlu0 %354  ;;  %535 = vmatmul.mubr.msk.bf16.vlgmr.msra.gmra.mrb[4].mxu0 %vm207_vm3, %v500_v14 }
  0x90   : > { %539 = vmatpush3.bf16.msra.mxu1 %v355_v15  ;;  %540 = vmatprep.mubr.msk.bf16.mxu1 %vm600_vm0, %v599_v0 }
  0x97   : > { %541 = vmatmul.mubr.msk.bf16.vlgmr.msra.gmra.mrb[4].mxu1 %vm207_vm3, %v308_v16 }
  0xef   : > { %v245_v17 = vpop.f32.mrb[0].mxu0 }
  0xf0   : > { %v524_v18 = vpop.f32.mrb[1].mxu0 }
  0xf1   : > { %v248_v19 = vpop.f32.mrb[2].mxu0 }
  0xf2   : > { %v525_v20 = vpop.f32.mrb[3].mxu0 }
 0x162   : > { %v292_v22 = vpop.f32.mrb[0].mxu1  ;;  %v348_v23 = vpop.f32.mrb[4].mxu0 }
 0x163   : > { %v293_v24 = vadd.f32 %v292_v22, %v245_v17  ;;  %v530_v25 = vpop.f32.mrb[1].mxu1  ;;  %v536_v26 = vpop.f32.mrb[5].mxu0 }
 0x164   : > { %v295_v27 = vpop.f32.mrb[2].mxu1  ;;  %v351_v28 = vpop.f32.mrb[6].mxu0 }
 0x165   : > { %v304_v29 = vadd.f32 %v302_v21, %v293_v24  ;;  %v531_v30 = vpop.f32.mrb[3].mxu1  ;;  %v537_v31 = vpop.f32.mrb[7].mxu0 }
 0x167   : > { %v305_v32 = vpack.c.bf16 %v304_v29, %v304_v29 }
 0x169   : > { %307 = vst.msk [vmem:[%s190_s7] sm:$0xf] %vm306_vm4, %v305_v32 }
 0x16a   : > { %v394_v33 = vpop.f32.mrb[4].mxu1 }
 0x16b   : > { %v395_v34 = vadd.f32 %v394_v33, %v348_v23  ;;  %v542_v35 = vpop.f32.mrb[5].mxu1 }
 0x16c   : > { %v397_v37 = vpop.f32.mrb[6].mxu1 }
 0x16d   : > { %v406_v38 = vadd.f32 %v404_v36, %v395_v34  ;;  %v543_v39 = vpop.f32.mrb[7].mxu1 }
 0x16f   : > { %v407_v40 = vpack.c.bf16 %v406_v38, %v406_v38 }
 0x171   : > { %503 = vst.msk [vmem:[%s190_s7 + $0x4] sm:$0xf] %vm306_vm4, %v407_v40 }
 0x172 PF: > { %s13_s14 = sadd.s32 1, %s597_s14   ;;  %s691_s12 = smov %s593_s13 }
 0x173   : > { %p10_p5 = scmp.ge.s32.totalorder %s13_s14, 4   ;;  %s692_s13 = smov %s694_s15 }
 0x175   :  { %12 = sbr.rel (!%p10_p5) target bundleno = 2 (0x2), region = 66 }

// kernel: _lambda_.25
= control target key start
LH: loop header
LB: loop body
LE: loop exit
PB: predicated region body
PF: predicated region fallthrough
CT: control target
= control target key end

     0   :  { %s808_s18 = smov 0   ;;  %s810_s19 = smov 0   ;;  %s913_s0 = inlined_call_operand.vmem [shape: bf16[2,8,36], index: 0, kind: input, shape index: {}]   ;;  %s914_s1 = inlined_call_operand.vmem [shape: bf16[3,8,8], index: 1, kind: input, shape index: {}]   ;;  %s915_s2 = inlined_call_operand.vmem [shape: f32[8,1], index: 2, kind: input, shape index: {}]   ;;  %s916_s3 = inlined_call_operand.vmem [shape: bf16[3,8,8], index: 3, kind: input, shape index: {}]   ;;  %s917_s4 = inlined_call_operand.vmem [shape: f32[8,1], index: 4, kind: input, shape index: {}]   ;;  %s918_s5 = inlined_call_operand.vmem [shape: bf16[2,8,32], index: 5, kind: output, shape index: {}]  }
   0x1   :  { %s812_s20 = smov 0  }
   0x2 LB: > { %s27_s21 = sadd.s32 1, %s767_s19  ;;  %p655_p0 = scmp.ge.s32.totalorder %s771_s20, 1  ;;  %s771_s20 = sphi %s812_s20, %s15_s20   ;;  %s767_s19 = sphi %s810_s19, %s920_s19   ;;  %s763_s18 = sphi %s808_s18, %s919_s18  }
   0x3   : > { %p29_p1 = scmp.ge.s32.totalorder %s27_s21, 2  ;;  %p200_p2 = scmp.lt.s32.totalorder %s771_s20, 3 }
   0x5   : > { %s922_s21 = smov (%p29_p1, %s27_s21), 0  ;;  %p201_p3 = pnand %p655_p0, %p200_p2 }
   0x6   : > { %p229_p4 = scmp.lt.s32.totalorder (!%p201_p3), %s763_s18, 1  ;;  %v773_v0 = vmov (!%p201_p3), 0.0   ;;  %vm774_vm0 = vmmov (!%p201_p3), 0   ;;  %vm257_vm2 = vcmask (!%p201_p3), 1043456   ;;  %v398_v6 = vld [vmem:[%s915_s2] sm:$0xff] (!%p201_p3)  ;;  %s775_s28 = smov (!%p201_p3), 127   ;;  %v408_v20 = vlaneseq (!%p201_p3) }
   0x7   : > { %204 = sbr.rel (%p201_p3) target bundleno = 722 (0x2d2), region = 40  ;;  %682 = vmatprep.subr.bf16.mxu0 (!%p201_p3), %v773_v0  ;;  %688 = vmatprep.subr.bf16.mxu1 (!%p201_p3), %v773_v0  ;;  %v776_v8 = vmov (!%p201_p3), 0   ;;  %vm253_vm3 = vcmask (!%p201_p3), 64512   ;;  %v247_v9 = vld [vmem:[%s914_s1] sm:$0xf] (!%p201_p3)  ;;  %s777_s6 = smov (!%p201_p3), 126  }
   0x8   : > { %684 = vmatprep.mubr.msk.bf16.mxu0 (!%p201_p3), %vm774_vm0, %v773_v0  ;;  %690 = vmatprep.mubr.msk.bf16.mxu1 (!%p201_p3), %vm774_vm0, %v773_v0  ;;  %v658_v12 = vld [vmem:[%s914_s1 + $0x4] sm:$0xf] (!%p201_p3)  ;;  %v661_v15 = vld [vmem:[%s914_s1 + $0x8] sm:$0xf] (!%p201_p3)  ;;  %v409_v25 = vand.u32 (!%p201_p3), 127, %v408_v20  ;;  %vm578_vm8 = vcmask (!%p201_p3), 257024  }
   0x9   : > { %747 = vset.pattern.permute.xlu1 (!%p201_p3), %v776_v8  ;;  %748 = vset.pattern.permute.xlu0 (!%p201_p3), %v776_v8  ;;  %v565_v40 = vld [vmem:[%s917_s4] sm:$0xff] (!%p201_p3)  ;;  %v666_v47 = vld [vmem:[%s916_s3 + $0x8] sm:$0xf] (!%p201_p3) }
   0xa   : > { %401 = vperm.xlu1 (!%p201_p3), %747, %v398_v6   ;;  %v410_v27 = vadd.s32 (!%p201_p3), 4294967295, %v409_v25  ;;  %v416_v41 = vld [vmem:[%s916_s3] sm:$0xf] (!%p201_p3)  ;;  %v663_v45 = vld [vmem:[%s916_s3 + $0x4] sm:$0xf] (!%p201_p3) }
   0xc   : > { %vm411_vm4 = vcmp.ge.s32.totalorder (!%p201_p3), %v410_v27, 0  ;;  %vm412_vm5 = vcmp.lt.s32.totalorder (!%p201_p3), %v410_v27, 32 }
   0xd   : > { %vm413_vm7 = vmand (!%p201_p3), %vm411_vm4, %vm412_vm5 }
   0xe   : > { %s924_s18 = smov (!%p229_p4, %s763_s18), 1 }
   0xf   : > { %s656_s22 = sshll.u32 %s924_s18, 2 }
  0x10   : > { %s232_s25 = scalar_lea.vmem %s913_s0, %s656_s22  ;;  %s239_s26 = scalar_lea.vmem %s918_s5, %s656_s22 }
  0x11   : > { %v241_v1 = vld [vmem:[%s232_s25] sm:$0xf] }
  0x12   : > { %v840_v2 = vunpack.c.l.bf16 %v241_v1 }
  0x14   : > { %vm243_vm1 = vcmp.ge.f32.partialorder %v840_v2, 0.0  ;;  %v244_v3 = vmul.f32 0.1, %v840_v2 }
  0x16   : > { %v245_v4 = vsel %vm243_vm1, %v840_v2, %v244_v3 }
  0x17   : > { %v246_v5 = vpack.c.bf16 %v245_v4, %v245_v4 }
  0x19   : > { %251 = vrot.lane.b32.xlu0 %v246_v5, %s775_s28  ;;  %v305_v7 = vsel %vm257_vm2, %v246_v5, 0 }
  0x1a   : > { %689 = vmatpush3.bf16.msra.mxu1 %v305_v7 }
  0x1b   : > { %700 = vmatprep.subr.bf16.mxu1 %v773_v0 }
  0x1d   : > { %349 = vrot.lane.b32.xlu0 %v246_v5, %s777_s6  ;;  %691 = vmatmul.mubr.msk.bf16.vlgmr.msra.gmra.mrb[0].mxu1 %vm253_vm3, %v247_v9 }
  0x1e   : > { %702 = vmatprep.mubr.msk.bf16.mxu1 %vm774_vm0, %v773_v0 }
  0x89   : > { %v402_v29 = vpop.permute.xlu1 %401 }
  0x8b   : > { %v252_v10 = vpop.permute.xlu0 %251 }
  0x8c   : > { %v259_v11 = vsel %vm257_vm2, %v252_v10, 0 }
  0x8d   : > { %683 = vmatpush3.bf16.msra.mxu0 %v259_v11 }
  0x8e   : > { %694 = vmatprep.subr.bf16.mxu0 %v773_v0 }
  0x8f   : > { %v350_v13 = vpop.permute.xlu0 %349 }
  0x90   : > { %685 = vmatmul.mubr.msk.bf16.vlgmr.msra.gmra.mrb[0].mxu0 %vm253_vm3, %v658_v12  ;;  %v355_v14 = vsel %vm257_vm2, %v350_v13, 0 }
  0x91   : > { %695 = vmatpush3.bf16.msra.mxu0 %v355_v14  ;;  %696 = vmatprep.mubr.msk.bf16.mxu0 %vm774_vm0, %v773_v0 }
  0x92   : > { %706 = vmatprep.subr.bf16.mxu0 %v773_v0 }
  0x98   : > { %697 = vmatmul.mubr.msk.bf16.vlgmr.msra.gmra.mrb[4].mxu0 %vm253_vm3, %v661_v15 }
  0x99   : > { %708 = vmatprep.mubr.msk.bf16.mxu0 %vm774_vm0, %v773_v0 }
  0xf0   : > { %v341_v16 = vpop.f32.mrb[0].mxu1 }
  0xf1   : > { %v692_v17 = vpop.f32.mrb[1].mxu1 }
  0xf2   : > { %v344_v18 = vpop.f32.mrb[2].mxu1 }
  0xf3   : > { %v693_v19 = vpop.f32.mrb[3].mxu1 }
 0x163   : > { %v295_v21 = vpop.f32.mrb[0].mxu0 }
 0x164   : > { %v342_v22 = vadd.f32 %v341_v16, %v295_v21  ;;  %v686_v23 = vpop.f32.mrb[1].mxu0 }
 0x165   : > { %v298_v24 = vpop.f32.mrb[2].mxu0 }
 0x166   : > { %v687_v26 = vpop.f32.mrb[3].mxu0 }
 0x16b   : > { %v391_v28 = vpop.f32.mrb[4].mxu0 }
 0x16c   : > { %v397_v30 = vadd.f32 %v391_v28, %v342_v22  ;;  %v698_v31 = vpop.f32.mrb[5].mxu0 }
 0x16d   : > { %v394_v32 = vpop.f32.mrb[6].mxu0 }
 0x16e   : > { %v404_v33 = vadd.f32 %v402_v29, %v397_v30  ;;  %v699_v34 = vpop.f32.mrb[7].mxu0 }
 0x170   : > { %vm405_vm6 = vcmp.ge.f32.partialorder %v404_v33, 0.0  ;;  %v406_v35 = vmul.f32 0.1, %v404_v33 }
 0x172   : > { %v407_v36 = vsel %vm405_vm6, %v404_v33, %v406_v35 }
 0x173   : > { %v414_v37 = vsel %vm413_vm7, %v407_v36, 0.0 }
 0x174   : > { %v415_v38 = vpack.c.bf16 %v414_v37, %v414_v37 }
 0x176   : > { %516 = vrot.lane.b32.xlu0 %v415_v38, %s777_s6  ;;  %420 = vrot.lane.b32.xlu1 %v415_v38, %s775_s28  ;;  %v472_v39 = vsel %vm257_vm2, %v415_v38, 0 }
 0x177   : > { %707 = vmatpush3.bf16.msra.mxu0 %v472_v39 }
 0x17a   : > { %568 = vperm.xlu1 %747, %v565_v40   ;;  %709 = vmatmul.mubr.msk.bf16.vlgmr.msra.gmra.mrb[8].mxu0 %vm253_vm3, %v416_v41 }
 0x17b   : > { %573 = vrot.lane.b32.xlu0 %v840_v2, %s777_s6 }
 0x1e8   : > { %v421_v42 = vpop.permute.xlu1 %420  ;;  %v517_v44 = vpop.permute.xlu0 %516 }
 0x1e9   : > { %v426_v43 = vsel %vm257_vm2, %v421_v42, 0  ;;  %v522_v46 = vsel %vm257_vm2, %v517_v44, 0 }
 0x1ea   : > { %701 = vmatpush3.bf16.msra.mxu1 %v426_v43 }
 0x1eb   : > { %712 = vmatprep.subr.bf16.mxu1 %v773_v0 }
 0x1ed   : > { %703 = vmatmul.mubr.msk.bf16.vlgmr.msra.gmra.mrb[4].mxu1 %vm253_vm3, %v663_v45  ;;  %v574_v61 = vpop.permute.xlu0 %573 }
 0x1ee   : > { %713 = vmatpush3.bf16.msra.mxu1 %v522_v46  ;;  %714 = vmatprep.mubr.msk.bf16.mxu1 %vm774_vm0, %v773_v0 }
 0x1f5   : > { %715 = vmatmul.mubr.msk.bf16.vlgmr.msra.gmra.mrb[8].mxu1 %vm253_vm3, %v666_v47 }
 0x1f9   : > { %v569_v58 = vpop.permute.xlu1 %568 }
 0x24d   : > { %v508_v48 = vpop.f32.mrb[8].mxu0 }
 0x24e   : > { %v710_v49 = vpop.f32.mrb[9].mxu0 }
 0x24f   : > { %v511_v50 = vpop.f32.mrb[10].mxu0 }
 0x250   : > { %v711_v51 = vpop.f32.mrb[11].mxu0 }
 0x2c0   : > { %v462_v52 = vpop.f32.mrb[4].mxu1 }
 0x2c1   : > { %v704_v53 = vpop.f32.mrb[5].mxu1  ;;  %v509_v54 = vadd.f32 %v508_v48, %v462_v52 }
 0x2c2   : > { %v465_v55 = vpop.f32.mrb[6].mxu1 }
 0x2c3   : > { %v705_v56 = vpop.f32.mrb[7].mxu1 }
 0x2c8   : > { %v558_v57 = vpop.f32.mrb[8].mxu1 }
 0x2c9   : > { %v564_v59 = vadd.f32 %v558_v57, %v509_v54  ;;  %v716_v60 = vpop.f32.mrb[9].mxu1 }
 0x2ca   : > { %v561_v62 = vpop.f32.mrb[10].mxu1 }
 0x2cb   : > { %v571_v63 = vadd.f32 %v569_v58, %v564_v59  ;;  %v717_v0 = vpop.f32.mrb[11].mxu1 }
 0x2cd   : > { %v576_v1 = vadd.f32 %v574_v61, %v571_v63 }
 0x2cf   : > { %v577_v2 = vpack.c.bf16 %v576_v1, %v576_v1 }
 0x2d1   : > { %579 = vst.msk [vmem:[%s239_s26] sm:$0xf] %vm578_vm8, %v577_v2 }
 0x2d2 PF: > { %s15_s20 = sadd.s32 1, %s771_s20   ;;  %s919_s18 = smov %s767_s19 }
 0x2d3   : > { %p12_p5 = scmp.ge.s32.totalorder %s15_s20, 4   ;;  %s920_s19 = smov %s922_s21 }
 0x2d5   :  { %14 = sbr.rel (!%p12_p5) target bundleno = 2 (0x2), region = 74 }

// kernel: _lambda_.26
= control target key start
LH: loop header
LB: loop body
LE: loop exit
PB: predicated region body
PF: predicated region fallthrough
CT: control target
= control target key end

     0   :  { %s814_s18 = smov 0   ;;  %s816_s19 = smov 0   ;;  %s914_s0 = inlined_call_operand.vmem [shape: bf16[2,8,40], index: 0, kind: input, shape index: {}]   ;;  %s915_s1 = inlined_call_operand.vmem [shape: bf16[3,8,8], index: 1, kind: input, shape index: {}]   ;;  %s916_s2 = inlined_call_operand.vmem [shape: f32[8,1], index: 2, kind: input, shape index: {}]   ;;  %s917_s3 = inlined_call_operand.vmem [shape: bf16[3,8,8], index: 3, kind: input, shape index: {}]   ;;  %s918_s4 = inlined_call_operand.vmem [shape: f32[8,1], index: 4, kind: input, shape index: {}]   ;;  %s919_s5 = inlined_call_operand.vmem [shape: bf16[2,8,32], index: 5, kind: output, shape index: {}]  }
   0x1   :  { %s818_s20 = smov 0  }
   0x2 LB: > { %s27_s21 = sadd.s32 1, %s770_s19  ;;  %p655_p0 = scmp.ge.s32.totalorder %s774_s20, 1  ;;  %s774_s20 = sphi %s818_s20, %s15_s20   ;;  %s770_s19 = sphi %s816_s19, %s921_s19   ;;  %s766_s18 = sphi %s814_s18, %s920_s18  }
   0x3   : > { %p29_p1 = scmp.ge.s32.totalorder %s27_s21, 2  ;;  %p200_p2 = scmp.lt.s32.totalorder %s774_s20, 3 }
   0x5   : > { %s923_s21 = smov (%p29_p1, %s27_s21), 0  ;;  %p201_p3 = pnand %p655_p0, %p200_p2 }
   0x6   : > { %p229_p4 = scmp.lt.s32.totalorder (!%p201_p3), %s766_s18, 1  ;;  %v776_v0 = vmov (!%p201_p3), 0.0   ;;  %vm777_vm0 = vmmov (!%p201_p3), 0   ;;  %vm257_vm2 = vcmask (!%p201_p3), 1043456   ;;  %v398_v6 = vld [vmem:[%s916_s2] sm:$0xff] (!%p201_p3)  ;;  %s778_s28 = smov (!%p201_p3), 125   ;;  %v408_v20 = vlaneseq (!%p201_p3) }
   0x7   : > { %204 = sbr.rel (%p201_p3) target bundleno = 722 (0x2d2), region = 40  ;;  %682 = vmatprep.subr.bf16.mxu0 (!%p201_p3), %v776_v0  ;;  %688 = vmatprep.subr.bf16.mxu1 (!%p201_p3), %v776_v0  ;;  %v779_v8 = vmov (!%p201_p3), 0   ;;  %vm253_vm3 = vcmask (!%p201_p3), 64512   ;;  %v247_v9 = vld [vmem:[%s915_s1] sm:$0xf] (!%p201_p3)  ;;  %s780_s6 = smov (!%p201_p3), 122  }
   0x8   : > { %684 = vmatprep.mubr.msk.bf16.mxu0 (!%p201_p3), %vm777_vm0, %v776_v0  ;;  %690 = vmatprep.mubr.msk.bf16.mxu1 (!%p201_p3), %vm777_vm0, %v776_v0  ;;  %v658_v12 = vld [vmem:[%s915_s1 + $0x4] sm:$0xf] (!%p201_p3)  ;;  %v661_v15 = vld [vmem:[%s915_s1 + $0x8] sm:$0xf] (!%p201_p3)  ;;  %v409_v25 = vand.u32 (!%p201_p3), 127, %v408_v20  ;;  %s781_s11 = smov (!%p201_p3), 126  }
   0x9   : > { %750 = vset.pattern.permute.xlu1 (!%p201_p3), %v779_v8  ;;  %751 = vset.pattern.permute.xlu0 (!%p201_p3), %v779_v8  ;;  %s782_s12 = smov (!%p201_p3), 127   ;;  %v565_v40 = vld [vmem:[%s918_s4] sm:$0xff] (!%p201_p3)  ;;  %s783_s17 = smov (!%p201_p3), 124   ;;  %v666_v47 = vld [vmem:[%s917_s3 + $0x8] sm:$0xf] (!%p201_p3)  ;;  %vm578_vm8 = vcmask (!%p201_p3), 257024  }
   0xa   : > { %401 = vperm.xlu1 (!%p201_p3), %750, %v398_v6   ;;  %v410_v27 = vadd.s32 (!%p201_p3), 4294967295, %v409_v25  ;;  %v416_v41 = vld [vmem:[%s917_s3] sm:$0xf] (!%p201_p3)  ;;  %v663_v45 = vld [vmem:[%s917_s3 + $0x4] sm:$0xf] (!%p201_p3) }
   0xc   : > { %vm411_vm4 = vcmp.ge.s32.totalorder (!%p201_p3), %v410_v27, 0  ;;  %vm412_vm5 = vcmp.lt.s32.totalorder (!%p201_p3), %v410_v27, 32 }
   0xd   : > { %vm413_vm7 = vmand (!%p201_p3), %vm411_vm4, %vm412_vm5 }
   0xe   : > { %s925_s18 = smov (!%p229_p4, %s766_s18), 1 }
   0xf   : > { %s656_s22 = sshll.u32 %s925_s18, 2 }
  0x10   : > { %s232_s25 = scalar_lea.vmem %s914_s0, %s656_s22  ;;  %s239_s29 = scalar_lea.vmem %s919_s5, %s656_s22 }
  0x11   : > { %v241_v1 = vld [vmem:[%s232_s25] sm:$0xf] }
  0x12   : > { %v846_v2 = vunpack.c.l.bf16 %v241_v1 }
  0x14   : > { %vm243_vm1 = vcmp.ge.f32.partialorder %v846_v2, 0.0  ;;  %v244_v3 = vmul.f32 0.1, %v846_v2 }
  0x16   : > { %v245_v4 = vsel %vm243_vm1, %v846_v2, %v244_v3 }
  0x17   : > { %v246_v5 = vpack.c.bf16 %v245_v4, %v245_v4 }
  0x19   : > { %251 = vrot.lane.b32.xlu0 %v246_v5, %s778_s28  ;;  %v305_v7 = vsel %vm257_vm2, %v246_v5, 0 }
  0x1a   : > { %689 = vmatpush3.bf16.msra.mxu1 %v305_v7 }
  0x1b   : > { %700 = vmatprep.subr.bf16.mxu1 %v776_v0 }
  0x1d   : > { %349 = vrot.lane.b32.xlu0 %v246_v5, %s780_s6  ;;  %691 = vmatmul.mubr.msk.bf16.vlgmr.msra.gmra.mrb[0].mxu1 %vm253_vm3, %v247_v9 }
  0x1e   : > { %702 = vmatprep.mubr.msk.bf16.mxu1 %vm777_vm0, %v776_v0 }
  0x89   : > { %v402_v29 = vpop.permute.xlu1 %401 }
  0x8b   : > { %v252_v10 = vpop.permute.xlu0 %251 }
  0x8c   : > { %v259_v11 = vsel %vm257_vm2, %v252_v10, 0 }
  0x8d   : > { %683 = vmatpush3.bf16.msra.mxu0 %v259_v11 }
  0x8e   : > { %694 = vmatprep.subr.bf16.mxu0 %v776_v0 }
  0x8f   : > { %v350_v13 = vpop.permute.xlu0 %349 }
  0x90   : > { %685 = vmatmul.mubr.msk.bf16.vlgmr.msra.gmra.mrb[0].mxu0 %vm253_vm3, %v658_v12  ;;  %v355_v14 = vsel %vm257_vm2, %v350_v13, 0 }
  0x91   : > { %695 = vmatpush3.bf16.msra.mxu0 %v355_v14  ;;  %696 = vmatprep.mubr.msk.bf16.mxu0 %vm777_vm0, %v776_v0 }
  0x92   : > { %706 = vmatprep.subr.bf16.mxu0 %v776_v0 }
  0x98   : > { %697 = vmatmul.mubr.msk.bf16.vlgmr.msra.gmra.mrb[4].mxu0 %vm253_vm3, %v661_v15 }
  0x99   : > { %708 = vmatprep.mubr.msk.bf16.mxu0 %vm777_vm0, %v776_v0 }
  0xf0   : > { %v341_v16 = vpop.f32.mrb[0].mxu1 }
  0xf1   : > { %v692_v17 = vpop.f32.mrb[1].mxu1 }
  0xf2   : > { %v344_v18 = vpop.f32.mrb[2].mxu1 }
  0xf3   : > { %v693_v19 = vpop.f32.mrb[3].mxu1 }
 0x163   : > { %v295_v21 = vpop.f32.mrb[0].mxu0 }
 0x164   : > { %v342_v22 = vadd.f32 %v341_v16, %v295_v21  ;;  %v686_v23 = vpop.f32.mrb[1].mxu0 }
 0x165   : > { %v298_v24 = vpop.f32.mrb[2].mxu0 }
 0x166   : > { %v687_v26 = vpop.f32.mrb[3].mxu0 }
 0x16b   : > { %v391_v28 = vpop.f32.mrb[4].mxu0 }
 0x16c   : > { %v397_v30 = vadd.f32 %v391_v28, %v342_v22  ;;  %v698_v31 = vpop.f32.mrb[5].mxu0 }
 0x16d   : > { %v394_v32 = vpop.f32.mrb[6].mxu0 }
 0x16e   : > { %v404_v33 = vadd.f32 %v402_v29, %v397_v30  ;;  %v699_v34 = vpop.f32.mrb[7].mxu0 }
 0x170   : > { %vm405_vm6 = vcmp.ge.f32.partialorder %v404_v33, 0.0  ;;  %v406_v35 = vmul.f32 0.1, %v404_v33 }
 0x172   : > { %v407_v36 = vsel %vm405_vm6, %v404_v33, %v406_v35 }
 0x173   : > { %v414_v37 = vsel %vm413_vm7, %v407_v36, 0.0 }
 0x174   : > { %v415_v38 = vpack.c.bf16 %v414_v37, %v414_v37 }
 0x176   : > { %516 = vrot.lane.b32.xlu0 %v415_v38, %s781_s11  ;;  %420 = vrot.lane.b32.xlu1 %v415_v38, %s782_s12  ;;  %v472_v39 = vsel %vm257_vm2, %v415_v38, 0 }
 0x177   : > { %707 = vmatpush3.bf16.msra.mxu0 %v472_v39 }
 0x17a   : > { %568 = vperm.xlu1 %750, %v565_v40   ;;  %709 = vmatmul.mubr.msk.bf16.vlgmr.msra.gmra.mrb[8].mxu0 %vm253_vm3, %v416_v41 }
 0x17b   : > { %573 = vrot.lane.b32.xlu0 %v846_v2, %s783_s17 }
 0x1e8   : > { %v421_v42 = vpop.permute.xlu1 %420  ;;  %v517_v44 = vpop.permute.xlu0 %516 }
 0x1e9   : > { %v426_v43 = vsel %vm257_vm2, %v421_v42, 0  ;;  %v522_v46 = vsel %vm257_vm2, %v517_v44, 0 }
 0x1ea   : > { %701 = vmatpush3.bf16.msra.mxu1 %v426_v43 }
 0x1eb   : > { %712 = vmatprep.subr.bf16.mxu1 %v776_v0 }
 0x1ed   : > { %703 = vmatmul.mubr.msk.bf16.vlgmr.msra.gmra.mrb[4].mxu1 %vm253_vm3, %v663_v45  ;;  %v574_v61 = vpop.permute.xlu0 %573 }
 0x1ee   : > { %713 = vmatpush3.bf16.msra.mxu1 %v522_v46  ;;  %714 = vmatprep.mubr.msk.bf16.mxu1 %vm777_vm0, %v776_v0 }
 0x1f5   : > { %715 = vmatmul.mubr.msk.bf16.vlgmr.msra.gmra.mrb[8].mxu1 %vm253_vm3, %v666_v47 }
 0x1f9   : > { %v569_v58 = vpop.permute.xlu1 %568 }
 0x24d   : > { %v508_v48 = vpop.f32.mrb[8].mxu0 }
 0x24e   : > { %v710_v49 = vpop.f32.mrb[9].mxu0 }
 0x24f   : > { %v511_v50 = vpop.f32.mrb[10].mxu0 }
 0x250   : > { %v711_v51 = vpop.f32.mrb[11].mxu0 }
 0x2c0   : > { %v462_v52 = vpop.f32.mrb[4].mxu1 }
 0x2c1   : > { %v704_v53 = vpop.f32.mrb[5].mxu1  ;;  %v509_v54 = vadd.f32 %v508_v48, %v462_v52 }
 0x2c2   : > { %v465_v55 = vpop.f32.mrb[6].mxu1 }
 0x2c3   : > { %v705_v56 = vpop.f32.mrb[7].mxu1 }
 0x2c8   : > { %v558_v57 = vpop.f32.mrb[8].mxu1 }
 0x2c9   : > { %v564_v59 = vadd.f32 %v558_v57, %v509_v54  ;;  %v716_v60 = vpop.f32.mrb[9].mxu1 }
 0x2ca   : > { %v561_v62 = vpop.f32.mrb[10].mxu1 }
 0x2cb   : > { %v571_v63 = vadd.f32 %v569_v58, %v564_v59  ;;  %v717_v0 = vpop.f32.mrb[11].mxu1 }
 0x2cd   : > { %v576_v1 = vadd.f32 %v574_v61, %v571_v63 }
 0x2cf   : > { %v577_v2 = vpack.c.bf16 %v576_v1, %v576_v1 }
 0x2d1   : > { %579 = vst.msk [vmem:[%s239_s29] sm:$0xf] %vm578_vm8, %v577_v2 }
 0x2d2 PF: > { %s15_s20 = sadd.s32 1, %s774_s20   ;;  %s920_s18 = smov %s770_s19 }
 0x2d3   : > { %p12_p5 = scmp.ge.s32.totalorder %s15_s20, 4   ;;  %s921_s19 = smov %s923_s21 }
 0x2d5   :  { %14 = sbr.rel (!%p12_p5) target bundleno = 2 (0x2), region = 74 }

// kernel: _lambda_.27
= control target key start
LH: loop header
LB: loop body
LE: loop exit
PB: predicated region body
PF: predicated region fallthrough
CT: control target
= control target key end

     0   :  { %s814_s18 = smov 0   ;;  %s816_s19 = smov 0   ;;  %s914_s0 = inlined_call_operand.vmem [shape: bf16[2,8,44], index: 0, kind: input, shape index: {}]   ;;  %s915_s1 = inlined_call_operand.vmem [shape: bf16[3,8,8], index: 1, kind: input, shape index: {}]   ;;  %s916_s2 = inlined_call_operand.vmem [shape: f32[8,1], index: 2, kind: input, shape index: {}]   ;;  %s917_s3 = inlined_call_operand.vmem [shape: bf16[3,8,8], index: 3, kind: input, shape index: {}]   ;;  %s918_s4 = inlined_call_operand.vmem [shape: f32[8,1], index: 4, kind: input, shape index: {}]   ;;  %s919_s5 = inlined_call_operand.vmem [shape: bf16[2,8,32], index: 5, kind: output, shape index: {}]  }
   0x1   :  { %s818_s20 = smov 0  }
   0x2 LB: > { %s27_s21 = sadd.s32 1, %s770_s19  ;;  %p655_p0 = scmp.ge.s32.totalorder %s774_s20, 1  ;;  %s774_s20 = sphi %s818_s20, %s15_s20   ;;  %s770_s19 = sphi %s816_s19, %s921_s19   ;;  %s766_s18 = sphi %s814_s18, %s920_s18  }
   0x3   : > { %p29_p1 = scmp.ge.s32.totalorder %s27_s21, 2  ;;  %p200_p2 = scmp.lt.s32.totalorder %s774_s20, 3 }
   0x5   : > { %s923_s21 = smov (%p29_p1, %s27_s21), 0  ;;  %p201_p3 = pnand %p655_p0, %p200_p2 }
   0x6   : > { %p229_p4 = scmp.lt.s32.totalorder (!%p201_p3), %s766_s18, 1  ;;  %v776_v0 = vmov (!%p201_p3), 0.0   ;;  %vm777_vm0 = vmmov (!%p201_p3), 0   ;;  %vm257_vm2 = vcmask (!%p201_p3), 1043456   ;;  %v398_v6 = vld [vmem:[%s916_s2] sm:$0xff] (!%p201_p3)  ;;  %s778_s28 = smov (!%p201_p3), 123   ;;  %v408_v20 = vlaneseq (!%p201_p3) }
   0x7   : > { %204 = sbr.rel (%p201_p3) target bundleno = 722 (0x2d2), region = 40  ;;  %682 = vmatprep.subr.bf16.mxu0 (!%p201_p3), %v776_v0  ;;  %688 = vmatprep.subr.bf16.mxu1 (!%p201_p3), %v776_v0  ;;  %v779_v8 = vmov (!%p201_p3), 0   ;;  %vm253_vm3 = vcmask (!%p201_p3), 64512   ;;  %v247_v9 = vld [vmem:[%s915_s1] sm:$0xf] (!%p201_p3)  ;;  %s780_s6 = smov (!%p201_p3), 118  }
   0x8   : > { %684 = vmatprep.mubr.msk.bf16.mxu0 (!%p201_p3), %vm777_vm0, %v776_v0  ;;  %690 = vmatprep.mubr.msk.bf16.mxu1 (!%p201_p3), %vm777_vm0, %v776_v0  ;;  %v658_v12 = vld [vmem:[%s915_s1 + $0x4] sm:$0xf] (!%p201_p3)  ;;  %v661_v15 = vld [vmem:[%s915_s1 + $0x8] sm:$0xf] (!%p201_p3)  ;;  %v409_v25 = vand.u32 (!%p201_p3), 127, %v408_v20  ;;  %s781_s11 = smov (!%p201_p3), 126  }
   0x9   : > { %750 = vset.pattern.permute.xlu1 (!%p201_p3), %v779_v8  ;;  %751 = vset.pattern.permute.xlu0 (!%p201_p3), %v779_v8  ;;  %s782_s12 = smov (!%p201_p3), 127   ;;  %v565_v40 = vld [vmem:[%s918_s4] sm:$0xff] (!%p201_p3)  ;;  %s783_s17 = smov (!%p201_p3), 122   ;;  %v666_v47 = vld [vmem:[%s917_s3 + $0x8] sm:$0xf] (!%p201_p3)  ;;  %vm578_vm8 = vcmask (!%p201_p3), 257024  }
   0xa   : > { %401 = vperm.xlu1 (!%p201_p3), %750, %v398_v6   ;;  %v410_v27 = vadd.s32 (!%p201_p3), 4294967295, %v409_v25  ;;  %v416_v41 = vld [vmem:[%s917_s3] sm:$0xf] (!%p201_p3)  ;;  %v663_v45 = vld [vmem:[%s917_s3 + $0x4] sm:$0xf] (!%p201_p3) }
   0xc   : > { %vm411_vm4 = vcmp.ge.s32.totalorder (!%p201_p3), %v410_v27, 0  ;;  %vm412_vm5 = vcmp.lt.s32.totalorder (!%p201_p3), %v410_v27, 32 }
   0xd   : > { %vm413_vm7 = vmand (!%p201_p3), %vm411_vm4, %vm412_vm5 }
   0xe   : > { %s925_s18 = smov (!%p229_p4, %s766_s18), 1 }
   0xf   : > { %s656_s22 = sshll.u32 %s925_s18, 2 }
  0x10   : > { %s232_s25 = scalar_lea.vmem %s914_s0, %s656_s22  ;;  %s239_s29 = scalar_lea.vmem %s919_s5, %s656_s22 }
  0x11   : > { %v241_v1 = vld [vmem:[%s232_s25] sm:$0xf] }
  0x12   : > { %v846_v2 = vunpack.c.l.bf16 %v241_v1 }
  0x14   : > { %vm243_vm1 = vcmp.ge.f32.partialorder %v846_v2, 0.0  ;;  %v244_v3 = vmul.f32 0.1, %v846_v2 }
  0x16   : > { %v245_v4 = vsel %vm243_vm1, %v846_v2, %v244_v3 }
  0x17   : > { %v246_v5 = vpack.c.bf16 %v245_v4, %v245_v4 }
  0x19   : > { %251 = vrot.lane.b32.xlu0 %v246_v5, %s778_s28  ;;  %v305_v7 = vsel %vm257_vm2, %v246_v5, 0 }
  0x1a   : > { %689 = vmatpush3.bf16.msra.mxu1 %v305_v7 }
  0x1b   : > { %700 = vmatprep.subr.bf16.mxu1 %v776_v0 }
  0x1d   : > { %349 = vrot.lane.b32.xlu0 %v246_v5, %s780_s6  ;;  %691 = vmatmul.mubr.msk.bf16.vlgmr.msra.gmra.mrb[0].mxu1 %vm253_vm3, %v247_v9 }
  0x1e   : > { %702 = vmatprep.mubr.msk.bf16.mxu1 %vm777_vm0, %v776_v0 }
  0x89   : > { %v402_v29 = vpop.permute.xlu1 %401 }
  0x8b   : > { %v252_v10 = vpop.permute.xlu0 %251 }
  0x8c   : > { %v259_v11 = vsel %vm257_vm2, %v252_v10, 0 }
  0x8d   : > { %683 = vmatpush3.bf16.msra.mxu0 %v259_v11 }
  0x8e   : > { %694 = vmatprep.subr.bf16.mxu0 %v776_v0 }
  0x8f   : > { %v350_v13 = vpop.permute.xlu0 %349 }
  0x90   : > { %685 = vmatmul.mubr.msk.bf16.vlgmr.msra.gmra.mrb[0].mxu0 %vm253_vm3, %v658_v12  ;;  %v355_v14 = vsel %vm257_vm2, %v350_v13, 0 }
  0x91   : > { %695 = vmatpush3.bf16.msra.mxu0 %v355_v14  ;;  %696 = vmatprep.mubr.msk.bf16.mxu0 %vm777_vm0, %v776_v0 }
  0x92   : > { %706 = vmatprep.subr.bf16.mxu0 %v776_v0 }
  0x98   : > { %697 = vmatmul.mubr.msk.bf16.vlgmr.msra.gmra.mrb[4].mxu0 %vm253_vm3, %v661_v15 }
  0x99   : > { %708 = vmatprep.mubr.msk.bf16.mxu0 %vm777_vm0, %v776_v0 }
  0xf0   : > { %v341_v16 = vpop.f32.mrb[0].mxu1 }
  0xf1   : > { %v692_v17 = vpop.f32.mrb[1].mxu1 }
  0xf2   : > { %v344_v18 = vpop.f32.mrb[2].mxu1 }
  0xf3   : > { %v693_v19 = vpop.f32.mrb[3].mxu1 }
 0x163   : > { %v295_v21 = vpop.f32.mrb[0].mxu0 }
 0x164   : > { %v342_v22 = vadd.f32 %v341_v16, %v295_v21  ;;  %v686_v23 = vpop.f32.mrb[1].mxu0 }
 0x165   : > { %v298_v24 = vpop.f32.mrb[2].mxu0 }
 0x166   : > { %v687_v26 = vpop.f32.mrb[3].mxu0 }
 0x16b   : > { %v391_v28 = vpop.f32.mrb[4].mxu0 }
 0x16c   : > { %v397_v30 = vadd.f32 %v391_v28, %v342_v22  ;;  %v698_v31 = vpop.f32.mrb[5].mxu0 }
 0x16d   : > { %v394_v32 = vpop.f32.mrb[6].mxu0 }
 0x16e   : > { %v404_v33 = vadd.f32 %v402_v29, %v397_v30  ;;  %v699_v34 = vpop.f32.mrb[7].mxu0 }
 0x170   : > { %vm405_vm6 = vcmp.ge.f32.partialorder %v404_v33, 0.0  ;;  %v406_v35 = vmul.f32 0.1, %v404_v33 }
 0x172   : > { %v407_v36 = vsel %vm405_vm6, %v404_v33, %v406_v35 }
 0x173   : > { %v414_v37 = vsel %vm413_vm7, %v407_v36, 0.0 }
 0x174   : > { %v415_v38 = vpack.c.bf16 %v414_v37, %v414_v37 }
 0x176   : > { %516 = vrot.lane.b32.xlu0 %v415_v38, %s781_s11  ;;  %420 = vrot.lane.b32.xlu1 %v415_v38, %s782_s12  ;;  %v472_v39 = vsel %vm257_vm2, %v415_v38, 0 }
 0x177   : > { %707 = vmatpush3.bf16.msra.mxu0 %v472_v39 }
 0x17a   : > { %568 = vperm.xlu1 %750, %v565_v40   ;;  %709 = vmatmul.mubr.msk.bf16.vlgmr.msra.gmra.mrb[8].mxu0 %vm253_vm3, %v416_v41 }
 0x17b   : > { %573 = vrot.lane.b32.xlu0 %v846_v2, %s783_s17 }
 0x1e8   : > { %v421_v42 = vpop.permute.xlu1 %420  ;;  %v517_v44 = vpop.permute.xlu0 %516 }
 0x1e9   : > { %v426_v43 = vsel %vm257_vm2, %v421_v42, 0  ;;  %v522_v46 = vsel %vm257_vm2, %v517_v44, 0 }
 0x1ea   : > { %701 = vmatpush3.bf16.msra.mxu1 %v426_v43 }
 0x1eb   : > { %712 = vmatprep.subr.bf16.mxu1 %v776_v0 }
 0x1ed   : > { %703 = vmatmul.mubr.msk.bf16.vlgmr.msra.gmra.mrb[4].mxu1 %vm253_vm3, %v663_v45  ;;  %v574_v61 = vpop.permute.xlu0 %573 }
 0x1ee   : > { %713 = vmatpush3.bf16.msra.mxu1 %v522_v46  ;;  %714 = vmatprep.mubr.msk.bf16.mxu1 %vm777_vm0, %v776_v0 }
 0x1f5   : > { %715 = vmatmul.mubr.msk.bf16.vlgmr.msra.gmra.mrb[8].mxu1 %vm253_vm3, %v666_v47 }
 0x1f9   : > { %v569_v58 = vpop.permute.xlu1 %568 }
 0x24d   : > { %v508_v48 = vpop.f32.mrb[8].mxu0 }
 0x24e   : > { %v710_v49 = vpop.f32.mrb[9].mxu0 }
 0x24f   : > { %v511_v50 = vpop.f32.mrb[10].mxu0 }
 0x250   : > { %v711_v51 = vpop.f32.mrb[11].mxu0 }
 0x2c0   : > { %v462_v52 = vpop.f32.mrb[4].mxu1 }
 0x2c1   : > { %v704_v53 = vpop.f32.mrb[5].mxu1  ;;  %v509_v54 = vadd.f32 %v508_v48, %v462_v52 }
 0x2c2   : > { %v465_v55 = vpop.f32.mrb[6].mxu1 }
 0x2c3   : > { %v705_v56 = vpop.f32.mrb[7].mxu1 }
 0x2c8   : > { %v558_v57 = vpop.f32.mrb[8].mxu1 }
 0x2c9   : > { %v564_v59 = vadd.f32 %v558_v57, %v509_v54  ;;  %v716_v60 = vpop.f32.mrb[9].mxu1 }
 0x2ca   : > { %v561_v62 = vpop.f32.mrb[10].mxu1 }
 0x2cb   : > { %v571_v63 = vadd.f32 %v569_v58, %v564_v59  ;;  %v717_v0 = vpop.f32.mrb[11].mxu1 }
 0x2cd   : > { %v576_v1 = vadd.f32 %v574_v61, %v571_v63 }
 0x2cf   : > { %v577_v2 = vpack.c.bf16 %v576_v1, %v576_v1 }
 0x2d1   : > { %579 = vst.msk [vmem:[%s239_s29] sm:$0xf] %vm578_vm8, %v577_v2 }
 0x2d2 PF: > { %s15_s20 = sadd.s32 1, %s774_s20   ;;  %s920_s18 = smov %s770_s19 }
 0x2d3   : > { %p12_p5 = scmp.ge.s32.totalorder %s15_s20, 4   ;;  %s921_s19 = smov %s923_s21 }
 0x2d5   :  { %14 = sbr.rel (!%p12_p5) target bundleno = 2 (0x2), region = 74 }

// kernel: _lambda_.28
= control target key start
LH: loop header
LB: loop body
LE: loop exit
PB: predicated region body
PF: predicated region fallthrough
CT: control target
= control target key end

     0   :  { %s1055_s18 = smov 0   ;;  %s1057_s19 = smov 0   ;;  %s1196_s0 = inlined_call_operand.vmem [shape: bf16[2,8,40], index: 0, kind: input, shape index: {}]   ;;  %s1197_s1 = inlined_call_operand.vmem [shape: bf16[5,8,8], index: 1, kind: input, shape index: {}]   ;;  %s1198_s2 = inlined_call_operand.vmem [shape: f32[8,1], index: 2, kind: input, shape index: {}]   ;;  %s1199_s3 = inlined_call_operand.vmem [shape: bf16[5,8,8], index: 3, kind: input, shape index: {}]   ;;  %s1200_s4 = inlined_call_operand.vmem [shape: f32[8,1], index: 4, kind: input, shape index: {}]   ;;  %s1201_s5 = inlined_call_operand.vmem [shape: bf16[2,8,32], index: 5, kind: output, shape index: {}]  }
   0x1   :  { %s1059_s20 = smov 0  }
   0x2 LB: > { %s27_s21 = sadd.s32 1, %s1012_s19  ;;  %p859_p0 = scmp.ge.s32.totalorder %s1016_s20, 1  ;;  %s1016_s20 = sphi %s1059_s20, %s15_s20   ;;  %s1012_s19 = sphi %s1057_s19, %s1203_s19   ;;  %s1008_s18 = sphi %s1055_s18, %s1202_s18  }
   0x3   : > { %p29_p1 = scmp.ge.s32.totalorder %s27_s21, 2  ;;  %p200_p2 = scmp.lt.s32.totalorder %s1016_s20, 3 }
   0x5   : > { %s1205_s21 = smov (%p29_p1, %s27_s21), 0  ;;  %p201_p3 = pnand %p859_p0, %p200_p2 }
   0x6   : > { %p229_p4 = scmp.lt.s32.totalorder (!%p201_p3), %s1008_s18, 1  ;;  %v1018_v0 = vmov (!%p201_p3), 0.0   ;;  %vm1019_vm0 = vmmov (!%p201_p3), 0   ;;  %vm257_vm2 = vcmask (!%p201_p3), 1043456   ;;  %s1020_s26 = smov (!%p201_p3), 127   ;;  %vm253_vm3 = vcmask (!%p201_p3), 64512  }
   0x7   : > { %204 = sbr.rel (%p201_p3) target bundleno = 738 (0x2e2), region = 40  ;;  %902 = vmatprep.subr.bf16.mxu0 (!%p201_p3), %v1018_v0  ;;  %908 = vmatprep.subr.bf16.mxu1 (!%p201_p3), %v1018_v0  ;;  %s1021_s27 = smov (!%p201_p3), 125   ;;  %v247_v7 = vld [vmem:[%s1197_s1] sm:$0xf] (!%p201_p3)  ;;  %v1024_v9 = vmov (!%p201_p3), 0   ;;  %v510_v35 = vlaneseq (!%p201_p3)  ;;  %vm782_vm8 = vcmask (!%p201_p3), 257024  }
   0x8   : > { %904 = vmatprep.mubr.msk.bf16.mxu0 (!%p201_p3), %vm1019_vm0, %v1018_v0  ;;  %910 = vmatprep.mubr.msk.bf16.mxu1 (!%p201_p3), %vm1019_vm0, %v1018_v0  ;;  %s1022_s30 = smov (!%p201_p3), 126   ;;  %s1023_s6 = smov (!%p201_p3), 124   ;;  %v500_v8 = vld [vmem:[%s1198_s2] sm:$0xff] (!%p201_p3)  ;;  %v867_v15 = vld [vmem:[%s1197_s1 + $0xc] sm:$0xf] (!%p201_p3) }
   0x9   : > { %993 = vset.pattern.permute.xlu0 (!%p201_p3), %v1024_v9  ;;  %v862_v14 = vld [vmem:[%s1197_s1 + $0x4] sm:$0xf] (!%p201_p3)  ;;  %v865_v19 = vld [vmem:[%s1197_s1 + $0x8] sm:$0xf] (!%p201_p3)  ;;  %v869_v21 = vld [vmem:[%s1197_s1 + $0x10] sm:$0xf] (!%p201_p3) }
   0xa   : > { %v511_v40 = vand.u32 (!%p201_p3), 127, %v510_v35  ;;  %v769_v56 = vld [vmem:[%s1200_s4] sm:$0xff] (!%p201_p3)  ;;  %v876_v63 = vld [vmem:[%s1199_s3 + $0xc] sm:$0xf] (!%p201_p3) }
   0xb   : > { %v518_v57 = vld [vmem:[%s1199_s3] sm:$0xf] (!%p201_p3)  ;;  %v871_v62 = vld [vmem:[%s1199_s3 + $0x4] sm:$0xf] (!%p201_p3) }
   0xc   : > { %v512_v43 = vadd.s32 (!%p201_p3), 4294967294, %v511_v40 }
   0xe   : > { %s1207_s18 = smov (!%p229_p4, %s1008_s18), 1  ;;  %vm513_vm4 = vcmp.ge.s32.totalorder %v512_v43, 0  ;;  %vm514_vm5 = vcmp.lt.s32.totalorder %v512_v43, 32 }
   0xf   : > { %s860_s22 = sshll.u32 %s1207_s18, 2  ;;  %vm515_vm6 = vmand %vm513_vm4, %vm514_vm5 }
  0x10   : > { %s232_s25 = scalar_lea.vmem %s1196_s0, %s860_s22  ;;  %s239_s11 = scalar_lea.vmem %s1201_s5, %s860_s22 }
  0x11   : > { %v241_v1 = vld [vmem:[%s232_s25] sm:$0xf] }
  0x12   : > { %v1087_v2 = vunpack.c.l.bf16 %v241_v1 }
  0x14   : > { %vm243_vm1 = vcmp.ge.f32.partialorder %v1087_v2, 0.0  ;;  %v244_v3 = vmul.f32 0.1, %v1087_v2 }
  0x16   : > { %v245_v4 = vsel %vm243_vm1, %v1087_v2, %v244_v3 }
  0x17   : > { %v246_v5 = vpack.c.bf16 %v245_v4, %v245_v4  ;;  %v874_v4 = vld [vmem:[%s1199_s3 + $0x8] sm:$0xf] }
  0x19   : > { %251 = vrot.lane.b32.xlu0 %v246_v5, %s1020_s26  ;;  %400 = vrot.lane.b32.xlu1 %v246_v5, %s1021_s27  ;;  %v305_v6 = vsel %vm257_vm2, %v246_v5, 0 }
  0x1a   : > { %909 = vmatpush3.bf16.msra.mxu1 %v305_v6  ;;  %v878_v6 = vld [vmem:[%s1199_s3 + $0x10] sm:$0xf] }
  0x1b   : > { %920 = vmatprep.subr.bf16.mxu1 %v1018_v0 }
  0x1d   : > { %349 = vrot.lane.b32.xlu0 %v246_v5, %s1022_s30  ;;  %451 = vrot.lane.b32.xlu1 %v246_v5, %s1023_s6 }
  0x1e   : > { %911 = vmatmul.mubr.msk.bf16.vlgmr.msra.gmra.mrb[0].mxu1 %vm253_vm3, %v247_v7 }
  0x1f   : > { %922 = vmatprep.mubr.msk.bf16.mxu1 %vm1019_vm0, %v1018_v0 }
  0x21   : > { %503 = vperm.xlu0 %993, %v500_v8  }
  0x8b   : > { %v252_v10 = vpop.permute.xlu0 %251  ;;  %v401_v11 = vpop.permute.xlu1 %400 }
  0x8c   : > { %v259_v12 = vsel %vm257_vm2, %v252_v10, 0  ;;  %v406_v13 = vsel %vm257_vm2, %v401_v11, 0 }
  0x8d   : > { %903 = vmatpush3.bf16.msra.mxu0 %v259_v12  ;;  %921 = vmatpush3.bf16.msra.mxu1 %v406_v13 }
  0x8e   : > { %914 = vmatprep.subr.bf16.mxu0 %v1018_v0  ;;  %932 = vmatprep.subr.bf16.mxu1 %v1018_v0 }
  0x8f   : > { %v350_v16 = vpop.permute.xlu0 %349  ;;  %v452_v18 = vpop.permute.xlu1 %451 }
  0x90   : > { %905 = vmatmul.mubr.msk.bf16.vlgmr.msra.gmra.mrb[0].mxu0 %vm253_vm3, %v862_v14  ;;  %v355_v17 = vsel %vm257_vm2, %v350_v16, 0  ;;  %923 = vmatmul.mubr.msk.bf16.vlgmr.msra.gmra.mrb[4].mxu1 %vm253_vm3, %v867_v15  ;;  %v457_v20 = vsel %vm257_vm2, %v452_v18, 0 }
  0x91   : > { %915 = vmatpush3.bf16.msra.mxu0 %v355_v17  ;;  %916 = vmatprep.mubr.msk.bf16.mxu0 %vm1019_vm0, %v1018_v0 }
  0x92   : > { %926 = vmatprep.subr.bf16.mxu0 %v1018_v0  ;;  %934 = vmatprep.mubr.msk.bf16.mxu1 %vm1019_vm0, %v1018_v0 }
  0x98   : > { %917 = vmatmul.mubr.msk.bf16.vlgmr.msra.gmra.mrb[4].mxu0 %vm253_vm3, %v865_v19 }
  0x99   : > { %927 = vmatpush3.bf16.msra.mxu0 %v457_v20  ;;  %928 = vmatprep.mubr.msk.bf16.mxu0 %vm1019_vm0, %v1018_v0 }
  0x9a   : > { %938 = vmatprep.subr.bf16.mxu0 %v1018_v0 }
  0xa0   : > { %929 = vmatmul.mubr.msk.bf16.vlgmr.msra.gmra.mrb[8].mxu0 %vm253_vm3, %v869_v21  ;;  %v504_v45 = vpop.permute.xlu0 %503 }
  0xa1   : > { %940 = vmatprep.mubr.msk.bf16.mxu0 %vm1019_vm0, %v1018_v0 }
  0xf1   : > { %v341_v22 = vpop.f32.mrb[0].mxu1 }
  0xf2   : > { %v912_v23 = vpop.f32.mrb[1].mxu1 }
  0xf3   : > { %v344_v24 = vpop.f32.mrb[2].mxu1 }
  0xf4   : > { %v913_v25 = vpop.f32.mrb[3].mxu1 }
 0x163   : > { %v295_v26 = vpop.f32.mrb[0].mxu0  ;;  %v442_v27 = vpop.f32.mrb[4].mxu1 }
 0x164   : > { %v342_v28 = vadd.f32 %v341_v22, %v295_v26  ;;  %v906_v29 = vpop.f32.mrb[1].mxu0  ;;  %v924_v30 = vpop.f32.mrb[5].mxu1 }
 0x165   : > { %v298_v31 = vpop.f32.mrb[2].mxu0  ;;  %v445_v32 = vpop.f32.mrb[6].mxu1 }
 0x166   : > { %v907_v33 = vpop.f32.mrb[3].mxu0  ;;  %v925_v34 = vpop.f32.mrb[7].mxu1 }
 0x16b   : > { %v391_v36 = vpop.f32.mrb[4].mxu0 }
 0x16c   : > { %v397_v37 = vadd.f32 %v391_v36, %v342_v28  ;;  %v918_v38 = vpop.f32.mrb[5].mxu0 }
 0x16d   : > { %v394_v39 = vpop.f32.mrb[6].mxu0 }
 0x16e   : > { %v448_v41 = vadd.f32 %v442_v27, %v397_v37  ;;  %v919_v42 = vpop.f32.mrb[7].mxu0 }
 0x173   : > { %v493_v44 = vpop.f32.mrb[8].mxu0 }
 0x174   : > { %v499_v46 = vadd.f32 %v493_v44, %v448_v41  ;;  %v930_v47 = vpop.f32.mrb[9].mxu0 }
 0x175   : > { %v496_v48 = vpop.f32.mrb[10].mxu0 }
 0x176   : > { %v506_v49 = vadd.f32 %v504_v45, %v499_v46  ;;  %v931_v50 = vpop.f32.mrb[11].mxu0 }
 0x178   : > { %vm507_vm7 = vcmp.ge.f32.partialorder %v506_v49, 0.0  ;;  %v508_v51 = vmul.f32 0.1, %v506_v49 }
 0x17a   : > { %v509_v52 = vsel %vm507_vm7, %v506_v49, %v508_v51 }
 0x17b   : > { %v516_v53 = vsel %vm515_vm6, %v509_v52, 0.0 }
 0x17c   : > { %v517_v54 = vpack.c.bf16 %v516_v53, %v516_v53 }
 0x17e   : > { %669 = vrot.lane.b32.xlu0 %v517_v54, %s1021_s27  ;;  %522 = vrot.lane.b32.xlu1 %v517_v54, %s1020_s26  ;;  %v574_v55 = vsel %vm257_vm2, %v517_v54, 0 }
 0x17f   : > { %939 = vmatpush3.bf16.msra.mxu0 %v574_v55 }
 0x180   : > { %950 = vmatprep.subr.bf16.mxu0 %v1018_v0 }
 0x182   : > { %772 = vperm.xlu0 %993, %v769_v56   ;;  %618 = vrot.lane.b32.xlu1 %v517_v54, %s1022_s30 }
 0x183   : > { %941 = vmatmul.mubr.msk.bf16.vlgmr.msra.gmra.mrb[12].mxu0 %vm253_vm3, %v518_v57 }
 0x184   : > { %952 = vmatprep.mubr.msk.bf16.mxu0 %vm1019_vm0, %v1018_v0 }
 0x186   : > { %720 = vrot.lane.b32.xlu1 %v517_v54, %s1023_s6 }
 0x18a   : > { %777 = vrot.lane.b32.xlu1 %v1087_v2, %s1023_s6 }
 0x1f0   : > { %v670_v58 = vpop.permute.xlu0 %669  ;;  %v523_v59 = vpop.permute.xlu1 %522 }
 0x1f1   : > { %v675_v60 = vsel %vm257_vm2, %v670_v58, 0  ;;  %v528_v61 = vsel %vm257_vm2, %v523_v59, 0 }
 0x1f2   : > { %933 = vmatpush3.bf16.msra.mxu1 %v528_v61  ;;  %951 = vmatpush3.bf16.msra.mxu0 %v675_v60 }
 0x1f3   : > { %944 = vmatprep.subr.bf16.mxu1 %v1018_v0 }
 0x1f4   : > { %v619_v1 = vpop.permute.xlu1 %618 }
 0x1f5   : > { %v624_v2 = vsel %vm257_vm2, %v619_v1, 0  ;;  %935 = vmatmul.mubr.msk.bf16.vlgmr.msra.gmra.mrb[8].mxu1 %vm253_vm3, %v871_v62  ;;  %953 = vmatmul.mubr.msk.bf16.vlgmr.msra.gmra.mrb[16].mxu0 %vm253_vm3, %v876_v63 }
 0x1f6   : > { %945 = vmatpush3.bf16.msra.mxu1 %v624_v2  ;;  %946 = vmatprep.mubr.msk.bf16.mxu1 %vm1019_vm0, %v1018_v0 }
 0x1f7   : > { %956 = vmatprep.subr.bf16.mxu1 %v1018_v0 }
 0x1f8   : > { %v721_v3 = vpop.permute.xlu1 %720 }
 0x1f9   : > { %v726_v5 = vsel %vm257_vm2, %v721_v3, 0 }
 0x1fc   : > { %v778_v29 = vpop.permute.xlu1 %777 }
 0x1fd   : > { %947 = vmatmul.mubr.msk.bf16.vlgmr.msra.gmra.mrb[12].mxu1 %vm253_vm3, %v874_v4 }
 0x1fe   : > { %957 = vmatpush3.bf16.msra.mxu1 %v726_v5  ;;  %958 = vmatprep.mubr.msk.bf16.mxu1 %vm1019_vm0, %v1018_v0 }
 0x201   : > { %v773_v26 = vpop.permute.xlu0 %772 }
 0x205   : > { %959 = vmatmul.mubr.msk.bf16.vlgmr.msra.gmra.mrb[16].mxu1 %vm253_vm3, %v878_v6 }
 0x256   : > { %v610_v7 = vpop.f32.mrb[12].mxu0 }
 0x257   : > { %v942_v8 = vpop.f32.mrb[13].mxu0 }
 0x258   : > { %v613_v9 = vpop.f32.mrb[14].mxu0 }
 0x259   : > { %v943_v10 = vpop.f32.mrb[15].mxu0 }
 0x2c8   : > { %v564_v11 = vpop.f32.mrb[8].mxu1  ;;  %v711_v12 = vpop.f32.mrb[16].mxu0 }
 0x2c9   : > { %v936_v13 = vpop.f32.mrb[9].mxu1  ;;  %v611_v14 = vadd.f32 %v610_v7, %v564_v11  ;;  %v954_v15 = vpop.f32.mrb[17].mxu0 }
 0x2ca   : > { %v567_v16 = vpop.f32.mrb[10].mxu1  ;;  %v714_v17 = vpop.f32.mrb[18].mxu0 }
 0x2cb   : > { %v937_v18 = vpop.f32.mrb[11].mxu1  ;;  %v955_v19 = vpop.f32.mrb[19].mxu0 }
 0x2d0   : > { %v660_v0 = vpop.f32.mrb[12].mxu1 }
 0x2d1   : > { %v666_v20 = vadd.f32 %v660_v0, %v611_v14  ;;  %v948_v21 = vpop.f32.mrb[13].mxu1 }
 0x2d2   : > { %v663_v22 = vpop.f32.mrb[14].mxu1 }
 0x2d3   : > { %v717_v23 = vadd.f32 %v711_v12, %v666_v20  ;;  %v949_v24 = vpop.f32.mrb[15].mxu1 }
 0x2d8   : > { %v762_v25 = vpop.f32.mrb[16].mxu1 }
 0x2d9   : > { %v768_v27 = vadd.f32 %v762_v25, %v717_v23  ;;  %v960_v28 = vpop.f32.mrb[17].mxu1 }
 0x2da   : > { %v765_v30 = vpop.f32.mrb[18].mxu1 }
 0x2db   : > { %v775_v31 = vadd.f32 %v773_v26, %v768_v27  ;;  %v961_v32 = vpop.f32.mrb[19].mxu1 }
 0x2dd   : > { %v780_v33 = vadd.f32 %v778_v29, %v775_v31 }
 0x2df   : > { %v781_v34 = vpack.c.bf16 %v780_v33, %v780_v33 }
 0x2e1   : > { %783 = vst.msk [vmem:[%s239_s11] sm:$0xf] %vm782_vm8, %v781_v34 }
 0x2e2 PF: > { %s15_s20 = sadd.s32 1, %s1016_s20   ;;  %s1202_s18 = smov %s1012_s19 }
 0x2e3   : > { %p12_p5 = scmp.ge.s32.totalorder %s15_s20, 4   ;;  %s1203_s19 = smov %s1205_s21 }
 0x2e5   :  { %14 = sbr.rel (!%p12_p5) target bundleno = 2 (0x2), region = 78 }

// kernel: _lambda_.29
= control target key start
LH: loop header
LB: loop body
LE: loop exit
PB: predicated region body
PF: predicated region fallthrough
CT: control target
= control target key end

     0   :  { %s1063_s18 = smov 0   ;;  %s1065_s19 = smov 0   ;;  %s1197_s0 = inlined_call_operand.vmem [shape: bf16[2,8,48], index: 0, kind: input, shape index: {}]   ;;  %s1198_s1 = inlined_call_operand.vmem [shape: bf16[5,8,8], index: 1, kind: input, shape index: {}]   ;;  %s1199_s2 = inlined_call_operand.vmem [shape: f32[8,1], index: 2, kind: input, shape index: {}]   ;;  %s1200_s3 = inlined_call_operand.vmem [shape: bf16[5,8,8], index: 3, kind: input, shape index: {}]   ;;  %s1201_s4 = inlined_call_operand.vmem [shape: f32[8,1], index: 4, kind: input, shape index: {}]   ;;  %s1202_s5 = inlined_call_operand.vmem [shape: bf16[2,8,32], index: 5, kind: output, shape index: {}]  }
   0x1   :  { %s1067_s20 = smov 0  }
   0x2 LB: > { %s27_s21 = sadd.s32 1, %s1016_s19  ;;  %p859_p0 = scmp.ge.s32.totalorder %s1020_s20, 1  ;;  %s1020_s20 = sphi %s1067_s20, %s15_s20   ;;  %s1016_s19 = sphi %s1065_s19, %s1204_s19   ;;  %s1012_s18 = sphi %s1063_s18, %s1203_s18  }
   0x3   : > { %p29_p1 = scmp.ge.s32.totalorder %s27_s21, 2  ;;  %p200_p2 = scmp.lt.s32.totalorder %s1020_s20, 3 }
   0x5   : > { %s1206_s21 = smov (%p29_p1, %s27_s21), 0  ;;  %p201_p3 = pnand %p859_p0, %p200_p2 }
   0x6   : > { %p229_p4 = scmp.lt.s32.totalorder (!%p201_p3), %s1012_s18, 1  ;;  %v1022_v0 = vmov (!%p201_p3), 0.0   ;;  %vm1023_vm0 = vmmov (!%p201_p3), 0   ;;  %vm257_vm2 = vcmask (!%p201_p3), 1043456   ;;  %s1024_s26 = smov (!%p201_p3), 125   ;;  %vm253_vm3 = vcmask (!%p201_p3), 64512  }
   0x7   : > { %204 = sbr.rel (%p201_p3) target bundleno = 738 (0x2e2), region = 40  ;;  %902 = vmatprep.subr.bf16.mxu0 (!%p201_p3), %v1022_v0  ;;  %908 = vmatprep.subr.bf16.mxu1 (!%p201_p3), %v1022_v0  ;;  %s1025_s27 = smov (!%p201_p3), 119   ;;  %v247_v7 = vld [vmem:[%s1198_s1] sm:$0xf] (!%p201_p3)  ;;  %v1028_v9 = vmov (!%p201_p3), 0   ;;  %v510_v35 = vlaneseq (!%p201_p3)  ;;  %vm782_vm8 = vcmask (!%p201_p3), 257024  }
   0x8   : > { %904 = vmatprep.mubr.msk.bf16.mxu0 (!%p201_p3), %vm1023_vm0, %v1022_v0  ;;  %910 = vmatprep.mubr.msk.bf16.mxu1 (!%p201_p3), %vm1023_vm0, %v1022_v0  ;;  %s1026_s30 = smov (!%p201_p3), 122   ;;  %s1027_s6 = smov (!%p201_p3), 116   ;;  %v500_v8 = vld [vmem:[%s1199_s2] sm:$0xff] (!%p201_p3)  ;;  %v867_v15 = vld [vmem:[%s1198_s1 + $0xc] sm:$0xf] (!%p201_p3) }
   0x9   : > { %997 = vset.pattern.permute.xlu0 (!%p201_p3), %v1028_v9  ;;  %v862_v14 = vld [vmem:[%s1198_s1 + $0x4] sm:$0xf] (!%p201_p3)  ;;  %v865_v19 = vld [vmem:[%s1198_s1 + $0x8] sm:$0xf] (!%p201_p3)  ;;  %v869_v21 = vld [vmem:[%s1198_s1 + $0x10] sm:$0xf] (!%p201_p3) }
   0xa   : > { %v511_v40 = vand.u32 (!%p201_p3), 127, %v510_v35  ;;  %s1029_s17 = smov (!%p201_p3), 127   ;;  %v769_v56 = vld [vmem:[%s1201_s4] sm:$0xff] (!%p201_p3)  ;;  %s1030_s28 = smov (!%p201_p3), 126   ;;  %v876_v63 = vld [vmem:[%s1200_s3 + $0xc] sm:$0xf] (!%p201_p3) }
   0xb   : > { %v518_v57 = vld [vmem:[%s1200_s3] sm:$0xf] (!%p201_p3)  ;;  %s1032_s29 = smov (!%p201_p3), 120   ;;  %v871_v62 = vld [vmem:[%s1200_s3 + $0x4] sm:$0xf] (!%p201_p3) }
   0xc   : > { %v512_v43 = vadd.s32 (!%p201_p3), 4294967294, %v511_v40 }
   0xe   : > { %s1208_s18 = smov (!%p229_p4, %s1012_s18), 1  ;;  %vm513_vm4 = vcmp.ge.s32.totalorder %v512_v43, 0  ;;  %vm514_vm5 = vcmp.lt.s32.totalorder %v512_v43, 32 }
   0xf   : > { %s860_s22 = sshll.u32 %s1208_s18, 2  ;;  %vm515_vm6 = vmand %vm513_vm4, %vm514_vm5 }
  0x10   : > { %s232_s25 = scalar_lea.vmem %s1197_s0, %s860_s22  ;;  %s239_s15 = scalar_lea.vmem %s1202_s5, %s860_s22 }
  0x11   : > { %v241_v1 = vld [vmem:[%s232_s25] sm:$0xf] }
  0x12   : > { %v1095_v2 = vunpack.c.l.bf16 %v241_v1 }
  0x14   : > { %vm243_vm1 = vcmp.ge.f32.partialorder %v1095_v2, 0.0  ;;  %v244_v3 = vmul.f32 0.1, %v1095_v2 }
  0x16   : > { %v245_v4 = vsel %vm243_vm1, %v1095_v2, %v244_v3 }
  0x17   : > { %v246_v5 = vpack.c.bf16 %v245_v4, %v245_v4  ;;  %v874_v4 = vld [vmem:[%s1200_s3 + $0x8] sm:$0xf] }
  0x19   : > { %251 = vrot.lane.b32.xlu0 %v246_v5, %s1024_s26  ;;  %400 = vrot.lane.b32.xlu1 %v246_v5, %s1025_s27  ;;  %v305_v6 = vsel %vm257_vm2, %v246_v5, 0 }
  0x1a   : > { %909 = vmatpush3.bf16.msra.mxu1 %v305_v6  ;;  %v878_v6 = vld [vmem:[%s1200_s3 + $0x10] sm:$0xf] }
  0x1b   : > { %920 = vmatprep.subr.bf16.mxu1 %v1022_v0 }
  0x1d   : > { %349 = vrot.lane.b32.xlu0 %v246_v5, %s1026_s30  ;;  %451 = vrot.lane.b32.xlu1 %v246_v5, %s1027_s6 }
  0x1e   : > { %911 = vmatmul.mubr.msk.bf16.vlgmr.msra.gmra.mrb[0].mxu1 %vm253_vm3, %v247_v7 }
  0x1f   : > { %922 = vmatprep.mubr.msk.bf16.mxu1 %vm1023_vm0, %v1022_v0 }
  0x21   : > { %503 = vperm.xlu0 %997, %v500_v8  }
  0x8b   : > { %v252_v10 = vpop.permute.xlu0 %251  ;;  %v401_v11 = vpop.permute.xlu1 %400 }
  0x8c   : > { %v259_v12 = vsel %vm257_vm2, %v252_v10, 0  ;;  %v406_v13 = vsel %vm257_vm2, %v401_v11, 0 }
  0x8d   : > { %903 = vmatpush3.bf16.msra.mxu0 %v259_v12  ;;  %921 = vmatpush3.bf16.msra.mxu1 %v406_v13 }
  0x8e   : > { %914 = vmatprep.subr.bf16.mxu0 %v1022_v0  ;;  %932 = vmatprep.subr.bf16.mxu1 %v1022_v0 }
  0x8f   : > { %v350_v16 = vpop.permute.xlu0 %349  ;;  %v452_v18 = vpop.permute.xlu1 %451 }
  0x90   : > { %905 = vmatmul.mubr.msk.bf16.vlgmr.msra.gmra.mrb[0].mxu0 %vm253_vm3, %v862_v14  ;;  %v355_v17 = vsel %vm257_vm2, %v350_v16, 0  ;;  %923 = vmatmul.mubr.msk.bf16.vlgmr.msra.gmra.mrb[4].mxu1 %vm253_vm3, %v867_v15  ;;  %v457_v20 = vsel %vm257_vm2, %v452_v18, 0 }
  0x91   : > { %915 = vmatpush3.bf16.msra.mxu0 %v355_v17  ;;  %916 = vmatprep.mubr.msk.bf16.mxu0 %vm1023_vm0, %v1022_v0 }
  0x92   : > { %926 = vmatprep.subr.bf16.mxu0 %v1022_v0  ;;  %934 = vmatprep.mubr.msk.bf16.mxu1 %vm1023_vm0, %v1022_v0 }
  0x98   : > { %917 = vmatmul.mubr.msk.bf16.vlgmr.msra.gmra.mrb[4].mxu0 %vm253_vm3, %v865_v19 }
  0x99   : > { %927 = vmatpush3.bf16.msra.mxu0 %v457_v20  ;;  %928 = vmatprep.mubr.msk.bf16.mxu0 %vm1023_vm0, %v1022_v0 }
  0x9a   : > { %938 = vmatprep.subr.bf16.mxu0 %v1022_v0 }
  0xa0   : > { %929 = vmatmul.mubr.msk.bf16.vlgmr.msra.gmra.mrb[8].mxu0 %vm253_vm3, %v869_v21  ;;  %v504_v45 = vpop.permute.xlu0 %503 }
  0xa1   : > { %940 = vmatprep.mubr.msk.bf16.mxu0 %vm1023_vm0, %v1022_v0 }
  0xf1   : > { %v341_v22 = vpop.f32.mrb[0].mxu1 }
  0xf2   : > { %v912_v23 = vpop.f32.mrb[1].mxu1 }
  0xf3   : > { %v344_v24 = vpop.f32.mrb[2].mxu1 }
  0xf4   : > { %v913_v25 = vpop.f32.mrb[3].mxu1 }
 0x163   : > { %v295_v26 = vpop.f32.mrb[0].mxu0  ;;  %v442_v27 = vpop.f32.mrb[4].mxu1 }
 0x164   : > { %v342_v28 = vadd.f32 %v341_v22, %v295_v26  ;;  %v906_v29 = vpop.f32.mrb[1].mxu0  ;;  %v924_v30 = vpop.f32.mrb[5].mxu1 }
 0x165   : > { %v298_v31 = vpop.f32.mrb[2].mxu0  ;;  %v445_v32 = vpop.f32.mrb[6].mxu1 }
 0x166   : > { %v907_v33 = vpop.f32.mrb[3].mxu0  ;;  %v925_v34 = vpop.f32.mrb[7].mxu1 }
 0x16b   : > { %v391_v36 = vpop.f32.mrb[4].mxu0 }
 0x16c   : > { %v397_v37 = vadd.f32 %v391_v36, %v342_v28  ;;  %v918_v38 = vpop.f32.mrb[5].mxu0 }
 0x16d   : > { %v394_v39 = vpop.f32.mrb[6].mxu0 }
 0x16e   : > { %v448_v41 = vadd.f32 %v442_v27, %v397_v37  ;;  %v919_v42 = vpop.f32.mrb[7].mxu0 }
 0x173   : > { %v493_v44 = vpop.f32.mrb[8].mxu0 }
 0x174   : > { %v499_v46 = vadd.f32 %v493_v44, %v448_v41  ;;  %v930_v47 = vpop.f32.mrb[9].mxu0 }
 0x175   : > { %v496_v48 = vpop.f32.mrb[10].mxu0 }
 0x176   : > { %v506_v49 = vadd.f32 %v504_v45, %v499_v46  ;;  %v931_v50 = vpop.f32.mrb[11].mxu0 }
 0x178   : > { %vm507_vm7 = vcmp.ge.f32.partialorder %v506_v49, 0.0  ;;  %v508_v51 = vmul.f32 0.1, %v506_v49 }
 0x17a   : > { %v509_v52 = vsel %vm507_vm7, %v506_v49, %v508_v51 }
 0x17b   : > { %v516_v53 = vsel %vm515_vm6, %v509_v52, 0.0 }
 0x17c   : > { %v517_v54 = vpack.c.bf16 %v516_v53, %v516_v53 }
 0x17e   : > { %669 = vrot.lane.b32.xlu0 %v517_v54, %s1024_s26  ;;  %522 = vrot.lane.b32.xlu1 %v517_v54, %s1029_s17  ;;  %v574_v55 = vsel %vm257_vm2, %v517_v54, 0  ;;  %s1031_s26 = smov 124  }
 0x17f   : > { %939 = vmatpush3.bf16.msra.mxu0 %v574_v55 }
 0x180   : > { %950 = vmatprep.subr.bf16.mxu0 %v1022_v0 }
 0x182   : > { %772 = vperm.xlu0 %997, %v769_v56   ;;  %618 = vrot.lane.b32.xlu1 %v517_v54, %s1030_s28 }
 0x183   : > { %941 = vmatmul.mubr.msk.bf16.vlgmr.msra.gmra.mrb[12].mxu0 %vm253_vm3, %v518_v57 }
 0x184   : > { %952 = vmatprep.mubr.msk.bf16.mxu0 %vm1023_vm0, %v1022_v0 }
 0x186   : > { %720 = vrot.lane.b32.xlu1 %v517_v54, %s1031_s26 }
 0x18a   : > { %777 = vrot.lane.b32.xlu1 %v1095_v2, %s1032_s29 }
 0x1f0   : > { %v670_v58 = vpop.permute.xlu0 %669  ;;  %v523_v59 = vpop.permute.xlu1 %522 }
 0x1f1   : > { %v675_v60 = vsel %vm257_vm2, %v670_v58, 0  ;;  %v528_v61 = vsel %vm257_vm2, %v523_v59, 0 }
 0x1f2   : > { %933 = vmatpush3.bf16.msra.mxu1 %v528_v61  ;;  %951 = vmatpush3.bf16.msra.mxu0 %v675_v60 }
 0x1f3   : > { %944 = vmatprep.subr.bf16.mxu1 %v1022_v0 }
 0x1f4   : > { %v619_v1 = vpop.permute.xlu1 %618 }
 0x1f5   : > { %v624_v2 = vsel %vm257_vm2, %v619_v1, 0  ;;  %935 = vmatmul.mubr.msk.bf16.vlgmr.msra.gmra.mrb[8].mxu1 %vm253_vm3, %v871_v62  ;;  %953 = vmatmul.mubr.msk.bf16.vlgmr.msra.gmra.mrb[16].mxu0 %vm253_vm3, %v876_v63 }
 0x1f6   : > { %945 = vmatpush3.bf16.msra.mxu1 %v624_v2  ;;  %946 = vmatprep.mubr.msk.bf16.mxu1 %vm1023_vm0, %v1022_v0 }
 0x1f7   : > { %956 = vmatprep.subr.bf16.mxu1 %v1022_v0 }
 0x1f8   : > { %v721_v3 = vpop.permute.xlu1 %720 }
 0x1f9   : > { %v726_v5 = vsel %vm257_vm2, %v721_v3, 0 }
 0x1fc   : > { %v778_v29 = vpop.permute.xlu1 %777 }
 0x1fd   : > { %947 = vmatmul.mubr.msk.bf16.vlgmr.msra.gmra.mrb[12].mxu1 %vm253_vm3, %v874_v4 }
 0x1fe   : > { %957 = vmatpush3.bf16.msra.mxu1 %v726_v5  ;;  %958 = vmatprep.mubr.msk.bf16.mxu1 %vm1023_vm0, %v1022_v0 }
 0x201   : > { %v773_v26 = vpop.permute.xlu0 %772 }
 0x205   : > { %959 = vmatmul.mubr.msk.bf16.vlgmr.msra.gmra.mrb[16].mxu1 %vm253_vm3, %v878_v6 }
 0x256   : > { %v610_v7 = vpop.f32.mrb[12].mxu0 }
 0x257   : > { %v942_v8 = vpop.f32.mrb[13].mxu0 }
 0x258   : > { %v613_v9 = vpop.f32.mrb[14].mxu0 }
 0x259   : > { %v943_v10 = vpop.f32.mrb[15].mxu0 }
 0x2c8   : > { %v564_v11 = vpop.f32.mrb[8].mxu1  ;;  %v711_v12 = vpop.f32.mrb[16].mxu0 }
 0x2c9   : > { %v936_v13 = vpop.f32.mrb[9].mxu1  ;;  %v611_v14 = vadd.f32 %v610_v7, %v564_v11  ;;  %v954_v15 = vpop.f32.mrb[17].mxu0 }
 0x2ca   : > { %v567_v16 = vpop.f32.mrb[10].mxu1  ;;  %v714_v17 = vpop.f32.mrb[18].mxu0 }
 0x2cb   : > { %v937_v18 = vpop.f32.mrb[11].mxu1  ;;  %v955_v19 = vpop.f32.mrb[19].mxu0 }
 0x2d0   : > { %v660_v0 = vpop.f32.mrb[12].mxu1 }
 0x2d1   : > { %v666_v20 = vadd.f32 %v660_v0, %v611_v14  ;;  %v948_v21 = vpop.f32.mrb[13].mxu1 }
 0x2d2   : > { %v663_v22 = vpop.f32.mrb[14].mxu1 }
 0x2d3   : > { %v717_v23 = vadd.f32 %v711_v12, %v666_v20  ;;  %v949_v24 = vpop.f32.mrb[15].mxu1 }
 0x2d8   : > { %v762_v25 = vpop.f32.mrb[16].mxu1 }
 0x2d9   : > { %v768_v27 = vadd.f32 %v762_v25, %v717_v23  ;;  %v960_v28 = vpop.f32.mrb[17].mxu1 }
 0x2da   : > { %v765_v30 = vpop.f32.mrb[18].mxu1 }
 0x2db   : > { %v775_v31 = vadd.f32 %v773_v26, %v768_v27  ;;  %v961_v32 = vpop.f32.mrb[19].mxu1 }
 0x2dd   : > { %v780_v33 = vadd.f32 %v778_v29, %v775_v31 }
 0x2df   : > { %v781_v34 = vpack.c.bf16 %v780_v33, %v780_v33 }
 0x2e1   : > { %783 = vst.msk [vmem:[%s239_s15] sm:$0xf] %vm782_vm8, %v781_v34 }
 0x2e2 PF: > { %s15_s20 = sadd.s32 1, %s1020_s20   ;;  %s1203_s18 = smov %s1016_s19 }
 0x2e3   : > { %p12_p5 = scmp.ge.s32.totalorder %s15_s20, 4   ;;  %s1204_s19 = smov %s1206_s21 }
 0x2e5   :  { %14 = sbr.rel (!%p12_p5) target bundleno = 2 (0x2), region = 78 }

// kernel: _lambda_.30
= control target key start
LH: loop header
LB: loop body
LE: loop exit
PB: predicated region body
PF: predicated region fallthrough
CT: control target
= control target key end

     0   :  { %s1145_s21 = smov 0   ;;  %s1147_s22 = smov 0   ;;  %s1278_s0 = inlined_call_operand.vmem [shape: bf16[2,8,56], index: 0, kind: input, shape index: {}]   ;;  %s1279_s1 = inlined_call_operand.vmem [shape: bf16[5,8,8], index: 1, kind: input, shape index: {}]   ;;  %s1280_s2 = inlined_call_operand.vmem [shape: f32[8,1], index: 2, kind: input, shape index: {}]   ;;  %s1281_s3 = inlined_call_operand.vmem [shape: bf16[5,8,8], index: 3, kind: input, shape index: {}]   ;;  %s1282_s4 = inlined_call_operand.vmem [shape: f32[8,1], index: 4, kind: input, shape index: {}]   ;;  %s1283_s5 = inlined_call_operand.vmem [shape: bf16[2,8,32], index: 5, kind: input, shape index: {}]   ;;  %s1284_s6 = inlined_call_operand.vmem [shape: bf16[2,8,32], index: 6, kind: output, shape index: {}]  }
   0x1   :  { %s1149_s23 = smov 0  }
   0x2 LB: > { %s28_s24 = sadd.s32 1, %s1092_s22  ;;  %p933_p0 = scmp.ge.s32.totalorder %s1096_s23, 1  ;;  %s1096_s23 = sphi %s1149_s23, %s16_s23   ;;  %s1092_s22 = sphi %s1147_s22, %s1286_s22   ;;  %s1088_s21 = sphi %s1145_s21, %s1285_s21  }
   0x3   : > { %p30_p1 = scmp.ge.s32.totalorder %s28_s24, 2  ;;  %p239_p2 = scmp.lt.s32.totalorder %s1096_s23, 3 }
   0x5   : > { %s1288_s24 = smov (%p30_p1, %s28_s24), 0  ;;  %p240_p3 = pnand %p933_p0, %p239_p2 }
   0x6   : > { %p277_p4 = scmp.lt.s32.totalorder (!%p240_p3), %s1088_s21, 1  ;;  %v1098_v0 = vmov (!%p240_p3), 0.0   ;;  %vm1099_vm0 = vmmov (!%p240_p3), 0   ;;  %vm312_vm2 = vcmask (!%p240_p3), 1043456   ;;  %s1100_s29 = smov (!%p240_p3), 123   ;;  %vm308_vm3 = vcmask (!%p240_p3), 64512  }
   0x7   : > { %243 = sbr.rel (%p240_p3) target bundleno = 742 (0x2e6), region = 44  ;;  %977 = vmatprep.subr.bf16.mxu0 (!%p240_p3), %v1098_v0  ;;  %983 = vmatprep.subr.bf16.mxu1 (!%p240_p3), %v1098_v0  ;;  %s1101_s30 = smov (!%p240_p3), 113   ;;  %v302_v7 = vld [vmem:[%s1279_s1] sm:$0xf] (!%p240_p3)  ;;  %v1104_v9 = vmov (!%p240_p3), 0   ;;  %v565_v35 = vlaneseq (!%p240_p3)  ;;  %vm841_vm8 = vcmask (!%p240_p3), 257024  }
   0x8   : > { %979 = vmatprep.mubr.msk.bf16.mxu0 (!%p240_p3), %vm1099_vm0, %v1098_v0  ;;  %985 = vmatprep.mubr.msk.bf16.mxu1 (!%p240_p3), %vm1099_vm0, %v1098_v0  ;;  %s1102_s9 = smov (!%p240_p3), 118   ;;  %s1103_s10 = smov (!%p240_p3), 108   ;;  %v555_v8 = vld [vmem:[%s1280_s2] sm:$0xff] (!%p240_p3)  ;;  %v942_v15 = vld [vmem:[%s1279_s1 + $0xc] sm:$0xf] (!%p240_p3) }
   0x9   : > { %1073 = vset.pattern.permute.xlu0 (!%p240_p3), %v1104_v9  ;;  %v937_v14 = vld [vmem:[%s1279_s1 + $0x4] sm:$0xf] (!%p240_p3)  ;;  %v940_v19 = vld [vmem:[%s1279_s1 + $0x8] sm:$0xf] (!%p240_p3)  ;;  %v944_v21 = vld [vmem:[%s1279_s1 + $0x10] sm:$0xf] (!%p240_p3) }
   0xa   : > { %v566_v40 = vand.u32 (!%p240_p3), 127, %v565_v35  ;;  %s1106_s26 = smov (!%p240_p3), 127   ;;  %v824_v56 = vld [vmem:[%s1282_s4] sm:$0xff] (!%p240_p3)  ;;  %s1107_s7 = smov (!%p240_p3), 126   ;;  %v951_v63 = vld [vmem:[%s1281_s3 + $0xc] sm:$0xf] (!%p240_p3) }
   0xb   : > { %v573_v57 = vld [vmem:[%s1281_s3] sm:$0xf] (!%p240_p3)  ;;  %s1108_s8 = smov (!%p240_p3), 124   ;;  %v946_v62 = vld [vmem:[%s1281_s3 + $0x4] sm:$0xf] (!%p240_p3) }
   0xc   : > { %v567_v43 = vadd.s32 (!%p240_p3), 4294967294, %v566_v40 }
   0xe   : > { %s1290_s21 = smov (!%p277_p4, %s1088_s21), 1  ;;  %vm568_vm4 = vcmp.ge.s32.totalorder %v567_v43, 0  ;;  %vm569_vm5 = vcmp.lt.s32.totalorder %v567_v43, 32 }
   0xf   : > { %s1169_s25 = sshll.u32 %s1290_s21, 2  ;;  %vm570_vm6 = vmand %vm568_vm4, %vm569_vm5  ;;  %s1105_s21 = smov 125  }
  0x10   : > { %s280_s28 = scalar_lea.vmem %s1278_s0, %s1169_s25  ;;  %s287_s20 = scalar_lea.vmem %s1283_s5, %s1169_s25 }
  0x11   : > { %v296_v1 = vld [vmem:[%s280_s28] sm:$0xf]  ;;  %s294_s27 = scalar_lea.vmem %s1284_s6, %s1169_s25 }
  0x12   : > { %v1175_v2 = vunpack.c.l.bf16 %v296_v1 }
  0x14   : > { %vm298_vm1 = vcmp.ge.f32.partialorder %v1175_v2, 0.0  ;;  %v299_v3 = vmul.f32 0.1, %v1175_v2 }
  0x16   : > { %v300_v4 = vsel %vm298_vm1, %v1175_v2, %v299_v3 }
  0x17   : > { %v301_v5 = vpack.c.bf16 %v300_v4, %v300_v4  ;;  %v949_v4 = vld [vmem:[%s1281_s3 + $0x8] sm:$0xf] }
  0x19   : > { %306 = vrot.lane.b32.xlu0 %v301_v5, %s1100_s29  ;;  %455 = vrot.lane.b32.xlu1 %v301_v5, %s1101_s30  ;;  %v360_v6 = vsel %vm312_vm2, %v301_v5, 0 }
  0x1a   : > { %984 = vmatpush3.bf16.msra.mxu1 %v360_v6  ;;  %v953_v6 = vld [vmem:[%s1281_s3 + $0x10] sm:$0xf] }
  0x1b   : > { %995 = vmatprep.subr.bf16.mxu1 %v1098_v0 }
  0x1d   : > { %404 = vrot.lane.b32.xlu0 %v301_v5, %s1102_s9  ;;  %506 = vrot.lane.b32.xlu1 %v301_v5, %s1103_s10  ;;  %s1109_s9 = smov 116  }
  0x1e   : > { %986 = vmatmul.mubr.msk.bf16.vlgmr.msra.gmra.mrb[0].mxu1 %vm308_vm3, %v302_v7 }
  0x1f   : > { %997 = vmatprep.mubr.msk.bf16.mxu1 %vm1099_vm0, %v1098_v0 }
  0x21   : > { %558 = vperm.xlu0 %1073, %v555_v8  }
  0x8b   : > { %v307_v10 = vpop.permute.xlu0 %306  ;;  %v456_v11 = vpop.permute.xlu1 %455 }
  0x8c   : > { %v314_v12 = vsel %vm312_vm2, %v307_v10, 0  ;;  %v461_v13 = vsel %vm312_vm2, %v456_v11, 0 }
  0x8d   : > { %978 = vmatpush3.bf16.msra.mxu0 %v314_v12  ;;  %996 = vmatpush3.bf16.msra.mxu1 %v461_v13 }
  0x8e   : > { %989 = vmatprep.subr.bf16.mxu0 %v1098_v0  ;;  %1007 = vmatprep.subr.bf16.mxu1 %v1098_v0 }
  0x8f   : > { %v405_v16 = vpop.permute.xlu0 %404  ;;  %v507_v18 = vpop.permute.xlu1 %506 }
  0x90   : > { %980 = vmatmul.mubr.msk.bf16.vlgmr.msra.gmra.mrb[0].mxu0 %vm308_vm3, %v937_v14  ;;  %v410_v17 = vsel %vm312_vm2, %v405_v16, 0  ;;  %998 = vmatmul.mubr.msk.bf16.vlgmr.msra.gmra.mrb[4].mxu1 %vm308_vm3, %v942_v15  ;;  %v512_v20 = vsel %vm312_vm2, %v507_v18, 0 }
  0x91   : > { %990 = vmatpush3.bf16.msra.mxu0 %v410_v17  ;;  %991 = vmatprep.mubr.msk.bf16.mxu0 %vm1099_vm0, %v1098_v0 }
  0x92   : > { %1001 = vmatprep.subr.bf16.mxu0 %v1098_v0  ;;  %1009 = vmatprep.mubr.msk.bf16.mxu1 %vm1099_vm0, %v1098_v0 }
  0x98   : > { %992 = vmatmul.mubr.msk.bf16.vlgmr.msra.gmra.mrb[4].mxu0 %vm308_vm3, %v940_v19 }
  0x99   : > { %1002 = vmatpush3.bf16.msra.mxu0 %v512_v20  ;;  %1003 = vmatprep.mubr.msk.bf16.mxu0 %vm1099_vm0, %v1098_v0 }
  0x9a   : > { %1013 = vmatprep.subr.bf16.mxu0 %v1098_v0 }
  0xa0   : > { %1004 = vmatmul.mubr.msk.bf16.vlgmr.msra.gmra.mrb[8].mxu0 %vm308_vm3, %v944_v21  ;;  %v559_v45 = vpop.permute.xlu0 %558 }
  0xa1   : > { %1015 = vmatprep.mubr.msk.bf16.mxu0 %vm1099_vm0, %v1098_v0 }
  0xf1   : > { %v396_v22 = vpop.f32.mrb[0].mxu1 }
  0xf2   : > { %v987_v23 = vpop.f32.mrb[1].mxu1 }
  0xf3   : > { %v399_v24 = vpop.f32.mrb[2].mxu1 }
  0xf4   : > { %v988_v25 = vpop.f32.mrb[3].mxu1 }
 0x163   : > { %v350_v26 = vpop.f32.mrb[0].mxu0  ;;  %v497_v27 = vpop.f32.mrb[4].mxu1 }
 0x164   : > { %v397_v28 = vadd.f32 %v396_v22, %v350_v26  ;;  %v981_v29 = vpop.f32.mrb[1].mxu0  ;;  %v999_v30 = vpop.f32.mrb[5].mxu1  ;;  %v836_v26 = vld [vmem:[%s287_s20] sm:$0xf] }
 0x165   : > { %v353_v31 = vpop.f32.mrb[2].mxu0  ;;  %v500_v32 = vpop.f32.mrb[6].mxu1 }
 0x166   : > { %v982_v33 = vpop.f32.mrb[3].mxu0  ;;  %v1000_v34 = vpop.f32.mrb[7].mxu1  ;;  %v837_v32 = vunpack.c.l.bf16 %v836_v26 }
 0x16b   : > { %v446_v36 = vpop.f32.mrb[4].mxu0 }
 0x16c   : > { %v452_v37 = vadd.f32 %v446_v36, %v397_v28  ;;  %v993_v38 = vpop.f32.mrb[5].mxu0 }
 0x16d   : > { %v449_v39 = vpop.f32.mrb[6].mxu0 }
 0x16e   : > { %v503_v41 = vadd.f32 %v497_v27, %v452_v37  ;;  %v994_v42 = vpop.f32.mrb[7].mxu0 }
 0x173   : > { %v548_v44 = vpop.f32.mrb[8].mxu0 }
 0x174   : > { %v554_v46 = vadd.f32 %v548_v44, %v503_v41  ;;  %v1005_v47 = vpop.f32.mrb[9].mxu0 }
 0x175   : > { %v551_v48 = vpop.f32.mrb[10].mxu0 }
 0x176   : > { %v561_v49 = vadd.f32 %v559_v45, %v554_v46  ;;  %v1006_v50 = vpop.f32.mrb[11].mxu0 }
 0x178   : > { %vm562_vm7 = vcmp.ge.f32.partialorder %v561_v49, 0.0  ;;  %v563_v51 = vmul.f32 0.1, %v561_v49 }
 0x17a   : > { %v564_v52 = vsel %vm562_vm7, %v561_v49, %v563_v51 }
 0x17b   : > { %v571_v53 = vsel %vm570_vm6, %v564_v52, 0.0 }
 0x17c   : > { %v572_v54 = vpack.c.bf16 %v571_v53, %v571_v53 }
 0x17e   : > { %724 = vrot.lane.b32.xlu0 %v572_v54, %s1105_s21  ;;  %577 = vrot.lane.b32.xlu1 %v572_v54, %s1106_s26  ;;  %v629_v55 = vsel %vm312_vm2, %v572_v54, 0 }
 0x17f   : > { %1014 = vmatpush3.bf16.msra.mxu0 %v629_v55 }
 0x180   : > { %1025 = vmatprep.subr.bf16.mxu0 %v1098_v0 }
 0x182   : > { %827 = vperm.xlu0 %1073, %v824_v56   ;;  %673 = vrot.lane.b32.xlu1 %v572_v54, %s1107_s7 }
 0x183   : > { %1016 = vmatmul.mubr.msk.bf16.vlgmr.msra.gmra.mrb[12].mxu0 %vm308_vm3, %v573_v57 }
 0x184   : > { %1027 = vmatprep.mubr.msk.bf16.mxu0 %vm1099_vm0, %v1098_v0 }
 0x186   : > { %775 = vrot.lane.b32.xlu1 %v572_v54, %s1108_s8 }
 0x18a   : > { %832 = vrot.lane.b32.xlu1 %v1175_v2, %s1109_s9 }
 0x1f0   : > { %v725_v58 = vpop.permute.xlu0 %724  ;;  %v578_v59 = vpop.permute.xlu1 %577 }
 0x1f1   : > { %v730_v60 = vsel %vm312_vm2, %v725_v58, 0  ;;  %v583_v61 = vsel %vm312_vm2, %v578_v59, 0 }
 0x1f2   : > { %1008 = vmatpush3.bf16.msra.mxu1 %v583_v61  ;;  %1026 = vmatpush3.bf16.msra.mxu0 %v730_v60 }
 0x1f3   : > { %1019 = vmatprep.subr.bf16.mxu1 %v1098_v0 }
 0x1f4   : > { %v674_v1 = vpop.permute.xlu1 %673 }
 0x1f5   : > { %v679_v2 = vsel %vm312_vm2, %v674_v1, 0  ;;  %1010 = vmatmul.mubr.msk.bf16.vlgmr.msra.gmra.mrb[8].mxu1 %vm308_vm3, %v946_v62  ;;  %1028 = vmatmul.mubr.msk.bf16.vlgmr.msra.gmra.mrb[16].mxu0 %vm308_vm3, %v951_v63 }
 0x1f6   : > { %1020 = vmatpush3.bf16.msra.mxu1 %v679_v2  ;;  %1021 = vmatprep.mubr.msk.bf16.mxu1 %vm1099_vm0, %v1098_v0 }
 0x1f7   : > { %1031 = vmatprep.subr.bf16.mxu1 %v1098_v0 }
 0x1f8   : > { %v776_v3 = vpop.permute.xlu1 %775 }
 0x1f9   : > { %v781_v5 = vsel %vm312_vm2, %v776_v3, 0 }
 0x1fc   : > { %v833_v30 = vpop.permute.xlu1 %832 }
 0x1fd   : > { %1022 = vmatmul.mubr.msk.bf16.vlgmr.msra.gmra.mrb[12].mxu1 %vm308_vm3, %v949_v4 }
 0x1fe   : > { %1032 = vmatpush3.bf16.msra.mxu1 %v781_v5  ;;  %1033 = vmatprep.mubr.msk.bf16.mxu1 %vm1099_vm0, %v1098_v0 }
 0x201   : > { %v828_v27 = vpop.permute.xlu0 %827 }
 0x205   : > { %1034 = vmatmul.mubr.msk.bf16.vlgmr.msra.gmra.mrb[16].mxu1 %vm308_vm3, %v953_v6 }
 0x256   : > { %v665_v7 = vpop.f32.mrb[12].mxu0 }
 0x257   : > { %v1017_v8 = vpop.f32.mrb[13].mxu0 }
 0x258   : > { %v668_v9 = vpop.f32.mrb[14].mxu0 }
 0x259   : > { %v1018_v10 = vpop.f32.mrb[15].mxu0 }
 0x2c8   : > { %v619_v11 = vpop.f32.mrb[8].mxu1  ;;  %v766_v12 = vpop.f32.mrb[16].mxu0 }
 0x2c9   : > { %v1011_v13 = vpop.f32.mrb[9].mxu1  ;;  %v666_v14 = vadd.f32 %v665_v7, %v619_v11  ;;  %v1029_v15 = vpop.f32.mrb[17].mxu0 }
 0x2ca   : > { %v622_v16 = vpop.f32.mrb[10].mxu1  ;;  %v769_v17 = vpop.f32.mrb[18].mxu0 }
 0x2cb   : > { %v1012_v18 = vpop.f32.mrb[11].mxu1  ;;  %v1030_v0 = vpop.f32.mrb[19].mxu0 }
 0x2d0   : > { %v715_v19 = vpop.f32.mrb[12].mxu1 }
 0x2d1   : > { %v721_v20 = vadd.f32 %v715_v19, %v666_v14  ;;  %v1023_v21 = vpop.f32.mrb[13].mxu1 }
 0x2d2   : > { %v718_v22 = vpop.f32.mrb[14].mxu1 }
 0x2d3   : > { %v772_v23 = vadd.f32 %v766_v12, %v721_v20  ;;  %v1024_v24 = vpop.f32.mrb[15].mxu1 }
 0x2d8   : > { %v817_v25 = vpop.f32.mrb[16].mxu1 }
 0x2d9   : > { %v823_v28 = vadd.f32 %v817_v25, %v772_v23  ;;  %v1035_v29 = vpop.f32.mrb[17].mxu1 }
 0x2da   : > { %v820_v31 = vpop.f32.mrb[18].mxu1 }
 0x2db   : > { %v830_v33 = vadd.f32 %v828_v27, %v823_v28  ;;  %v1036_v34 = vpop.f32.mrb[19].mxu1 }
 0x2dd   : > { %v835_v35 = vadd.f32 %v833_v30, %v830_v33 }
 0x2df   : > { %v838_v36 = vadd.f32 %v837_v32, %v835_v35 }
 0x2e1   : > { %v839_v37 = vmul.f32 0.5, %v838_v36 }
 0x2e3   : > { %v840_v38 = vpack.c.bf16 %v839_v37, %v839_v37 }
 0x2e5   : > { %842 = vst.msk [vmem:[%s294_s27] sm:$0xf] %vm841_vm8, %v840_v38 }
 0x2e6 PF: > { %s16_s23 = sadd.s32 1, %s1096_s23   ;;  %s1285_s21 = smov %s1092_s22 }
 0x2e7   : > { %p13_p5 = scmp.ge.s32.totalorder %s16_s23, 4   ;;  %s1286_s22 = smov %s1288_s24 }
 0x2e9   :  { %15 = sbr.rel (!%p13_p5) target bundleno = 2 (0x2), region = 85 }

// kernel: _lambda_.31
= control target key start
LH: loop header
LB: loop body
LE: loop exit
PB: predicated region body
PF: predicated region fallthrough
CT: control target
= control target key end

     0   :  { %s1495_s0 = inlined_call_operand.vmem [shape: bf16[2,8,42], index: 0, kind: input, shape index: {}]   ;;  %s1496_s1 = inlined_call_operand.vmem [shape: bf16[7,4,8], index: 1, kind: input, shape index: {}]   ;;  %s1497_s2 = inlined_call_operand.vmem [shape: f32[4,1], index: 2, kind: input, shape index: {}]   ;;  %s1498_s3 = inlined_call_operand.vmem [shape: bf16[5,1,4], index: 3, kind: input, shape index: {}]   ;;  %s1499_s4 = inlined_call_operand.<no memory space> [shape: f32[1,1], index: 4, kind: input, shape index: {}]   ;;  %s1500_s5 = inlined_call_operand.hbm [shape: f32[2,1,32], index: 5, kind: output, shape index: {}]  }
   0x1   :  { %v10_v0 = vstv %s1499_s4 }
   0x2   :  { %11 = vst [vmem:[#allocation2] sm:$0x1] %v10_v0 }
   0x3   :  { %12 = vsyncpa [#allocation4], 0 }
   0x4   :  { %14 = vsyncpa [#allocation4 + $0x1], 0  ;;  %s1274_s20 = smov 0   ;;  %s1276_s21 = smov 0  }
   0x5   :  { %s1278_s22 = smov 0   ;;  %s1280_s23 = smov 0  }
   0x6   :  { %s1282_s24 = smov 0   ;;  %s1284_s25 = smov 0  }
   0x7 LB: > { %s957_s4 = sadd.s32 4294967295, %s1229_s25   ;;  %s958_s26 = sadd.s32 4294967294, %s1229_s25   ;;  %s1229_s25 = sphi %s1284_s25, %s20_s25   ;;  %s1225_s24 = sphi %s1282_s24, %s1507_s24   ;;  %s1221_s23 = sphi %s1280_s23, %s1506_s23   ;;  %s1217_s22 = sphi %s1278_s22, %s1505_s22   ;;  %s1213_s21 = sphi %s1276_s21, %s1504_s21   ;;  %s1209_s20 = sphi %s1274_s20, %s1503_s20  }
   0x8   : > { %s32_s27 = sadd.s32 1, %s1225_s24  ;;  %s151_s28 = sadd.s32 1, %s1217_s22 }
   0x9   : > { %p34_p0 = scmp.ge.s32.totalorder %s32_s27, 2  ;;  %p161_p1 = scmp.ne.s32.totalorder %s1217_s22, %s1213_s21 }
   0xa   : > { %p162_p2 = scmp.eq.s32.totalorder %s957_s4, 1  ;;  %p167_p3 = scmp.ne.s32.totalorder %s1213_s21, %s1209_s20 }
   0xb   : > { %s1509_s27 = smov (%p34_p0, %s32_s27), 0  ;;  %p168_p5 = scmp.eq.s32.totalorder %s958_s26, 1 }
   0xc   : > { %p1314_p4 = por %p162_p2, %p161_p1  ;;  %s146_s30 = ssub.s32 %s1225_s24, %s1509_s27 }
   0xd   : > { %p961_p6 = scmp.ge.s32.totalorder %s1229_s25, 1  ;;  %p149_p7 = scmp.eq.s32.totalorder %s146_s30, 0 }
   0xe   : > { %p1321_p8 = por %p168_p5, %p167_p3  ;;  %p205_p9 = scmp.lt.s32.totalorder %s1229_s25, 3 }
   0xf   : > { %s1327_s7 = scalar_select %p149_p7, %s1217_s22, %s151_s28  }
  0x10   : > { %p206_p10 = pnand %p961_p6, %p205_p9 }
  0x11   : > { %p231_p11 = scmp.lt.s32.totalorder (!%p206_p10), %s1221_s23, 1  ;;  %v1231_v1 = vmov (!%p206_p10), 0.0   ;;  %vm1232_vm0 = vmmov (!%p206_p10), 0   ;;  %vm252_vm2 = vcmask (!%p206_p10), 1043456   ;;  %s1233_s13 = smov (!%p206_p10), 127   ;;  %vm248_vm3 = vcmask (!%p206_p10), 64512  }
  0x12   : > { %209 = sbr.rel (%p206_p10) target bundleno = 775 (0x307), region = 40  ;;  %1012 = vmatprep.subr.bf16.mxu0 (!%p206_p10), %v1231_v1  ;;  %1018 = vmatprep.subr.bf16.mxu1 (!%p206_p10), %v1231_v1  ;;  %s1234_s14 = smov (!%p206_p10), 125   ;;  %v242_v8 = vld [vmem:[%s1496_s1] sm:$0x3] (!%p206_p10)  ;;  %v1239_v10 = vmov (!%p206_p10), 0   ;;  %v604_v52 = vlaneseq (!%p206_p10)  ;;  %vm622_vm7 = vcmask (!%p206_p10), 1041408  }
  0x13   : > { %1014 = vmatprep.mubr.msk.bf16.mxu0 (!%p206_p10), %vm1232_vm0, %v1231_v1  ;;  %1020 = vmatprep.mubr.msk.bf16.mxu1 (!%p206_p10), %vm1232_vm0, %v1231_v1  ;;  %s1235_s17 = smov (!%p206_p10), 126   ;;  %s1236_s18 = smov (!%p206_p10), 124   ;;  %v597_v9 = vld [vmem:[%s1497_s2] sm:$0xf] (!%p206_p10)  ;;  %v968_v16 = vld [vmem:[%s1496_s1 + $0x6] sm:$0x3] (!%p206_p10) }
  0x14   : > { %s1237_s19 = smov (!%p206_p10), 123   ;;  %s1238_s4 = smov (!%p206_p10), 122   ;;  %1148 = vset.pattern.permute.xlu0 (!%p206_p10), %v1239_v10  ;;  %v963_v15 = vld [vmem:[%s1496_s1 + $0x2] sm:$0x3] (!%p206_p10)  ;;  %v966_v22 = vld [vmem:[%s1496_s1 + $0x4] sm:$0x3] (!%p206_p10) }
  0x15   : > { %v972_v23 = vld [vmem:[%s1496_s1 + $0xa] sm:$0x3] (!%p206_p10)  ;;  %v970_v26 = vld [vmem:[%s1496_s1 + $0x8] sm:$0x3] (!%p206_p10)  ;;  %v974_v28 = vld [vmem:[%s1496_s1 + $0xc] sm:$0x3] (!%p206_p10) }
  0x16   : > { %v605_v53 = vand.u32 (!%p206_p10), 127, %v604_v52  ;;  %vm618_vm8 = vcmask (!%p206_p10), 31744   ;;  %s229_s15 = sand.u32 (!%p206_p10), 1, %s1213_s21   ;;  %s985_s16 = sshll.u32 (!%p206_p10), %s1221_s23, 4  ;;  %vm877_vm9 = vcmask (!%p206_p10), 253952  }
  0x17   : > { %s1448_s30 = scalar_lea.hbm (!%p206_p10), %s1500_s5, %s985_s16 }
  0x18   : > { %v606_v60 = vadd.s32 (!%p206_p10), 4294967294, %v605_v53 }
  0x19   : > { %s232_s8 = scalar_select %p231_p11, %s1221_s23, 1 }
  0x1a   : > { %vm607_vm4 = vcmp.ge.s32.totalorder %v606_v60, 0  ;;  %vm608_vm5 = vcmp.lt.s32.totalorder %v606_v60, 32  ;;  %s1240_s23 = smov [#allocation3]  }
  0x1b   : > { %s962_s9 = sshll.u32 %s232_s8, 2  ;;  %vm609_vm6 = vmand %vm607_vm4, %vm608_vm5  ;;  %s880_s8 = scalar_lea.sflag [#allocation4], %s229_s15 }
  0x1c   : > { %s234_s12 = scalar_lea.vmem %s1495_s0, %s962_s9 }
  0x1d   : > { %v236_v2 = vld [vmem:[%s234_s12] sm:$0xf] }
  0x1e   : > { %v237_v3 = vunpack.c.l.bf16 %v236_v2 }
  0x20   : > { %vm238_vm1 = vcmp.ge.f32.partialorder %v237_v3, 0.0  ;;  %v239_v4 = vmul.f32 0.01, %v237_v3 }
  0x22   : > { %v240_v5 = vsel %vm238_vm1, %v237_v3, %v239_v4 }
  0x23   : > { %v241_v6 = vpack.c.bf16 %v240_v5, %v240_v5 }
  0x25   : > { %246 = vrot.lane.b32.xlu0 %v241_v6, %s1233_s13  ;;  %395 = vrot.lane.b32.xlu1 %v241_v6, %s1234_s14  ;;  %v300_v7 = vsel %vm252_vm2, %v241_v6, 0 }
  0x26   : > { %1019 = vmatpush3.bf16.msra.mxu1 %v300_v7 }
  0x27   : > { %1030 = vmatprep.subr.bf16.mxu1 %v1231_v1 }
  0x29   : > { %344 = vrot.lane.b32.xlu0 %v241_v6, %s1235_s17  ;;  %446 = vrot.lane.b32.xlu1 %v241_v6, %s1236_s18 }
  0x2a   : > { %1021 = vmatmul.mubr.msk.bf16.vlgmr.msra.gmra.mrb[0].mxu1 %vm248_vm3, %v242_v8  ;;  %v865_v8 = vld [vmem:[#allocation2] sm:$0x1] }
  0x2b   : > { %1032 = vmatprep.mubr.msk.bf16.mxu1 %vm1232_vm0, %v1231_v1 }
  0x2d   : > { %497 = vrot.lane.b32.xlu0 %v241_v6, %s1237_s19  ;;  %548 = vrot.lane.b32.xlu1 %v241_v6, %s1238_s4  ;;  %s230_s19 = scalar_lea.vmem [#allocation3], %s229_s15 }
  0x2e   : > { %s893_s4 = sshll.u32 %s230_s19, 4  ;;  %s1450_s4 = int_to_ptr.vmem [resolvable:$true] %s893_s4 }
  0x31   : > { %600 = vperm.xlu0 %1148, %v597_v9   ;;  %v612_v9 = vld [vmem:[%s1498_s3] sm:$0x1] }
  0x97   : > { %v247_v11 = vpop.permute.xlu0 %246  ;;  %v396_v12 = vpop.permute.xlu1 %395 }
  0x98   : > { %v254_v13 = vsel %vm252_vm2, %v247_v11, 0  ;;  %v401_v14 = vsel %vm252_vm2, %v396_v12, 0 }
  0x99   : > { %1013 = vmatpush3.bf16.msra.mxu0 %v254_v13  ;;  %1031 = vmatpush3.bf16.msra.mxu1 %v401_v14  ;;  %v976_v14 = vld [vmem:[%s1498_s3 + $0x1] sm:$0x1] }
  0x9a   : > { %1024 = vmatprep.subr.bf16.mxu0 %v1231_v1  ;;  %1042 = vmatprep.subr.bf16.mxu1 %v1231_v1 }
  0x9b   : > { %v345_v17 = vpop.permute.xlu0 %344  ;;  %v447_v19 = vpop.permute.xlu1 %446 }
  0x9c   : > { %1015 = vmatmul.mubr.msk.bf16.vlgmr.msra.gmra.mrb[0].mxu0 %vm248_vm3, %v963_v15  ;;  %v350_v18 = vsel %vm252_vm2, %v345_v17, 0  ;;  %1033 = vmatmul.mubr.msk.bf16.vlgmr.msra.gmra.mrb[4].mxu1 %vm248_vm3, %v968_v16  ;;  %v452_v24 = vsel %vm252_vm2, %v447_v19, 0  ;;  %v981_v15 = vld [vmem:[%s1498_s3 + $0x3] sm:$0x1]  ;;  %v979_v19 = vld [vmem:[%s1498_s3 + $0x2] sm:$0x1] }
  0x9d   : > { %1025 = vmatpush3.bf16.msra.mxu0 %v350_v18  ;;  %1026 = vmatprep.mubr.msk.bf16.mxu0 %vm1232_vm0, %v1231_v1 }
  0x9e   : > { %1036 = vmatprep.subr.bf16.mxu0 %v1231_v1  ;;  %1044 = vmatprep.mubr.msk.bf16.mxu1 %vm1232_vm0, %v1231_v1 }
  0x9f   : > { %v498_v20 = vpop.permute.xlu0 %497  ;;  %v549_v25 = vpop.permute.xlu1 %548 }
  0xa0   : > { %v503_v21 = vsel %vm252_vm2, %v498_v20, 0  ;;  %v554_v27 = vsel %vm252_vm2, %v549_v25, 0 }
  0xa1   : > { %1043 = vmatpush3.bf16.msra.mxu1 %v503_v21  ;;  %v983_v21 = vld [vmem:[%s1498_s3 + $0x4] sm:$0x1] }
  0xa2   : > { %1054 = vmatprep.subr.bf16.mxu1 %v1231_v1 }
  0xa4   : > { %1027 = vmatmul.mubr.msk.bf16.vlgmr.msra.gmra.mrb[4].mxu0 %vm248_vm3, %v966_v22  ;;  %1045 = vmatmul.mubr.msk.bf16.vlgmr.msra.gmra.mrb[8].mxu1 %vm248_vm3, %v972_v23 }
  0xa5   : > { %1037 = vmatpush3.bf16.msra.mxu0 %v452_v24  ;;  %1038 = vmatprep.mubr.msk.bf16.mxu0 %vm1232_vm0, %v1231_v1 }
  0xa6   : > { %1048 = vmatprep.subr.bf16.mxu0 %v1231_v1  ;;  %1056 = vmatprep.mubr.msk.bf16.mxu1 %vm1232_vm0, %v1231_v1 }
  0xac   : > { %1039 = vmatmul.mubr.msk.bf16.vlgmr.msra.gmra.mrb[8].mxu0 %vm248_vm3, %v970_v26 }
  0xad   : > { %1049 = vmatpush3.bf16.msra.mxu0 %v554_v27  ;;  %1050 = vmatprep.mubr.msk.bf16.mxu0 %vm1232_vm0, %v1231_v1 }
  0xae   : > { %1060 = vmatprep.subr.bf16.mxu0 %v1231_v1 }
  0xb0   : > { %v601_v62 = vpop.permute.xlu0 %600 }
  0xb4   : > { %1051 = vmatmul.mubr.msk.bf16.vlgmr.msra.gmra.mrb[12].mxu0 %vm248_vm3, %v974_v28 }
  0xb5   : > { %1062 = vmatprep.mubr.msk.bf16.mxu0 %vm1232_vm0, %v1231_v1 }
  0xfd   : > { %v336_v29 = vpop.f32.mrb[0].mxu1 }
  0xfe   : > { %v1022_v30 = vpop.f32.mrb[1].mxu1 }
  0xff   : > { %v339_v31 = vpop.f32.mrb[2].mxu1 }
 0x100   : > { %v1023_v32 = vpop.f32.mrb[3].mxu1 }
 0x16f   : > { %v290_v33 = vpop.f32.mrb[0].mxu0  ;;  %v437_v34 = vpop.f32.mrb[4].mxu1 }
 0x170   : > { %v337_v35 = vadd.f32 %v336_v29, %v290_v33  ;;  %v1016_v36 = vpop.f32.mrb[1].mxu0  ;;  %v1034_v37 = vpop.f32.mrb[5].mxu1 }
 0x171   : > { %v293_v38 = vpop.f32.mrb[2].mxu0  ;;  %v440_v39 = vpop.f32.mrb[6].mxu1 }
 0x172   : > { %v1017_v40 = vpop.f32.mrb[3].mxu0  ;;  %v1035_v41 = vpop.f32.mrb[7].mxu1 }
 0x177   : > { %v386_v42 = vpop.f32.mrb[4].mxu0  ;;  %v539_v43 = vpop.f32.mrb[8].mxu1 }
 0x178   : > { %v392_v44 = vadd.f32 %v386_v42, %v337_v35  ;;  %v1028_v45 = vpop.f32.mrb[5].mxu0  ;;  %v1046_v46 = vpop.f32.mrb[9].mxu1  ;;  %v872_v35 = vshrl.u32 %v604_v52, 7 }
 0x179   : > { %v389_v47 = vpop.f32.mrb[6].mxu0  ;;  %v542_v48 = vpop.f32.mrb[10].mxu1 }
 0x17a   : > { %v443_v49 = vadd.f32 %v437_v34, %v392_v44  ;;  %v1029_v50 = vpop.f32.mrb[7].mxu0  ;;  %v1047_v51 = vpop.f32.mrb[11].mxu1  ;;  %v873_v41 = vsub.s32 0, %v872_v35 }
 0x17f   : > { %v488_v54 = vpop.f32.mrb[8].mxu0 }
 0x180   : > { %v494_v55 = vadd.f32 %v488_v54, %v443_v49  ;;  %v1040_v56 = vpop.f32.mrb[9].mxu0 }
 0x181   : > { %v491_v57 = vpop.f32.mrb[10].mxu0 }
 0x182   : > { %v545_v58 = vadd.f32 %v539_v43, %v494_v55  ;;  %v1041_v59 = vpop.f32.mrb[11].mxu0 }
 0x187   : > { %v590_v61 = vpop.f32.mrb[12].mxu0 }
 0x188   : > { %v596_v63 = vadd.f32 %v590_v61, %v545_v58  ;;  %v1052_v0 = vpop.f32.mrb[13].mxu0 }
 0x189   : > { %v593_v2 = vpop.f32.mrb[14].mxu0 }
 0x18a   : > { %v603_v3 = vadd.f32 %v601_v62, %v596_v63  ;;  %v1053_v4 = vpop.f32.mrb[15].mxu0 }
 0x18c   : > { %v610_v5 = vsel %vm609_vm6, %v603_v3, 0.0 }
 0x18d   : > { %v611_v6 = vpack.c.bf16 %v610_v5, %v610_v5 }
 0x18f   : > { %765 = vrot.lane.b32.xlu0 %v611_v6, %s1234_s14  ;;  %616 = vrot.lane.b32.xlu1 %v611_v6, %s1233_s13  ;;  %v670_v7 = vsel %vm622_vm7, %v611_v6, 0  ;;  %s1151_s13 = scalar_lea.vmem %s1450_s4, 16  ;;  %s1155_s14 = sshll.u32 %s1240_s23, 4  ;;  %s1156_s14 = int_to_ptr.vmem [resolvable:$false] %s1155_s14 }
 0x190   : > { %1061 = vmatpush3.bf16.msra.mxu0 %v670_v7  ;;  %p1152_p12 = scmp.ne.s32.totalorder %s1450_s4, %s1151_s13  ;;  %p1158_p1 = scmp.lt.s32.totalorder %s1450_s4, %s1156_s14 }
 0x191   : > { %1072 = vmatprep.subr.bf16.mxu0 %v1231_v1 }
 0x192   : > { %p1153_p13 = pnand %p1152_p12, %p1314_p4 }
 0x193   : > { %868 = vperm.xlu0 %1148, %v865_v8   ;;  %714 = vrot.lane.b32.xlu1 %v611_v6, %s1235_s17  ;;  %s1157_s17 = scalar_lea.vmem %s1156_s14, 32 }
 0x194   : > { %1063 = vmatmul.mubr.msk.bf16.vlgmr.msra.gmra.mrb[16].mxu0 %vm618_vm8, %v612_v9  ;;  %p1154_p0 = pneg %p1153_p13  ;;  %p1159_p2 = scmp.lt.s32.totalorder %s1157_s17, %s1151_s13 }
 0x195   : > { %1074 = vmatprep.mubr.msk.bf16.mxu0 %vm1232_vm0, %v1231_v1 }
 0x196   : > { %p1160_p3 = por %p1159_p2, %p1158_p1 }
 0x197   : > { %816 = vrot.lane.b32.xlu1 %v611_v6, %s1236_s18 }
 0x198   : > { %p1161_p5 = pnand %p1160_p3, %p1154_p0 }
 0x201   : > { %v766_v10 = vpop.permute.xlu0 %765  ;;  %v617_v11 = vpop.permute.xlu1 %616 }
 0x202   : > { %v771_v12 = vsel %vm622_vm7, %v766_v10, 0  ;;  %v624_v13 = vsel %vm622_vm7, %v617_v11, 0 }
 0x203   : > { %1055 = vmatpush3.bf16.msra.mxu1 %v624_v13  ;;  %1073 = vmatpush3.bf16.msra.mxu0 %v771_v12 }
 0x204   : > { %1066 = vmatprep.subr.bf16.mxu1 %v1231_v1 }
 0x205   : > { %v715_v16 = vpop.permute.xlu1 %714 }
 0x206   : > { %v720_v17 = vsel %vm622_vm7, %v715_v16, 0  ;;  %1057 = vmatmul.mubr.msk.bf16.vlgmr.msra.gmra.mrb[12].mxu1 %vm618_vm8, %v976_v14  ;;  %1075 = vmatmul.mubr.msk.bf16.vlgmr.msra.gmra.mrb[20].mxu0 %vm618_vm8, %v981_v15 }
 0x207   : > { %1067 = vmatpush3.bf16.msra.mxu1 %v720_v17  ;;  %1068 = vmatprep.mubr.msk.bf16.mxu1 %vm1232_vm0, %v1231_v1 }
 0x208   : > { %1078 = vmatprep.subr.bf16.mxu1 %v1231_v1 }
 0x209   : > { %v817_v18 = vpop.permute.xlu1 %816 }
 0x20a   : > { %v822_v20 = vsel %vm622_vm7, %v817_v18, 0 }
 0x20e   : > { %1069 = vmatmul.mubr.msk.bf16.vlgmr.msra.gmra.mrb[16].mxu1 %vm618_vm8, %v979_v19 }
 0x20f   : > { %1079 = vmatpush3.bf16.msra.mxu1 %v822_v20  ;;  %1080 = vmatprep.mubr.msk.bf16.mxu1 %vm1232_vm0, %v1231_v1 }
 0x212   : > { %v869_v42 = vpop.permute.xlu0 %868 }
 0x213   : > { %v874_v44 = vrot.slane %v869_v42, %v873_v41 }
 0x216   : > { %1081 = vmatmul.mubr.msk.bf16.vlgmr.msra.gmra.mrb[20].mxu1 %vm618_vm8, %v983_v21 }
 0x267   : > { %v706_v22 = vpop.f32.mrb[16].mxu0 }
 0x268   : > { %v1064_v23 = vpop.f32.mrb[17].mxu0 }
 0x269   : > { %v709_v24 = vpop.f32.mrb[18].mxu0 }
 0x26a   : > { %v1065_v25 = vpop.f32.mrb[19].mxu0 }
 0x2d9   : > { %v660_v26 = vpop.f32.mrb[12].mxu1  ;;  %v807_v27 = vpop.f32.mrb[20].mxu0 }
 0x2da   : > { %v1058_v28 = vpop.f32.mrb[13].mxu1  ;;  %v707_v29 = vadd.f32 %v706_v22, %v660_v26  ;;  %v1076_v30 = vpop.f32.mrb[21].mxu0 }
 0x2db   : > { %v663_v31 = vpop.f32.mrb[14].mxu1  ;;  %v810_v32 = vpop.f32.mrb[22].mxu0 }
 0x2dc   : > { %v1059_v33 = vpop.f32.mrb[15].mxu1  ;;  %v1077_v34 = vpop.f32.mrb[23].mxu0 }
 0x2e1   : > { %v756_v1 = vpop.f32.mrb[16].mxu1 }
 0x2e2   : > { %v762_v36 = vadd.f32 %v756_v1, %v707_v29  ;;  %v1070_v37 = vpop.f32.mrb[17].mxu1 }
 0x2e3   : > { %v759_v38 = vpop.f32.mrb[18].mxu1 }
 0x2e4   : > { %v813_v39 = vadd.f32 %v807_v27, %v762_v36  ;;  %v1071_v40 = vpop.f32.mrb[19].mxu1 }
 0x2e9   : > { %v858_v43 = vpop.f32.mrb[20].mxu1 }
 0x2ea   : > { %v864_v45 = vadd.f32 %v858_v43, %v813_v39  ;;  %v1082_v46 = vpop.f32.mrb[21].mxu1 }
 0x2eb   : > { %v861_v47 = vpop.f32.mrb[22].mxu1 }
 0x2ec   : > { %v875_v48 = vadd.f32 %v874_v44, %v864_v45  ;;  %v1083_v49 = vpop.f32.mrb[23].mxu1 }
 0x2ee   : > { %1149 = vtanh.f32 %v875_v48 }
 0x2f8   : > { %v1150_v50 = vpop.eup %1149 }
 0x2f9   : > { %878 = vst.msk [vmem:[%s230_s19] sm:$0x1] %vm877_vm9, %v1150_v50 }
 0x2fa   : > { %1164 = shalt.err (!%p1161_p5)
}
 0x2fb   : > { %s1165_s9 = scalar_lea.hbm %s1448_s30, 16  ;;  %s1169_s11 = scalar_lea.hbm %s1500_s5, 32 }
 0x2fc   : > { %p1166_p6 = scmp.ne.s32.totalorder %s1448_s30, %s1165_s9  ;;  %p1170_p10 = scmp.lt.u32.totalorder %s1448_s30, %s1500_s5 }
 0x2fd   : > { %p1171_p11 = scmp.lt.u32.totalorder %s1169_s11, %s1165_s9  ;;  %p1173_p13 = scmp.lt.u32.totalorder %s1165_s9, %s1448_s30 }
 0x2fe   : > { %p1167_p7 = pnand %p1166_p6, %p1314_p4 }
 0x2ff   : > { %p1172_p12 = por %p1171_p11, %p1170_p10 }
 0x300   : > { %p1168_p9 = pneg %p1167_p7 }
 0x301   : > { %p1174_p0 = por %p1173_p13, %p1172_p12 }
 0x303   : > { %p1175_p1 = pnand %p1174_p0, %p1168_p9 }
 0x305   : > { %1178 = shalt.err (!%p1175_p1)
}
 0x306   : > { %1084 = dma.vmem_to_hbm [thread:$0]  (%p1314_p4), %s1450_s4, 16, %s1448_s30, %s880_s8  }
 0x307 PF: > { %p1090_p2 = scmp.ge.s32.totalorder %s1229_s25, 2  ;;  %s905_s16 = sand.u32 1, %s1209_s20  }
 0x308   : > { %s906_s19 = scalar_lea.sflag [#allocation4], %s905_s16 }
 0x309   : > { %p1087_p3 = pnand %p1090_p2, %p1321_p8 }
 0x30b   : > { %1204 = dma.done.wait (!%p1087_p3), %s906_s19, 16  }
 0x30c   : > { %1206 = vsyncadd (!%p1087_p3), %s906_s19, 4294967280  ;;  %s20_s25 = sadd.s32 1, %s1229_s25   ;;  %s1503_s20 = smov %s1213_s21 }
 0x30d   : > { %p17_p5 = scmp.ge.s32.totalorder %s20_s25, 4   ;;  %s1504_s21 = smov %s1217_s22 }
 0x30e   : > { %s1505_s22 = smov %s1327_s7  ;;  %s1506_s23 = smov %s1225_s24 }
 0x30f   : > { %s1507_s24 = smov %s1509_s27  ;;  %19 = sbr.rel (!%p17_p5) target bundleno = 7 (0x7), region = 85 }
 0x316   :  { %910 = vsyncpa [#allocation4], 1 }
 0x317   :  { %912 = vsyncpa [#allocation4 + $0x1], 1 }

</bundles_post_ra>
